<compile_context>
chip_gen: v7x
topology: tpu7x:2x2x1
jax: 0.10.0
libtpu: 0.0.40
codegen_flags: <defaults>
</compile_context>

<pallas_src>
import functools

import jax
import jax.numpy as jnp
from jax import lax
from jax.experimental import pallas as pl
from jax.experimental.pallas import tpu as pltpu

CHANNELS = 16          # d_model
N_HEAD = 4
HEAD_DIM = CHANNELS // N_HEAD
NUM_LAYERS = 2
OUT_DIM = 10
N_ENC_IN = 2
N_DEC_IN = 2
FF_DIM = 4 * CHANNELS  # 64 real hidden width
FF_PAD = 128           # FFN hidden padded to a full lane tile
OUT_PAD = 128          # final projection padded to a full lane tile
MASK_ON_DECODER = True
LN_EPS = 1e-5
NEG_INF = -1e9
# TODO(synk): nn.Dropout layers are identity in eval mode and are omitted.


# ===================== wrapper-side parameter packing =====================

class _Packer:
    """Packs many small (r, c<=width) f32 params into one slab; each entry
    starts on an 8-row boundary so in-kernel static slices are tile-aligned."""

    def __init__(self, width):
        self.width = width
        self.chunks = []
        self.off = {}        # name -> (row_start, real_rows)
        self.rows = 0

    def add(self, name, a):
        a = jnp.asarray(a, jnp.float32)
        if a.ndim == 1:
            a = a[None, :]
        r, c = a.shape
        a = jnp.pad(a, ((0, (-r) % 8), (0, self.width - c)))
        self.off[name] = (self.rows, r)
        self.chunks.append(a)
        self.rows += a.shape[0]

    def pack(self):
        return jnp.concatenate(self.chunks, axis=0), self.off


def _pack_params(params, S, T):
    """All parameter leaves -> 2 slabs (16-lane + 128-lane) => 2 DMAs."""
    p16 = _Packer(CHANNELS)
    p128 = _Packer(128)

    p16.add("in_proj_w", params["input_proj_w"])
    p16.add("in_proj_b", params["input_proj_b"])
    p16.add("out_proj_w", params["output_proj_w"])
    p16.add("out_proj_b", params["output_proj_b"])
    # Positional "embedding lookup" of arange(L) == first L rows of the table;
    # passed raw (not batch-tiled) and replicated in-kernel.
    p16.add("in_pos", params["input_pos_emb"][:S])
    p16.add("tg_pos", params["target_pos_emb"][:T])

    def add_attn(pfx, ap):
        for n in ("wq", "bq", "wk", "bk", "wv", "bv", "wo", "bo"):
            p16.add(f"{pfx}_{n}", ap[n])

    def add_ffn(pfx, lp):
        # Hidden dim lane-padded 64 -> 128 (lane-dense ReLU / unmasked stores);
        # ff_w2 rows zero-padded to 128 so padded hidden columns contribute 0.
        p128.add(f"{pfx}_w1", lp["ff_w1"])
        p128.add(f"{pfx}_b1", lp["ff_b1"])
        p16.add(f"{pfx}_w2", jnp.pad(lp["ff_w2"], ((0, FF_PAD - FF_DIM), (0, 0))))
        p16.add(f"{pfx}_b2", lp["ff_b2"])

    for i, lp in enumerate(params["enc_layers"]):
        add_attn(f"enc{i}_sa", lp["self_attn"])
        add_ffn(f"enc{i}_ff", lp)
        for n in ("ln1_g", "ln1_b", "ln2_g", "ln2_b"):
            p16.add(f"enc{i}_{n}", lp[n])
    for i, lp in enumerate(params["dec_layers"]):
        add_attn(f"dec{i}_sa", lp["self_attn"])
        add_attn(f"dec{i}_ca", lp["cross_attn"])
        add_ffn(f"dec{i}_ff", lp)
        for n in ("ln1_g", "ln1_b", "ln2_g", "ln2_b", "ln3_g", "ln3_b"):
            p16.add(f"dec{i}_{n}", lp[n])

    # Final projection padded to 128 output lanes -> lane-dense store.
    p128.add("final_w", jnp.pad(params["final_w"], ((0, 0), (0, OUT_PAD - OUT_DIM))))
    p128.add("final_b", jnp.pad(params["final_b"], ((0, OUT_PAD - OUT_DIM),)))

    slab16, off16 = p16.pack()
    slab128, off128 = p128.pack()
    return slab16, off16, slab128, off128


# ===================== the single fused kernel =====================

def _forward_kernel(src_ref, trg_ref, p16_ref, p128_ref, o_ref, *,
                    off16, off128, B, S, T, causal):
    E, H, Dh = CHANNELS, N_HEAD, HEAD_DIM

    def g16(name):
        r0, n = off16[name]
        return p16_ref[r0:r0 + n, :]

    def g128(name):
        r0, n = off128[name]
        return p128_ref[r0:r0 + n, :]

    def proj_in(x, wname, bname):
        # K=2 projection on the VPU: two broadcast multiply-adds (no MXU
        # round-trip at the head of the dependency chain).
        w = g16(wname)                                     # (2, E)
        return x[:, 0:1] * w[0:1, :] + x[:, 1:2] * w[1:2, :] + g16(bname)

    def add_layernorm(x, res, gname, bname):
        y = x + res
        mu = jnp.mean(y, axis=-1, keepdims=True)
        d = y - mu
        var = jnp.mean(d * d, axis=-1, keepdims=True)
        return d * lax.rsqrt(var + LN_EPS) * g16(gname) + g16(bname)

    def split_heads(x2d, L):
        # (B*L, E) -> (H*B, L, Dh): static lane slices + leading-dim reshape +
        # leading-axis concat (all cheap, proven Mosaic lowerings).
        return jnp.concatenate(
            [x2d[:, h * Dh:(h + 1) * Dh].reshape(B, L, Dh) for h in range(H)],
            axis=0)

    def merge_heads(o, Lq):
        # (H*B, Lq, Dh) -> (B*Lq, E)
        return jnp.concatenate(
            [o[h * B:(h + 1) * B].reshape(B * Lq, Dh) for h in range(H)],
            axis=1)

    def mha(x_q, x_kv, Lq, Lk, pfx, causal_mask):
        # nn.MultiheadAttention (eval).  x_kv=None => self-attention.
        scale = 1.0 / float(Dh) ** 0.5
        x_k = x_q if x_kv is None else x_kv
        q = jnp.dot(x_q, g16(f"{pfx}_wq"), preferred_element_type=jnp.float32) + g16(f"{pfx}_bq")
        k = jnp.dot(x_k, g16(f"{pfx}_wk"), preferred_element_type=jnp.float32) + g16(f"{pfx}_bk")
        v = jnp.dot(x_k, g16(f"{pfx}_wv"), preferred_element_type=jnp.float32) + g16(f"{pfx}_bv")
        qh, kh, vh = split_heads(q, Lq), split_heads(k, Lk), split_heads(v, Lk)
        # All heads and batches in one batched einsum (batch = H*B).
        s = jnp.einsum("bqd,bkd->bqk", qh, kh,
                       preferred_element_type=jnp.float32) * scale
        if causal_mask:
            rows = lax.broadcasted_iota(jnp.int32, (Lq, Lk), 0)
            cols = lax.broadcasted_iota(jnp.int32, (Lq, Lk), 1)
            s = jnp.where((rows >= cols)[None], s, NEG_INF)   # diag always kept
        s = s - jnp.max(s, axis=-1, keepdims=True)
        p = jnp.exp(s)
        p = p * pl.reciprocal(jnp.sum(p, axis=-1, keepdims=True), approx=True)
        o = jnp.einsum("bqk,bkd->bqd", p, vh, preferred_element_type=jnp.float32)
        # Single (E,E) output projection instead of per-head row-slice dots.
        return jnp.dot(merge_heads(o, Lq), g16(f"{pfx}_wo"),
                       preferred_element_type=jnp.float32) + g16(f"{pfx}_bo")

    def ffn(x, pfx):
        h = jnp.dot(x, g128(f"{pfx}_w1"),
                    preferred_element_type=jnp.float32) + g128(f"{pfx}_b1")
        h = jnp.maximum(h, 0.0)                            # (rows, 128) lane-dense
        return jnp.dot(h, g16(f"{pfx}_w2"),
                       preferred_element_type=jnp.float32) + g16(f"{pfx}_b2")

    # ------------------------------ encoder ------------------------------
    src_start = proj_in(src_ref[...], "in_proj_w", "in_proj_b")       # (B*S, E)
    x = src_start + jnp.concatenate([g16("in_pos")] * B, axis=0)
    for i in range(NUM_LAYERS):
        sa = mha(x, None, S, S, f"enc{i}_sa", False)
        x = add_layernorm(sa, x, f"enc{i}_ln1_g", f"enc{i}_ln1_b")
        ff = ffn(x, f"enc{i}_ff")
        x = add_layernorm(ff, x, f"enc{i}_ln2_g", f"enc{i}_ln2_b")
    memory = x + src_start                                             # (B*S, E)

    # ------------------------------ decoder ------------------------------
    trg_start = proj_in(trg_ref[...], "out_proj_w", "out_proj_b")      # (B*T, E)
    y = trg_start + jnp.concatenate([g16("tg_pos")] * B, axis=0)
    for i in range(NUM_LAYERS):
        sa = mha(y, None, T, T, f"dec{i}_sa", causal)
        y = add_layernorm(sa, y, f"dec{i}_ln1_g", f"dec{i}_ln1_b")
        ca = mha(y, memory, T, S, f"dec{i}_ca", False)
        y = add_layernorm(ca, y, f"dec{i}_ln2_g", f"dec{i}_ln2_b")
        ff = ffn(y, f"dec{i}_ff")
        y = add_layernorm(ff, y, f"dec{i}_ln3_g", f"dec{i}_ln3_b")
    y = y + trg_start

    # ---------- final projection (128-lane padded => unmasked store) ------
    o_ref[...] = jnp.dot(y, g128("final_w"),
                         preferred_element_type=jnp.float32) + g128("final_b")


# ===================== wrapper =====================

def forward(params, src, trg):
    B, S, _ = src.shape
    T = trg.shape[1]
    slab16, off16, slab128, off128 = _pack_params(params, S, T)

    kernel = functools.partial(
        _forward_kernel, off16=off16, off128=off128,
        B=B, S=S, T=T, causal=MASK_ON_DECODER)

    vmem = pl.BlockSpec(memory_space=pltpu.MemorySpace.VMEM)
    out = pl.pallas_call(
        kernel,
        out_shape=jax.ShapeDtypeStruct((B * T, OUT_PAD), jnp.float32),
        in_specs=[vmem, vmem, vmem, vmem],
        out_specs=vmem,
    )(src.reshape(B * S, N_ENC_IN), trg.reshape(B * T, N_DEC_IN), slab16, slab128)
    return out.reshape(B, T, OUT_PAD)[:, :, :OUT_DIM]


# ===================== deterministic parameter init =====================

def init_params(key):
    E, FF = CHANNELS, FF_DIM
    keys = iter(jax.random.split(key, 512))

    def nrm(shape, s=0.05):
        return jax.random.normal(next(keys), shape, jnp.float32) * s

    def mha():
        # NOTE: stored in "x @ W" orientation (the transpose of PyTorch's
        # in_proj_weight / out_proj.weight); porting real torch weights needs
        # W = torch_w.T and splitting in_proj into q/k/v thirds.
        return dict(wq=nrm((E, E)), bq=nrm((E,)),
                    wk=nrm((E, E)), bk=nrm((E,)),
                    wv=nrm((E, E)), bv=nrm((E,)),
                    wo=nrm((E, E)), bo=nrm((E,)))

    def enc_layer():
        return dict(self_attn=mha(),
                    ff_w1=nrm((E, FF)), ff_b1=nrm((FF,)),
                    ff_w2=nrm((FF, E)), ff_b2=nrm((E,)),
                    ln1_g=jnp.ones((E,), jnp.float32), ln1_b=jnp.zeros((E,), jnp.float32),
                    ln2_g=jnp.ones((E,), jnp.float32), ln2_b=jnp.zeros((E,), jnp.float32))

    def dec_layer():
        return dict(self_attn=mha(), cross_attn=mha(),
                    ff_w1=nrm((E, FF)), ff_b1=nrm((FF,)),
                    ff_w2=nrm((FF, E)), ff_b2=nrm((E,)),
                    ln1_g=jnp.ones((E,), jnp.float32), ln1_b=jnp.zeros((E,), jnp.float32),
                    ln2_g=jnp.ones((E,), jnp.float32), ln2_b=jnp.zeros((E,), jnp.float32),
                    ln3_g=jnp.ones((E,), jnp.float32), ln3_b=jnp.zeros((E,), jnp.float32))

    return dict(
        input_proj_w=nrm((N_ENC_IN, E)), input_proj_b=nrm((E,)),
        output_proj_w=nrm((N_DEC_IN, E)), output_proj_b=nrm((E,)),
        input_pos_emb=nrm((1024, E)),
        target_pos_emb=nrm((1024, E)),
        final_w=nrm((E, OUT_DIM)), final_b=nrm((OUT_DIM,)),
        enc_layers=[enc_layer() for _ in range(NUM_LAYERS)],
        dec_layers=[dec_layer() for _ in range(NUM_LAYERS)],
    )


if __name__ == "__main__":
    key = jax.random.PRNGKey(0)
    pkey, skey, tkey = jax.random.split(key, 3)
    params = init_params(pkey)

    B, S_ENC, S_DEC = 2, 16, 8
    src = jax.random.normal(skey, (B, S_ENC, N_ENC_IN), jnp.float32)
    trg = jax.random.normal(tkey, (B, S_DEC, N_DEC_IN), jnp.float32)

    out = jax.jit(forward)(params, src, trg)
    out = jax.block_until_ready(out)
    assert out.shape == (B, S_DEC, OUT_DIM), out.shape
    assert bool(jnp.all(jnp.isfinite(out)))
    print("KERNEL_OK")
</pallas_src>

<mosaic_0001>
module attributes {stable_mosaic.version = 11 : i64} {
  func.func @_forward_kernel(%arg0: memref<32x2xf32, #tpu.memory_space<vmem>>, %arg1: memref<16x2xf32, #tpu.memory_space<vmem>>, %arg2: memref<1336x16xf32, #tpu.memory_space<vmem>>, %arg3: memref<120x128xf32, #tpu.memory_space<vmem>>, %arg4: memref<16x128xf32, #tpu.memory_space<vmem>>) attributes {dimension_semantics = [], scalar_prefetch = 0 : i64, scratch_operands = 0 : i64, tpu.core_type = #tpu.core_type<tc>} {
    %c0 = arith.constant 0 : index
    %c0_0 = arith.constant 0 : index
    %0 = vector.load %arg0[%c0, %c0_0] : memref<32x2xf32, #tpu.memory_space<vmem>>, vector<32x2xf32>
    %c0_1 = arith.constant 0 : index
    %c0_2 = arith.constant 0 : index
    %1 = vector.load %arg2[%c0_1, %c0_2] : memref<1336x16xf32, #tpu.memory_space<vmem>>, vector<2x16xf32>
    %2 = vector.extract_strided_slice %0 {offsets = [0, 0], sizes = [32, 1], strides = [1, 1]} : vector<32x2xf32> to vector<32x1xf32>
    %3 = vector.extract_strided_slice %1 {offsets = [0, 0], sizes = [1, 16], strides = [1, 1]} : vector<2x16xf32> to vector<1x16xf32>
    %4 = vector.broadcast %2 : vector<32x1xf32> to vector<32x16xf32>
    %5 = vector.broadcast %3 : vector<1x16xf32> to vector<32x16xf32>
    %6 = arith.mulf %4, %5 : vector<32x16xf32>
    %7 = vector.extract_strided_slice %0 {offsets = [0, 1], sizes = [32, 1], strides = [1, 1]} : vector<32x2xf32> to vector<32x1xf32>
    %8 = vector.extract_strided_slice %1 {offsets = [1, 0], sizes = [1, 16], strides = [1, 1]} : vector<2x16xf32> to vector<1x16xf32>
    %9 = vector.broadcast %7 : vector<32x1xf32> to vector<32x16xf32>
    %10 = vector.broadcast %8 : vector<1x16xf32> to vector<32x16xf32>
    %11 = arith.mulf %9, %10 : vector<32x16xf32>
    %12 = arith.addf %6, %11 : vector<32x16xf32>
    %c8 = arith.constant 8 : index
    %c0_3 = arith.constant 0 : index
    %13 = vector.load %arg2[%c8, %c0_3] : memref<1336x16xf32, #tpu.memory_space<vmem>>, vector<1x16xf32>
    %14 = vector.broadcast %13 : vector<1x16xf32> to vector<32x16xf32>
    %15 = arith.addf %12, %14 : vector<32x16xf32>
    %c32 = arith.constant 32 : index
    %c0_4 = arith.constant 0 : index
    %16 = vector.load %arg2[%c32, %c0_4] : memref<1336x16xf32, #tpu.memory_space<vmem>>, vector<16x16xf32>
    %17 = tpu.concatenate %16, %16 in 0 : vector<16x16xf32>, vector<16x16xf32> -> vector<32x16xf32>
    %18 = arith.addf %15, %17 : vector<32x16xf32>
    %c56 = arith.constant 56 : index
    %c0_5 = arith.constant 0 : index
    %19 = vector.load %arg2[%c56, %c0_5] : memref<1336x16xf32, #tpu.memory_space<vmem>>, vector<16x16xf32>
    %cst = arith.constant dense<0.000000e+00> : vector<32x16xf32>
    %20 = tpu.matmul %18, %19, %cst {dimension_numbers = #tpu.dot_dimension_numbers<[1], [0], [0], [1], [0, 0, 1, 1], [], []>} : vector<32x16xf32>, vector<16x16xf32>, vector<32x16xf32> -> vector<32x16xf32>
    %c72 = arith.constant 72 : index
    %c0_6 = arith.constant 0 : index
    %21 = vector.load %arg2[%c72, %c0_6] : memref<1336x16xf32, #tpu.memory_space<vmem>>, vector<1x16xf32>
    %22 = vector.broadcast %21 : vector<1x16xf32> to vector<32x16xf32>
    %23 = arith.addf %20, %22 : vector<32x16xf32>
    %c80 = arith.constant 80 : index
    %c0_7 = arith.constant 0 : index
    %24 = vector.load %arg2[%c80, %c0_7] : memref<1336x16xf32, #tpu.memory_space<vmem>>, vector<16x16xf32>
    %cst_8 = arith.constant dense<0.000000e+00> : vector<32x16xf32>
    %25 = tpu.matmul %18, %24, %cst_8 {dimension_numbers = #tpu.dot_dimension_numbers<[1], [0], [0], [1], [0, 0, 1, 1], [], []>} : vector<32x16xf32>, vector<16x16xf32>, vector<32x16xf32> -> vector<32x16xf32>
    %c96 = arith.constant 96 : index
    %c0_9 = arith.constant 0 : index
    %26 = vector.load %arg2[%c96, %c0_9] : memref<1336x16xf32, #tpu.memory_space<vmem>>, vector<1x16xf32>
    %27 = vector.broadcast %26 : vector<1x16xf32> to vector<32x16xf32>
    %28 = arith.addf %25, %27 : vector<32x16xf32>
    %c104 = arith.constant 104 : index
    %c0_10 = arith.constant 0 : index
    %29 = vector.load %arg2[%c104, %c0_10] : memref<1336x16xf32, #tpu.memory_space<vmem>>, vector<16x16xf32>
    %cst_11 = arith.constant dense<0.000000e+00> : vector<32x16xf32>
    %30 = tpu.matmul %18, %29, %cst_11 {dimension_numbers = #tpu.dot_dimension_numbers<[1], [0], [0], [1], [0, 0, 1, 1], [], []>} : vector<32x16xf32>, vector<16x16xf32>, vector<32x16xf32> -> vector<32x16xf32>
    %c120 = arith.constant 120 : index
    %c0_12 = arith.constant 0 : index
    %31 = vector.load %arg2[%c120, %c0_12] : memref<1336x16xf32, #tpu.memory_space<vmem>>, vector<1x16xf32>
    %32 = vector.broadcast %31 : vector<1x16xf32> to vector<32x16xf32>
    %33 = arith.addf %30, %32 : vector<32x16xf32>
    %34 = vector.extract_strided_slice %23 {offsets = [0, 0], sizes = [32, 4], strides = [1, 1]} : vector<32x16xf32> to vector<32x4xf32>
    %35 = vector.shape_cast %34 : vector<32x4xf32> to vector<2x16x4xf32>
    %36 = vector.extract_strided_slice %23 {offsets = [0, 4], sizes = [32, 4], strides = [1, 1]} : vector<32x16xf32> to vector<32x4xf32>
    %37 = vector.shape_cast %36 : vector<32x4xf32> to vector<2x16x4xf32>
    %38 = vector.extract_strided_slice %23 {offsets = [0, 8], sizes = [32, 4], strides = [1, 1]} : vector<32x16xf32> to vector<32x4xf32>
    %39 = vector.shape_cast %38 : vector<32x4xf32> to vector<2x16x4xf32>
    %40 = vector.extract_strided_slice %23 {offsets = [0, 12], sizes = [32, 4], strides = [1, 1]} : vector<32x16xf32> to vector<32x4xf32>
    %41 = vector.shape_cast %40 : vector<32x4xf32> to vector<2x16x4xf32>
    %42 = tpu.concatenate %35, %37, %39, %41 in 0 : vector<2x16x4xf32>, vector<2x16x4xf32>, vector<2x16x4xf32>, vector<2x16x4xf32> -> vector<8x16x4xf32>
    %43 = vector.extract_strided_slice %28 {offsets = [0, 0], sizes = [32, 4], strides = [1, 1]} : vector<32x16xf32> to vector<32x4xf32>
    %44 = vector.shape_cast %43 : vector<32x4xf32> to vector<2x16x4xf32>
    %45 = vector.extract_strided_slice %28 {offsets = [0, 4], sizes = [32, 4], strides = [1, 1]} : vector<32x16xf32> to vector<32x4xf32>
    %46 = vector.shape_cast %45 : vector<32x4xf32> to vector<2x16x4xf32>
    %47 = vector.extract_strided_slice %28 {offsets = [0, 8], sizes = [32, 4], strides = [1, 1]} : vector<32x16xf32> to vector<32x4xf32>
    %48 = vector.shape_cast %47 : vector<32x4xf32> to vector<2x16x4xf32>
    %49 = vector.extract_strided_slice %28 {offsets = [0, 12], sizes = [32, 4], strides = [1, 1]} : vector<32x16xf32> to vector<32x4xf32>
    %50 = vector.shape_cast %49 : vector<32x4xf32> to vector<2x16x4xf32>
    %51 = tpu.concatenate %44, %46, %48, %50 in 0 : vector<2x16x4xf32>, vector<2x16x4xf32>, vector<2x16x4xf32>, vector<2x16x4xf32> -> vector<8x16x4xf32>
    %52 = vector.extract_strided_slice %33 {offsets = [0, 0], sizes = [32, 4], strides = [1, 1]} : vector<32x16xf32> to vector<32x4xf32>
    %53 = vector.shape_cast %52 : vector<32x4xf32> to vector<2x16x4xf32>
    %54 = vector.extract_strided_slice %33 {offsets = [0, 4], sizes = [32, 4], strides = [1, 1]} : vector<32x16xf32> to vector<32x4xf32>
    %55 = vector.shape_cast %54 : vector<32x4xf32> to vector<2x16x4xf32>
    %56 = vector.extract_strided_slice %33 {offsets = [0, 8], sizes = [32, 4], strides = [1, 1]} : vector<32x16xf32> to vector<32x4xf32>
    %57 = vector.shape_cast %56 : vector<32x4xf32> to vector<2x16x4xf32>
    %58 = vector.extract_strided_slice %33 {offsets = [0, 12], sizes = [32, 4], strides = [1, 1]} : vector<32x16xf32> to vector<32x4xf32>
    %59 = vector.shape_cast %58 : vector<32x4xf32> to vector<2x16x4xf32>
    %60 = tpu.concatenate %53, %55, %57, %59 in 0 : vector<2x16x4xf32>, vector<2x16x4xf32>, vector<2x16x4xf32>, vector<2x16x4xf32> -> vector<8x16x4xf32>
    "tpu.trace_start"() <{level = 10 : i32, message = "bqd,bkd->bqk"}> : () -> ()
    %cst_13 = arith.constant dense<0.000000e+00> : vector<8x16x16xf32>
    %61 = tpu.matmul %42, %51, %cst_13 {dimension_numbers = #tpu.dot_dimension_numbers<[2], [2], [1], [1], [0, 0, 0, 1, 1, 1], [0], [0]>} : vector<8x16x4xf32>, vector<8x16x4xf32>, vector<8x16x16xf32> -> vector<8x16x16xf32>
    "tpu.trace_stop"() : () -> ()
    %cst_14 = arith.constant 5.000000e-01 : f32
    %62 = vector.broadcast %cst_14 : f32 to vector<8x16x16xf32>
    %63 = arith.mulf %61, %62 : vector<8x16x16xf32>
    %cst_15 = arith.constant dense<0xFF800000> : vector<8x16xf32>
    %64 = vector.multi_reduction <maximumf>, %63, %cst_15 [2] : vector<8x16x16xf32> to vector<8x16xf32>
    %65 = vector.shape_cast %64 : vector<8x16xf32> to vector<8x16x1xf32>
    %66 = vector.broadcast %65 : vector<8x16x1xf32> to vector<8x16x16xf32>
    %67 = arith.subf %63, %66 : vector<8x16x16xf32>
    %68 = math.exp %67 : vector<8x16x16xf32>
    %cst_16 = arith.constant dense<0.000000e+00> : vector<8x16xf32>
    %69 = vector.multi_reduction <add>, %68, %cst_16 [2] : vector<8x16x16xf32> to vector<8x16xf32>
    %70 = vector.shape_cast %69 : vector<8x16xf32> to vector<8x16x1xf32>
    %71 = tpu.reciprocal %70 {approx = true} : vector<8x16x1xf32> -> vector<8x16x1xf32>
    %72 = vector.broadcast %71 : vector<8x16x1xf32> to vector<8x16x16xf32>
    %73 = arith.mulf %68, %72 : vector<8x16x16xf32>
    "tpu.trace_start"() <{level = 10 : i32, message = "bqk,bkd->bqd"}> : () -> ()
    %cst_17 = arith.constant dense<0.000000e+00> : vector<8x16x4xf32>
    %74 = tpu.matmul %73, %60, %cst_17 {dimension_numbers = #tpu.dot_dimension_numbers<[2], [1], [1], [2], [0, 0, 0, 1, 1, 2], [0], [0]>} : vector<8x16x16xf32>, vector<8x16x4xf32>, vector<8x16x4xf32> -> vector<8x16x4xf32>
    "tpu.trace_stop"() : () -> ()
    %75 = vector.extract_strided_slice %74 {offsets = [0, 0, 0], sizes = [2, 16, 4], strides = [1, 1, 1]} : vector<8x16x4xf32> to vector<2x16x4xf32>
    %76 = vector.shape_cast %75 : vector<2x16x4xf32> to vector<32x4xf32>
    %77 = vector.extract_strided_slice %74 {offsets = [2, 0, 0], sizes = [2, 16, 4], strides = [1, 1, 1]} : vector<8x16x4xf32> to vector<2x16x4xf32>
    %78 = vector.shape_cast %77 : vector<2x16x4xf32> to vector<32x4xf32>
    %79 = vector.extract_strided_slice %74 {offsets = [4, 0, 0], sizes = [2, 16, 4], strides = [1, 1, 1]} : vector<8x16x4xf32> to vector<2x16x4xf32>
    %80 = vector.shape_cast %79 : vector<2x16x4xf32> to vector<32x4xf32>
    %81 = vector.extract_strided_slice %74 {offsets = [6, 0, 0], sizes = [2, 16, 4], strides = [1, 1, 1]} : vector<8x16x4xf32> to vector<2x16x4xf32>
    %82 = vector.shape_cast %81 : vector<2x16x4xf32> to vector<32x4xf32>
    %83 = tpu.concatenate %76, %78, %80, %82 in 1 : vector<32x4xf32>, vector<32x4xf32>, vector<32x4xf32>, vector<32x4xf32> -> vector<32x16xf32>
    %c128 = arith.constant 128 : index
    %c0_18 = arith.constant 0 : index
    %84 = vector.load %arg2[%c128, %c0_18] : memref<1336x16xf32, #tpu.memory_space<vmem>>, vector<16x16xf32>
    %cst_19 = arith.constant dense<0.000000e+00> : vector<32x16xf32>
    %85 = tpu.matmul %83, %84, %cst_19 {dimension_numbers = #tpu.dot_dimension_numbers<[1], [0], [0], [1], [0, 0, 1, 1], [], []>} : vector<32x16xf32>, vector<16x16xf32>, vector<32x16xf32> -> vector<32x16xf32>
    %c144 = arith.constant 144 : index
    %c0_20 = arith.constant 0 : index
    %86 = vector.load %arg2[%c144, %c0_20] : memref<1336x16xf32, #tpu.memory_space<vmem>>, vector<1x16xf32>
    %87 = vector.broadcast %86 : vector<1x16xf32> to vector<32x16xf32>
    %88 = arith.addf %85, %87 : vector<32x16xf32>
    %89 = arith.addf %88, %18 : vector<32x16xf32>
    %cst_21 = arith.constant dense<0.000000e+00> : vector<32xf32>
    %90 = vector.multi_reduction <add>, %89, %cst_21 [1] : vector<32x16xf32> to vector<32xf32>
    %91 = vector.shape_cast %90 : vector<32xf32> to vector<32x1xf32>
    %cst_22 = arith.constant 1.600000e+01 : f32
    %92 = vector.broadcast %cst_22 : f32 to vector<32x1xf32>
    %93 = arith.divf %91, %92 : vector<32x1xf32>
    %94 = vector.broadcast %93 : vector<32x1xf32> to vector<32x16xf32>
    %95 = arith.subf %89, %94 : vector<32x16xf32>
    %96 = arith.mulf %95, %95 : vector<32x16xf32>
    %cst_23 = arith.constant dense<0.000000e+00> : vector<32xf32>
    %97 = vector.multi_reduction <add>, %96, %cst_23 [1] : vector<32x16xf32> to vector<32xf32>
    %98 = vector.shape_cast %97 : vector<32xf32> to vector<32x1xf32>
    %cst_24 = arith.constant 1.600000e+01 : f32
    %99 = vector.broadcast %cst_24 : f32 to vector<32x1xf32>
    %100 = arith.divf %98, %99 : vector<32x1xf32>
    %cst_25 = arith.constant 9.99999974E-6 : f32
    %101 = vector.broadcast %cst_25 : f32 to vector<32x1xf32>
    %102 = arith.addf %100, %101 : vector<32x1xf32>
    %103 = math.rsqrt %102 : vector<32x1xf32>
    %104 = vector.broadcast %103 : vector<32x1xf32> to vector<32x16xf32>
    %105 = arith.mulf %95, %104 : vector<32x16xf32>
    %c288 = arith.constant 288 : index
    %c0_26 = arith.constant 0 : index
    %106 = vector.load %arg2[%c288, %c0_26] : memref<1336x16xf32, #tpu.memory_space<vmem>>, vector<1x16xf32>
    %107 = vector.broadcast %106 : vector<1x16xf32> to vector<32x16xf32>
    %108 = arith.mulf %105, %107 : vector<32x16xf32>
    %c296 = arith.constant 296 : index
    %c0_27 = arith.constant 0 : index
    %109 = vector.load %arg2[%c296, %c0_27] : memref<1336x16xf32, #tpu.memory_space<vmem>>, vector<1x16xf32>
    %110 = vector.broadcast %109 : vector<1x16xf32> to vector<32x16xf32>
    %111 = arith.addf %108, %110 : vector<32x16xf32>
    %c0_28 = arith.constant 0 : index
    %c0_29 = arith.constant 0 : index
    %112 = vector.load %arg3[%c0_28, %c0_29] : memref<120x128xf32, #tpu.memory_space<vmem>>, vector<16x128xf32>
    %cst_30 = arith.constant dense<0.000000e+00> : vector<32x128xf32>
    %113 = tpu.matmul %111, %112, %cst_30 {dimension_numbers = #tpu.dot_dimension_numbers<[1], [0], [0], [1], [0, 0, 1, 1], [], []>} : vector<32x16xf32>, vector<16x128xf32>, vector<32x128xf32> -> vector<32x128xf32>
    %c16 = arith.constant 16 : index
    %c0_31 = arith.constant 0 : index
    %114 = vector.load %arg3[%c16, %c0_31] : memref<120x128xf32, #tpu.memory_space<vmem>>, vector<1x128xf32>
    %115 = vector.broadcast %114 : vector<1x128xf32> to vector<32x128xf32>
    %116 = arith.addf %113, %115 : vector<32x128xf32>
    %cst_32 = arith.constant 0.000000e+00 : f32
    %117 = vector.broadcast %cst_32 : f32 to vector<32x128xf32>
    %118 = arith.maximumf %116, %117 : vector<32x128xf32>
    %c152 = arith.constant 152 : index
    %c0_33 = arith.constant 0 : index
    %119 = vector.load %arg2[%c152, %c0_33] : memref<1336x16xf32, #tpu.memory_space<vmem>>, vector<128x16xf32>
    %cst_34 = arith.constant dense<0.000000e+00> : vector<32x16xf32>
    %120 = tpu.matmul %118, %119, %cst_34 {dimension_numbers = #tpu.dot_dimension_numbers<[1], [0], [0], [1], [0, 0, 1, 1], [], []>} : vector<32x128xf32>, vector<128x16xf32>, vector<32x16xf32> -> vector<32x16xf32>
    %c280 = arith.constant 280 : index
    %c0_35 = arith.constant 0 : index
    %121 = vector.load %arg2[%c280, %c0_35] : memref<1336x16xf32, #tpu.memory_space<vmem>>, vector<1x16xf32>
    %122 = vector.broadcast %121 : vector<1x16xf32> to vector<32x16xf32>
    %123 = arith.addf %120, %122 : vector<32x16xf32>
    %124 = arith.addf %123, %111 : vector<32x16xf32>
    %cst_36 = arith.constant dense<0.000000e+00> : vector<32xf32>
    %125 = vector.multi_reduction <add>, %124, %cst_36 [1] : vector<32x16xf32> to vector<32xf32>
    %126 = vector.shape_cast %125 : vector<32xf32> to vector<32x1xf32>
    %cst_37 = arith.constant 1.600000e+01 : f32
    %127 = vector.broadcast %cst_37 : f32 to vector<32x1xf32>
    %128 = arith.divf %126, %127 : vector<32x1xf32>
    %129 = vector.broadcast %128 : vector<32x1xf32> to vector<32x16xf32>
    %130 = arith.subf %124, %129 : vector<32x16xf32>
    %131 = arith.mulf %130, %130 : vector<32x16xf32>
    %cst_38 = arith.constant dense<0.000000e+00> : vector<32xf32>
    %132 = vector.multi_reduction <add>, %131, %cst_38 [1] : vector<32x16xf32> to vector<32xf32>
    %133 = vector.shape_cast %132 : vector<32xf32> to vector<32x1xf32>
    %cst_39 = arith.constant 1.600000e+01 : f32
    %134 = vector.broadcast %cst_39 : f32 to vector<32x1xf32>
    %135 = arith.divf %133, %134 : vector<32x1xf32>
    %cst_40 = arith.constant 9.99999974E-6 : f32
    %136 = vector.broadcast %cst_40 : f32 to vector<32x1xf32>
    %137 = arith.addf %135, %136 : vector<32x1xf32>
    %138 = math.rsqrt %137 : vector<32x1xf32>
    %139 = vector.broadcast %138 : vector<32x1xf32> to vector<32x16xf32>
    %140 = arith.mulf %130, %139 : vector<32x16xf32>
    %c304 = arith.constant 304 : index
    %c0_41 = arith.constant 0 : index
    %141 = vector.load %arg2[%c304, %c0_41] : memref<1336x16xf32, #tpu.memory_space<vmem>>, vector<1x16xf32>
    %142 = vector.broadcast %141 : vector<1x16xf32> to vector<32x16xf32>
    %143 = arith.mulf %140, %142 : vector<32x16xf32>
    %c312 = arith.constant 312 : index
    %c0_42 = arith.constant 0 : index
    %144 = vector.load %arg2[%c312, %c0_42] : memref<1336x16xf32, #tpu.memory_space<vmem>>, vector<1x16xf32>
    %145 = vector.broadcast %144 : vector<1x16xf32> to vector<32x16xf32>
    %146 = arith.addf %143, %145 : vector<32x16xf32>
    %c320 = arith.constant 320 : index
    %c0_43 = arith.constant 0 : index
    %147 = vector.load %arg2[%c320, %c0_43] : memref<1336x16xf32, #tpu.memory_space<vmem>>, vector<16x16xf32>
    %cst_44 = arith.constant dense<0.000000e+00> : vector<32x16xf32>
    %148 = tpu.matmul %146, %147, %cst_44 {dimension_numbers = #tpu.dot_dimension_numbers<[1], [0], [0], [1], [0, 0, 1, 1], [], []>} : vector<32x16xf32>, vector<16x16xf32>, vector<32x16xf32> -> vector<32x16xf32>
    %c336 = arith.constant 336 : index
    %c0_45 = arith.constant 0 : index
    %149 = vector.load %arg2[%c336, %c0_45] : memref<1336x16xf32, #tpu.memory_space<vmem>>, vector<1x16xf32>
    %150 = vector.broadcast %149 : vector<1x16xf32> to vector<32x16xf32>
    %151 = arith.addf %148, %150 : vector<32x16xf32>
    %c344 = arith.constant 344 : index
    %c0_46 = arith.constant 0 : index
    %152 = vector.load %arg2[%c344, %c0_46] : memref<1336x16xf32, #tpu.memory_space<vmem>>, vector<16x16xf32>
    %cst_47 = arith.constant dense<0.000000e+00> : vector<32x16xf32>
    %153 = tpu.matmul %146, %152, %cst_47 {dimension_numbers = #tpu.dot_dimension_numbers<[1], [0], [0], [1], [0, 0, 1, 1], [], []>} : vector<32x16xf32>, vector<16x16xf32>, vector<32x16xf32> -> vector<32x16xf32>
    %c360 = arith.constant 360 : index
    %c0_48 = arith.constant 0 : index
    %154 = vector.load %arg2[%c360, %c0_48] : memref<1336x16xf32, #tpu.memory_space<vmem>>, vector<1x16xf32>
    %155 = vector.broadcast %154 : vector<1x16xf32> to vector<32x16xf32>
    %156 = arith.addf %153, %155 : vector<32x16xf32>
    %c368 = arith.constant 368 : index
    %c0_49 = arith.constant 0 : index
    %157 = vector.load %arg2[%c368, %c0_49] : memref<1336x16xf32, #tpu.memory_space<vmem>>, vector<16x16xf32>
    %cst_50 = arith.constant dense<0.000000e+00> : vector<32x16xf32>
    %158 = tpu.matmul %146, %157, %cst_50 {dimension_numbers = #tpu.dot_dimension_numbers<[1], [0], [0], [1], [0, 0, 1, 1], [], []>} : vector<32x16xf32>, vector<16x16xf32>, vector<32x16xf32> -> vector<32x16xf32>
    %c384 = arith.constant 384 : index
    %c0_51 = arith.constant 0 : index
    %159 = vector.load %arg2[%c384, %c0_51] : memref<1336x16xf32, #tpu.memory_space<vmem>>, vector<1x16xf32>
    %160 = vector.broadcast %159 : vector<1x16xf32> to vector<32x16xf32>
    %161 = arith.addf %158, %160 : vector<32x16xf32>
    %162 = vector.extract_strided_slice %151 {offsets = [0, 0], sizes = [32, 4], strides = [1, 1]} : vector<32x16xf32> to vector<32x4xf32>
    %163 = vector.shape_cast %162 : vector<32x4xf32> to vector<2x16x4xf32>
    %164 = vector.extract_strided_slice %151 {offsets = [0, 4], sizes = [32, 4], strides = [1, 1]} : vector<32x16xf32> to vector<32x4xf32>
    %165 = vector.shape_cast %164 : vector<32x4xf32> to vector<2x16x4xf32>
    %166 = vector.extract_strided_slice %151 {offsets = [0, 8], sizes = [32, 4], strides = [1, 1]} : vector<32x16xf32> to vector<32x4xf32>
    %167 = vector.shape_cast %166 : vector<32x4xf32> to vector<2x16x4xf32>
    %168 = vector.extract_strided_slice %151 {offsets = [0, 12], sizes = [32, 4], strides = [1, 1]} : vector<32x16xf32> to vector<32x4xf32>
    %169 = vector.shape_cast %168 : vector<32x4xf32> to vector<2x16x4xf32>
    %170 = tpu.concatenate %163, %165, %167, %169 in 0 : vector<2x16x4xf32>, vector<2x16x4xf32>, vector<2x16x4xf32>, vector<2x16x4xf32> -> vector<8x16x4xf32>
    %171 = vector.extract_strided_slice %156 {offsets = [0, 0], sizes = [32, 4], strides = [1, 1]} : vector<32x16xf32> to vector<32x4xf32>
    %172 = vector.shape_cast %171 : vector<32x4xf32> to vector<2x16x4xf32>
    %173 = vector.extract_strided_slice %156 {offsets = [0, 4], sizes = [32, 4], strides = [1, 1]} : vector<32x16xf32> to vector<32x4xf32>
    %174 = vector.shape_cast %173 : vector<32x4xf32> to vector<2x16x4xf32>
    %175 = vector.extract_strided_slice %156 {offsets = [0, 8], sizes = [32, 4], strides = [1, 1]} : vector<32x16xf32> to vector<32x4xf32>
    %176 = vector.shape_cast %175 : vector<32x4xf32> to vector<2x16x4xf32>
    %177 = vector.extract_strided_slice %156 {offsets = [0, 12], sizes = [32, 4], strides = [1, 1]} : vector<32x16xf32> to vector<32x4xf32>
    %178 = vector.shape_cast %177 : vector<32x4xf32> to vector<2x16x4xf32>
    %179 = tpu.concatenate %172, %174, %176, %178 in 0 : vector<2x16x4xf32>, vector<2x16x4xf32>, vector<2x16x4xf32>, vector<2x16x4xf32> -> vector<8x16x4xf32>
    %180 = vector.extract_strided_slice %161 {offsets = [0, 0], sizes = [32, 4], strides = [1, 1]} : vector<32x16xf32> to vector<32x4xf32>
    %181 = vector.shape_cast %180 : vector<32x4xf32> to vector<2x16x4xf32>
    %182 = vector.extract_strided_slice %161 {offsets = [0, 4], sizes = [32, 4], strides = [1, 1]} : vector<32x16xf32> to vector<32x4xf32>
    %183 = vector.shape_cast %182 : vector<32x4xf32> to vector<2x16x4xf32>
    %184 = vector.extract_strided_slice %161 {offsets = [0, 8], sizes = [32, 4], strides = [1, 1]} : vector<32x16xf32> to vector<32x4xf32>
    %185 = vector.shape_cast %184 : vector<32x4xf32> to vector<2x16x4xf32>
    %186 = vector.extract_strided_slice %161 {offsets = [0, 12], sizes = [32, 4], strides = [1, 1]} : vector<32x16xf32> to vector<32x4xf32>
    %187 = vector.shape_cast %186 : vector<32x4xf32> to vector<2x16x4xf32>
    %188 = tpu.concatenate %181, %183, %185, %187 in 0 : vector<2x16x4xf32>, vector<2x16x4xf32>, vector<2x16x4xf32>, vector<2x16x4xf32> -> vector<8x16x4xf32>
    "tpu.trace_start"() <{level = 10 : i32, message = "bqd,bkd->bqk"}> : () -> ()
    %cst_52 = arith.constant dense<0.000000e+00> : vector<8x16x16xf32>
    %189 = tpu.matmul %170, %179, %cst_52 {dimension_numbers = #tpu.dot_dimension_numbers<[2], [2], [1], [1], [0, 0, 0, 1, 1, 1], [0], [0]>} : vector<8x16x4xf32>, vector<8x16x4xf32>, vector<8x16x16xf32> -> vector<8x16x16xf32>
    "tpu.trace_stop"() : () -> ()
    %cst_53 = arith.constant 5.000000e-01 : f32
    %190 = vector.broadcast %cst_53 : f32 to vector<8x16x16xf32>
    %191 = arith.mulf %189, %190 : vector<8x16x16xf32>
    %cst_54 = arith.constant dense<0xFF800000> : vector<8x16xf32>
    %192 = vector.multi_reduction <maximumf>, %191, %cst_54 [2] : vector<8x16x16xf32> to vector<8x16xf32>
    %193 = vector.shape_cast %192 : vector<8x16xf32> to vector<8x16x1xf32>
    %194 = vector.broadcast %193 : vector<8x16x1xf32> to vector<8x16x16xf32>
    %195 = arith.subf %191, %194 : vector<8x16x16xf32>
    %196 = math.exp %195 : vector<8x16x16xf32>
    %cst_55 = arith.constant dense<0.000000e+00> : vector<8x16xf32>
    %197 = vector.multi_reduction <add>, %196, %cst_55 [2] : vector<8x16x16xf32> to vector<8x16xf32>
    %198 = vector.shape_cast %197 : vector<8x16xf32> to vector<8x16x1xf32>
    %199 = tpu.reciprocal %198 {approx = true} : vector<8x16x1xf32> -> vector<8x16x1xf32>
    %200 = vector.broadcast %199 : vector<8x16x1xf32> to vector<8x16x16xf32>
    %201 = arith.mulf %196, %200 : vector<8x16x16xf32>
    "tpu.trace_start"() <{level = 10 : i32, message = "bqk,bkd->bqd"}> : () -> ()
    %cst_56 = arith.constant dense<0.000000e+00> : vector<8x16x4xf32>
    %202 = tpu.matmul %201, %188, %cst_56 {dimension_numbers = #tpu.dot_dimension_numbers<[2], [1], [1], [2], [0, 0, 0, 1, 1, 2], [0], [0]>} : vector<8x16x16xf32>, vector<8x16x4xf32>, vector<8x16x4xf32> -> vector<8x16x4xf32>
    "tpu.trace_stop"() : () -> ()
    %203 = vector.extract_strided_slice %202 {offsets = [0, 0, 0], sizes = [2, 16, 4], strides = [1, 1, 1]} : vector<8x16x4xf32> to vector<2x16x4xf32>
    %204 = vector.shape_cast %203 : vector<2x16x4xf32> to vector<32x4xf32>
    %205 = vector.extract_strided_slice %202 {offsets = [2, 0, 0], sizes = [2, 16, 4], strides = [1, 1, 1]} : vector<8x16x4xf32> to vector<2x16x4xf32>
    %206 = vector.shape_cast %205 : vector<2x16x4xf32> to vector<32x4xf32>
    %207 = vector.extract_strided_slice %202 {offsets = [4, 0, 0], sizes = [2, 16, 4], strides = [1, 1, 1]} : vector<8x16x4xf32> to vector<2x16x4xf32>
    %208 = vector.shape_cast %207 : vector<2x16x4xf32> to vector<32x4xf32>
    %209 = vector.extract_strided_slice %202 {offsets = [6, 0, 0], sizes = [2, 16, 4], strides = [1, 1, 1]} : vector<8x16x4xf32> to vector<2x16x4xf32>
    %210 = vector.shape_cast %209 : vector<2x16x4xf32> to vector<32x4xf32>
    %211 = tpu.concatenate %204, %206, %208, %210 in 1 : vector<32x4xf32>, vector<32x4xf32>, vector<32x4xf32>, vector<32x4xf32> -> vector<32x16xf32>
    %c392 = arith.constant 392 : index
    %c0_57 = arith.constant 0 : index
    %212 = vector.load %arg2[%c392, %c0_57] : memref<1336x16xf32, #tpu.memory_space<vmem>>, vector<16x16xf32>
    %cst_58 = arith.constant dense<0.000000e+00> : vector<32x16xf32>
    %213 = tpu.matmul %211, %212, %cst_58 {dimension_numbers = #tpu.dot_dimension_numbers<[1], [0], [0], [1], [0, 0, 1, 1], [], []>} : vector<32x16xf32>, vector<16x16xf32>, vector<32x16xf32> -> vector<32x16xf32>
    %c408 = arith.constant 408 : index
    %c0_59 = arith.constant 0 : index
    %214 = vector.load %arg2[%c408, %c0_59] : memref<1336x16xf32, #tpu.memory_space<vmem>>, vector<1x16xf32>
    %215 = vector.broadcast %214 : vector<1x16xf32> to vector<32x16xf32>
    %216 = arith.addf %213, %215 : vector<32x16xf32>
    %217 = arith.addf %216, %146 : vector<32x16xf32>
    %cst_60 = arith.constant dense<0.000000e+00> : vector<32xf32>
    %218 = vector.multi_reduction <add>, %217, %cst_60 [1] : vector<32x16xf32> to vector<32xf32>
    %219 = vector.shape_cast %218 : vector<32xf32> to vector<32x1xf32>
    %cst_61 = arith.constant 1.600000e+01 : f32
    %220 = vector.broadcast %cst_61 : f32 to vector<32x1xf32>
    %221 = arith.divf %219, %220 : vector<32x1xf32>
    %222 = vector.broadcast %221 : vector<32x1xf32> to vector<32x16xf32>
    %223 = arith.subf %217, %222 : vector<32x16xf32>
    %224 = arith.mulf %223, %223 : vector<32x16xf32>
    %cst_62 = arith.constant dense<0.000000e+00> : vector<32xf32>
    %225 = vector.multi_reduction <add>, %224, %cst_62 [1] : vector<32x16xf32> to vector<32xf32>
    %226 = vector.shape_cast %225 : vector<32xf32> to vector<32x1xf32>
    %cst_63 = arith.constant 1.600000e+01 : f32
    %227 = vector.broadcast %cst_63 : f32 to vector<32x1xf32>
    %228 = arith.divf %226, %227 : vector<32x1xf32>
    %cst_64 = arith.constant 9.99999974E-6 : f32
    %229 = vector.broadcast %cst_64 : f32 to vector<32x1xf32>
    %230 = arith.addf %228, %229 : vector<32x1xf32>
    %231 = math.rsqrt %230 : vector<32x1xf32>
    %232 = vector.broadcast %231 : vector<32x1xf32> to vector<32x16xf32>
    %233 = arith.mulf %223, %232 : vector<32x16xf32>
    %c552 = arith.constant 552 : index
    %c0_65 = arith.constant 0 : index
    %234 = vector.load %arg2[%c552, %c0_65] : memref<1336x16xf32, #tpu.memory_space<vmem>>, vector<1x16xf32>
    %235 = vector.broadcast %234 : vector<1x16xf32> to vector<32x16xf32>
    %236 = arith.mulf %233, %235 : vector<32x16xf32>
    %c560 = arith.constant 560 : index
    %c0_66 = arith.constant 0 : index
    %237 = vector.load %arg2[%c560, %c0_66] : memref<1336x16xf32, #tpu.memory_space<vmem>>, vector<1x16xf32>
    %238 = vector.broadcast %237 : vector<1x16xf32> to vector<32x16xf32>
    %239 = arith.addf %236, %238 : vector<32x16xf32>
    %c24 = arith.constant 24 : index
    %c0_67 = arith.constant 0 : index
    %240 = vector.load %arg3[%c24, %c0_67] : memref<120x128xf32, #tpu.memory_space<vmem>>, vector<16x128xf32>
    %cst_68 = arith.constant dense<0.000000e+00> : vector<32x128xf32>
    %241 = tpu.matmul %239, %240, %cst_68 {dimension_numbers = #tpu.dot_dimension_numbers<[1], [0], [0], [1], [0, 0, 1, 1], [], []>} : vector<32x16xf32>, vector<16x128xf32>, vector<32x128xf32> -> vector<32x128xf32>
    %c40 = arith.constant 40 : index
    %c0_69 = arith.constant 0 : index
    %242 = vector.load %arg3[%c40, %c0_69] : memref<120x128xf32, #tpu.memory_space<vmem>>, vector<1x128xf32>
    %243 = vector.broadcast %242 : vector<1x128xf32> to vector<32x128xf32>
    %244 = arith.addf %241, %243 : vector<32x128xf32>
    %cst_70 = arith.constant 0.000000e+00 : f32
    %245 = vector.broadcast %cst_70 : f32 to vector<32x128xf32>
    %246 = arith.maximumf %244, %245 : vector<32x128xf32>
    %c416 = arith.constant 416 : index
    %c0_71 = arith.constant 0 : index
    %247 = vector.load %arg2[%c416, %c0_71] : memref<1336x16xf32, #tpu.memory_space<vmem>>, vector<128x16xf32>
    %cst_72 = arith.constant dense<0.000000e+00> : vector<32x16xf32>
    %248 = tpu.matmul %246, %247, %cst_72 {dimension_numbers = #tpu.dot_dimension_numbers<[1], [0], [0], [1], [0, 0, 1, 1], [], []>} : vector<32x128xf32>, vector<128x16xf32>, vector<32x16xf32> -> vector<32x16xf32>
    %c544 = arith.constant 544 : index
    %c0_73 = arith.constant 0 : index
    %249 = vector.load %arg2[%c544, %c0_73] : memref<1336x16xf32, #tpu.memory_space<vmem>>, vector<1x16xf32>
    %250 = vector.broadcast %249 : vector<1x16xf32> to vector<32x16xf32>
    %251 = arith.addf %248, %250 : vector<32x16xf32>
    %252 = arith.addf %251, %239 : vector<32x16xf32>
    %cst_74 = arith.constant dense<0.000000e+00> : vector<32xf32>
    %253 = vector.multi_reduction <add>, %252, %cst_74 [1] : vector<32x16xf32> to vector<32xf32>
    %254 = vector.shape_cast %253 : vector<32xf32> to vector<32x1xf32>
    %cst_75 = arith.constant 1.600000e+01 : f32
    %255 = vector.broadcast %cst_75 : f32 to vector<32x1xf32>
    %256 = arith.divf %254, %255 : vector<32x1xf32>
    %257 = vector.broadcast %256 : vector<32x1xf32> to vector<32x16xf32>
    %258 = arith.subf %252, %257 : vector<32x16xf32>
    %259 = arith.mulf %258, %258 : vector<32x16xf32>
    %cst_76 = arith.constant dense<0.000000e+00> : vector<32xf32>
    %260 = vector.multi_reduction <add>, %259, %cst_76 [1] : vector<32x16xf32> to vector<32xf32>
    %261 = vector.shape_cast %260 : vector<32xf32> to vector<32x1xf32>
    %cst_77 = arith.constant 1.600000e+01 : f32
    %262 = vector.broadcast %cst_77 : f32 to vector<32x1xf32>
    %263 = arith.divf %261, %262 : vector<32x1xf32>
    %cst_78 = arith.constant 9.99999974E-6 : f32
    %264 = vector.broadcast %cst_78 : f32 to vector<32x1xf32>
    %265 = arith.addf %263, %264 : vector<32x1xf32>
    %266 = math.rsqrt %265 : vector<32x1xf32>
    %267 = vector.broadcast %266 : vector<32x1xf32> to vector<32x16xf32>
    %268 = arith.mulf %258, %267 : vector<32x16xf32>
    %c568 = arith.constant 568 : index
    %c0_79 = arith.constant 0 : index
    %269 = vector.load %arg2[%c568, %c0_79] : memref<1336x16xf32, #tpu.memory_space<vmem>>, vector<1x16xf32>
    %270 = vector.broadcast %269 : vector<1x16xf32> to vector<32x16xf32>
    %271 = arith.mulf %268, %270 : vector<32x16xf32>
    %c576 = arith.constant 576 : index
    %c0_80 = arith.constant 0 : index
    %272 = vector.load %arg2[%c576, %c0_80] : memref<1336x16xf32, #tpu.memory_space<vmem>>, vector<1x16xf32>
    %273 = vector.broadcast %272 : vector<1x16xf32> to vector<32x16xf32>
    %274 = arith.addf %271, %273 : vector<32x16xf32>
    %275 = arith.addf %274, %15 : vector<32x16xf32>
    %c0_81 = arith.constant 0 : index
    %c0_82 = arith.constant 0 : index
    %276 = vector.load %arg1[%c0_81, %c0_82] : memref<16x2xf32, #tpu.memory_space<vmem>>, vector<16x2xf32>
    %c16_83 = arith.constant 16 : index
    %c0_84 = arith.constant 0 : index
    %277 = vector.load %arg2[%c16_83, %c0_84] : memref<1336x16xf32, #tpu.memory_space<vmem>>, vector<2x16xf32>
    %278 = vector.extract_strided_slice %276 {offsets = [0, 0], sizes = [16, 1], strides = [1, 1]} : vector<16x2xf32> to vector<16x1xf32>
    %279 = vector.extract_strided_slice %277 {offsets = [0, 0], sizes = [1, 16], strides = [1, 1]} : vector<2x16xf32> to vector<1x16xf32>
    %280 = vector.broadcast %278 : vector<16x1xf32> to vector<16x16xf32>
    %281 = vector.broadcast %279 : vector<1x16xf32> to vector<16x16xf32>
    %282 = arith.mulf %280, %281 : vector<16x16xf32>
    %283 = vector.extract_strided_slice %276 {offsets = [0, 1], sizes = [16, 1], strides = [1, 1]} : vector<16x2xf32> to vector<16x1xf32>
    %284 = vector.extract_strided_slice %277 {offsets = [1, 0], sizes = [1, 16], strides = [1, 1]} : vector<2x16xf32> to vector<1x16xf32>
    %285 = vector.broadcast %283 : vector<16x1xf32> to vector<16x16xf32>
    %286 = vector.broadcast %284 : vector<1x16xf32> to vector<16x16xf32>
    %287 = arith.mulf %285, %286 : vector<16x16xf32>
    %288 = arith.addf %282, %287 : vector<16x16xf32>
    %c24_85 = arith.constant 24 : index
    %c0_86 = arith.constant 0 : index
    %289 = vector.load %arg2[%c24_85, %c0_86] : memref<1336x16xf32, #tpu.memory_space<vmem>>, vector<1x16xf32>
    %290 = vector.broadcast %289 : vector<1x16xf32> to vector<16x16xf32>
    %291 = arith.addf %288, %290 : vector<16x16xf32>
    %c48 = arith.constant 48 : index
    %c0_87 = arith.constant 0 : index
    %292 = vector.load %arg2[%c48, %c0_87] : memref<1336x16xf32, #tpu.memory_space<vmem>>, vector<8x16xf32>
    %293 = tpu.concatenate %292, %292 in 0 : vector<8x16xf32>, vector<8x16xf32> -> vector<16x16xf32>
    %294 = arith.addf %291, %293 : vector<16x16xf32>
    %c584 = arith.constant 584 : index
    %c0_88 = arith.constant 0 : index
    %295 = vector.load %arg2[%c584, %c0_88] : memref<1336x16xf32, #tpu.memory_space<vmem>>, vector<16x16xf32>
    %cst_89 = arith.constant dense<0.000000e+00> : vector<16x16xf32>
    %296 = tpu.matmul %294, %295, %cst_89 {dimension_numbers = #tpu.dot_dimension_numbers<[1], [0], [0], [1], [0, 0, 1, 1], [], []>} : vector<16x16xf32>, vector<16x16xf32>, vector<16x16xf32> -> vector<16x16xf32>
    %c600 = arith.constant 600 : index
    %c0_90 = arith.constant 0 : index
    %297 = vector.load %arg2[%c600, %c0_90] : memref<1336x16xf32, #tpu.memory_space<vmem>>, vector<1x16xf32>
    %298 = vector.broadcast %297 : vector<1x16xf32> to vector<16x16xf32>
    %299 = arith.addf %296, %298 : vector<16x16xf32>
    %c608 = arith.constant 608 : index
    %c0_91 = arith.constant 0 : index
    %300 = vector.load %arg2[%c608, %c0_91] : memref<1336x16xf32, #tpu.memory_space<vmem>>, vector<16x16xf32>
    %cst_92 = arith.constant dense<0.000000e+00> : vector<16x16xf32>
    %301 = tpu.matmul %294, %300, %cst_92 {dimension_numbers = #tpu.dot_dimension_numbers<[1], [0], [0], [1], [0, 0, 1, 1], [], []>} : vector<16x16xf32>, vector<16x16xf32>, vector<16x16xf32> -> vector<16x16xf32>
    %c624 = arith.constant 624 : index
    %c0_93 = arith.constant 0 : index
    %302 = vector.load %arg2[%c624, %c0_93] : memref<1336x16xf32, #tpu.memory_space<vmem>>, vector<1x16xf32>
    %303 = vector.broadcast %302 : vector<1x16xf32> to vector<16x16xf32>
    %304 = arith.addf %301, %303 : vector<16x16xf32>
    %c632 = arith.constant 632 : index
    %c0_94 = arith.constant 0 : index
    %305 = vector.load %arg2[%c632, %c0_94] : memref<1336x16xf32, #tpu.memory_space<vmem>>, vector<16x16xf32>
    %cst_95 = arith.constant dense<0.000000e+00> : vector<16x16xf32>
    %306 = tpu.matmul %294, %305, %cst_95 {dimension_numbers = #tpu.dot_dimension_numbers<[1], [0], [0], [1], [0, 0, 1, 1], [], []>} : vector<16x16xf32>, vector<16x16xf32>, vector<16x16xf32> -> vector<16x16xf32>
    %c648 = arith.constant 648 : index
    %c0_96 = arith.constant 0 : index
    %307 = vector.load %arg2[%c648, %c0_96] : memref<1336x16xf32, #tpu.memory_space<vmem>>, vector<1x16xf32>
    %308 = vector.broadcast %307 : vector<1x16xf32> to vector<16x16xf32>
    %309 = arith.addf %306, %308 : vector<16x16xf32>
    %310 = vector.extract_strided_slice %299 {offsets = [0, 0], sizes = [16, 4], strides = [1, 1]} : vector<16x16xf32> to vector<16x4xf32>
    %311 = vector.shape_cast %310 : vector<16x4xf32> to vector<2x8x4xf32>
    %312 = vector.extract_strided_slice %299 {offsets = [0, 4], sizes = [16, 4], strides = [1, 1]} : vector<16x16xf32> to vector<16x4xf32>
    %313 = vector.shape_cast %312 : vector<16x4xf32> to vector<2x8x4xf32>
    %314 = vector.extract_strided_slice %299 {offsets = [0, 8], sizes = [16, 4], strides = [1, 1]} : vector<16x16xf32> to vector<16x4xf32>
    %315 = vector.shape_cast %314 : vector<16x4xf32> to vector<2x8x4xf32>
    %316 = vector.extract_strided_slice %299 {offsets = [0, 12], sizes = [16, 4], strides = [1, 1]} : vector<16x16xf32> to vector<16x4xf32>
    %317 = vector.shape_cast %316 : vector<16x4xf32> to vector<2x8x4xf32>
    %318 = tpu.concatenate %311, %313, %315, %317 in 0 : vector<2x8x4xf32>, vector<2x8x4xf32>, vector<2x8x4xf32>, vector<2x8x4xf32> -> vector<8x8x4xf32>
    %319 = vector.extract_strided_slice %304 {offsets = [0, 0], sizes = [16, 4], strides = [1, 1]} : vector<16x16xf32> to vector<16x4xf32>
    %320 = vector.shape_cast %319 : vector<16x4xf32> to vector<2x8x4xf32>
    %321 = vector.extract_strided_slice %304 {offsets = [0, 4], sizes = [16, 4], strides = [1, 1]} : vector<16x16xf32> to vector<16x4xf32>
    %322 = vector.shape_cast %321 : vector<16x4xf32> to vector<2x8x4xf32>
    %323 = vector.extract_strided_slice %304 {offsets = [0, 8], sizes = [16, 4], strides = [1, 1]} : vector<16x16xf32> to vector<16x4xf32>
    %324 = vector.shape_cast %323 : vector<16x4xf32> to vector<2x8x4xf32>
    %325 = vector.extract_strided_slice %304 {offsets = [0, 12], sizes = [16, 4], strides = [1, 1]} : vector<16x16xf32> to vector<16x4xf32>
    %326 = vector.shape_cast %325 : vector<16x4xf32> to vector<2x8x4xf32>
    %327 = tpu.concatenate %320, %322, %324, %326 in 0 : vector<2x8x4xf32>, vector<2x8x4xf32>, vector<2x8x4xf32>, vector<2x8x4xf32> -> vector<8x8x4xf32>
    %328 = vector.extract_strided_slice %309 {offsets = [0, 0], sizes = [16, 4], strides = [1, 1]} : vector<16x16xf32> to vector<16x4xf32>
    %329 = vector.shape_cast %328 : vector<16x4xf32> to vector<2x8x4xf32>
    %330 = vector.extract_strided_slice %309 {offsets = [0, 4], sizes = [16, 4], strides = [1, 1]} : vector<16x16xf32> to vector<16x4xf32>
    %331 = vector.shape_cast %330 : vector<16x4xf32> to vector<2x8x4xf32>
    %332 = vector.extract_strided_slice %309 {offsets = [0, 8], sizes = [16, 4], strides = [1, 1]} : vector<16x16xf32> to vector<16x4xf32>
    %333 = vector.shape_cast %332 : vector<16x4xf32> to vector<2x8x4xf32>
    %334 = vector.extract_strided_slice %309 {offsets = [0, 12], sizes = [16, 4], strides = [1, 1]} : vector<16x16xf32> to vector<16x4xf32>
    %335 = vector.shape_cast %334 : vector<16x4xf32> to vector<2x8x4xf32>
    %336 = tpu.concatenate %329, %331, %333, %335 in 0 : vector<2x8x4xf32>, vector<2x8x4xf32>, vector<2x8x4xf32>, vector<2x8x4xf32> -> vector<8x8x4xf32>
    "tpu.trace_start"() <{level = 10 : i32, message = "bqd,bkd->bqk"}> : () -> ()
    %cst_97 = arith.constant dense<0.000000e+00> : vector<8x8x8xf32>
    %337 = tpu.matmul %318, %327, %cst_97 {dimension_numbers = #tpu.dot_dimension_numbers<[2], [2], [1], [1], [0, 0, 0, 1, 1, 1], [0], [0]>} : vector<8x8x4xf32>, vector<8x8x4xf32>, vector<8x8x8xf32> -> vector<8x8x8xf32>
    "tpu.trace_stop"() : () -> ()
    %cst_98 = arith.constant 5.000000e-01 : f32
    %338 = vector.broadcast %cst_98 : f32 to vector<8x8x8xf32>
    %339 = arith.mulf %337, %338 : vector<8x8x8xf32>
    %340 = tpu.iota {dimensions = array<i32: 0>} : vector<8x8xi32>
    %341 = tpu.iota {dimensions = array<i32: 1>} : vector<8x8xi32>
    %342 = arith.cmpi sge, %340, %341 : vector<8x8xi32>
    %343 = vector.shape_cast %342 : vector<8x8xi1> to vector<1x8x8xi1>
    %cst_99 = arith.constant -1.000000e+09 : f32
    %344 = vector.shape_cast %343 : vector<1x8x8xi1> to vector<1x8x8xi1>
    %345 = vector.broadcast %344 : vector<1x8x8xi1> to vector<8x8x8xi1>
    %346 = vector.broadcast %cst_99 : f32 to vector<8x8x8xf32>
    %347 = arith.select %345, %339, %346 : vector<8x8x8xi1>, vector<8x8x8xf32>
    %cst_100 = arith.constant dense<0xFF800000> : vector<8x8xf32>
    %348 = vector.multi_reduction <maximumf>, %347, %cst_100 [2] : vector<8x8x8xf32> to vector<8x8xf32>
    %349 = vector.shape_cast %348 : vector<8x8xf32> to vector<8x8x1xf32>
    %350 = vector.broadcast %349 : vector<8x8x1xf32> to vector<8x8x8xf32>
    %351 = arith.subf %347, %350 : vector<8x8x8xf32>
    %352 = math.exp %351 : vector<8x8x8xf32>
    %cst_101 = arith.constant dense<0.000000e+00> : vector<8x8xf32>
    %353 = vector.multi_reduction <add>, %352, %cst_101 [2] : vector<8x8x8xf32> to vector<8x8xf32>
    %354 = vector.shape_cast %353 : vector<8x8xf32> to vector<8x8x1xf32>
    %355 = tpu.reciprocal %354 {approx = true} : vector<8x8x1xf32> -> vector<8x8x1xf32>
    %356 = vector.broadcast %355 : vector<8x8x1xf32> to vector<8x8x8xf32>
    %357 = arith.mulf %352, %356 : vector<8x8x8xf32>
    "tpu.trace_start"() <{level = 10 : i32, message = "bqk,bkd->bqd"}> : () -> ()
    %cst_102 = arith.constant dense<0.000000e+00> : vector<8x8x4xf32>
    %358 = tpu.matmul %357, %336, %cst_102 {dimension_numbers = #tpu.dot_dimension_numbers<[2], [1], [1], [2], [0, 0, 0, 1, 1, 2], [0], [0]>} : vector<8x8x8xf32>, vector<8x8x4xf32>, vector<8x8x4xf32> -> vector<8x8x4xf32>
    "tpu.trace_stop"() : () -> ()
    %359 = vector.extract_strided_slice %358 {offsets = [0, 0, 0], sizes = [2, 8, 4], strides = [1, 1, 1]} : vector<8x8x4xf32> to vector<2x8x4xf32>
    %360 = vector.shape_cast %359 : vector<2x8x4xf32> to vector<16x4xf32>
    %361 = vector.extract_strided_slice %358 {offsets = [2, 0, 0], sizes = [2, 8, 4], strides = [1, 1, 1]} : vector<8x8x4xf32> to vector<2x8x4xf32>
    %362 = vector.shape_cast %361 : vector<2x8x4xf32> to vector<16x4xf32>
    %363 = vector.extract_strided_slice %358 {offsets = [4, 0, 0], sizes = [2, 8, 4], strides = [1, 1, 1]} : vector<8x8x4xf32> to vector<2x8x4xf32>
    %364 = vector.shape_cast %363 : vector<2x8x4xf32> to vector<16x4xf32>
    %365 = vector.extract_strided_slice %358 {offsets = [6, 0, 0], sizes = [2, 8, 4], strides = [1, 1, 1]} : vector<8x8x4xf32> to vector<2x8x4xf32>
    %366 = vector.shape_cast %365 : vector<2x8x4xf32> to vector<16x4xf32>
    %367 = tpu.concatenate %360, %362, %364, %366 in 1 : vector<16x4xf32>, vector<16x4xf32>, vector<16x4xf32>, vector<16x4xf32> -> vector<16x16xf32>
    %c656 = arith.constant 656 : index
    %c0_103 = arith.constant 0 : index
    %368 = vector.load %arg2[%c656, %c0_103] : memref<1336x16xf32, #tpu.memory_space<vmem>>, vector<16x16xf32>
    %cst_104 = arith.constant dense<0.000000e+00> : vector<16x16xf32>
    %369 = tpu.matmul %367, %368, %cst_104 {dimension_numbers = #tpu.dot_dimension_numbers<[1], [0], [0], [1], [0, 0, 1, 1], [], []>} : vector<16x16xf32>, vector<16x16xf32>, vector<16x16xf32> -> vector<16x16xf32>
    %c672 = arith.constant 672 : index
    %c0_105 = arith.constant 0 : index
    %370 = vector.load %arg2[%c672, %c0_105] : memref<1336x16xf32, #tpu.memory_space<vmem>>, vector<1x16xf32>
    %371 = vector.broadcast %370 : vector<1x16xf32> to vector<16x16xf32>
    %372 = arith.addf %369, %371 : vector<16x16xf32>
    %373 = arith.addf %372, %294 : vector<16x16xf32>
    %cst_106 = arith.constant dense<0.000000e+00> : vector<16xf32>
    %374 = vector.multi_reduction <add>, %373, %cst_106 [1] : vector<16x16xf32> to vector<16xf32>
    %375 = vector.shape_cast %374 : vector<16xf32> to vector<16x1xf32>
    %cst_107 = arith.constant 1.600000e+01 : f32
    %376 = vector.broadcast %cst_107 : f32 to vector<16x1xf32>
    %377 = arith.divf %375, %376 : vector<16x1xf32>
    %378 = vector.broadcast %377 : vector<16x1xf32> to vector<16x16xf32>
    %379 = arith.subf %373, %378 : vector<16x16xf32>
    %380 = arith.mulf %379, %379 : vector<16x16xf32>
    %cst_108 = arith.constant dense<0.000000e+00> : vector<16xf32>
    %381 = vector.multi_reduction <add>, %380, %cst_108 [1] : vector<16x16xf32> to vector<16xf32>
    %382 = vector.shape_cast %381 : vector<16xf32> to vector<16x1xf32>
    %cst_109 = arith.constant 1.600000e+01 : f32
    %383 = vector.broadcast %cst_109 : f32 to vector<16x1xf32>
    %384 = arith.divf %382, %383 : vector<16x1xf32>
    %cst_110 = arith.constant 9.99999974E-6 : f32
    %385 = vector.broadcast %cst_110 : f32 to vector<16x1xf32>
    %386 = arith.addf %384, %385 : vector<16x1xf32>
    %387 = math.rsqrt %386 : vector<16x1xf32>
    %388 = vector.broadcast %387 : vector<16x1xf32> to vector<16x16xf32>
    %389 = arith.mulf %379, %388 : vector<16x16xf32>
    %c912 = arith.constant 912 : index
    %c0_111 = arith.constant 0 : index
    %390 = vector.load %arg2[%c912, %c0_111] : memref<1336x16xf32, #tpu.memory_space<vmem>>, vector<1x16xf32>
    %391 = vector.broadcast %390 : vector<1x16xf32> to vector<16x16xf32>
    %392 = arith.mulf %389, %391 : vector<16x16xf32>
    %c920 = arith.constant 920 : index
    %c0_112 = arith.constant 0 : index
    %393 = vector.load %arg2[%c920, %c0_112] : memref<1336x16xf32, #tpu.memory_space<vmem>>, vector<1x16xf32>
    %394 = vector.broadcast %393 : vector<1x16xf32> to vector<16x16xf32>
    %395 = arith.addf %392, %394 : vector<16x16xf32>
    %c680 = arith.constant 680 : index
    %c0_113 = arith.constant 0 : index
    %396 = vector.load %arg2[%c680, %c0_113] : memref<1336x16xf32, #tpu.memory_space<vmem>>, vector<16x16xf32>
    %cst_114 = arith.constant dense<0.000000e+00> : vector<16x16xf32>
    %397 = tpu.matmul %395, %396, %cst_114 {dimension_numbers = #tpu.dot_dimension_numbers<[1], [0], [0], [1], [0, 0, 1, 1], [], []>} : vector<16x16xf32>, vector<16x16xf32>, vector<16x16xf32> -> vector<16x16xf32>
    %c696 = arith.constant 696 : index
    %c0_115 = arith.constant 0 : index
    %398 = vector.load %arg2[%c696, %c0_115] : memref<1336x16xf32, #tpu.memory_space<vmem>>, vector<1x16xf32>
    %399 = vector.broadcast %398 : vector<1x16xf32> to vector<16x16xf32>
    %400 = arith.addf %397, %399 : vector<16x16xf32>
    %c704 = arith.constant 704 : index
    %c0_116 = arith.constant 0 : index
    %401 = vector.load %arg2[%c704, %c0_116] : memref<1336x16xf32, #tpu.memory_space<vmem>>, vector<16x16xf32>
    %cst_117 = arith.constant dense<0.000000e+00> : vector<32x16xf32>
    %402 = tpu.matmul %275, %401, %cst_117 {dimension_numbers = #tpu.dot_dimension_numbers<[1], [0], [0], [1], [0, 0, 1, 1], [], []>} : vector<32x16xf32>, vector<16x16xf32>, vector<32x16xf32> -> vector<32x16xf32>
    %c720 = arith.constant 720 : index
    %c0_118 = arith.constant 0 : index
    %403 = vector.load %arg2[%c720, %c0_118] : memref<1336x16xf32, #tpu.memory_space<vmem>>, vector<1x16xf32>
    %404 = vector.broadcast %403 : vector<1x16xf32> to vector<32x16xf32>
    %405 = arith.addf %402, %404 : vector<32x16xf32>
    %c728 = arith.constant 728 : index
    %c0_119 = arith.constant 0 : index
    %406 = vector.load %arg2[%c728, %c0_119] : memref<1336x16xf32, #tpu.memory_space<vmem>>, vector<16x16xf32>
    %cst_120 = arith.constant dense<0.000000e+00> : vector<32x16xf32>
    %407 = tpu.matmul %275, %406, %cst_120 {dimension_numbers = #tpu.dot_dimension_numbers<[1], [0], [0], [1], [0, 0, 1, 1], [], []>} : vector<32x16xf32>, vector<16x16xf32>, vector<32x16xf32> -> vector<32x16xf32>
    %c744 = arith.constant 744 : index
    %c0_121 = arith.constant 0 : index
    %408 = vector.load %arg2[%c744, %c0_121] : memref<1336x16xf32, #tpu.memory_space<vmem>>, vector<1x16xf32>
    %409 = vector.broadcast %408 : vector<1x16xf32> to vector<32x16xf32>
    %410 = arith.addf %407, %409 : vector<32x16xf32>
    %411 = vector.extract_strided_slice %400 {offsets = [0, 0], sizes = [16, 4], strides = [1, 1]} : vector<16x16xf32> to vector<16x4xf32>
    %412 = vector.shape_cast %411 : vector<16x4xf32> to vector<2x8x4xf32>
    %413 = vector.extract_strided_slice %400 {offsets = [0, 4], sizes = [16, 4], strides = [1, 1]} : vector<16x16xf32> to vector<16x4xf32>
    %414 = vector.shape_cast %413 : vector<16x4xf32> to vector<2x8x4xf32>
    %415 = vector.extract_strided_slice %400 {offsets = [0, 8], sizes = [16, 4], strides = [1, 1]} : vector<16x16xf32> to vector<16x4xf32>
    %416 = vector.shape_cast %415 : vector<16x4xf32> to vector<2x8x4xf32>
    %417 = vector.extract_strided_slice %400 {offsets = [0, 12], sizes = [16, 4], strides = [1, 1]} : vector<16x16xf32> to vector<16x4xf32>
    %418 = vector.shape_cast %417 : vector<16x4xf32> to vector<2x8x4xf32>
    %419 = tpu.concatenate %412, %414, %416, %418 in 0 : vector<2x8x4xf32>, vector<2x8x4xf32>, vector<2x8x4xf32>, vector<2x8x4xf32> -> vector<8x8x4xf32>
    %420 = vector.extract_strided_slice %405 {offsets = [0, 0], sizes = [32, 4], strides = [1, 1]} : vector<32x16xf32> to vector<32x4xf32>
    %421 = vector.shape_cast %420 : vector<32x4xf32> to vector<2x16x4xf32>
    %422 = vector.extract_strided_slice %405 {offsets = [0, 4], sizes = [32, 4], strides = [1, 1]} : vector<32x16xf32> to vector<32x4xf32>
    %423 = vector.shape_cast %422 : vector<32x4xf32> to vector<2x16x4xf32>
    %424 = vector.extract_strided_slice %405 {offsets = [0, 8], sizes = [32, 4], strides = [1, 1]} : vector<32x16xf32> to vector<32x4xf32>
    %425 = vector.shape_cast %424 : vector<32x4xf32> to vector<2x16x4xf32>
    %426 = vector.extract_strided_slice %405 {offsets = [0, 12], sizes = [32, 4], strides = [1, 1]} : vector<32x16xf32> to vector<32x4xf32>
    %427 = vector.shape_cast %426 : vector<32x4xf32> to vector<2x16x4xf32>
    %428 = tpu.concatenate %421, %423, %425, %427 in 0 : vector<2x16x4xf32>, vector<2x16x4xf32>, vector<2x16x4xf32>, vector<2x16x4xf32> -> vector<8x16x4xf32>
    %429 = vector.extract_strided_slice %410 {offsets = [0, 0], sizes = [32, 4], strides = [1, 1]} : vector<32x16xf32> to vector<32x4xf32>
    %430 = vector.shape_cast %429 : vector<32x4xf32> to vector<2x16x4xf32>
    %431 = vector.extract_strided_slice %410 {offsets = [0, 4], sizes = [32, 4], strides = [1, 1]} : vector<32x16xf32> to vector<32x4xf32>
    %432 = vector.shape_cast %431 : vector<32x4xf32> to vector<2x16x4xf32>
    %433 = vector.extract_strided_slice %410 {offsets = [0, 8], sizes = [32, 4], strides = [1, 1]} : vector<32x16xf32> to vector<32x4xf32>
    %434 = vector.shape_cast %433 : vector<32x4xf32> to vector<2x16x4xf32>
    %435 = vector.extract_strided_slice %410 {offsets = [0, 12], sizes = [32, 4], strides = [1, 1]} : vector<32x16xf32> to vector<32x4xf32>
    %436 = vector.shape_cast %435 : vector<32x4xf32> to vector<2x16x4xf32>
    %437 = tpu.concatenate %430, %432, %434, %436 in 0 : vector<2x16x4xf32>, vector<2x16x4xf32>, vector<2x16x4xf32>, vector<2x16x4xf32> -> vector<8x16x4xf32>
    "tpu.trace_start"() <{level = 10 : i32, message = "bqd,bkd->bqk"}> : () -> ()
    %cst_122 = arith.constant dense<0.000000e+00> : vector<8x8x16xf32>
    %438 = tpu.matmul %419, %428, %cst_122 {dimension_numbers = #tpu.dot_dimension_numbers<[2], [2], [1], [1], [0, 0, 0, 1, 1, 1], [0], [0]>} : vector<8x8x4xf32>, vector<8x16x4xf32>, vector<8x8x16xf32> -> vector<8x8x16xf32>
    "tpu.trace_stop"() : () -> ()
    %cst_123 = arith.constant 5.000000e-01 : f32
    %439 = vector.broadcast %cst_123 : f32 to vector<8x8x16xf32>
    %440 = arith.mulf %438, %439 : vector<8x8x16xf32>
    %cst_124 = arith.constant dense<0xFF800000> : vector<8x8xf32>
    %441 = vector.multi_reduction <maximumf>, %440, %cst_124 [2] : vector<8x8x16xf32> to vector<8x8xf32>
    %442 = vector.shape_cast %441 : vector<8x8xf32> to vector<8x8x1xf32>
    %443 = vector.broadcast %442 : vector<8x8x1xf32> to vector<8x8x16xf32>
    %444 = arith.subf %440, %443 : vector<8x8x16xf32>
    %445 = math.exp %444 : vector<8x8x16xf32>
    %cst_125 = arith.constant dense<0.000000e+00> : vector<8x8xf32>
    %446 = vector.multi_reduction <add>, %445, %cst_125 [2] : vector<8x8x16xf32> to vector<8x8xf32>
    %447 = vector.shape_cast %446 : vector<8x8xf32> to vector<8x8x1xf32>
    %448 = tpu.reciprocal %447 {approx = true} : vector<8x8x1xf32> -> vector<8x8x1xf32>
    %449 = vector.broadcast %448 : vector<8x8x1xf32> to vector<8x8x16xf32>
    %450 = arith.mulf %445, %449 : vector<8x8x16xf32>
    "tpu.trace_start"() <{level = 10 : i32, message = "bqk,bkd->bqd"}> : () -> ()
    %cst_126 = arith.constant dense<0.000000e+00> : vector<8x8x4xf32>
    %451 = tpu.matmul %450, %437, %cst_126 {dimension_numbers = #tpu.dot_dimension_numbers<[2], [1], [1], [2], [0, 0, 0, 1, 1, 2], [0], [0]>} : vector<8x8x16xf32>, vector<8x16x4xf32>, vector<8x8x4xf32> -> vector<8x8x4xf32>
    "tpu.trace_stop"() : () -> ()
    %452 = vector.extract_strided_slice %451 {offsets = [0, 0, 0], sizes = [2, 8, 4], strides = [1, 1, 1]} : vector<8x8x4xf32> to vector<2x8x4xf32>
    %453 = vector.shape_cast %452 : vector<2x8x4xf32> to vector<16x4xf32>
    %454 = vector.extract_strided_slice %451 {offsets = [2, 0, 0], sizes = [2, 8, 4], strides = [1, 1, 1]} : vector<8x8x4xf32> to vector<2x8x4xf32>
    %455 = vector.shape_cast %454 : vector<2x8x4xf32> to vector<16x4xf32>
    %456 = vector.extract_strided_slice %451 {offsets = [4, 0, 0], sizes = [2, 8, 4], strides = [1, 1, 1]} : vector<8x8x4xf32> to vector<2x8x4xf32>
    %457 = vector.shape_cast %456 : vector<2x8x4xf32> to vector<16x4xf32>
    %458 = vector.extract_strided_slice %451 {offsets = [6, 0, 0], sizes = [2, 8, 4], strides = [1, 1, 1]} : vector<8x8x4xf32> to vector<2x8x4xf32>
    %459 = vector.shape_cast %458 : vector<2x8x4xf32> to vector<16x4xf32>
    %460 = tpu.concatenate %453, %455, %457, %459 in 1 : vector<16x4xf32>, vector<16x4xf32>, vector<16x4xf32>, vector<16x4xf32> -> vector<16x16xf32>
    %c752 = arith.constant 752 : index
    %c0_127 = arith.constant 0 : index
    %461 = vector.load %arg2[%c752, %c0_127] : memref<1336x16xf32, #tpu.memory_space<vmem>>, vector<16x16xf32>
    %cst_128 = arith.constant dense<0.000000e+00> : vector<16x16xf32>
    %462 = tpu.matmul %460, %461, %cst_128 {dimension_numbers = #tpu.dot_dimension_numbers<[1], [0], [0], [1], [0, 0, 1, 1], [], []>} : vector<16x16xf32>, vector<16x16xf32>, vector<16x16xf32> -> vector<16x16xf32>
    %c768 = arith.constant 768 : index
    %c0_129 = arith.constant 0 : index
    %463 = vector.load %arg2[%c768, %c0_129] : memref<1336x16xf32, #tpu.memory_space<vmem>>, vector<1x16xf32>
    %464 = vector.broadcast %463 : vector<1x16xf32> to vector<16x16xf32>
    %465 = arith.addf %462, %464 : vector<16x16xf32>
    %466 = arith.addf %465, %395 : vector<16x16xf32>
    %cst_130 = arith.constant dense<0.000000e+00> : vector<16xf32>
    %467 = vector.multi_reduction <add>, %466, %cst_130 [1] : vector<16x16xf32> to vector<16xf32>
    %468 = vector.shape_cast %467 : vector<16xf32> to vector<16x1xf32>
    %cst_131 = arith.constant 1.600000e+01 : f32
    %469 = vector.broadcast %cst_131 : f32 to vector<16x1xf32>
    %470 = arith.divf %468, %469 : vector<16x1xf32>
    %471 = vector.broadcast %470 : vector<16x1xf32> to vector<16x16xf32>
    %472 = arith.subf %466, %471 : vector<16x16xf32>
    %473 = arith.mulf %472, %472 : vector<16x16xf32>
    %cst_132 = arith.constant dense<0.000000e+00> : vector<16xf32>
    %474 = vector.multi_reduction <add>, %473, %cst_132 [1] : vector<16x16xf32> to vector<16xf32>
    %475 = vector.shape_cast %474 : vector<16xf32> to vector<16x1xf32>
    %cst_133 = arith.constant 1.600000e+01 : f32
    %476 = vector.broadcast %cst_133 : f32 to vector<16x1xf32>
    %477 = arith.divf %475, %476 : vector<16x1xf32>
    %cst_134 = arith.constant 9.99999974E-6 : f32
    %478 = vector.broadcast %cst_134 : f32 to vector<16x1xf32>
    %479 = arith.addf %477, %478 : vector<16x1xf32>
    %480 = math.rsqrt %479 : vector<16x1xf32>
    %481 = vector.broadcast %480 : vector<16x1xf32> to vector<16x16xf32>
    %482 = arith.mulf %472, %481 : vector<16x16xf32>
    %c928 = arith.constant 928 : index
    %c0_135 = arith.constant 0 : index
    %483 = vector.load %arg2[%c928, %c0_135] : memref<1336x16xf32, #tpu.memory_space<vmem>>, vector<1x16xf32>
    %484 = vector.broadcast %483 : vector<1x16xf32> to vector<16x16xf32>
    %485 = arith.mulf %482, %484 : vector<16x16xf32>
    %c936 = arith.constant 936 : index
    %c0_136 = arith.constant 0 : index
    %486 = vector.load %arg2[%c936, %c0_136] : memref<1336x16xf32, #tpu.memory_space<vmem>>, vector<1x16xf32>
    %487 = vector.broadcast %486 : vector<1x16xf32> to vector<16x16xf32>
    %488 = arith.addf %485, %487 : vector<16x16xf32>
    %c48_137 = arith.constant 48 : index
    %c0_138 = arith.constant 0 : index
    %489 = vector.load %arg3[%c48_137, %c0_138] : memref<120x128xf32, #tpu.memory_space<vmem>>, vector<16x128xf32>
    %cst_139 = arith.constant dense<0.000000e+00> : vector<16x128xf32>
    %490 = tpu.matmul %488, %489, %cst_139 {dimension_numbers = #tpu.dot_dimension_numbers<[1], [0], [0], [1], [0, 0, 1, 1], [], []>} : vector<16x16xf32>, vector<16x128xf32>, vector<16x128xf32> -> vector<16x128xf32>
    %c64 = arith.constant 64 : index
    %c0_140 = arith.constant 0 : index
    %491 = vector.load %arg3[%c64, %c0_140] : memref<120x128xf32, #tpu.memory_space<vmem>>, vector<1x128xf32>
    %492 = vector.broadcast %491 : vector<1x128xf32> to vector<16x128xf32>
    %493 = arith.addf %490, %492 : vector<16x128xf32>
    %cst_141 = arith.constant 0.000000e+00 : f32
    %494 = vector.broadcast %cst_141 : f32 to vector<16x128xf32>
    %495 = arith.maximumf %493, %494 : vector<16x128xf32>
    %c776 = arith.constant 776 : index
    %c0_142 = arith.constant 0 : index
    %496 = vector.load %arg2[%c776, %c0_142] : memref<1336x16xf32, #tpu.memory_space<vmem>>, vector<128x16xf32>
    %cst_143 = arith.constant dense<0.000000e+00> : vector<16x16xf32>
    %497 = tpu.matmul %495, %496, %cst_143 {dimension_numbers = #tpu.dot_dimension_numbers<[1], [0], [0], [1], [0, 0, 1, 1], [], []>} : vector<16x128xf32>, vector<128x16xf32>, vector<16x16xf32> -> vector<16x16xf32>
    %c904 = arith.constant 904 : index
    %c0_144 = arith.constant 0 : index
    %498 = vector.load %arg2[%c904, %c0_144] : memref<1336x16xf32, #tpu.memory_space<vmem>>, vector<1x16xf32>
    %499 = vector.broadcast %498 : vector<1x16xf32> to vector<16x16xf32>
    %500 = arith.addf %497, %499 : vector<16x16xf32>
    %501 = arith.addf %500, %488 : vector<16x16xf32>
    %cst_145 = arith.constant dense<0.000000e+00> : vector<16xf32>
    %502 = vector.multi_reduction <add>, %501, %cst_145 [1] : vector<16x16xf32> to vector<16xf32>
    %503 = vector.shape_cast %502 : vector<16xf32> to vector<16x1xf32>
    %cst_146 = arith.constant 1.600000e+01 : f32
    %504 = vector.broadcast %cst_146 : f32 to vector<16x1xf32>
    %505 = arith.divf %503, %504 : vector<16x1xf32>
    %506 = vector.broadcast %505 : vector<16x1xf32> to vector<16x16xf32>
    %507 = arith.subf %501, %506 : vector<16x16xf32>
    %508 = arith.mulf %507, %507 : vector<16x16xf32>
    %cst_147 = arith.constant dense<0.000000e+00> : vector<16xf32>
    %509 = vector.multi_reduction <add>, %508, %cst_147 [1] : vector<16x16xf32> to vector<16xf32>
    %510 = vector.shape_cast %509 : vector<16xf32> to vector<16x1xf32>
    %cst_148 = arith.constant 1.600000e+01 : f32
    %511 = vector.broadcast %cst_148 : f32 to vector<16x1xf32>
    %512 = arith.divf %510, %511 : vector<16x1xf32>
    %cst_149 = arith.constant 9.99999974E-6 : f32
    %513 = vector.broadcast %cst_149 : f32 to vector<16x1xf32>
    %514 = arith.addf %512, %513 : vector<16x1xf32>
    %515 = math.rsqrt %514 : vector<16x1xf32>
    %516 = vector.broadcast %515 : vector<16x1xf32> to vector<16x16xf32>
    %517 = arith.mulf %507, %516 : vector<16x16xf32>
    %c944 = arith.constant 944 : index
    %c0_150 = arith.constant 0 : index
    %518 = vector.load %arg2[%c944, %c0_150] : memref<1336x16xf32, #tpu.memory_space<vmem>>, vector<1x16xf32>
    %519 = vector.broadcast %518 : vector<1x16xf32> to vector<16x16xf32>
    %520 = arith.mulf %517, %519 : vector<16x16xf32>
    %c952 = arith.constant 952 : index
    %c0_151 = arith.constant 0 : index
    %521 = vector.load %arg2[%c952, %c0_151] : memref<1336x16xf32, #tpu.memory_space<vmem>>, vector<1x16xf32>
    %522 = vector.broadcast %521 : vector<1x16xf32> to vector<16x16xf32>
    %523 = arith.addf %520, %522 : vector<16x16xf32>
    %c960 = arith.constant 960 : index
    %c0_152 = arith.constant 0 : index
    %524 = vector.load %arg2[%c960, %c0_152] : memref<1336x16xf32, #tpu.memory_space<vmem>>, vector<16x16xf32>
    %cst_153 = arith.constant dense<0.000000e+00> : vector<16x16xf32>
    %525 = tpu.matmul %523, %524, %cst_153 {dimension_numbers = #tpu.dot_dimension_numbers<[1], [0], [0], [1], [0, 0, 1, 1], [], []>} : vector<16x16xf32>, vector<16x16xf32>, vector<16x16xf32> -> vector<16x16xf32>
    %c976 = arith.constant 976 : index
    %c0_154 = arith.constant 0 : index
    %526 = vector.load %arg2[%c976, %c0_154] : memref<1336x16xf32, #tpu.memory_space<vmem>>, vector<1x16xf32>
    %527 = vector.broadcast %526 : vector<1x16xf32> to vector<16x16xf32>
    %528 = arith.addf %525, %527 : vector<16x16xf32>
    %c984 = arith.constant 984 : index
    %c0_155 = arith.constant 0 : index
    %529 = vector.load %arg2[%c984, %c0_155] : memref<1336x16xf32, #tpu.memory_space<vmem>>, vector<16x16xf32>
    %cst_156 = arith.constant dense<0.000000e+00> : vector<16x16xf32>
    %530 = tpu.matmul %523, %529, %cst_156 {dimension_numbers = #tpu.dot_dimension_numbers<[1], [0], [0], [1], [0, 0, 1, 1], [], []>} : vector<16x16xf32>, vector<16x16xf32>, vector<16x16xf32> -> vector<16x16xf32>
    %c1000 = arith.constant 1000 : index
    %c0_157 = arith.constant 0 : index
    %531 = vector.load %arg2[%c1000, %c0_157] : memref<1336x16xf32, #tpu.memory_space<vmem>>, vector<1x16xf32>
    %532 = vector.broadcast %531 : vector<1x16xf32> to vector<16x16xf32>
    %533 = arith.addf %530, %532 : vector<16x16xf32>
    %c1008 = arith.constant 1008 : index
    %c0_158 = arith.constant 0 : index
    %534 = vector.load %arg2[%c1008, %c0_158] : memref<1336x16xf32, #tpu.memory_space<vmem>>, vector<16x16xf32>
    %cst_159 = arith.constant dense<0.000000e+00> : vector<16x16xf32>
    %535 = tpu.matmul %523, %534, %cst_159 {dimension_numbers = #tpu.dot_dimension_numbers<[1], [0], [0], [1], [0, 0, 1, 1], [], []>} : vector<16x16xf32>, vector<16x16xf32>, vector<16x16xf32> -> vector<16x16xf32>
    %c1024 = arith.constant 1024 : index
    %c0_160 = arith.constant 0 : index
    %536 = vector.load %arg2[%c1024, %c0_160] : memref<1336x16xf32, #tpu.memory_space<vmem>>, vector<1x16xf32>
    %537 = vector.broadcast %536 : vector<1x16xf32> to vector<16x16xf32>
    %538 = arith.addf %535, %537 : vector<16x16xf32>
    %539 = vector.extract_strided_slice %528 {offsets = [0, 0], sizes = [16, 4], strides = [1, 1]} : vector<16x16xf32> to vector<16x4xf32>
    %540 = vector.shape_cast %539 : vector<16x4xf32> to vector<2x8x4xf32>
    %541 = vector.extract_strided_slice %528 {offsets = [0, 4], sizes = [16, 4], strides = [1, 1]} : vector<16x16xf32> to vector<16x4xf32>
    %542 = vector.shape_cast %541 : vector<16x4xf32> to vector<2x8x4xf32>
    %543 = vector.extract_strided_slice %528 {offsets = [0, 8], sizes = [16, 4], strides = [1, 1]} : vector<16x16xf32> to vector<16x4xf32>
    %544 = vector.shape_cast %543 : vector<16x4xf32> to vector<2x8x4xf32>
    %545 = vector.extract_strided_slice %528 {offsets = [0, 12], sizes = [16, 4], strides = [1, 1]} : vector<16x16xf32> to vector<16x4xf32>
    %546 = vector.shape_cast %545 : vector<16x4xf32> to vector<2x8x4xf32>
    %547 = tpu.concatenate %540, %542, %544, %546 in 0 : vector<2x8x4xf32>, vector<2x8x4xf32>, vector<2x8x4xf32>, vector<2x8x4xf32> -> vector<8x8x4xf32>
    %548 = vector.extract_strided_slice %533 {offsets = [0, 0], sizes = [16, 4], strides = [1, 1]} : vector<16x16xf32> to vector<16x4xf32>
    %549 = vector.shape_cast %548 : vector<16x4xf32> to vector<2x8x4xf32>
    %550 = vector.extract_strided_slice %533 {offsets = [0, 4], sizes = [16, 4], strides = [1, 1]} : vector<16x16xf32> to vector<16x4xf32>
    %551 = vector.shape_cast %550 : vector<16x4xf32> to vector<2x8x4xf32>
    %552 = vector.extract_strided_slice %533 {offsets = [0, 8], sizes = [16, 4], strides = [1, 1]} : vector<16x16xf32> to vector<16x4xf32>
    %553 = vector.shape_cast %552 : vector<16x4xf32> to vector<2x8x4xf32>
    %554 = vector.extract_strided_slice %533 {offsets = [0, 12], sizes = [16, 4], strides = [1, 1]} : vector<16x16xf32> to vector<16x4xf32>
    %555 = vector.shape_cast %554 : vector<16x4xf32> to vector<2x8x4xf32>
    %556 = tpu.concatenate %549, %551, %553, %555 in 0 : vector<2x8x4xf32>, vector<2x8x4xf32>, vector<2x8x4xf32>, vector<2x8x4xf32> -> vector<8x8x4xf32>
    %557 = vector.extract_strided_slice %538 {offsets = [0, 0], sizes = [16, 4], strides = [1, 1]} : vector<16x16xf32> to vector<16x4xf32>
    %558 = vector.shape_cast %557 : vector<16x4xf32> to vector<2x8x4xf32>
    %559 = vector.extract_strided_slice %538 {offsets = [0, 4], sizes = [16, 4], strides = [1, 1]} : vector<16x16xf32> to vector<16x4xf32>
    %560 = vector.shape_cast %559 : vector<16x4xf32> to vector<2x8x4xf32>
    %561 = vector.extract_strided_slice %538 {offsets = [0, 8], sizes = [16, 4], strides = [1, 1]} : vector<16x16xf32> to vector<16x4xf32>
    %562 = vector.shape_cast %561 : vector<16x4xf32> to vector<2x8x4xf32>
    %563 = vector.extract_strided_slice %538 {offsets = [0, 12], sizes = [16, 4], strides = [1, 1]} : vector<16x16xf32> to vector<16x4xf32>
    %564 = vector.shape_cast %563 : vector<16x4xf32> to vector<2x8x4xf32>
    %565 = tpu.concatenate %558, %560, %562, %564 in 0 : vector<2x8x4xf32>, vector<2x8x4xf32>, vector<2x8x4xf32>, vector<2x8x4xf32> -> vector<8x8x4xf32>
    "tpu.trace_start"() <{level = 10 : i32, message = "bqd,bkd->bqk"}> : () -> ()
    %cst_161 = arith.constant dense<0.000000e+00> : vector<8x8x8xf32>
    %566 = tpu.matmul %547, %556, %cst_161 {dimension_numbers = #tpu.dot_dimension_numbers<[2], [2], [1], [1], [0, 0, 0, 1, 1, 1], [0], [0]>} : vector<8x8x4xf32>, vector<8x8x4xf32>, vector<8x8x8xf32> -> vector<8x8x8xf32>
    "tpu.trace_stop"() : () -> ()
    %cst_162 = arith.constant 5.000000e-01 : f32
    %567 = vector.broadcast %cst_162 : f32 to vector<8x8x8xf32>
    %568 = arith.mulf %566, %567 : vector<8x8x8xf32>
    %569 = tpu.iota {dimensions = array<i32: 0>} : vector<8x8xi32>
    %570 = tpu.iota {dimensions = array<i32: 1>} : vector<8x8xi32>
    %571 = arith.cmpi sge, %569, %570 : vector<8x8xi32>
    %572 = vector.shape_cast %571 : vector<8x8xi1> to vector<1x8x8xi1>
    %cst_163 = arith.constant -1.000000e+09 : f32
    %573 = vector.shape_cast %572 : vector<1x8x8xi1> to vector<1x8x8xi1>
    %574 = vector.broadcast %573 : vector<1x8x8xi1> to vector<8x8x8xi1>
    %575 = vector.broadcast %cst_163 : f32 to vector<8x8x8xf32>
    %576 = arith.select %574, %568, %575 : vector<8x8x8xi1>, vector<8x8x8xf32>
    %cst_164 = arith.constant dense<0xFF800000> : vector<8x8xf32>
    %577 = vector.multi_reduction <maximumf>, %576, %cst_164 [2] : vector<8x8x8xf32> to vector<8x8xf32>
    %578 = vector.shape_cast %577 : vector<8x8xf32> to vector<8x8x1xf32>
    %579 = vector.broadcast %578 : vector<8x8x1xf32> to vector<8x8x8xf32>
    %580 = arith.subf %576, %579 : vector<8x8x8xf32>
    %581 = math.exp %580 : vector<8x8x8xf32>
    %cst_165 = arith.constant dense<0.000000e+00> : vector<8x8xf32>
    %582 = vector.multi_reduction <add>, %581, %cst_165 [2] : vector<8x8x8xf32> to vector<8x8xf32>
    %583 = vector.shape_cast %582 : vector<8x8xf32> to vector<8x8x1xf32>
    %584 = tpu.reciprocal %583 {approx = true} : vector<8x8x1xf32> -> vector<8x8x1xf32>
    %585 = vector.broadcast %584 : vector<8x8x1xf32> to vector<8x8x8xf32>
    %586 = arith.mulf %581, %585 : vector<8x8x8xf32>
    "tpu.trace_start"() <{level = 10 : i32, message = "bqk,bkd->bqd"}> : () -> ()
    %cst_166 = arith.constant dense<0.000000e+00> : vector<8x8x4xf32>
    %587 = tpu.matmul %586, %565, %cst_166 {dimension_numbers = #tpu.dot_dimension_numbers<[2], [1], [1], [2], [0, 0, 0, 1, 1, 2], [0], [0]>} : vector<8x8x8xf32>, vector<8x8x4xf32>, vector<8x8x4xf32> -> vector<8x8x4xf32>
    "tpu.trace_stop"() : () -> ()
    %588 = vector.extract_strided_slice %587 {offsets = [0, 0, 0], sizes = [2, 8, 4], strides = [1, 1, 1]} : vector<8x8x4xf32> to vector<2x8x4xf32>
    %589 = vector.shape_cast %588 : vector<2x8x4xf32> to vector<16x4xf32>
    %590 = vector.extract_strided_slice %587 {offsets = [2, 0, 0], sizes = [2, 8, 4], strides = [1, 1, 1]} : vector<8x8x4xf32> to vector<2x8x4xf32>
    %591 = vector.shape_cast %590 : vector<2x8x4xf32> to vector<16x4xf32>
    %592 = vector.extract_strided_slice %587 {offsets = [4, 0, 0], sizes = [2, 8, 4], strides = [1, 1, 1]} : vector<8x8x4xf32> to vector<2x8x4xf32>
    %593 = vector.shape_cast %592 : vector<2x8x4xf32> to vector<16x4xf32>
    %594 = vector.extract_strided_slice %587 {offsets = [6, 0, 0], sizes = [2, 8, 4], strides = [1, 1, 1]} : vector<8x8x4xf32> to vector<2x8x4xf32>
    %595 = vector.shape_cast %594 : vector<2x8x4xf32> to vector<16x4xf32>
    %596 = tpu.concatenate %589, %591, %593, %595 in 1 : vector<16x4xf32>, vector<16x4xf32>, vector<16x4xf32>, vector<16x4xf32> -> vector<16x16xf32>
    %c1032 = arith.constant 1032 : index
    %c0_167 = arith.constant 0 : index
    %597 = vector.load %arg2[%c1032, %c0_167] : memref<1336x16xf32, #tpu.memory_space<vmem>>, vector<16x16xf32>
    %cst_168 = arith.constant dense<0.000000e+00> : vector<16x16xf32>
    %598 = tpu.matmul %596, %597, %cst_168 {dimension_numbers = #tpu.dot_dimension_numbers<[1], [0], [0], [1], [0, 0, 1, 1], [], []>} : vector<16x16xf32>, vector<16x16xf32>, vector<16x16xf32> -> vector<16x16xf32>
    %c1048 = arith.constant 1048 : index
    %c0_169 = arith.constant 0 : index
    %599 = vector.load %arg2[%c1048, %c0_169] : memref<1336x16xf32, #tpu.memory_space<vmem>>, vector<1x16xf32>
    %600 = vector.broadcast %599 : vector<1x16xf32> to vector<16x16xf32>
    %601 = arith.addf %598, %600 : vector<16x16xf32>
    %602 = arith.addf %601, %523 : vector<16x16xf32>
    %cst_170 = arith.constant dense<0.000000e+00> : vector<16xf32>
    %603 = vector.multi_reduction <add>, %602, %cst_170 [1] : vector<16x16xf32> to vector<16xf32>
    %604 = vector.shape_cast %603 : vector<16xf32> to vector<16x1xf32>
    %cst_171 = arith.constant 1.600000e+01 : f32
    %605 = vector.broadcast %cst_171 : f32 to vector<16x1xf32>
    %606 = arith.divf %604, %605 : vector<16x1xf32>
    %607 = vector.broadcast %606 : vector<16x1xf32> to vector<16x16xf32>
    %608 = arith.subf %602, %607 : vector<16x16xf32>
    %609 = arith.mulf %608, %608 : vector<16x16xf32>
    %cst_172 = arith.constant dense<0.000000e+00> : vector<16xf32>
    %610 = vector.multi_reduction <add>, %609, %cst_172 [1] : vector<16x16xf32> to vector<16xf32>
    %611 = vector.shape_cast %610 : vector<16xf32> to vector<16x1xf32>
    %cst_173 = arith.constant 1.600000e+01 : f32
    %612 = vector.broadcast %cst_173 : f32 to vector<16x1xf32>
    %613 = arith.divf %611, %612 : vector<16x1xf32>
    %cst_174 = arith.constant 9.99999974E-6 : f32
    %614 = vector.broadcast %cst_174 : f32 to vector<16x1xf32>
    %615 = arith.addf %613, %614 : vector<16x1xf32>
    %616 = math.rsqrt %615 : vector<16x1xf32>
    %617 = vector.broadcast %616 : vector<16x1xf32> to vector<16x16xf32>
    %618 = arith.mulf %608, %617 : vector<16x16xf32>
    %c1288 = arith.constant 1288 : index
    %c0_175 = arith.constant 0 : index
    %619 = vector.load %arg2[%c1288, %c0_175] : memref<1336x16xf32, #tpu.memory_space<vmem>>, vector<1x16xf32>
    %620 = vector.broadcast %619 : vector<1x16xf32> to vector<16x16xf32>
    %621 = arith.mulf %618, %620 : vector<16x16xf32>
    %c1296 = arith.constant 1296 : index
    %c0_176 = arith.constant 0 : index
    %622 = vector.load %arg2[%c1296, %c0_176] : memref<1336x16xf32, #tpu.memory_space<vmem>>, vector<1x16xf32>
    %623 = vector.broadcast %622 : vector<1x16xf32> to vector<16x16xf32>
    %624 = arith.addf %621, %623 : vector<16x16xf32>
    %c1056 = arith.constant 1056 : index
    %c0_177 = arith.constant 0 : index
    %625 = vector.load %arg2[%c1056, %c0_177] : memref<1336x16xf32, #tpu.memory_space<vmem>>, vector<16x16xf32>
    %cst_178 = arith.constant dense<0.000000e+00> : vector<16x16xf32>
    %626 = tpu.matmul %624, %625, %cst_178 {dimension_numbers = #tpu.dot_dimension_numbers<[1], [0], [0], [1], [0, 0, 1, 1], [], []>} : vector<16x16xf32>, vector<16x16xf32>, vector<16x16xf32> -> vector<16x16xf32>
    %c1072 = arith.constant 1072 : index
    %c0_179 = arith.constant 0 : index
    %627 = vector.load %arg2[%c1072, %c0_179] : memref<1336x16xf32, #tpu.memory_space<vmem>>, vector<1x16xf32>
    %628 = vector.broadcast %627 : vector<1x16xf32> to vector<16x16xf32>
    %629 = arith.addf %626, %628 : vector<16x16xf32>
    %c1080 = arith.constant 1080 : index
    %c0_180 = arith.constant 0 : index
    %630 = vector.load %arg2[%c1080, %c0_180] : memref<1336x16xf32, #tpu.memory_space<vmem>>, vector<16x16xf32>
    %cst_181 = arith.constant dense<0.000000e+00> : vector<32x16xf32>
    %631 = tpu.matmul %275, %630, %cst_181 {dimension_numbers = #tpu.dot_dimension_numbers<[1], [0], [0], [1], [0, 0, 1, 1], [], []>} : vector<32x16xf32>, vector<16x16xf32>, vector<32x16xf32> -> vector<32x16xf32>
    %c1096 = arith.constant 1096 : index
    %c0_182 = arith.constant 0 : index
    %632 = vector.load %arg2[%c1096, %c0_182] : memref<1336x16xf32, #tpu.memory_space<vmem>>, vector<1x16xf32>
    %633 = vector.broadcast %632 : vector<1x16xf32> to vector<32x16xf32>
    %634 = arith.addf %631, %633 : vector<32x16xf32>
    %c1104 = arith.constant 1104 : index
    %c0_183 = arith.constant 0 : index
    %635 = vector.load %arg2[%c1104, %c0_183] : memref<1336x16xf32, #tpu.memory_space<vmem>>, vector<16x16xf32>
    %cst_184 = arith.constant dense<0.000000e+00> : vector<32x16xf32>
    %636 = tpu.matmul %275, %635, %cst_184 {dimension_numbers = #tpu.dot_dimension_numbers<[1], [0], [0], [1], [0, 0, 1, 1], [], []>} : vector<32x16xf32>, vector<16x16xf32>, vector<32x16xf32> -> vector<32x16xf32>
    %c1120 = arith.constant 1120 : index
    %c0_185 = arith.constant 0 : index
    %637 = vector.load %arg2[%c1120, %c0_185] : memref<1336x16xf32, #tpu.memory_space<vmem>>, vector<1x16xf32>
    %638 = vector.broadcast %637 : vector<1x16xf32> to vector<32x16xf32>
    %639 = arith.addf %636, %638 : vector<32x16xf32>
    %640 = vector.extract_strided_slice %629 {offsets = [0, 0], sizes = [16, 4], strides = [1, 1]} : vector<16x16xf32> to vector<16x4xf32>
    %641 = vector.shape_cast %640 : vector<16x4xf32> to vector<2x8x4xf32>
    %642 = vector.extract_strided_slice %629 {offsets = [0, 4], sizes = [16, 4], strides = [1, 1]} : vector<16x16xf32> to vector<16x4xf32>
    %643 = vector.shape_cast %642 : vector<16x4xf32> to vector<2x8x4xf32>
    %644 = vector.extract_strided_slice %629 {offsets = [0, 8], sizes = [16, 4], strides = [1, 1]} : vector<16x16xf32> to vector<16x4xf32>
    %645 = vector.shape_cast %644 : vector<16x4xf32> to vector<2x8x4xf32>
    %646 = vector.extract_strided_slice %629 {offsets = [0, 12], sizes = [16, 4], strides = [1, 1]} : vector<16x16xf32> to vector<16x4xf32>
    %647 = vector.shape_cast %646 : vector<16x4xf32> to vector<2x8x4xf32>
    %648 = tpu.concatenate %641, %643, %645, %647 in 0 : vector<2x8x4xf32>, vector<2x8x4xf32>, vector<2x8x4xf32>, vector<2x8x4xf32> -> vector<8x8x4xf32>
    %649 = vector.extract_strided_slice %634 {offsets = [0, 0], sizes = [32, 4], strides = [1, 1]} : vector<32x16xf32> to vector<32x4xf32>
    %650 = vector.shape_cast %649 : vector<32x4xf32> to vector<2x16x4xf32>
    %651 = vector.extract_strided_slice %634 {offsets = [0, 4], sizes = [32, 4], strides = [1, 1]} : vector<32x16xf32> to vector<32x4xf32>
    %652 = vector.shape_cast %651 : vector<32x4xf32> to vector<2x16x4xf32>
    %653 = vector.extract_strided_slice %634 {offsets = [0, 8], sizes = [32, 4], strides = [1, 1]} : vector<32x16xf32> to vector<32x4xf32>
    %654 = vector.shape_cast %653 : vector<32x4xf32> to vector<2x16x4xf32>
    %655 = vector.extract_strided_slice %634 {offsets = [0, 12], sizes = [32, 4], strides = [1, 1]} : vector<32x16xf32> to vector<32x4xf32>
    %656 = vector.shape_cast %655 : vector<32x4xf32> to vector<2x16x4xf32>
    %657 = tpu.concatenate %650, %652, %654, %656 in 0 : vector<2x16x4xf32>, vector<2x16x4xf32>, vector<2x16x4xf32>, vector<2x16x4xf32> -> vector<8x16x4xf32>
    %658 = vector.extract_strided_slice %639 {offsets = [0, 0], sizes = [32, 4], strides = [1, 1]} : vector<32x16xf32> to vector<32x4xf32>
    %659 = vector.shape_cast %658 : vector<32x4xf32> to vector<2x16x4xf32>
    %660 = vector.extract_strided_slice %639 {offsets = [0, 4], sizes = [32, 4], strides = [1, 1]} : vector<32x16xf32> to vector<32x4xf32>
    %661 = vector.shape_cast %660 : vector<32x4xf32> to vector<2x16x4xf32>
    %662 = vector.extract_strided_slice %639 {offsets = [0, 8], sizes = [32, 4], strides = [1, 1]} : vector<32x16xf32> to vector<32x4xf32>
    %663 = vector.shape_cast %662 : vector<32x4xf32> to vector<2x16x4xf32>
    %664 = vector.extract_strided_slice %639 {offsets = [0, 12], sizes = [32, 4], strides = [1, 1]} : vector<32x16xf32> to vector<32x4xf32>
    %665 = vector.shape_cast %664 : vector<32x4xf32> to vector<2x16x4xf32>
    %666 = tpu.concatenate %659, %661, %663, %665 in 0 : vector<2x16x4xf32>, vector<2x16x4xf32>, vector<2x16x4xf32>, vector<2x16x4xf32> -> vector<8x16x4xf32>
    "tpu.trace_start"() <{level = 10 : i32, message = "bqd,bkd->bqk"}> : () -> ()
    %cst_186 = arith.constant dense<0.000000e+00> : vector<8x8x16xf32>
    %667 = tpu.matmul %648, %657, %cst_186 {dimension_numbers = #tpu.dot_dimension_numbers<[2], [2], [1], [1], [0, 0, 0, 1, 1, 1], [0], [0]>} : vector<8x8x4xf32>, vector<8x16x4xf32>, vector<8x8x16xf32> -> vector<8x8x16xf32>
    "tpu.trace_stop"() : () -> ()
    %cst_187 = arith.constant 5.000000e-01 : f32
    %668 = vector.broadcast %cst_187 : f32 to vector<8x8x16xf32>
    %669 = arith.mulf %667, %668 : vector<8x8x16xf32>
    %cst_188 = arith.constant dense<0xFF800000> : vector<8x8xf32>
    %670 = vector.multi_reduction <maximumf>, %669, %cst_188 [2] : vector<8x8x16xf32> to vector<8x8xf32>
    %671 = vector.shape_cast %670 : vector<8x8xf32> to vector<8x8x1xf32>
    %672 = vector.broadcast %671 : vector<8x8x1xf32> to vector<8x8x16xf32>
    %673 = arith.subf %669, %672 : vector<8x8x16xf32>
    %674 = math.exp %673 : vector<8x8x16xf32>
    %cst_189 = arith.constant dense<0.000000e+00> : vector<8x8xf32>
    %675 = vector.multi_reduction <add>, %674, %cst_189 [2] : vector<8x8x16xf32> to vector<8x8xf32>
    %676 = vector.shape_cast %675 : vector<8x8xf32> to vector<8x8x1xf32>
    %677 = tpu.reciprocal %676 {approx = true} : vector<8x8x1xf32> -> vector<8x8x1xf32>
    %678 = vector.broadcast %677 : vector<8x8x1xf32> to vector<8x8x16xf32>
    %679 = arith.mulf %674, %678 : vector<8x8x16xf32>
    "tpu.trace_start"() <{level = 10 : i32, message = "bqk,bkd->bqd"}> : () -> ()
    %cst_190 = arith.constant dense<0.000000e+00> : vector<8x8x4xf32>
    %680 = tpu.matmul %679, %666, %cst_190 {dimension_numbers = #tpu.dot_dimension_numbers<[2], [1], [1], [2], [0, 0, 0, 1, 1, 2], [0], [0]>} : vector<8x8x16xf32>, vector<8x16x4xf32>, vector<8x8x4xf32> -> vector<8x8x4xf32>
    "tpu.trace_stop"() : () -> ()
    %681 = vector.extract_strided_slice %680 {offsets = [0, 0, 0], sizes = [2, 8, 4], strides = [1, 1, 1]} : vector<8x8x4xf32> to vector<2x8x4xf32>
    %682 = vector.shape_cast %681 : vector<2x8x4xf32> to vector<16x4xf32>
    %683 = vector.extract_strided_slice %680 {offsets = [2, 0, 0], sizes = [2, 8, 4], strides = [1, 1, 1]} : vector<8x8x4xf32> to vector<2x8x4xf32>
    %684 = vector.shape_cast %683 : vector<2x8x4xf32> to vector<16x4xf32>
    %685 = vector.extract_strided_slice %680 {offsets = [4, 0, 0], sizes = [2, 8, 4], strides = [1, 1, 1]} : vector<8x8x4xf32> to vector<2x8x4xf32>
    %686 = vector.shape_cast %685 : vector<2x8x4xf32> to vector<16x4xf32>
    %687 = vector.extract_strided_slice %680 {offsets = [6, 0, 0], sizes = [2, 8, 4], strides = [1, 1, 1]} : vector<8x8x4xf32> to vector<2x8x4xf32>
    %688 = vector.shape_cast %687 : vector<2x8x4xf32> to vector<16x4xf32>
    %689 = tpu.concatenate %682, %684, %686, %688 in 1 : vector<16x4xf32>, vector<16x4xf32>, vector<16x4xf32>, vector<16x4xf32> -> vector<16x16xf32>
    %c1128 = arith.constant 1128 : index
    %c0_191 = arith.constant 0 : index
    %690 = vector.load %arg2[%c1128, %c0_191] : memref<1336x16xf32, #tpu.memory_space<vmem>>, vector<16x16xf32>
    %cst_192 = arith.constant dense<0.000000e+00> : vector<16x16xf32>
    %691 = tpu.matmul %689, %690, %cst_192 {dimension_numbers = #tpu.dot_dimension_numbers<[1], [0], [0], [1], [0, 0, 1, 1], [], []>} : vector<16x16xf32>, vector<16x16xf32>, vector<16x16xf32> -> vector<16x16xf32>
    %c1144 = arith.constant 1144 : index
    %c0_193 = arith.constant 0 : index
    %692 = vector.load %arg2[%c1144, %c0_193] : memref<1336x16xf32, #tpu.memory_space<vmem>>, vector<1x16xf32>
    %693 = vector.broadcast %692 : vector<1x16xf32> to vector<16x16xf32>
    %694 = arith.addf %691, %693 : vector<16x16xf32>
    %695 = arith.addf %694, %624 : vector<16x16xf32>
    %cst_194 = arith.constant dense<0.000000e+00> : vector<16xf32>
    %696 = vector.multi_reduction <add>, %695, %cst_194 [1] : vector<16x16xf32> to vector<16xf32>
    %697 = vector.shape_cast %696 : vector<16xf32> to vector<16x1xf32>
    %cst_195 = arith.constant 1.600000e+01 : f32
    %698 = vector.broadcast %cst_195 : f32 to vector<16x1xf32>
    %699 = arith.divf %697, %698 : vector<16x1xf32>
    %700 = vector.broadcast %699 : vector<16x1xf32> to vector<16x16xf32>
    %701 = arith.subf %695, %700 : vector<16x16xf32>
    %702 = arith.mulf %701, %701 : vector<16x16xf32>
    %cst_196 = arith.constant dense<0.000000e+00> : vector<16xf32>
    %703 = vector.multi_reduction <add>, %702, %cst_196 [1] : vector<16x16xf32> to vector<16xf32>
    %704 = vector.shape_cast %703 : vector<16xf32> to vector<16x1xf32>
    %cst_197 = arith.constant 1.600000e+01 : f32
    %705 = vector.broadcast %cst_197 : f32 to vector<16x1xf32>
    %706 = arith.divf %704, %705 : vector<16x1xf32>
    %cst_198 = arith.constant 9.99999974E-6 : f32
    %707 = vector.broadcast %cst_198 : f32 to vector<16x1xf32>
    %708 = arith.addf %706, %707 : vector<16x1xf32>
    %709 = math.rsqrt %708 : vector<16x1xf32>
    %710 = vector.broadcast %709 : vector<16x1xf32> to vector<16x16xf32>
    %711 = arith.mulf %701, %710 : vector<16x16xf32>
    %c1304 = arith.constant 1304 : index
    %c0_199 = arith.constant 0 : index
    %712 = vector.load %arg2[%c1304, %c0_199] : memref<1336x16xf32, #tpu.memory_space<vmem>>, vector<1x16xf32>
    %713 = vector.broadcast %712 : vector<1x16xf32> to vector<16x16xf32>
    %714 = arith.mulf %711, %713 : vector<16x16xf32>
    %c1312 = arith.constant 1312 : index
    %c0_200 = arith.constant 0 : index
    %715 = vector.load %arg2[%c1312, %c0_200] : memref<1336x16xf32, #tpu.memory_space<vmem>>, vector<1x16xf32>
    %716 = vector.broadcast %715 : vector<1x16xf32> to vector<16x16xf32>
    %717 = arith.addf %714, %716 : vector<16x16xf32>
    %c72_201 = arith.constant 72 : index
    %c0_202 = arith.constant 0 : index
    %718 = vector.load %arg3[%c72_201, %c0_202] : memref<120x128xf32, #tpu.memory_space<vmem>>, vector<16x128xf32>
    %cst_203 = arith.constant dense<0.000000e+00> : vector<16x128xf32>
    %719 = tpu.matmul %717, %718, %cst_203 {dimension_numbers = #tpu.dot_dimension_numbers<[1], [0], [0], [1], [0, 0, 1, 1], [], []>} : vector<16x16xf32>, vector<16x128xf32>, vector<16x128xf32> -> vector<16x128xf32>
    %c88 = arith.constant 88 : index
    %c0_204 = arith.constant 0 : index
    %720 = vector.load %arg3[%c88, %c0_204] : memref<120x128xf32, #tpu.memory_space<vmem>>, vector<1x128xf32>
    %721 = vector.broadcast %720 : vector<1x128xf32> to vector<16x128xf32>
    %722 = arith.addf %719, %721 : vector<16x128xf32>
    %cst_205 = arith.constant 0.000000e+00 : f32
    %723 = vector.broadcast %cst_205 : f32 to vector<16x128xf32>
    %724 = arith.maximumf %722, %723 : vector<16x128xf32>
    %c1152 = arith.constant 1152 : index
    %c0_206 = arith.constant 0 : index
    %725 = vector.load %arg2[%c1152, %c0_206] : memref<1336x16xf32, #tpu.memory_space<vmem>>, vector<128x16xf32>
    %cst_207 = arith.constant dense<0.000000e+00> : vector<16x16xf32>
    %726 = tpu.matmul %724, %725, %cst_207 {dimension_numbers = #tpu.dot_dimension_numbers<[1], [0], [0], [1], [0, 0, 1, 1], [], []>} : vector<16x128xf32>, vector<128x16xf32>, vector<16x16xf32> -> vector<16x16xf32>
    %c1280 = arith.constant 1280 : index
    %c0_208 = arith.constant 0 : index
    %727 = vector.load %arg2[%c1280, %c0_208] : memref<1336x16xf32, #tpu.memory_space<vmem>>, vector<1x16xf32>
    %728 = vector.broadcast %727 : vector<1x16xf32> to vector<16x16xf32>
    %729 = arith.addf %726, %728 : vector<16x16xf32>
    %730 = arith.addf %729, %717 : vector<16x16xf32>
    %cst_209 = arith.constant dense<0.000000e+00> : vector<16xf32>
    %731 = vector.multi_reduction <add>, %730, %cst_209 [1] : vector<16x16xf32> to vector<16xf32>
    %732 = vector.shape_cast %731 : vector<16xf32> to vector<16x1xf32>
    %cst_210 = arith.constant 1.600000e+01 : f32
    %733 = vector.broadcast %cst_210 : f32 to vector<16x1xf32>
    %734 = arith.divf %732, %733 : vector<16x1xf32>
    %735 = vector.broadcast %734 : vector<16x1xf32> to vector<16x16xf32>
    %736 = arith.subf %730, %735 : vector<16x16xf32>
    %737 = arith.mulf %736, %736 : vector<16x16xf32>
    %cst_211 = arith.constant dense<0.000000e+00> : vector<16xf32>
    %738 = vector.multi_reduction <add>, %737, %cst_211 [1] : vector<16x16xf32> to vector<16xf32>
    %739 = vector.shape_cast %738 : vector<16xf32> to vector<16x1xf32>
    %cst_212 = arith.constant 1.600000e+01 : f32
    %740 = vector.broadcast %cst_212 : f32 to vector<16x1xf32>
    %741 = arith.divf %739, %740 : vector<16x1xf32>
    %cst_213 = arith.constant 9.99999974E-6 : f32
    %742 = vector.broadcast %cst_213 : f32 to vector<16x1xf32>
    %743 = arith.addf %741, %742 : vector<16x1xf32>
    %744 = math.rsqrt %743 : vector<16x1xf32>
    %745 = vector.broadcast %744 : vector<16x1xf32> to vector<16x16xf32>
    %746 = arith.mulf %736, %745 : vector<16x16xf32>
    %c1320 = arith.constant 1320 : index
    %c0_214 = arith.constant 0 : index
    %747 = vector.load %arg2[%c1320, %c0_214] : memref<1336x16xf32, #tpu.memory_space<vmem>>, vector<1x16xf32>
    %748 = vector.broadcast %747 : vector<1x16xf32> to vector<16x16xf32>
    %749 = arith.mulf %746, %748 : vector<16x16xf32>
    %c1328 = arith.constant 1328 : index
    %c0_215 = arith.constant 0 : index
    %750 = vector.load %arg2[%c1328, %c0_215] : memref<1336x16xf32, #tpu.memory_space<vmem>>, vector<1x16xf32>
    %751 = vector.broadcast %750 : vector<1x16xf32> to vector<16x16xf32>
    %752 = arith.addf %749, %751 : vector<16x16xf32>
    %753 = arith.addf %752, %291 : vector<16x16xf32>
    %c96_216 = arith.constant 96 : index
    %c0_217 = arith.constant 0 : index
    %754 = vector.load %arg3[%c96_216, %c0_217] : memref<120x128xf32, #tpu.memory_space<vmem>>, vector<16x128xf32>
    %cst_218 = arith.constant dense<0.000000e+00> : vector<16x128xf32>
    %755 = tpu.matmul %753, %754, %cst_218 {dimension_numbers = #tpu.dot_dimension_numbers<[1], [0], [0], [1], [0, 0, 1, 1], [], []>} : vector<16x16xf32>, vector<16x128xf32>, vector<16x128xf32> -> vector<16x128xf32>
    %c112 = arith.constant 112 : index
    %c0_219 = arith.constant 0 : index
    %756 = vector.load %arg3[%c112, %c0_219] : memref<120x128xf32, #tpu.memory_space<vmem>>, vector<1x128xf32>
    %757 = vector.broadcast %756 : vector<1x128xf32> to vector<16x128xf32>
    %758 = arith.addf %755, %757 : vector<16x128xf32>
    %c0_220 = arith.constant 0 : index
    %c0_221 = arith.constant 0 : index
    %759 = vector.load %arg4[%c0_220, %c0_221] : memref<16x128xf32, #tpu.memory_space<vmem>>, vector<16x128xf32>
    tpu.vector_store %arg4[%c0_220, %c0_221], %758 {strides = array<i32>} : memref<16x128xf32, #tpu.memory_space<vmem>>, vector<16x128xf32>,
    return
  }
}

</mosaic_0001>

<bundles_post_ra>
// kernel: forward.1
= control target key start
LH: loop header
LB: loop body
LE: loop exit
PB: predicated region body
PF: predicated region fallthrough
CT: control target
= control target key end

     0   :  { %v43_v2 = vlaneseq  ;;  %v15614_v3 = vmov 0   ;;  %s17880_s0 = inlined_call_operand.vmem [shape: f32[32,2], index: 0, kind: input, shape index: {}]   ;;  %s17881_s1 = inlined_call_operand.vmem [shape: f32[16,2], index: 1, kind: input, shape index: {}]   ;;  %s17882_s2 = inlined_call_operand.vmem [shape: f32[1336,16], index: 2, kind: input, shape index: {}]   ;;  %s17883_s3 = inlined_call_operand.vmem [shape: f32[120,128], index: 3, kind: input, shape index: {}]   ;;  %s17884_s4 = inlined_call_operand.hbm [shape: f32[16,128], index: 4, kind: output, shape index: {}]  }
   0x1   :  { %v19_v0 = vld [vmem:[%s17880_s0 + $0x8] sm:$0xff]  ;;  %v18_v1 = vld [vmem:[%s17880_s0] sm:$0xff]  ;;  %15030 = vset.pattern.permute.xlu1 %v15614_v3  ;;  %15028 = vset.pattern.permute.xlu0 %v15614_v3 }
   0x2   :  { %9 = vsyncpa [#allocation3], 0  ;;  %30 = vperm.xlu1 %15030, %v19_v0   ;;  %25 = vperm.xlu0 %15028, %v18_v1   ;;  %v15660_v4 = vshrl.u32 %v43_v2, 7  ;;  %v5879_v5 = vand.u32 127, %v43_v2  ;;  %v15615_v7 = vmov 1   ;;  %v20_v8 = vld [vmem:[%s17880_s0 + $0x10] sm:$0xff] }
   0x3   :  { %v94_v9 = vld [vmem:[%s17882_s2 + $0x38] sm:$0xff]  ;;  %v95_v10 = vld [vmem:[%s17882_s2 + $0x40] sm:$0xff]  ;;  %v199_v13 = vld [vmem:[%s17882_s2 + $0x50] sm:$0xff]  ;;  %vm101_vm1 = vcmask 130048   ;;  %vm479_vm2 = vcmask 31744   ;;  %s15616_s18 = smov 124  }
   0x4   :  { %vm15663_vm0 = vcmp.ge.s32.totalorder %v15660_v4, %v5879_v5  ;;  %v14499_v11 = vpack.c.bf16 %v95_v10, %v94_v9  ;;  %v21_v12 = vld [vmem:[%s17880_s0 + $0x18] sm:$0xff]  ;;  %v45_v16 = vsub.s32 0, %v15660_v4  ;;  %v69_v17 = vsub.s32 1, %v15660_v4  ;;  %v22_v18 = vld [vmem:[%s17882_s2] sm:$0x3]  ;;  %v89_v34 = vld [vmem:[%s17882_s2 + $0x28] sm:$0xff] }
   0x5   :  { %v200_v14 = vld [vmem:[%s17882_s2 + $0x58] sm:$0xff]  ;;  %v12643_v29 = vld [vmem:[%s17882_s2 + $0x8] ss:$0 sm:$0xff]  ;;  %v88_v33 = vld [vmem:[%s17882_s2 + $0x20] sm:$0xff]  ;;  %s15617_s23 = smov 120   ;;  %s15618_s24 = smov 116  }
   0x6   :  { %15031 = vset.pattern.permute.xlu1 %v15615_v7  ;;  %15029 = vset.pattern.permute.xlu0 %v15615_v7  ;;  %v14503_v15 = vpack.c.bf16 %v200_v14, %v199_v13  ;;  %v46_v21 = vrot.slane %v22_v18, %v45_v16  ;;  %v70_v22 = vrot.slane %v22_v18, %v69_v17  ;;  %v291_v39 = vld [vmem:[%s17882_s2 + $0x68] sm:$0xff]  ;;  %v292_v40 = vld [vmem:[%s17882_s2 + $0x70] sm:$0xff]  ;;  %v12649_v62 = vld [vmem:[%s17882_s2 + $0x60] ss:$0 sm:$0xff]  ;;  %s15619_s25 = smov 4   ;;  %s15620_s30 = smov 8  }
   0x7   :  { %56 = vperm.xlu1 %15031, %v19_v0   ;;  %52 = vperm.xlu0 %15029, %v18_v1   ;;  %v14507_v46 = vpack.c.bf16 %v292_v40, %v291_v39  ;;  %v12644_v55 = vld [vmem:[%s17882_s2 + $0x48] ss:$0 sm:$0xff]  ;;  %vm15769_vm3 = vmpackc.low %vm479_vm2, %vm479_vm2  ;;  %v12654_v14 = vld [vmem:[%s17882_s2 + $0x78] ss:$0 sm:$0xff]  ;;  %s15621_s0 = smov 12   ;;  %vm2036_vm4 = vcmask 64512  }
   0x8   :  { %14500 = vmatprep.subr.bf16.mxu1 %v14499_v11  ;;  %vm2041_vm5 = vcmask 97280   ;;  %v12791_v4 = vld [vmem:[%s17882_s2 + $0x230] ss:$0 sm:$0xff]  ;;  %vm15623_vm6 = vmmov 0   ;;  %s15625_s27 = smov [#allocation2]  }
   0x9   :  { %14502 = vmatpush3.bf16.msra.mxu1 %v14499_v11 }
   0xa   :  { %14504 = vmatprep.subr.bf16.mxu1 %v14503_v15 }
   0xb   :  { %15032 = vset.pattern.permute.xlu1 %v15614_v3  ;;  %60 = vperm.xlu0 %15029, %v20_v8  }
   0xc   :  { %35 = vperm.xlu1 %15032, %v20_v8  }
   0xf   :  { %64 = vperm.xlu0 %15029, %v21_v12  }
  0x10   :  { %40 = vperm.xlu1 %15032, %v21_v12  }
  0x13   :  { %15153 = vset.pattern.permute.xlu0 %v15614_v3 }
  0x14   :  { %15154 = vset.pattern.permute.xlu1 %v15615_v7 }
  0x81   :  { %v31_v19 = vpop.permute.xlu1 %30  ;;  %v26_v20 = vpop.permute.xlu0 %25 }
  0x82   :  { %v48_v25 = vmul.f32 %v46_v21, %v31_v19  ;;  %v47_v26 = vmul.f32 %v46_v21, %v26_v20 }
  0x86   :  { %v57_v23 = vpop.permute.xlu1 %56  ;;  %v53_v24 = vpop.permute.xlu0 %52 }
  0x87   :  { %v72_v27 = vmul.f32 %v70_v22, %v57_v23  ;;  %v71_v28 = vmul.f32 %v70_v22, %v53_v24 }
  0x89   :  { %v76_v30 = vadd.f32 %v72_v27, %v48_v25  ;;  %v75_v31 = vadd.f32 %v71_v28, %v47_v26 }
  0x8a   :  { %v61_v32 = vpop.permute.xlu0 %60 }
  0x8b   :  { %v15708_v35 = vadd.f32 %v12643_v29, %v76_v30  ;;  %v15710_v36 = vadd.f32 %v12643_v29, %v75_v31  ;;  %v73_v37 = vmul.f32 %v70_v22, %v61_v32  ;;  %v36_v38 = vpop.permute.xlu1 %35 }
  0x8c   :  { %v49_v41 = vmul.f32 %v46_v21, %v36_v38 }
  0x8d   :  { %v15719_v42 = vadd.f32 %v88_v33, %v15710_v36  ;;  %v15722_v43 = vadd.f32 %v89_v34, %v15708_v35 }
  0x8e   :  { %v77_v44 = vadd.f32 %v73_v37, %v49_v41  ;;  %v65_v45 = vpop.permute.xlu0 %64 }
  0x8f   :  { %v74_v47 = vmul.f32 %v70_v22, %v65_v45  ;;  %v41_v48 = vpop.permute.xlu1 %40  ;;  %13504 = vmatprep.mubr.msk.f32.mxu1 %vm101_vm1, %v15719_v42 }
  0x90   :  { %v15726_v49 = vadd.f32 %v12643_v29, %v77_v44  ;;  %v50_v50 = vmul.f32 %v46_v21, %v41_v48  ;;  %13505 = vmatmul.mubr.msk.f32.vlgmr.msra.gmra.mrb[0].mxu1 %vm101_vm1, %v15722_v43 }
  0x91   :  { %14506 = vmatpush3.bf16.msra.mxu1 %v14503_v15 }
  0x92   :  { %v78_v51 = vadd.f32 %v74_v47, %v50_v50  ;;  %v15731_v52 = vadd.f32 %v88_v33, %v15726_v49  ;;  %14508 = vmatprep.subr.bf16.mxu1 %v14507_v46 }
  0x94   :  { %v15733_v53 = vadd.f32 %v12643_v29, %v78_v51  ;;  %13507 = vmatprep.mubr.msk.f32.mxu1 %vm101_vm1, %v15731_v52 }
  0x96   :  { %v15738_v54 = vadd.f32 %v89_v34, %v15733_v53 }
  0x98   :  { %13508 = vmatmul.mubr.msk.f32.gmra.mrb[2].mxu1 %vm101_vm1, %v15738_v54 }
  0x99   :  { %13514 = vmatprep.mubr.msk.f32.mxu1 %vm101_vm1, %v15719_v42 }
  0x9c   :  { %13515 = vmatmul.mubr.msk.f32.vlgmr.msra.gmra.mrb[4].mxu1 %vm101_vm1, %v15722_v43 }
  0x9d   :  { %13517 = vmatprep.mubr.msk.f32.mxu1 %vm101_vm1, %v15731_v52  ;;  %14510 = vmatpush3.bf16.msra.mxu1 %v14507_v46 }
  0xa0   :  { %13518 = vmatmul.mubr.msk.f32.gmra.mrb[6].mxu1 %vm101_vm1, %v15738_v54 }
  0xa1   :  { %13524 = vmatprep.mubr.msk.f32.mxu1 %vm101_vm1, %v15719_v42 }
  0xa4   :  { %13525 = vmatmul.mubr.msk.f32.vlgmr.msra.gmra.mrb[8].mxu1 %vm101_vm1, %v15722_v43 }
  0xa5   :  { %13527 = vmatprep.mubr.msk.f32.mxu1 %vm101_vm1, %v15731_v52 }
  0xa8   :  { %13528 = vmatmul.mubr.msk.f32.gmra.mrb[10].mxu1 %vm101_vm1, %v15738_v54 }
 0x163   :  { %v13506_v56 = vpop.f32.mrb[0].mxu1 }
 0x164   :  { %v180_v57 = vpop.f32.mrb[1].mxu1  ;;  %v186_v20 = vadd.f32 %v13506_v56, %v12644_v55 }
 0x165   :  { %v181_v58 = vadd.f32 %v12644_v55, %v180_v57 }
 0x167   :  { %387 = vrot.lane.b32.xlu0 %v181_v58, %s15616_s18  ;;  %13534 = vmatprep.mubr.msk.f32.mxu1 %vm479_vm2, %v181_v58 }
 0x16b   :  { %v13509_v59 = vpop.f32.mrb[2].mxu1 }
 0x16c   :  { %v190_v60 = vpop.f32.mrb[3].mxu1  ;;  %v196_v24 = vadd.f32 %v13509_v59, %v12644_v55 }
 0x16d   :  { %v191_v61 = vadd.f32 %v12644_v55, %v190_v60 }
 0x16f   :  { %v13516_v63 = vpop.f32.mrb[4].mxu1  ;;  %13541 = vmatprep.mubr.msk.f32.mxu0 %vm479_vm2, %v191_v61 }
 0x170   :  { %v278_v0 = vadd.f32 %v13516_v63, %v12649_v62  ;;  %v272_v1 = vpop.f32.mrb[5].mxu1 }
 0x171   :  { %v273_v2 = vadd.f32 %v12649_v62, %v272_v1 }
 0x173   :  { %v13519_v8 = vpop.f32.mrb[6].mxu1  ;;  %v15033_v9 = vpack.i.bf16 %v278_v0, %v273_v2  ;;  %v14511_v10 = vpack.c.bf16 %v278_v0, %v273_v2 }
 0x174   :  { %v288_v11 = vadd.f32 %v13519_v8, %v12649_v62  ;;  %v282_v12 = vpop.f32.mrb[7].mxu1 }
 0x175   :  { %v283_v13 = vadd.f32 %v12649_v62, %v282_v12  ;;  %15034 = vrot.lane.b32.xlu1 %v15033_v9, %s15616_s18  ;;  %14513 = vmatprep.subr.msk.bf16.mxu1 %vm15769_vm3, %v14511_v10 }
 0x176   :  { %14516 = vmatpush3.bf16.xpose.msk.msra.mxu1 %vm15769_vm3, %v14511_v10 }
 0x177   :  { %v13526_v15 = vpop.f32.mrb[8].mxu1  ;;  %v15043_v18 = vpack.i.bf16 %v288_v11, %v283_v13  ;;  %v14517_v19 = vpack.c.bf16 %v288_v11, %v283_v13 }
 0x178   :  { %v370_v21 = vadd.f32 %v13526_v15, %v12654_v14  ;;  %v364_v22 = vpop.f32.mrb[9].mxu1 }
 0x179   :  { %v365_v23 = vadd.f32 %v12654_v14, %v364_v22  ;;  %15044 = vrot.lane.b32.xlu0 %v15043_v18, %s15616_s18  ;;  %14519 = vmatprep.subr.msk.bf16.mxu0 %vm15769_vm3, %v14517_v19 }
 0x17a   :  { %389 = vrot.lane.b32.xlu1 %v186_v20, %s15616_s18  ;;  %14522 = vmatpush3.bf16.xpose.msk.msra.mxu0 %vm15769_vm3, %v14517_v19 }
 0x17b   :  { %v13529_v25 = vpop.f32.mrb[10].mxu1  ;;  %v15787_v26 = vpack.i.bf16 %v370_v21, %v365_v23  ;;  %v15789_v27 = vpack.c.bf16 %v370_v21, %v365_v23 }
 0x17c   :  { %v380_v28 = vadd.f32 %v13529_v25, %v12654_v14  ;;  %v374_v29 = vpop.f32.mrb[11].mxu1 }
 0x17d   :  { %v375_v30 = vadd.f32 %v12654_v14, %v374_v29  ;;  %393 = vrot.lane.b32.xlu0 %v196_v24, %s15616_s18  ;;  %13535 = vmatmul.mubr.msk.f32.vlgmr.msra.gmra.mrb[12].mxu1 %vm479_vm2, %v186_v20 }
 0x17e   :  { %15039 = vrot.lane.b32.xlu1 %v15033_v9, %s15617_s23 }
 0x17f   :  { %v15794_v31 = vpack.i.bf16 %v380_v28, %v375_v30  ;;  %v15796_v32 = vpack.c.bf16 %v380_v28, %v375_v30 }
 0x181   :  { %15054 = vrot.lane.b32.xlu0 %v15043_v18, %s15617_s23  ;;  %13542 = vmatmul.mubr.msk.f32.vlgmr.msra.gmra.mrb[0].mxu0 %vm479_vm2, %v196_v24 }
 0x182   :  { %391 = vrot.lane.b32.xlu1 %v191_v61, %s15616_s18 }
 0x185   :  { %395 = vrot.lane.b32.xlu0 %v181_v58, %s15617_s23 }
 0x186   :  { %15049 = vrot.lane.b32.xlu1 %v15033_v9, %s15618_s24 }
 0x189   :  { %15059 = vrot.lane.b32.xlu0 %v15043_v18, %s15618_s24 }
 0x18a   :  { %397 = vrot.lane.b32.xlu1 %v186_v20, %s15617_s23 }
 0x18d   :  { %401 = vrot.lane.b32.xlu0 %v196_v24, %s15617_s23 }
 0x18e   :  { %399 = vrot.lane.b32.xlu1 %v191_v61, %s15617_s23 }
 0x191   :  { %405 = vrot.lane.b32.xlu0 %v186_v20, %s15618_s24 }
 0x192   :  { %403 = vrot.lane.b32.xlu1 %v181_v58, %s15618_s24 }
 0x195   :  { %409 = vrot.lane.b32.xlu0 %v196_v24, %s15618_s24 }
 0x196   :  { %407 = vrot.lane.b32.xlu1 %v191_v61, %s15618_s24 }
 0x199   :  { %15064 = vrot.lane.b32.xlu0 %v15787_v26, %s15616_s18 }
 0x19a   :  { %15069 = vrot.lane.b32.xlu1 %v15794_v31, %s15616_s18 }
 0x1d9   :  { %v388_v33 = vpop.permute.xlu0 %387 }
 0x1da   :  { %13548 = vmatprep.mubr.msk.f32.mxu1 %vm479_vm2, %v388_v33 }
 0x1e7   :  { %v15035_v34 = vpop.permute.xlu1 %15034 }
 0x1e8   :  { %v15037_v37 = vunpack.i.h.bf16 %v15035_v34  ;;  %v15036_v38 = vunpack.i.l.bf16 %v15035_v34 }
 0x1ea   :  { %v14523_v39 = vpack.c.bf16 %v15037_v37, %v15036_v38 }
 0x1eb   :  { %v15045_v40 = vpop.permute.xlu0 %15044 }
 0x1ec   :  { %v390_v41 = vpop.permute.xlu1 %389  ;;  %v15047_v44 = vunpack.i.h.bf16 %v15045_v40  ;;  %v15046_v45 = vunpack.i.l.bf16 %v15045_v40  ;;  %14525 = vmatprep.subr.msk.bf16.mxu1 %vm15769_vm3, %v14523_v39 }
 0x1ed   :  { %14528 = vmatpush3.bf16.xpose.msk.msra.mxu1 %vm15769_vm3, %v14523_v39 }
 0x1ee   :  { %v14529_v46 = vpack.c.bf16 %v15047_v44, %v15046_v45 }
 0x1ef   :  { %v394_v47 = vpop.permute.xlu0 %393 }
 0x1f0   :  { %v15040_v48 = vpop.permute.xlu1 %15039  ;;  %14531 = vmatprep.subr.msk.bf16.mxu0 %vm15769_vm3, %v14529_v46 }
 0x1f1   :  { %v15042_v50 = vunpack.i.h.bf16 %v15040_v48  ;;  %v15041_v51 = vunpack.i.l.bf16 %v15040_v48  ;;  %14534 = vmatpush3.bf16.xpose.msk.msra.mxu0 %vm15769_vm3, %v14529_v46 }
 0x1f3   :  { %v14535_v55 = vpack.c.bf16 %v15042_v50, %v15041_v51  ;;  %v15055_v56 = vpop.permute.xlu0 %15054 }
 0x1f4   :  { %v392_v57 = vpop.permute.xlu1 %391  ;;  %v15057_v58 = vunpack.i.h.bf16 %v15055_v56  ;;  %v15056_v59 = vunpack.i.l.bf16 %v15055_v56  ;;  %13549 = vmatmul.mubr.msk.f32.vlgmr.msra.gmra.mrb[14].mxu1 %vm479_vm2, %v390_v41 }
 0x1f5   :  { %13555 = vmatprep.mubr.msk.f32.mxu0 %vm479_vm2, %v392_v57  ;;  %14537 = vmatprep.subr.msk.bf16.mxu1 %vm15769_vm3, %v14535_v55 }
 0x1f6   :  { %v14541_v60 = vpack.c.bf16 %v15057_v58, %v15056_v59  ;;  %14540 = vmatpush3.bf16.xpose.msk.msra.mxu1 %vm15769_vm3, %v14535_v55 }
 0x1f7   :  { %v396_v61 = vpop.permute.xlu0 %395 }
 0x1f8   :  { %v15050_v62 = vpop.permute.xlu1 %15049  ;;  %13556 = vmatmul.mubr.msk.f32.vlgmr.msra.gmra.mrb[2].mxu0 %vm479_vm2, %v394_v47  ;;  %13562 = vmatprep.mubr.msk.f32.mxu1 %vm479_vm2, %v396_v61 }
 0x1f9   :  { %v15052_v63 = vunpack.i.h.bf16 %v15050_v62  ;;  %v15051_v0 = vunpack.i.l.bf16 %v15050_v62  ;;  %14543 = vmatprep.subr.msk.bf16.mxu0 %vm15769_vm3, %v14541_v60 }
 0x1fa   :  { %14546 = vmatpush3.bf16.xpose.msk.msra.mxu0 %vm15769_vm3, %v14541_v60 }
 0x1fb   :  { %v14547_v1 = vpack.c.bf16 %v15052_v63, %v15051_v0  ;;  %v15060_v2 = vpop.permute.xlu0 %15059 }
 0x1fc   :  { %v398_v8 = vpop.permute.xlu1 %397  ;;  %v15062_v9 = vunpack.i.h.bf16 %v15060_v2  ;;  %v15061_v10 = vunpack.i.l.bf16 %v15060_v2 }
 0x1fd   :  { %13563 = vmatmul.mubr.msk.f32.vlgmr.msra.gmra.mrb[16].mxu1 %vm479_vm2, %v398_v8  ;;  %14549 = vmatprep.subr.msk.bf16.mxu1 %vm15769_vm3, %v14547_v1 }
 0x1fe   :  { %v14553_v11 = vpack.c.bf16 %v15062_v9, %v15061_v10  ;;  %14552 = vmatpush3.bf16.xpose.msk.msra.mxu1 %vm15769_vm3, %v14547_v1 }
 0x1ff   :  { %14560 = vmatprep.subr.bf16.mxu1 %v15789_v27  ;;  %v402_v12 = vpop.permute.xlu0 %401 }
 0x200   :  { %v400_v13 = vpop.permute.xlu1 %399  ;;  %14555 = vmatprep.subr.msk.bf16.mxu0 %vm15769_vm3, %v14553_v11 }
 0x201   :  { %13569 = vmatprep.mubr.msk.f32.mxu0 %vm479_vm2, %v400_v13 }
 0x202   :  { %13570 = vmatmul.mubr.msk.f32.vlgmr.msra.gmra.mrb[4].mxu0 %vm479_vm2, %v402_v12 }
 0x203   :  { %14558 = vmatpush3.bf16.xpose.msk.msra.mxu0 %vm15769_vm3, %v14553_v11  ;;  %v406_v14 = vpop.permute.xlu0 %405 }
 0x204   :  { %v404_v15 = vpop.permute.xlu1 %403 }
 0x205   :  { %13576 = vmatprep.mubr.msk.f32.mxu1 %vm479_vm2, %v404_v15 }
 0x206   :  { %13577 = vmatmul.mubr.msk.f32.vlgmr.msra.gmra.mrb[18].mxu1 %vm479_vm2, %v406_v14 }
 0x207   :  { %14562 = vmatpush3.bf16.msra.mxu1 %v15789_v27  ;;  %v410_v18 = vpop.permute.xlu0 %409 }
 0x208   :  { %14564 = vmatprep.subr.bf16.mxu1 %v15796_v32  ;;  %v408_v19 = vpop.permute.xlu1 %407 }
 0x209   :  { %13583 = vmatprep.mubr.msk.f32.mxu0 %vm479_vm2, %v408_v19 }
 0x20a   :  { %13584 = vmatmul.mubr.msk.f32.vlgmr.msra.gmra.mrb[6].mxu0 %vm479_vm2, %v410_v18 }
 0x20b   :  { %v15065_v20 = vpop.permute.xlu0 %15064 }
 0x20c   :  { %v15067_v21 = vunpack.i.h.bf16 %v15065_v20  ;;  %v15066_v22 = vunpack.i.l.bf16 %v15065_v20 }
 0x20e   :  { %v14567_v23 = vpack.c.bf16 %v15067_v21, %v15066_v22 }
 0x210   :  { %14568 = vmatprep.subr.bf16.mxu0 %v14567_v23 }
 0x211   :  { %14570 = vmatpush3.bf16.msra.mxu0 %v14567_v23 }
 0x250   :  { %v13536_v24 = vpop.f32.mrb[12].mxu1 }
 0x251   :  { %v15854_v25 = vmul.f32 0.5, %v13536_v24  ;;  %v554_v28 = vpop.f32.mrb[13].mxu1 }
 0x252   :  { %v15856_v29 = vmul.f32 0.5, %v554_v28 }
 0x253   :  { %v1163_v27 = vsel %vm101_vm1, %v15854_v25, -inf }
 0x254   :  { %1164 = vmax.xlane.f32.xlu0 %v1163_v27  ;;  %v13543_v30 = vpop.f32.mrb[0].mxu0  ;;  %v1160_v33 = vsel %vm101_vm1, %v15856_v29, -inf  ;;  %v15922_v27 = vpop.permute.xlu1 %15069 }
 0x255   :  { %v15862_v34 = vmul.f32 0.5, %v13543_v30  ;;  %1161 = vmax.xlane.f32.xlu1 %v1160_v33  ;;  %v637_v37 = vpop.f32.mrb[1].mxu0 }
 0x256   :  { %v15864_v38 = vmul.f32 0.5, %v637_v37 }
 0x257   :  { %v1169_v39 = vsel %vm101_vm1, %v15862_v34, -inf }
 0x258   :  { %1170 = vmax.xlane.f32.xlu0 %v1169_v39  ;;  %v1166_v40 = vsel %vm101_vm1, %v15864_v38, -inf }
 0x25c   :  { %1167 = vmax.xlane.f32.xlu0 %v1166_v40 }
 0x2c7   :  { %v13550_v41 = vpop.f32.mrb[14].mxu1 }
 0x2c8   :  { %v15870_v44 = vmul.f32 0.5, %v13550_v41  ;;  %v720_v45 = vpop.f32.mrb[15].mxu1 }
 0x2c9   :  { %v15872_v46 = vmul.f32 0.5, %v720_v45 }
 0x2ca   :  { %v1175_v47 = vsel %vm101_vm1, %v15870_v44, -inf }
 0x2cb   :  { %1176 = vmax.xlane.f32.xlu1 %v1175_v47  ;;  %v13557_v48 = vpop.f32.mrb[2].mxu0  ;;  %v1172_v56 = vsel %vm101_vm1, %v15872_v46, -inf }
 0x2cc   :  { %v15876_v50 = vmul.f32 0.5, %v13557_v48  ;;  %v803_v51 = vpop.f32.mrb[3].mxu0 }
 0x2cd   :  { %v15878_v55 = vmul.f32 0.5, %v803_v51 }
 0x2ce   :  { %v1181_v57 = vsel %vm101_vm1, %v15876_v50, -inf }
 0x2cf   :  { %1173 = vmax.xlane.f32.xlu1 %v1172_v56  ;;  %1182 = vmax.xlane.f32.xlu0 %v1181_v57  ;;  %v1178_v61 = vsel %vm101_vm1, %v15878_v55, -inf }
 0x2d0   :  { %v13564_v58 = vpop.f32.mrb[16].mxu1 }
 0x2d1   :  { %v15884_v59 = vmul.f32 0.5, %v13564_v58  ;;  %v886_v60 = vpop.f32.mrb[17].mxu1 }
 0x2d2   :  { %v15888_v62 = vmul.f32 0.5, %v886_v60 }
 0x2d3   :  { %v1187_v63 = vsel %vm101_vm1, %v15884_v59, -inf  ;;  %1179 = vmax.xlane.f32.xlu0 %v1178_v61 }
 0x2d4   :  { %1188 = vmax.xlane.f32.xlu1 %v1187_v63  ;;  %v1184_v8 = vsel %vm101_vm1, %v15888_v62, -inf }
 0x2d5   :  { %v13571_v0 = vpop.f32.mrb[4].mxu0 }
 0x2d6   :  { %v15892_v1 = vmul.f32 0.5, %v13571_v0  ;;  %v969_v2 = vpop.f32.mrb[5].mxu0 }
 0x2d7   :  { %v15896_v9 = vmul.f32 0.5, %v969_v2 }
 0x2d8   :  { %1185 = vmax.xlane.f32.xlu1 %v1184_v8  ;;  %v1193_v10 = vsel %vm101_vm1, %v15892_v1, -inf }
 0x2d9   :  { %v13578_v11 = vpop.f32.mrb[18].mxu1  ;;  %1194 = vmax.xlane.f32.xlu0 %v1193_v10  ;;  %v1190_v18 = vsel %vm101_vm1, %v15896_v9, -inf }
 0x2da   :  { %v15900_v12 = vmul.f32 0.5, %v13578_v11  ;;  %v1052_v13 = vpop.f32.mrb[19].mxu1 }
 0x2db   :  { %v15902_v14 = vmul.f32 0.5, %v1052_v13 }
 0x2dc   :  { %v1199_v15 = vsel %vm101_vm1, %v15900_v12, -inf }
 0x2dd   :  { %1200 = vmax.xlane.f32.xlu1 %v1199_v15  ;;  %1191 = vmax.xlane.f32.xlu0 %v1190_v18  ;;  %v13585_v19 = vpop.f32.mrb[6].mxu0  ;;  %v1196_v23 = vsel %vm101_vm1, %v15902_v14, -inf }
 0x2de   :  { %v1135_v20 = vpop.f32.mrb[7].mxu0  ;;  %v15910_v22 = vmul.f32 0.5, %v13585_v19 }
 0x2df   :  { %v15908_v21 = vmul.f32 0.5, %v1135_v20 }
 0x2e0   :  { %v1205_v28 = vsel %vm101_vm1, %v15910_v22, -inf }
 0x2e1   :  { %1197 = vmax.xlane.f32.xlu1 %v1196_v23  ;;  %v1202_v24 = vsel %vm101_vm1, %v15908_v21, -inf  ;;  %v1165_v30 = vpop.xlane.xlu0 %1164 }
 0x2e2   :  { %1203 = vmax.xlane.f32.xlu0 %v1202_v24  ;;  %v1162_v33 = vpop.xlane.xlu1 %1161  ;;  %v1209_v40 = vsub.f32 %v15854_v25, %v1165_v30 }
 0x2e3   :  { %v1208_v39 = vsub.f32 %v15856_v29, %v1162_v33 }
 0x2e4   :  { %v1226_v48 = vmul.f32 1.442695, %v1209_v40 }
 0x2e5   :  { %1206 = vmax.xlane.f32.xlu1 %v1205_v28  ;;  %v1171_v37 = vpop.xlane.xlu0 %1170  ;;  %v1224_v41 = vmul.f32 1.442695, %v1208_v39 }
 0x2e6   :  { %v1211_v45 = vsub.f32 %v15862_v34, %v1171_v37 }
 0x2e7   :  { %15278 = vpow2.f32 %v1224_v41 }
 0x2e8   :  { %v1230_v51 = vmul.f32 1.442695, %v1211_v45  ;;  %15280 = vpow2.f32 %v1226_v48 }
 0x2e9   :  { %v1168_v47 = vpop.xlane.xlu0 %1167 }
 0x2ea   :  { %v1210_v56 = vsub.f32 %v15864_v38, %v1168_v47  ;;  %15282 = vpow2.f32 %v1230_v51 }
 0x2ec   :  { %v1228_v57 = vmul.f32 1.442695, %v1210_v56 }
 0x2ee   :  { %15284 = vpow2.f32 %v1228_v57 }
 0x2f1   :  { %v15928_v58 = vpop.eup %15278 }
 0x2f2   :  { %v15930_v60 = vpop.eup %15280  ;;  %v1256_v25 = vsel %vm101_vm1, %v15928_v58, 0.0 }
 0x2f3   :  { %v1259_v34 = vsel %vm101_vm1, %v15930_v60, 0.0 }
 0x2f4   :  { %v15934_v29 = vpop.eup %15282 }
 0x2f5   :  { %v1265_v38 = vsel %vm101_vm1, %v15934_v29, 0.0 }
 0x2f6   :  { %15074 = vrot.lane.b32.xlu1 %v15787_v26, %s15617_s23 }
 0x2f8   :  { %15079 = vrot.lane.b32.xlu0 %v15794_v31, %s15617_s23  ;;  %v15940_v61 = vpop.eup %15284 }
 0x2f9   :  { %v1262_v63 = vsel %vm101_vm1, %v15940_v61, 0.0 }
 0x317   :  { %1257 = vadd.xlane.f32.xlu0 %v1256_v25 }
 0x31a   :  { %1260 = vadd.xlane.f32.xlu1 %v1259_v34 }
 0x31b   :  { %1266 = vadd.xlane.f32.xlu0 %v1265_v38 }
 0x31f   :  { %1263 = vadd.xlane.f32.xlu0 %v1262_v63 }
 0x358   :  { %v1177_v0 = vpop.xlane.xlu1 %1176 }
 0x359   :  { %v1213_v2 = vsub.f32 %v15870_v44, %v1177_v0 }
 0x35b   :  { %v1234_v8 = vmul.f32 1.442695, %v1213_v2 }
 0x35c   :  { %v1174_v10 = vpop.xlane.xlu1 %1173  ;;  %v1183_v11 = vpop.xlane.xlu0 %1182 }
 0x35d   :  { %15286 = vpow2.f32 %v1234_v8  ;;  %v1212_v13 = vsub.f32 %v15872_v46, %v1174_v10  ;;  %v1215_v15 = vsub.f32 %v15876_v50, %v1183_v11 }
 0x35f   :  { %v1232_v18 = vmul.f32 1.442695, %v1212_v13  ;;  %v1238_v19 = vmul.f32 1.442695, %v1215_v15 }
 0x360   :  { %v1180_v20 = vpop.xlane.xlu0 %1179 }
 0x361   :  { %15288 = vpow2.f32 %v1232_v18  ;;  %v1189_v23 = vpop.xlane.xlu1 %1188  ;;  %v1214_v24 = vsub.f32 %v15878_v55, %v1180_v20 }
 0x362   :  { %15290 = vpow2.f32 %v1238_v19  ;;  %v1217_v28 = vsub.f32 %v15884_v59, %v1189_v23 }
 0x363   :  { %v1236_v30 = vmul.f32 1.442695, %v1214_v24 }
 0x364   :  { %v1242_v44 = vmul.f32 1.442695, %v1217_v28 }
 0x365   :  { %15292 = vpow2.f32 %v1236_v30  ;;  %v1186_v33 = vpop.xlane.xlu1 %1185 }
 0x366   :  { %15294 = vpow2.f32 %v1242_v44  ;;  %v1216_v37 = vsub.f32 %v15888_v62, %v1186_v33  ;;  %v1195_v46 = vpop.xlane.xlu0 %1194 }
 0x367   :  { %v15950_v39 = vpop.eup %15286  ;;  %v1219_v50 = vsub.f32 %v15892_v1, %v1195_v46 }
 0x368   :  { %v1240_v40 = vmul.f32 1.442695, %v1216_v37  ;;  %v1271_v41 = vsel %vm101_vm1, %v15950_v39, 0.0 }
 0x369   :  { %v1246_v55 = vmul.f32 1.442695, %v1219_v50  ;;  %1272 = vadd.xlane.f32.xlu1 %v1271_v41 }
 0x36a   :  { %15296 = vpow2.f32 %v1240_v40  ;;  %v1201_v59 = vpop.xlane.xlu1 %1200  ;;  %v1192_v45 = vpop.xlane.xlu0 %1191 }
 0x36b   :  { %v15955_v47 = vpop.eup %15288  ;;  %15298 = vpow2.f32 %v1246_v55  ;;  %v1221_v48 = vsub.f32 %v15900_v12, %v1201_v59  ;;  %v1218_v62 = vsub.f32 %v15896_v9, %v1192_v45 }
 0x36c   :  { %v15959_v51 = vpop.eup %15290  ;;  %v1268_v1 = vsel %vm101_vm1, %v15955_v47, 0.0 }
 0x36d   :  { %v1250_v56 = vmul.f32 1.442695, %v1221_v48  ;;  %v1244_v57 = vmul.f32 1.442695, %v1218_v62  ;;  %1269 = vadd.xlane.f32.xlu1 %v1268_v1  ;;  %v1277_v25 = vsel %vm101_vm1, %v15959_v51, 0.0 }
 0x36e   :  { %v1198_v34 = vpop.xlane.xlu1 %1197  ;;  %1278 = vadd.xlane.f32.xlu0 %v1277_v25 }
 0x36f   :  { %v15965_v38 = vpop.eup %15292  ;;  %15300 = vpow2.f32 %v1250_v56  ;;  %v1220_v12 = vsub.f32 %v15902_v14, %v1198_v34  ;;  %v1204_v63 = vpop.xlane.xlu0 %1203  ;;  %v15072_v34 = vunpack.i.h.bf16 %v15922_v27 }
 0x370   :  { %v15968_v9 = vpop.eup %15294  ;;  %15302 = vpow2.f32 %v1244_v57  ;;  %v1222_v0 = vsub.f32 %v15908_v21, %v1204_v63  ;;  %v1274_v2 = vsel %vm101_vm1, %v15965_v38, 0.0 }
 0x371   :  { %v1248_v8 = vmul.f32 1.442695, %v1220_v12  ;;  %v1283_v10 = vsel %vm101_vm1, %v15968_v9, 0.0  ;;  %v15071_v12 = vunpack.i.l.bf16 %v15922_v27 }
 0x372   :  { %v1252_v11 = vmul.f32 1.442695, %v1222_v0  ;;  %1284 = vadd.xlane.f32.xlu1 %v1283_v10  ;;  %v1207_v13 = vpop.xlane.xlu1 %1206  ;;  %1275 = vadd.xlane.f32.xlu0 %v1274_v2 }
 0x373   :  { %15304 = vpow2.f32 %v1248_v8  ;;  %v1223_v14 = vsub.f32 %v15910_v22, %v1207_v13  ;;  %v15080_v45 = vpop.permute.xlu0 %15079  ;;  %v14571_v63 = vpack.c.bf16 %v15072_v34, %v15071_v12 }
 0x374   :  { %v15976_v15 = vpop.eup %15296  ;;  %15306 = vpow2.f32 %v1252_v11  ;;  %v15082_v8 = vunpack.i.h.bf16 %v15080_v45  ;;  %v15081_v10 = vunpack.i.l.bf16 %v15080_v45 }
 0x375   :  { %v15978_v18 = vpop.eup %15298  ;;  %v1254_v21 = vmul.f32 1.442695, %v1223_v14  ;;  %v1280_v19 = vsel %vm101_vm1, %v15976_v15, 0.0 }
 0x376   :  { %1281 = vadd.xlane.f32.xlu1 %v1280_v19  ;;  %v15075_v20 = vpop.permute.xlu1 %15074  ;;  %v1289_v23 = vsel %vm101_vm1, %v15978_v18, 0.0  ;;  %v14579_v27 = vpack.c.bf16 %v15082_v8, %v15081_v10 }
 0x377   :  { %15308 = vpow2.f32 %v1254_v21  ;;  %v15077_v24 = vunpack.i.h.bf16 %v15075_v20  ;;  %v15076_v28 = vunpack.i.l.bf16 %v15075_v20  ;;  %1290 = vadd.xlane.f32.xlu0 %v1289_v23 }
 0x379   :  { %v15984_v30 = vpop.eup %15300  ;;  %v15986_v22 = vpack.c.bf16 %v15077_v24, %v15076_v28 }
 0x37a   :  { %v15988_v44 = vpop.eup %15302  ;;  %v1295_v33 = vsel %vm101_vm1, %v15984_v30, 0.0 }
 0x37b   :  { %1296 = vadd.xlane.f32.xlu1 %v1295_v33  ;;  %14576 = vmatprep.subr.bf16.mxu0 %v15986_v22  ;;  %v1286_v37 = vsel %vm101_vm1, %v15988_v44, 0.0 }
 0x37c   :  { %1287 = vadd.xlane.f32.xlu0 %v1286_v37 }
 0x37d   :  { %v15995_v46 = vpop.eup %15304 }
 0x37e   :  { %v15997_v50 = vpop.eup %15306  ;;  %v1292_v40 = vsel %vm101_vm1, %v15995_v46, 0.0 }
 0x37f   :  { %1293 = vadd.xlane.f32.xlu1 %v1292_v40  ;;  %v1298_v41 = vsel %vm101_vm1, %v15997_v50, 0.0 }
 0x380   :  { %1299 = vadd.xlane.f32.xlu0 %v1298_v41 }
 0x381   :  { %v16003_v55 = vpop.eup %15308 }
 0x382   :  { %v1301_v59 = vsel %vm101_vm1, %v16003_v55, 0.0 }
 0x383   :  { %1302 = vadd.xlane.f32.xlu1 %v1301_v59 }
 0x394   :  { %15084 = vrot.lane.b32.xlu1 %v15787_v26, %s15618_s24 }
 0x396   :  { %15089 = vrot.lane.b32.xlu0 %v15794_v31, %s15618_s24 }
 0x3a4   :  { %v1258_v48 = vpop.xlane.xlu0 %1257 }
 0x3a5   :  { %15310 = vrcp.f32 %v1258_v48 }
 0x3a7   :  { %v1261_v62 = vpop.xlane.xlu1 %1260 }
 0x3a8   :  { %15312 = vrcp.f32 %v1261_v62  ;;  %v1267_v1 = vpop.xlane.xlu0 %1266 }
 0x3a9   :  { %15314 = vrcp.f32 %v1267_v1 }
 0x3ac   :  { %v1264_v56 = vpop.xlane.xlu0 %1263 }
 0x3ad   :  { %15316 = vrcp.f32 %v1264_v56 }
 0x3af   :  { %v15311_v57 = vpop.eup %15310 }
 0x3b0   :  { %v1320_v25 = vmul.f32 %v15311_v57, %v15928_v58 }
 0x3b2   :  { %v15313_v26 = vpop.eup %15312  ;;  %13590 = vmatprep.mubr.msk.f32.mxu1 %vm101_vm1, %v1320_v25 }
 0x3b3   :  { %v1321_v31 = vmul.f32 %v15313_v26, %v15930_v60  ;;  %v15315_v0 = vpop.eup %15314 }
 0x3b4   :  { %v1323_v11 = vmul.f32 %v15315_v0, %v15934_v29 }
 0x3b5   :  { %13591 = vmatmul.mubr.msk.f32.vlgmr.msra.gmra.mrb[20].mxu1 %vm101_vm1, %v1321_v31 }
 0x3b6   :  { %14566 = vmatpush3.bf16.msra.mxu1 %v15796_v32 }
 0x3b7   :  { %v15317_v2 = vpop.eup %15316  ;;  %14572 = vmatprep.subr.bf16.mxu1 %v14571_v63 }
 0x3b8   :  { %v1322_v58 = vmul.f32 %v15317_v2, %v15940_v61 }
 0x3ba   :  { %13597 = vmatprep.mubr.msk.f32.mxu1 %vm101_vm1, %v1322_v58 }
 0x3bb   :  { %13598 = vmatmul.mubr.msk.f32.vlgmr.msra.gmra.mrb[22].mxu1 %vm101_vm1, %v1323_v11 }
 0x3bc   :  { %14574 = vmatpush3.bf16.msra.mxu1 %v14571_v63 }
 0x3bd   :  { %14580 = vmatprep.subr.bf16.mxu1 %v14579_v27 }
 0x3f6   :  { %v1273_v60 = vpop.xlane.xlu1 %1272 }
 0x3f7   :  { %15318 = vrcp.f32 %v1273_v60 }
 0x3fa   :  { %v1270_v13 = vpop.xlane.xlu1 %1269 }
 0x3fb   :  { %15320 = vrcp.f32 %v1270_v13  ;;  %v1279_v32 = vpop.xlane.xlu0 %1278 }
 0x3fc   :  { %15322 = vrcp.f32 %v1279_v32 }
 0x3ff   :  { %v1285_v14 = vpop.xlane.xlu1 %1284  ;;  %v1276_v21 = vpop.xlane.xlu0 %1275 }
 0x400   :  { %15324 = vrcp.f32 %v1276_v21 }
 0x401   :  { %15326 = vrcp.f32 %v1285_v14  ;;  %v15319_v19 = vpop.eup %15318 }
 0x402   :  { %v1325_v24 = vmul.f32 %v15319_v19, %v15950_v39 }
 0x403   :  { %v1282_v61 = vpop.xlane.xlu1 %1281 }
 0x404   :  { %15328 = vrcp.f32 %v1282_v61  ;;  %v1291_v29 = vpop.xlane.xlu0 %1290 }
 0x405   :  { %v15321_v20 = vpop.eup %15320  ;;  %15330 = vrcp.f32 %v1291_v29 }
 0x406   :  { %v1324_v23 = vmul.f32 %v15321_v20, %v15955_v47  ;;  %v15323_v37 = vpop.eup %15322 }
 0x407   :  { %v1327_v39 = vmul.f32 %v15323_v37, %v15959_v51 }
 0x408   :  { %v1297_v28 = vpop.xlane.xlu1 %1296  ;;  %13604 = vmatprep.mubr.msk.f32.mxu0 %vm101_vm1, %v1324_v23 }
 0x409   :  { %v1288_v33 = vpop.xlane.xlu0 %1287  ;;  %13605 = vmatmul.mubr.msk.f32.vlgmr.msra.gmra.mrb[8].mxu0 %vm101_vm1, %v1325_v24 }
 0x40a   :  { %15332 = vrcp.f32 %v1288_v33  ;;  %14578 = vmatpush3.bf16.msra.mxu0 %v15986_v22  ;;  %v15325_v40 = vpop.eup %15324 }
 0x40b   :  { %15334 = vrcp.f32 %v1297_v28  ;;  %v1326_v59 = vmul.f32 %v15325_v40, %v15965_v38  ;;  %v15327_v45 = vpop.eup %15326 }
 0x40c   :  { %v1294_v41 = vpop.xlane.xlu1 %1293  ;;  %v1329_v1 = vmul.f32 %v15327_v45, %v15968_v9 }
 0x40d   :  { %15336 = vrcp.f32 %v1294_v41  ;;  %v1300_v47 = vpop.xlane.xlu0 %1299  ;;  %13611 = vmatprep.mubr.msk.f32.mxu1 %vm101_vm1, %v1326_v59 }
 0x40e   :  { %v15329_v48 = vpop.eup %15328  ;;  %15338 = vrcp.f32 %v1300_v47  ;;  %13612 = vmatmul.mubr.msk.f32.vlgmr.msra.gmra.mrb[24].mxu1 %vm101_vm1, %v1327_v39 }
 0x40f   :  { %v1328_v62 = vmul.f32 %v15329_v48, %v15976_v15  ;;  %14582 = vmatpush3.bf16.msra.mxu1 %v14579_v27  ;;  %v15331_v51 = vpop.eup %15330 }
 0x410   :  { %v1303_v22 = vpop.xlane.xlu1 %1302  ;;  %v1331_v9 = vmul.f32 %v15331_v51, %v15978_v18 }
 0x411   :  { %15340 = vrcp.f32 %v1303_v22  ;;  %13618 = vmatprep.mubr.msk.f32.mxu0 %vm101_vm1, %v1328_v62  ;;  %v15090_v38 = vpop.permute.xlu0 %15089 }
 0x412   :  { %v15092_v56 = vunpack.i.h.bf16 %v15090_v38  ;;  %v15091_v57 = vunpack.i.l.bf16 %v15090_v38  ;;  %13619 = vmatmul.mubr.msk.f32.vlgmr.msra.gmra.mrb[10].mxu0 %vm101_vm1, %v1329_v1 }
 0x414   :  { %v15333_v25 = vpop.eup %15332  ;;  %v15085_v34 = vpop.permute.xlu1 %15084  ;;  %v14587_v12 = vpack.c.bf16 %v15092_v56, %v15091_v57 }
 0x415   :  { %v15087_v26 = vunpack.i.h.bf16 %v15085_v34  ;;  %v15086_v31 = vunpack.i.l.bf16 %v15085_v34  ;;  %v1330_v15 = vmul.f32 %v15333_v25, %v15988_v44  ;;  %v15335_v63 = vpop.eup %15334 }
 0x416   :  { %14588 = vmatprep.subr.bf16.mxu1 %v14587_v12  ;;  %v1333_v18 = vmul.f32 %v15335_v63, %v15984_v30  ;;  %v2046_v30 = vld [vmem:[%s17882_s2 + $0x80] sm:$0xff] }
 0x417   :  { %v15337_v0 = vpop.eup %15336  ;;  %13625 = vmatprep.mubr.msk.f32.mxu1 %vm101_vm1, %v1330_v15  ;;  %v14583_v2 = vpack.c.bf16 %v15087_v26, %v15086_v31 }
 0x418   :  { %v15339_v8 = vpop.eup %15338  ;;  %13626 = vmatmul.mubr.msk.f32.vlgmr.msra.gmra.mrb[26].mxu1 %vm101_vm1, %v1331_v9  ;;  %v1332_v10 = vmul.f32 %v15337_v0, %v15995_v46 }
 0x419   :  { %14590 = vmatpush3.bf16.msra.mxu1 %v14587_v12  ;;  %14584 = vmatprep.subr.bf16.mxu0 %v14583_v2  ;;  %v1334_v58 = vmul.f32 %v15339_v8, %v15997_v50  ;;  %v12707_v8 = vld [vmem:[%s17882_s2 + $0x90] ss:$0 sm:$0xff] }
 0x41a   :  { %14586 = vmatpush3.bf16.msra.mxu0 %v14583_v2  ;;  %13632 = vmatprep.mubr.msk.f32.mxu0 %vm101_vm1, %v1332_v10 }
 0x41b   :  { %v15341_v44 = vpop.eup %15340  ;;  %13639 = vmatprep.mubr.msk.f32.mxu1 %vm101_vm1, %v1334_v58 }
 0x41c   :  { %v1335_v11 = vmul.f32 %v15341_v44, %v16003_v55  ;;  %v2047_v55 = vld [vmem:[%s17882_s2 + $0x88] sm:$0xff] }
 0x41d   :  { %13633 = vmatmul.mubr.msk.f32.vlgmr.msra.gmra.mrb[12].mxu0 %vm101_vm1, %v1333_v18  ;;  %v14591_v14 = vpack.c.bf16 %v2047_v55, %v2046_v30 }
 0x41e   :  { %13640 = vmatmul.mubr.msk.f32.vlgmr.msra.gmra.mrb[28].mxu1 %vm101_vm1, %v1335_v11 }
 0x41f   :  { %14592 = vmatprep.subr.bf16.mxu0 %v14591_v14 }
 0x420   :  { %14594 = vmatpush3.bf16.msra.mxu0 %v14591_v14 }
 0x488   :  { %v13592_v27 = vpop.f32.mrb[20].mxu1 }
 0x489   :  { %v1408_v46 = vpop.f32.mrb[21].mxu1 }
 0x48e   :  { %v13599_v60 = vpop.f32.mrb[22].mxu1 }
 0x48f   :  { %v1489_v13 = vpop.f32.mrb[23].mxu1 }
 0x4dc   :  { %v13606_v32 = vpop.f32.mrb[8].mxu0 }
 0x4dd   :  { %v1570_v50 = vpop.f32.mrb[9].mxu0  ;;  %1990 = vrot.lane.b32.xlu0 %v13606_v32, %s15619_s25 }
 0x4de   :  { %1988 = vrot.lane.b32.xlu1 %v1570_v50, %s15619_s25 }
 0x4e1   :  { %v13613_v21 = vpop.f32.mrb[24].mxu1 }
 0x4e2   :  { %1994 = vrot.lane.b32.xlu0 %v13613_v21, %s15619_s25  ;;  %v1651_v61 = vpop.f32.mrb[25].mxu1 }
 0x4e3   :  { %1992 = vrot.lane.b32.xlu1 %v1651_v61, %s15619_s25 }
 0x4e5   :  { %v13620_v19 = vpop.f32.mrb[10].mxu0 }
 0x4e6   :  { %v1732_v29 = vpop.f32.mrb[11].mxu0  ;;  %2006 = vrot.lane.b32.xlu0 %v13620_v19, %s15620_s30 }
 0x4e7   :  { %2004 = vrot.lane.b32.xlu1 %v1732_v29, %s15620_s30 }
 0x4eb   :  { %v13627_v20 = vpop.f32.mrb[26].mxu1 }
 0x4ec   :  { %2010 = vrot.lane.b32.xlu0 %v13627_v20, %s15620_s30  ;;  %v1813_v23 = vpop.f32.mrb[27].mxu1 }
 0x4ed   :  { %2008 = vrot.lane.b32.xlu1 %v1813_v23, %s15620_s30 }
 0x4f0   :  { %v13634_v24 = vpop.f32.mrb[12].mxu0 }
 0x4f1   :  { %v1894_v28 = vpop.f32.mrb[13].mxu0  ;;  %2022 = vrot.lane.b32.xlu0 %v13634_v24, %s15621_s0  ;;  %v13641_v33 = vpop.f32.mrb[28].mxu1 }
 0x4f2   :  { %2020 = vrot.lane.b32.xlu1 %v1894_v28, %s15621_s0  ;;  %v1975_v37 = vpop.f32.mrb[29].mxu1 }
 0x4f5   :  { %2026 = vrot.lane.b32.xlu0 %v13641_v33, %s15621_s0 }
 0x4f6   :  { %2024 = vrot.lane.b32.xlu1 %v1975_v37, %s15621_s0 }
 0x54f   :  { %v1991_v40 = vpop.permute.xlu0 %1990 }
 0x550   :  { %v1989_v41 = vpop.permute.xlu1 %1988  ;;  %v2033_v38 = vsel %vm479_vm2, %v13592_v27, %v1991_v40 }
 0x551   :  { %v2032_v22 = vsel %vm479_vm2, %v1408_v46, %v1989_v41 }
 0x554   :  { %v1995_v59 = vpop.permute.xlu0 %1994 }
 0x555   :  { %v1993_v45 = vpop.permute.xlu1 %1992  ;;  %v2035_v31 = vsel %vm479_vm2, %v13599_v60, %v1995_v59 }
 0x556   :  { %v2034_v12 = vsel %vm479_vm2, %v1489_v13, %v1993_v45 }
 0x558   :  { %v2007_v47 = vpop.permute.xlu0 %2006 }
 0x559   :  { %v2005_v39 = vpop.permute.xlu1 %2004  ;;  %v2038_v51 = vsel %vm2036_vm4, %v2033_v38, %v2007_v47 }
 0x55a   :  { %v2037_v56 = vsel %vm2036_vm4, %v2032_v22, %v2005_v39  ;;  %v2225_v22 = vld [vmem:[%s17883_s3] sm:$0xff] }
 0x55e   :  { %v2011_v48 = vpop.permute.xlu0 %2010 }
 0x55f   :  { %v2009_v62 = vpop.permute.xlu1 %2008  ;;  %v2040_v9 = vsel %vm2036_vm4, %v2035_v31, %v2011_v48  ;;  %v2338_v31 = vld [vmem:[%s17882_s2 + $0xc0] sm:$0xff] }
 0x560   :  { %v2039_v15 = vsel %vm2036_vm4, %v2034_v12, %v2009_v62 }
 0x563   :  { %v2023_v1 = vpop.permute.xlu0 %2022 }
 0x564   :  { %v2021_v57 = vpop.permute.xlu1 %2020  ;;  %v2043_v34 = vsel %vm2041_vm5, %v2038_v51, %v2023_v1  ;;  %v2226_v1 = vld [vmem:[%s17883_s3 + $0x8] sm:$0xff] }
 0x565   :  { %v2042_v25 = vsel %vm2041_vm5, %v2037_v56, %v2021_v57  ;;  %v14595_v38 = vpack.c.bf16 %v2226_v1, %v2225_v22  ;;  %v2333_v56 = vld [vmem:[%s17882_s2 + $0x98] sm:$0xff]  ;;  %v2334_v57 = vld [vmem:[%s17882_s2 + $0xa0] sm:$0xff]  ;;  %v2335_v51 = vld [vmem:[%s17882_s2 + $0xa8] sm:$0xff] }
 0x566   :  { %13646 = vmatprep.mubr.msk.f32.mxu0 %vm101_vm1, %v2042_v25  ;;  %v14599_v25 = vpack.c.bf16 %v2334_v57, %v2333_v56  ;;  %v2347_v56 = vld [vmem:[%s17882_s2 + $0x108] sm:$0xff]  ;;  %v12714_v57 = vld [vmem:[%s17883_s3 + $0x10] ss:$0 sm:$0xff] }
 0x567   :  { %13647 = vmatmul.mubr.msk.f32.vlgmr.msra.gmra.mrb[14].mxu0 %vm101_vm1, %v2043_v34  ;;  %v2027_v26 = vpop.permute.xlu0 %2026  ;;  %14596 = vmatprep.subr.bf16.mxu1 %v14595_v38  ;;  %v2336_v34 = vld [vmem:[%s17882_s2 + $0xb0] sm:$0xff] }
 0x568   :  { %v2025_v63 = vpop.permute.xlu1 %2024  ;;  %v2045_v2 = vsel %vm2041_vm5, %v2040_v9, %v2027_v26  ;;  %14598 = vmatpush3.bf16.msra.mxu1 %v14595_v38  ;;  %v14603_v12 = vpack.c.bf16 %v2336_v34, %v2335_v51  ;;  %v2337_v26 = vld [vmem:[%s17882_s2 + $0xb8] sm:$0xff]  ;;  %14600 = vmatprep.subr.bf16.mxu0 %v14599_v25  ;;  %v2340_v9 = vld [vmem:[%s17882_s2 + $0xd0] sm:$0xff] }
 0x569   :  { %v2044_v0 = vsel %vm2041_vm5, %v2039_v15, %v2025_v63  ;;  %14602 = vmatpush3.bf16.msra.mxu0 %v14599_v25  ;;  %v14607_v15 = vpack.c.bf16 %v2338_v31, %v2337_v26  ;;  %v2339_v63 = vld [vmem:[%s17882_s2 + $0xc8] sm:$0xff] }
 0x56a   :  { %13649 = vmatprep.mubr.msk.f32.mxu0 %vm101_vm1, %v2044_v0  ;;  %14604 = vmatprep.subr.bf16.mxu0 %v14603_v12  ;;  %v14611_v0 = vpack.c.bf16 %v2340_v9, %v2339_v63 }
 0x56b   :  { %13650 = vmatmul.mubr.msk.f32.gmra.mrb[16].mxu0 %vm101_vm1, %v2045_v2  ;;  %v2341_v2 = vld [vmem:[%s17882_s2 + $0xd8] sm:$0xff] }
 0x56d   :  { %14606 = vmatpush3.bf16.msra.mxu0 %v14603_v12 }
 0x56e   :  { %14608 = vmatprep.subr.bf16.mxu0 %v14607_v15 }
 0x571   :  { %14610 = vmatpush3.bf16.msra.mxu0 %v14607_v15 }
 0x572   :  { %14612 = vmatprep.subr.bf16.mxu0 %v14611_v0 }
 0x575   :  { %14614 = vmatpush3.bf16.msra.mxu0 %v14611_v0 }
 0x63a   :  { %v13648_v10 = vpop.f32.mrb[14].mxu0 }
 0x63b   :  { %v2137_v58 = vadd.f32 %v13648_v10, %v12707_v8  ;;  %v2131_v44 = vpop.f32.mrb[15].mxu0 }
 0x63c   :  { %v2132_v18 = vadd.f32 %v12707_v8, %v2131_v44  ;;  %v2344_v44 = vld [vmem:[%s17882_s2 + $0xf0] sm:$0xff] }
 0x63d   :  { %v2151_v11 = vadd.f32 %v2137_v58, %v15722_v43  ;;  %v2343_v58 = vld [vmem:[%s17882_s2 + $0xe8] sm:$0xff] }
 0x63e   :  { %v13651_v27 = vpop.f32.mrb[16].mxu0  ;;  %v2150_v46 = vadd.f32 %v2132_v18, %v15719_v42  ;;  %v14619_v18 = vpack.c.bf16 %v2344_v44, %v2343_v58 }
 0x63f   :  { %v2147_v60 = vadd.f32 %v13651_v27, %v12707_v8  ;;  %v2141_v13 = vpop.f32.mrb[17].mxu0  ;;  %v2157_v32 = vsel %vm101_vm1, %v2151_v11, 0.0  ;;  %v2346_v27 = vld [vmem:[%s17882_s2 + $0x100] sm:$0xff] }
 0x640   :  { %v2142_v50 = vadd.f32 %v12707_v8, %v2141_v13  ;;  %2158 = vadd.xlane.f32.xlu0 %v2157_v32  ;;  %v2154_v30 = vsel %vm101_vm1, %v2150_v46, 0.0  ;;  %v2342_v8 = vld [vmem:[%s17882_s2 + $0xe0] sm:$0xff] }
 0x641   :  { %2155 = vadd.xlane.f32.xlu1 %v2154_v30  ;;  %v2153_v55 = vadd.f32 %v2147_v60, %v15738_v54  ;;  %v14615_v10 = vpack.c.bf16 %v2342_v8, %v2341_v2 }
 0x642   :  { %v2152_v14 = vadd.f32 %v2142_v50, %v15731_v52 }
 0x643   :  { %v2163_v21 = vsel %vm101_vm1, %v2153_v55, 0.0  ;;  %14616 = vmatprep.subr.bf16.mxu0 %v14615_v10 }
 0x644   :  { %v2160_v43 = vsel %vm101_vm1, %v2152_v14, 0.0  ;;  %14618 = vmatpush3.bf16.msra.mxu0 %v14615_v10  ;;  %v12719_v10 = vld [vmem:[%s17882_s2 + $0x118] ss:$0 sm:$0xff] }
 0x645   :  { %2164 = vadd.xlane.f32.xlu1 %v2163_v21  ;;  %2161 = vadd.xlane.f32.xlu0 %v2160_v43 }
 0x646   :  { %14620 = vmatprep.subr.bf16.mxu0 %v14619_v18 }
 0x648   :  { %14622 = vmatpush3.bf16.msra.mxu0 %v14619_v18 }
 0x6cd   :  { %v2159_v42 = vpop.xlane.xlu0 %2158 }
 0x6ce   :  { %v2168_v61 = vmul.f32 0.0625, %v2159_v42  ;;  %v2156_v19 = vpop.xlane.xlu1 %2155 }
 0x6cf   :  { %v2167_v29 = vmul.f32 0.0625, %v2156_v19 }
 0x6d0   :  { %v16092_v20 = vsub.f32 %v2151_v11, %v2168_v61  ;;  %v2345_v11 = vld [vmem:[%s17882_s2 + $0xf8] sm:$0xff] }
 0x6d1   :  { %v16094_v23 = vsub.f32 %v2150_v46, %v2167_v29  ;;  %v14623_v46 = vpack.c.bf16 %v2346_v27, %v2345_v11 }
 0x6d2   :  { %v2162_v24 = vpop.xlane.xlu0 %2161  ;;  %v2165_v28 = vpop.xlane.xlu1 %2164  ;;  %v2176_v54 = vmul.f32 %v16092_v20, %v16092_v20 }
 0x6d3   :  { %v2169_v52 = vmul.f32 0.0625, %v2162_v24  ;;  %v2170_v33 = vmul.f32 0.0625, %v2165_v28  ;;  %v2175_v37 = vmul.f32 %v16094_v23, %v16094_v23  ;;  %14624 = vmatprep.subr.bf16.mxu0 %v14623_v46  ;;  %v12712_v24 = vld [vmem:[%s17882_s2 + $0x120] ss:$0 sm:$0xff] }
 0x6d4   :  { %v2182_v40 = vsel %vm101_vm1, %v2176_v54, 0.0  ;;  %14626 = vmatpush3.bf16.msra.mxu0 %v14623_v46 }
 0x6d5   :  { %v16101_v41 = vsub.f32 %v2152_v14, %v2169_v52  ;;  %v16103_v59 = vsub.f32 %v2153_v55, %v2170_v33  ;;  %2183 = vadd.xlane.f32.xlu1 %v2182_v40  ;;  %v2179_v45 = vsel %vm101_vm1, %v2175_v37, 0.0  ;;  %v12713_v33 = vld [vmem:[%s17882_s2 + $0x128] ss:$0 sm:$0xff] }
 0x6d6   :  { %2180 = vadd.xlane.f32.xlu0 %v2179_v45 }
 0x6d7   :  { %v2177_v47 = vmul.f32 %v16101_v41, %v16101_v41  ;;  %v2178_v39 = vmul.f32 %v16103_v59, %v16103_v59 }
 0x6d9   :  { %v2185_v48 = vsel %vm101_vm1, %v2177_v47, 0.0  ;;  %v2188_v62 = vsel %vm101_vm1, %v2178_v39, 0.0 }
 0x6da   :  { %2186 = vadd.xlane.f32.xlu0 %v2185_v48  ;;  %2189 = vadd.xlane.f32.xlu1 %v2188_v62 }
 0x762   :  { %v2184_v60 = vpop.xlane.xlu1 %2183 }
 0x763   :  { %v2192_v13 = vmul.f32 0.0625, %v2184_v60  ;;  %v2181_v32 = vpop.xlane.xlu0 %2180 }
 0x764   :  { %v2191_v50 = vmul.f32 0.0625, %v2181_v32 }
 0x765   :  { %v2196_v30 = vadd.f32 1e-05, %v2192_v13 }
 0x766   :  { %v2195_v55 = vadd.f32 1e-05, %v2191_v50 }
 0x767   :  { %15342 = vrsqrt.f32 %v2196_v30  ;;  %v2187_v14 = vpop.xlane.xlu0 %2186  ;;  %v2190_v21 = vpop.xlane.xlu1 %2189 }
 0x768   :  { %15344 = vrsqrt.f32 %v2195_v55  ;;  %v2193_v43 = vmul.f32 0.0625, %v2187_v14  ;;  %v2194_v42 = vmul.f32 0.0625, %v2190_v21 }
 0x76a   :  { %v2197_v61 = vadd.f32 1e-05, %v2193_v43  ;;  %v2198_v19 = vadd.f32 1e-05, %v2194_v42 }
 0x76c   :  { %15346 = vrsqrt.f32 %v2197_v61 }
 0x76d   :  { %15348 = vrsqrt.f32 %v2198_v19 }
 0x771   :  { %v15343_v29 = vpop.eup %15342 }
 0x772   :  { %v15345_v28 = vpop.eup %15344  ;;  %v2204_v54 = vmul.f32 %v15343_v29, %v16092_v20 }
 0x773   :  { %v2203_v52 = vmul.f32 %v15345_v28, %v16094_v23 }
 0x774   :  { %v2213_v37 = vmul.f32 %v12712_v24, %v2204_v54 }
 0x775   :  { %v2212_v40 = vmul.f32 %v12712_v24, %v2203_v52 }
 0x776   :  { %v15347_v45 = vpop.eup %15346  ;;  %v2222_v62 = vadd.f32 %v12713_v33, %v2213_v37 }
 0x777   :  { %v15349_v47 = vpop.eup %15348  ;;  %v2221_v39 = vadd.f32 %v12713_v33, %v2212_v40  ;;  %v2205_v48 = vmul.f32 %v15347_v45, %v16101_v41  ;;  %v2348_v41 = vld [vmem:[%s17882_s2 + $0x110] sm:$0xff] }
 0x778   :  { %v2206_v22 = vmul.f32 %v15349_v47, %v16103_v59  ;;  %v14627_v59 = vpack.c.bf16 %v2348_v41, %v2347_v56  ;;  %v2513_v56 = vld [vmem:[%s17882_s2 + $0x140] sm:$0xff]  ;;  %v2514_v41 = vld [vmem:[%s17882_s2 + $0x148] sm:$0xff] }
 0x779   :  { %13656 = vmatprep.mubr.msk.f32.mxu1 %vm101_vm1, %v2221_v39  ;;  %v2214_v1 = vmul.f32 %v12712_v24, %v2205_v48 }
 0x77a   :  { %13657 = vmatmul.mubr.msk.f32.vlgmr.msra.gmra.mrb[30].mxu1 %vm101_vm1, %v2222_v62  ;;  %v2215_v20 = vmul.f32 %v12712_v24, %v2206_v22  ;;  %14628 = vmatprep.subr.bf16.mxu0 %v14627_v59 }
 0x77b   :  { %v2223_v23 = vadd.f32 %v12713_v33, %v2214_v1  ;;  %14630 = vmatpush3.bf16.msra.mxu0 %v14627_v59  ;;  %v14631_v59 = vpack.c.bf16 %v2514_v41, %v2513_v56 }
 0x77c   :  { %v2224_v38 = vadd.f32 %v12713_v33, %v2215_v20 }
 0x77d   :  { %13659 = vmatprep.mubr.msk.f32.mxu1 %vm101_vm1, %v2223_v23  ;;  %14632 = vmatprep.subr.bf16.mxu1 %v14631_v59 }
 0x77e   :  { %13660 = vmatmul.mubr.msk.f32.gmra.mrb[32].mxu1 %vm101_vm1, %v2224_v38 }
 0x77f   :  { %14634 = vmatpush3.bf16.msra.mxu1 %v14631_v59 }
 0x84d   :  { %v13658_v51 = vpop.f32.mrb[30].mxu1 }
 0x84e   :  { %v2316_v25 = vadd.f32 %v13658_v51, %v12714_v57  ;;  %v2310_v34 = vpop.f32.mrb[31].mxu1  ;;  %v2618_v51 = vld [vmem:[%s17882_s2 + $0x160] sm:$0xff] }
 0x84f   :  { %v2311_v12 = vadd.f32 %v12714_v57, %v2310_v34 }
 0x850   :  { %v2330_v15 = vmax.f32 %v2316_v25, 0.0 }
 0x851   :  { %v2329_v26 = vmax.f32 %v2311_v12, 0.0  ;;  %v13661_v31 = vpop.f32.mrb[32].mxu1 }
 0x852   :  { %v2326_v63 = vadd.f32 %v13661_v31, %v12714_v57  ;;  %v2320_v9 = vpop.f32.mrb[33].mxu1 }
 0x853   :  { %v2321_v0 = vadd.f32 %v12714_v57, %v2320_v9  ;;  %13694 = vmatprep.mubr.f32.mxu0 %v2329_v26  ;;  %v2617_v57 = vld [vmem:[%s17882_s2 + $0x158] sm:$0xff] }
 0x854   :  { %13695 = vmatmul.mubr.f32.vlgmr.msra.gmra.mrb[18].mxu0 %v2330_v15  ;;  %v2332_v8 = vmax.f32 %v2326_v63, 0.0  ;;  %v14635_v25 = vpack.c.bf16 %v2618_v51, %v2617_v57  ;;  %v12732_v51 = vld [vmem:[%s17882_s2 + $0x180] ss:$0 sm:$0xff] }
 0x855   :  { %v2331_v2 = vmax.f32 %v2321_v0, 0.0 }
 0x856   :  { %14636 = vmatprep.subr.bf16.mxu1 %v14635_v25 }
 0x857   :  { %13697 = vmatprep.mubr.f32.mxu0 %v2331_v2 }
 0x858   :  { %13698 = vmatmul.mubr.f32.gmra.mrb[20].mxu0 %v2332_v8 }
 0x927   :  { %v13696_v58 = vpop.f32.mrb[18].mxu0 }
 0x928   :  { %v2426_v44 = vadd.f32 %v13696_v58, %v12719_v10  ;;  %v2420_v18 = vpop.f32.mrb[19].mxu0 }
 0x929   :  { %v2421_v11 = vadd.f32 %v12719_v10, %v2420_v18  ;;  %v12720_v18 = vld [vmem:[%s17882_s2 + $0x130] ss:$0 sm:$0xff] }
 0x92a   :  { %v2440_v27 = vadd.f32 %v2426_v44, %v2222_v62 }
 0x92b   :  { %v13699_v46 = vpop.f32.mrb[20].mxu0  ;;  %v2439_v60 = vadd.f32 %v2421_v11, %v2221_v39 }
 0x92c   :  { %v2436_v13 = vadd.f32 %v13699_v46, %v12719_v10  ;;  %v2430_v32 = vpop.f32.mrb[21].mxu0  ;;  %v2446_v50 = vsel %vm101_vm1, %v2440_v27, 0.0 }
 0x92d   :  { %v2431_v30 = vadd.f32 %v12719_v10, %v2430_v32  ;;  %2447 = vadd.xlane.f32.xlu1 %v2446_v50  ;;  %v2443_v55 = vsel %vm101_vm1, %v2439_v60, 0.0 }
 0x92e   :  { %2444 = vadd.xlane.f32.xlu0 %v2443_v55  ;;  %v2442_v14 = vadd.f32 %v2436_v13, %v2224_v38  ;;  %v12721_v13 = vld [vmem:[%s17882_s2 + $0x138] ss:$0 sm:$0xff] }
 0x92f   :  { %v2441_v21 = vadd.f32 %v2431_v30, %v2223_v23  ;;  %v2709_v30 = vld [vmem:[%s17882_s2 + $0x170] sm:$0xff]  ;;  %v2710_v55 = vld [vmem:[%s17882_s2 + $0x178] sm:$0xff] }
 0x930   :  { %v2452_v43 = vsel %vm101_vm1, %v2442_v14, 0.0 }
 0x931   :  { %2453 = vadd.xlane.f32.xlu1 %v2452_v43  ;;  %v2449_v42 = vsel %vm101_vm1, %v2441_v21, 0.0 }
 0x932   :  { %2450 = vadd.xlane.f32.xlu0 %v2449_v42 }
 0x9ba   :  { %v2448_v61 = vpop.xlane.xlu1 %2447 }
 0x9bb   :  { %v2456_v19 = vmul.f32 0.0625, %v2448_v61  ;;  %v2445_v29 = vpop.xlane.xlu0 %2444 }
 0x9bc   :  { %v2455_v24 = vmul.f32 0.0625, %v2445_v29  ;;  %v14639_v29 = vpack.c.bf16 %v2710_v55, %v2709_v30 }
 0x9bd   :  { %v2460_v28 = vsub.f32 %v2440_v27, %v2456_v19 }
 0x9be   :  { %v2459_v54 = vsub.f32 %v2439_v60, %v2455_v24  ;;  %v2454_v52 = vpop.xlane.xlu1 %2453 }
 0x9bf   :  { %v2458_v33 = vmul.f32 0.0625, %v2454_v52  ;;  %v2451_v37 = vpop.xlane.xlu0 %2450  ;;  %v2464_v40 = vmul.f32 %v2460_v28, %v2460_v28  ;;  %v12722_v52 = vld [vmem:[%s17882_s2 + $0x150] ss:$0 sm:$0xff] }
 0x9c0   :  { %v2457_v45 = vmul.f32 0.0625, %v2451_v37  ;;  %v2463_v47 = vmul.f32 %v2459_v54, %v2459_v54 }
 0x9c1   :  { %v2462_v39 = vsub.f32 %v2442_v14, %v2458_v33  ;;  %v2470_v48 = vsel %vm101_vm1, %v2464_v40, 0.0 }
 0x9c2   :  { %v2461_v62 = vsub.f32 %v2441_v21, %v2457_v45  ;;  %2471 = vadd.xlane.f32.xlu1 %v2470_v48  ;;  %v2467_v22 = vsel %vm101_vm1, %v2463_v47, 0.0  ;;  %v12727_v48 = vld [vmem:[%s17882_s2 + $0x168] ss:$0 sm:$0xff] }
 0x9c3   :  { %2468 = vadd.xlane.f32.xlu0 %v2467_v22  ;;  %v2466_v1 = vmul.f32 %v2462_v39, %v2462_v39 }
 0x9c4   :  { %v2465_v20 = vmul.f32 %v2461_v62, %v2461_v62 }
 0x9c5   :  { %v2476_v23 = vsel %vm101_vm1, %v2466_v1, 0.0 }
 0x9c6   :  { %2477 = vadd.xlane.f32.xlu1 %v2476_v23  ;;  %v2473_v38 = vsel %vm101_vm1, %v2465_v20, 0.0 }
 0x9c7   :  { %2474 = vadd.xlane.f32.xlu0 %v2473_v38 }
 0xa4f   :  { %v2472_v34 = vpop.xlane.xlu1 %2471 }
 0xa50   :  { %v2480_v12 = vmul.f32 0.0625, %v2472_v34  ;;  %v2469_v26 = vpop.xlane.xlu0 %2468 }
 0xa51   :  { %v2479_v31 = vmul.f32 0.0625, %v2469_v26 }
 0xa52   :  { %v2484_v15 = vadd.f32 1e-05, %v2480_v12 }
 0xa53   :  { %v2483_v63 = vadd.f32 1e-05, %v2479_v31  ;;  %v2478_v9 = vpop.xlane.xlu1 %2477 }
 0xa54   :  { %15350 = vrsqrt.f32 %v2484_v15  ;;  %v2482_v0 = vmul.f32 0.0625, %v2478_v9  ;;  %v2475_v2 = vpop.xlane.xlu0 %2474 }
 0xa55   :  { %15352 = vrsqrt.f32 %v2483_v63  ;;  %v2481_v8 = vmul.f32 0.0625, %v2475_v2 }
 0xa56   :  { %v2486_v10 = vadd.f32 1e-05, %v2482_v0 }
 0xa57   :  { %v2485_v58 = vadd.f32 1e-05, %v2481_v8 }
 0xa58   :  { %15354 = vrsqrt.f32 %v2486_v10 }
 0xa59   :  { %15356 = vrsqrt.f32 %v2485_v58 }
 0xa5e   :  { %v15351_v44 = vpop.eup %15350 }
 0xa5f   :  { %v15353_v11 = vpop.eup %15352  ;;  %v2492_v27 = vmul.f32 %v15351_v44, %v2460_v28 }
 0xa60   :  { %v2491_v46 = vmul.f32 %v15353_v11, %v2459_v54 }
 0xa61   :  { %v2501_v60 = vmul.f32 %v12720_v18, %v2492_v27 }
 0xa62   :  { %v15355_v32 = vpop.eup %15354  ;;  %v2500_v50 = vmul.f32 %v12720_v18, %v2491_v46 }
 0xa63   :  { %v15357_v14 = vpop.eup %15356  ;;  %v2494_v21 = vmul.f32 %v15355_v32, %v2462_v39  ;;  %v16220_v61 = vadd.f32 %v12721_v13, %v2501_v60 }
 0xa64   :  { %v16218_v43 = vadd.f32 %v12721_v13, %v2500_v50  ;;  %v2493_v42 = vmul.f32 %v15357_v14, %v2461_v62 }
 0xa65   :  { %v2503_v19 = vmul.f32 %v12720_v18, %v2494_v21 }
 0xa66   :  { %13704 = vmatprep.mubr.msk.f32.mxu1 %vm101_vm1, %v16218_v43  ;;  %v2502_v24 = vmul.f32 %v12720_v18, %v2493_v42 }
 0xa67   :  { %13705 = vmatmul.mubr.msk.f32.vlgmr.msra.gmra.mrb[34].mxu1 %vm101_vm1, %v16220_v61  ;;  %v16228_v54 = vadd.f32 %v12721_v13, %v2503_v19 }
 0xa68   :  { %14638 = vmatpush3.bf16.msra.mxu1 %v14635_v25  ;;  %v16226_v28 = vadd.f32 %v12721_v13, %v2502_v24 }
 0xa69   :  { %14640 = vmatprep.subr.bf16.mxu1 %v14639_v29 }
 0xa6a   :  { %13707 = vmatprep.mubr.msk.f32.mxu1 %vm101_vm1, %v16226_v28 }
 0xa6b   :  { %13708 = vmatmul.mubr.msk.f32.gmra.mrb[36].mxu1 %vm101_vm1, %v16228_v54 }
 0xa6c   :  { %13714 = vmatprep.mubr.msk.f32.mxu1 %vm101_vm1, %v16218_v43 }
 0xa6f   :  { %13715 = vmatmul.mubr.msk.f32.vlgmr.msra.gmra.mrb[38].mxu1 %vm101_vm1, %v16220_v61 }
 0xa70   :  { %13717 = vmatprep.mubr.msk.f32.mxu1 %vm101_vm1, %v16226_v28  ;;  %14642 = vmatpush3.bf16.msra.mxu1 %v14639_v29 }
 0xa73   :  { %13718 = vmatmul.mubr.msk.f32.gmra.mrb[40].mxu1 %vm101_vm1, %v16228_v54 }
 0xa74   :  { %13724 = vmatprep.mubr.msk.f32.mxu1 %vm101_vm1, %v16218_v43 }
 0xa77   :  { %13725 = vmatmul.mubr.msk.f32.vlgmr.msra.gmra.mrb[42].mxu1 %vm101_vm1, %v16220_v61 }
 0xa78   :  { %13727 = vmatprep.mubr.msk.f32.mxu1 %vm101_vm1, %v16226_v28 }
 0xa7b   :  { %13728 = vmatmul.mubr.msk.f32.gmra.mrb[44].mxu1 %vm101_vm1, %v16228_v54 }
 0xb3a   :  { %v13706_v33 = vpop.f32.mrb[34].mxu1 }
 0xb3b   :  { %v2598_v37 = vpop.f32.mrb[35].mxu1  ;;  %v2604_v63 = vadd.f32 %v13706_v33, %v12722_v52 }
 0xb3c   :  { %v2599_v40 = vadd.f32 %v12722_v52, %v2598_v37 }
 0xb3e   :  { %v13709_v45 = vpop.f32.mrb[36].mxu1  ;;  %13734 = vmatprep.mubr.msk.f32.mxu1 %vm479_vm2, %v2599_v40 }
 0xb3f   :  { %v2608_v47 = vpop.f32.mrb[37].mxu1  ;;  %v2614_v8 = vadd.f32 %v13709_v45, %v12722_v52 }
 0xb40   :  { %v2609_v39 = vadd.f32 %v12722_v52, %v2608_v47 }
 0xb42   :  { %v13716_v62 = vpop.f32.mrb[38].mxu1  ;;  %13741 = vmatprep.mubr.msk.f32.mxu0 %vm479_vm2, %v2609_v39 }
 0xb43   :  { %v2696_v22 = vadd.f32 %v13716_v62, %v12727_v48  ;;  %v2690_v1 = vpop.f32.mrb[39].mxu1 }
 0xb44   :  { %v2691_v20 = vadd.f32 %v12727_v48, %v2690_v1 }
 0xb46   :  { %v13719_v23 = vpop.f32.mrb[40].mxu1  ;;  %v15098_v38 = vpack.i.bf16 %v2696_v22, %v2691_v20  ;;  %v14643_v56 = vpack.c.bf16 %v2696_v22, %v2691_v20 }
 0xb47   :  { %v2706_v41 = vadd.f32 %v13719_v23, %v12727_v48  ;;  %v2700_v59 = vpop.f32.mrb[41].mxu1 }
 0xb48   :  { %v2701_v57 = vadd.f32 %v12727_v48, %v2700_v59  ;;  %15099 = vrot.lane.b32.xlu1 %v15098_v38, %s15617_s23  ;;  %15094 = vrot.lane.b32.xlu0 %v15098_v38, %s15616_s18 }
 0xb49   :  { %14645 = vmatprep.subr.msk.bf16.mxu1 %vm15769_vm3, %v14643_v56 }
 0xb4a   :  { %14648 = vmatpush3.bf16.xpose.msk.msra.mxu1 %vm15769_vm3, %v14643_v56  ;;  %v13726_v25 = vpop.f32.mrb[42].mxu1  ;;  %v14649_v34 = vpack.c.bf16 %v2706_v41, %v2701_v57  ;;  %v15103_v12 = vpack.i.bf16 %v2706_v41, %v2701_v57 }
 0xb4b   :  { %v2788_v26 = vadd.f32 %v13726_v25, %v12732_v51  ;;  %v2782_v31 = vpop.f32.mrb[43].mxu1 }
 0xb4c   :  { %v2783_v15 = vadd.f32 %v12732_v51, %v2782_v31  ;;  %14651 = vmatprep.subr.msk.bf16.mxu0 %vm15769_vm3, %v14649_v34  ;;  %15104 = vrot.lane.b32.xlu1 %v15103_v12, %s15616_s18 }
 0xb4d   :  { %2805 = vrot.lane.b32.xlu0 %v2599_v40, %s15616_s18  ;;  %14654 = vmatpush3.bf16.xpose.msk.msra.mxu0 %vm15769_vm3, %v14649_v34 }
 0xb4e   :  { %v13729_v9 = vpop.f32.mrb[44].mxu1  ;;  %v16273_v0 = vpack.i.bf16 %v2788_v26, %v2783_v15  ;;  %v16275_v2 = vpack.c.bf16 %v2788_v26, %v2783_v15 }
 0xb4f   :  { %v2798_v10 = vadd.f32 %v13729_v9, %v12732_v51  ;;  %v2792_v58 = vpop.f32.mrb[45].mxu1 }
 0xb50   :  { %v2793_v44 = vadd.f32 %v12732_v51, %v2792_v58  ;;  %2807 = vrot.lane.b32.xlu1 %v2604_v63, %s15616_s18 }
 0xb51   :  { %2811 = vrot.lane.b32.xlu0 %v2614_v8, %s15616_s18  ;;  %13735 = vmatmul.mubr.msk.f32.vlgmr.msra.gmra.mrb[46].mxu1 %vm479_vm2, %v2604_v63 }
 0xb52   :  { %v16280_v18 = vpack.i.bf16 %v2798_v10, %v2793_v44  ;;  %v16282_v11 = vpack.c.bf16 %v2798_v10, %v2793_v44 }
 0xb54   :  { %2809 = vrot.lane.b32.xlu1 %v2609_v39, %s15616_s18  ;;  %13742 = vmatmul.mubr.msk.f32.vlgmr.msra.gmra.mrb[22].mxu0 %vm479_vm2, %v2614_v8 }
 0xb55   :  { %15114 = vrot.lane.b32.xlu0 %v15103_v12, %s15617_s23 }
 0xb58   :  { %15109 = vrot.lane.b32.xlu1 %v15098_v38, %s15618_s24 }
 0xb59   :  { %2813 = vrot.lane.b32.xlu0 %v2599_v40, %s15617_s23 }
 0xb5c   :  { %2815 = vrot.lane.b32.xlu1 %v2604_v63, %s15617_s23 }
 0xb5d   :  { %15119 = vrot.lane.b32.xlu0 %v15103_v12, %s15618_s24 }
 0xb60   :  { %2817 = vrot.lane.b32.xlu1 %v2609_v39, %s15617_s23 }
 0xb61   :  { %2819 = vrot.lane.b32.xlu0 %v2614_v8, %s15617_s23 }
 0xb64   :  { %2821 = vrot.lane.b32.xlu1 %v2599_v40, %s15618_s24 }
 0xb65   :  { %2823 = vrot.lane.b32.xlu0 %v2604_v63, %s15618_s24 }
 0xb68   :  { %2825 = vrot.lane.b32.xlu1 %v2609_v39, %s15618_s24 }
 0xb69   :  { %2827 = vrot.lane.b32.xlu0 %v2614_v8, %s15618_s24 }
 0xb6c   :  { %15129 = vrot.lane.b32.xlu1 %v16280_v18, %s15616_s18 }
 0xb6d   :  { %15124 = vrot.lane.b32.xlu0 %v16273_v0, %s15616_s18 }
 0xbba   :  { %v15100_v27 = vpop.permute.xlu1 %15099  ;;  %v15095_v46 = vpop.permute.xlu0 %15094 }
 0xbbb   :  { %v15102_v60 = vunpack.i.h.bf16 %v15100_v27  ;;  %v15101_v13 = vunpack.i.l.bf16 %v15100_v27  ;;  %v15097_v32 = vunpack.i.h.bf16 %v15095_v46  ;;  %v15096_v50 = vunpack.i.l.bf16 %v15095_v46 }
 0xbbd   :  { %v14655_v30 = vpack.c.bf16 %v15097_v32, %v15096_v50  ;;  %v14667_v14 = vpack.c.bf16 %v15102_v60, %v15101_v13 }
 0xbbe   :  { %v15105_v55 = vpop.permute.xlu1 %15104 }
 0xbbf   :  { %v15107_v21 = vunpack.i.h.bf16 %v15105_v55  ;;  %v15106_v42 = vunpack.i.l.bf16 %v15105_v55  ;;  %v2806_v19 = vpop.permute.xlu0 %2805  ;;  %14657 = vmatprep.subr.msk.bf16.mxu1 %vm15769_vm3, %v14655_v30 }
 0xbc0   :  { %13748 = vmatprep.mubr.msk.f32.mxu1 %vm479_vm2, %v2806_v19  ;;  %14660 = vmatpush3.bf16.xpose.msk.msra.mxu1 %vm15769_vm3, %v14655_v30 }
 0xbc1   :  { %v14661_v29 = vpack.c.bf16 %v15107_v21, %v15106_v42  ;;  %14669 = vmatprep.subr.msk.bf16.mxu1 %vm15769_vm3, %v14667_v14 }
 0xbc2   :  { %v2808_v24 = vpop.permute.xlu1 %2807 }
 0xbc3   :  { %v2812_v52 = vpop.permute.xlu0 %2811  ;;  %14663 = vmatprep.subr.msk.bf16.mxu0 %vm15769_vm3, %v14661_v29 }
 0xbc4   :  { %14666 = vmatpush3.bf16.xpose.msk.msra.mxu0 %vm15769_vm3, %v14661_v29 }
 0xbc6   :  { %v2810_v33 = vpop.permute.xlu1 %2809 }
 0xbc7   :  { %v15115_v37 = vpop.permute.xlu0 %15114  ;;  %13749 = vmatmul.mubr.msk.f32.vlgmr.msra.gmra.mrb[48].mxu1 %vm479_vm2, %v2808_v24  ;;  %13755 = vmatprep.mubr.msk.f32.mxu0 %vm479_vm2, %v2810_v33 }
 0xbc8   :  { %v15117_v40 = vunpack.i.h.bf16 %v15115_v37  ;;  %v15116_v45 = vunpack.i.l.bf16 %v15115_v37  ;;  %14672 = vmatpush3.bf16.xpose.msk.msra.mxu1 %vm15769_vm3, %v14667_v14 }
 0xbca   :  { %v14673_v47 = vpack.c.bf16 %v15117_v40, %v15116_v45  ;;  %v15110_v39 = vpop.permute.xlu1 %15109 }
 0xbcb   :  { %v2814_v48 = vpop.permute.xlu0 %2813  ;;  %v15112_v62 = vunpack.i.h.bf16 %v15110_v39  ;;  %v15111_v22 = vunpack.i.l.bf16 %v15110_v39  ;;  %13756 = vmatmul.mubr.msk.f32.vlgmr.msra.gmra.mrb[24].mxu0 %vm479_vm2, %v2812_v52 }
 0xbcc   :  { %13762 = vmatprep.mubr.msk.f32.mxu1 %vm479_vm2, %v2814_v48  ;;  %14675 = vmatprep.subr.msk.bf16.mxu0 %vm15769_vm3, %v14673_v47 }
 0xbcd   :  { %v14679_v1 = vpack.c.bf16 %v15112_v62, %v15111_v22  ;;  %14678 = vmatpush3.bf16.xpose.msk.msra.mxu0 %vm15769_vm3, %v14673_v47 }
 0xbce   :  { %v2816_v20 = vpop.permute.xlu1 %2815 }
 0xbcf   :  { %v15120_v23 = vpop.permute.xlu0 %15119  ;;  %13763 = vmatmul.mubr.msk.f32.vlgmr.msra.gmra.mrb[50].mxu1 %vm479_vm2, %v2816_v20  ;;  %14681 = vmatprep.subr.msk.bf16.mxu1 %vm15769_vm3, %v14679_v1 }
 0xbd0   :  { %v15122_v38 = vunpack.i.h.bf16 %v15120_v23  ;;  %v15121_v56 = vunpack.i.l.bf16 %v15120_v23  ;;  %14684 = vmatpush3.bf16.xpose.msk.msra.mxu1 %vm15769_vm3, %v14679_v1 }
 0xbd1   :  { %14692 = vmatprep.subr.bf16.mxu1 %v16275_v2 }
 0xbd2   :  { %v14685_v41 = vpack.c.bf16 %v15122_v38, %v15121_v56  ;;  %v2818_v59 = vpop.permute.xlu1 %2817 }
 0xbd3   :  { %v2820_v57 = vpop.permute.xlu0 %2819  ;;  %13769 = vmatprep.mubr.msk.f32.mxu0 %vm479_vm2, %v2818_v59 }
 0xbd4   :  { %14687 = vmatprep.subr.msk.bf16.mxu0 %vm15769_vm3, %v14685_v41  ;;  %13770 = vmatmul.mubr.msk.f32.vlgmr.msra.gmra.mrb[26].mxu0 %vm479_vm2, %v2820_v57 }
 0xbd5   :  { %14690 = vmatpush3.bf16.xpose.msk.msra.mxu0 %vm15769_vm3, %v14685_v41 }
 0xbd6   :  { %v2822_v51 = vpop.permute.xlu1 %2821 }
 0xbd7   :  { %v2824_v25 = vpop.permute.xlu0 %2823  ;;  %13776 = vmatprep.mubr.msk.f32.mxu1 %vm479_vm2, %v2822_v51 }
 0xbd8   :  { %13777 = vmatmul.mubr.msk.f32.vlgmr.msra.gmra.mrb[52].mxu1 %vm479_vm2, %v2824_v25 }
 0xbd9   :  { %14694 = vmatpush3.bf16.msra.mxu1 %v16275_v2 }
 0xbda   :  { %14696 = vmatprep.subr.bf16.mxu1 %v16282_v11  ;;  %v2826_v34 = vpop.permute.xlu1 %2825 }
 0xbdb   :  { %v2828_v12 = vpop.permute.xlu0 %2827  ;;  %13783 = vmatprep.mubr.msk.f32.mxu0 %vm479_vm2, %v2826_v34 }
 0xbdc   :  { %13784 = vmatmul.mubr.msk.f32.vlgmr.msra.gmra.mrb[28].mxu0 %vm479_vm2, %v2828_v12 }
 0xbdf   :  { %v15125_v26 = vpop.permute.xlu0 %15124 }
 0xbe0   :  { %v15127_v31 = vunpack.i.h.bf16 %v15125_v26  ;;  %v15126_v15 = vunpack.i.l.bf16 %v15125_v26 }
 0xbe2   :  { %v14699_v63 = vpack.c.bf16 %v15127_v31, %v15126_v15 }
 0xbe4   :  { %14700 = vmatprep.subr.bf16.mxu0 %v14699_v63 }
 0xbe5   :  { %14702 = vmatpush3.bf16.msra.mxu0 %v14699_v63 }
 0xc24   :  { %v13736_v9 = vpop.f32.mrb[46].mxu1 }
 0xc25   :  { %v16340_v8 = vmul.f32 0.5, %v13736_v9  ;;  %v2971_v10 = vpop.f32.mrb[47].mxu1 }
 0xc26   :  { %v16342_v58 = vmul.f32 0.5, %v2971_v10 }
 0xc27   :  { %v3580_v2 = vsel %vm101_vm1, %v16340_v8, -inf  ;;  %v13743_v44 = vpop.f32.mrb[22].mxu0 }
 0xc28   :  { %3581 = vmax.xlane.f32.xlu0 %v3580_v2  ;;  %v16346_v27 = vmul.f32 0.5, %v13743_v44  ;;  %v3577_v46 = vsel %vm101_vm1, %v16342_v58, -inf  ;;  %v3054_v60 = vpop.f32.mrb[23].mxu0  ;;  %v16408_v2 = vpop.permute.xlu1 %15129 }
 0xc29   :  { %3578 = vmax.xlane.f32.xlu1 %v3577_v46  ;;  %v16352_v32 = vmul.f32 0.5, %v3054_v60 }
 0xc2a   :  { %v3586_v13 = vsel %vm101_vm1, %v16346_v27, -inf }
 0xc2b   :  { %v3583_v50 = vsel %vm101_vm1, %v16352_v32, -inf }
 0xc2c   :  { %3587 = vmax.xlane.f32.xlu0 %v3586_v13 }
 0xc30   :  { %3584 = vmax.xlane.f32.xlu0 %v3583_v50 }
 0xc9a   :  { %v13750_v30 = vpop.f32.mrb[48].mxu1 }
 0xc9b   :  { %v16356_v55 = vmul.f32 0.5, %v13750_v30  ;;  %v3137_v14 = vpop.f32.mrb[49].mxu1 }
 0xc9c   :  { %v16358_v21 = vmul.f32 0.5, %v3137_v14 }
 0xc9d   :  { %v3592_v42 = vsel %vm101_vm1, %v16356_v55, -inf }
 0xc9e   :  { %3593 = vmax.xlane.f32.xlu1 %v3592_v42  ;;  %v13757_v19 = vpop.f32.mrb[24].mxu0  ;;  %v3589_v33 = vsel %vm101_vm1, %v16358_v21, -inf }
 0xc9f   :  { %v16362_v29 = vmul.f32 0.5, %v13757_v19  ;;  %v3220_v24 = vpop.f32.mrb[25].mxu0 }
 0xca0   :  { %v16364_v52 = vmul.f32 0.5, %v3220_v24 }
 0xca1   :  { %v3598_v37 = vsel %vm101_vm1, %v16362_v29, -inf }
 0xca2   :  { %3590 = vmax.xlane.f32.xlu1 %v3589_v33  ;;  %v13764_v40 = vpop.f32.mrb[50].mxu1  ;;  %3599 = vmax.xlane.f32.xlu0 %v3598_v37  ;;  %v3595_v62 = vsel %vm101_vm1, %v16364_v52, -inf }
 0xca3   :  { %v16370_v45 = vmul.f32 0.5, %v13764_v40  ;;  %v3303_v47 = vpop.f32.mrb[51].mxu1 }
 0xca4   :  { %v16372_v39 = vmul.f32 0.5, %v3303_v47 }
 0xca5   :  { %v3604_v48 = vsel %vm101_vm1, %v16370_v45, -inf }
 0xca6   :  { %3605 = vmax.xlane.f32.xlu1 %v3604_v48  ;;  %3596 = vmax.xlane.f32.xlu0 %v3595_v62  ;;  %v3601_v23 = vsel %vm101_vm1, %v16372_v39, -inf }
 0xca7   :  { %v13771_v22 = vpop.f32.mrb[26].mxu0 }
 0xca8   :  { %v16378_v1 = vmul.f32 0.5, %v13771_v22  ;;  %v3386_v20 = vpop.f32.mrb[27].mxu0 }
 0xca9   :  { %v16382_v38 = vmul.f32 0.5, %v3386_v20 }
 0xcaa   :  { %3602 = vmax.xlane.f32.xlu1 %v3601_v23  ;;  %v3610_v56 = vsel %vm101_vm1, %v16378_v1, -inf }
 0xcab   :  { %v13778_v41 = vpop.f32.mrb[52].mxu1  ;;  %3611 = vmax.xlane.f32.xlu0 %v3610_v56  ;;  %v3607_v34 = vsel %vm101_vm1, %v16382_v38, -inf }
 0xcac   :  { %v16386_v59 = vmul.f32 0.5, %v13778_v41  ;;  %v3469_v57 = vpop.f32.mrb[53].mxu1 }
 0xcad   :  { %v16388_v51 = vmul.f32 0.5, %v3469_v57 }
 0xcae   :  { %v3616_v25 = vsel %vm101_vm1, %v16386_v59, -inf }
 0xcaf   :  { %3617 = vmax.xlane.f32.xlu1 %v3616_v25  ;;  %3608 = vmax.xlane.f32.xlu0 %v3607_v34  ;;  %v13785_v12 = vpop.f32.mrb[28].mxu0  ;;  %v3613_v63 = vsel %vm101_vm1, %v16388_v51, -inf }
 0xcb0   :  { %v3552_v26 = vpop.f32.mrb[29].mxu0  ;;  %v16396_v15 = vmul.f32 0.5, %v13785_v12 }
 0xcb1   :  { %v16394_v31 = vmul.f32 0.5, %v3552_v26 }
 0xcb2   :  { %v3622_v10 = vsel %vm101_vm1, %v16396_v15, -inf }
 0xcb3   :  { %3614 = vmax.xlane.f32.xlu1 %v3613_v63  ;;  %v3619_v9 = vsel %vm101_vm1, %v16394_v31, -inf }
 0xcb4   :  { %3620 = vmax.xlane.f32.xlu0 %v3619_v9 }
 0xcb5   :  { %v3582_v44 = vpop.xlane.xlu0 %3581 }
 0xcb6   :  { %v3579_v46 = vpop.xlane.xlu1 %3578  ;;  %v3626_v50 = vsub.f32 %v16340_v8, %v3582_v44 }
 0xcb7   :  { %3623 = vmax.xlane.f32.xlu1 %v3622_v10  ;;  %v3625_v13 = vsub.f32 %v16342_v58, %v3579_v46 }
 0xcb8   :  { %v3643_v19 = vmul.f32 1.442695, %v3626_v50 }
 0xcb9   :  { %v3588_v60 = vpop.xlane.xlu0 %3587  ;;  %v3641_v30 = vmul.f32 1.442695, %v3625_v13 }
 0xcba   :  { %v3628_v14 = vsub.f32 %v16346_v27, %v3588_v60 }
 0xcbb   :  { %15358 = vpow2.f32 %v3641_v30 }
 0xcbc   :  { %v3647_v24 = vmul.f32 1.442695, %v3628_v14  ;;  %15360 = vpow2.f32 %v3643_v19 }
 0xcbd   :  { %v3585_v42 = vpop.xlane.xlu0 %3584 }
 0xcbe   :  { %v3627_v33 = vsub.f32 %v16352_v32, %v3585_v42  ;;  %15362 = vpow2.f32 %v3647_v24 }
 0xcc0   :  { %v3645_v37 = vmul.f32 1.442695, %v3627_v33 }
 0xcc2   :  { %15364 = vpow2.f32 %v3645_v37 }
 0xcc5   :  { %v16414_v40 = vpop.eup %15358 }
 0xcc6   :  { %v16416_v47 = vpop.eup %15360  ;;  %v3673_v8 = vsel %vm101_vm1, %v16414_v40, 0.0 }
 0xcc7   :  { %v3676_v27 = vsel %vm101_vm1, %v16416_v47, 0.0 }
 0xcc8   :  { %15134 = vrot.lane.b32.xlu1 %v16273_v0, %s15617_s23  ;;  %v16420_v58 = vpop.eup %15362 }
 0xcc9   :  { %v3682_v32 = vsel %vm101_vm1, %v16420_v58, 0.0 }
 0xcca   :  { %15139 = vrot.lane.b32.xlu0 %v16280_v18, %s15617_s23 }
 0xccc   :  { %v16426_v48 = vpop.eup %15364 }
 0xccd   :  { %v3679_v62 = vsel %vm101_vm1, %v16426_v48, 0.0 }
 0xce9   :  { %3674 = vadd.xlane.f32.xlu0 %v3673_v8 }
 0xcec   :  { %3677 = vadd.xlane.f32.xlu1 %v3676_v27 }
 0xced   :  { %3683 = vadd.xlane.f32.xlu0 %v3682_v32 }
 0xcf1   :  { %3680 = vadd.xlane.f32.xlu0 %v3679_v62 }
 0xd2b   :  { %v3594_v22 = vpop.xlane.xlu1 %3593 }
 0xd2c   :  { %v3630_v20 = vsub.f32 %v16356_v55, %v3594_v22 }
 0xd2e   :  { %v3651_v23 = vmul.f32 1.442695, %v3630_v20 }
 0xd2f   :  { %v3591_v56 = vpop.xlane.xlu1 %3590  ;;  %v3600_v41 = vpop.xlane.xlu0 %3599 }
 0xd30   :  { %15366 = vpow2.f32 %v3651_v23  ;;  %v3629_v57 = vsub.f32 %v16358_v21, %v3591_v56  ;;  %v3632_v25 = vsub.f32 %v16362_v29, %v3600_v41 }
 0xd32   :  { %v3649_v34 = vmul.f32 1.442695, %v3629_v57  ;;  %v3655_v12 = vmul.f32 1.442695, %v3632_v25 }
 0xd33   :  { %v3606_v26 = vpop.xlane.xlu1 %3605  ;;  %v3597_v63 = vpop.xlane.xlu0 %3596 }
 0xd34   :  { %15368 = vpow2.f32 %v3649_v34  ;;  %v3634_v9 = vsub.f32 %v16370_v45, %v3606_v26  ;;  %v3631_v10 = vsub.f32 %v16364_v52, %v3597_v63 }
 0xd35   :  { %15370 = vpow2.f32 %v3655_v12 }
 0xd36   :  { %v3659_v44 = vmul.f32 1.442695, %v3634_v9  ;;  %v3653_v55 = vmul.f32 1.442695, %v3631_v10 }
 0xd37   :  { %v3603_v46 = vpop.xlane.xlu1 %3602 }
 0xd38   :  { %15372 = vpow2.f32 %v3659_v44  ;;  %v3633_v60 = vsub.f32 %v16372_v39, %v3603_v46  ;;  %v3612_v13 = vpop.xlane.xlu0 %3611 }
 0xd39   :  { %15374 = vpow2.f32 %v3653_v55  ;;  %v3636_v21 = vsub.f32 %v16378_v1, %v3612_v13 }
 0xd3a   :  { %v16437_v29 = vpop.eup %15366  ;;  %v3657_v50 = vmul.f32 1.442695, %v3633_v60 }
 0xd3b   :  { %v3663_v30 = vmul.f32 1.442695, %v3636_v21  ;;  %v3688_v45 = vsel %vm101_vm1, %v16437_v29, 0.0 }
 0xd3c   :  { %15376 = vpow2.f32 %v3657_v50  ;;  %v3618_v52 = vpop.xlane.xlu1 %3617  ;;  %v3609_v14 = vpop.xlane.xlu0 %3608  ;;  %3689 = vadd.xlane.f32.xlu1 %v3688_v45 }
 0xd3d   :  { %15378 = vpow2.f32 %v3663_v30  ;;  %v3638_v42 = vsub.f32 %v16386_v59, %v3618_v52  ;;  %v3635_v39 = vsub.f32 %v16382_v38, %v3609_v14 }
 0xd3e   :  { %v16443_v19 = vpop.eup %15368 }
 0xd3f   :  { %v16445_v24 = vpop.eup %15370  ;;  %v3667_v1 = vmul.f32 1.442695, %v3638_v42  ;;  %v3661_v33 = vmul.f32 1.442695, %v3635_v39  ;;  %v3685_v37 = vsel %vm101_vm1, %v16443_v19, 0.0 }
 0xd40   :  { %v3615_v8 = vpop.xlane.xlu1 %3614  ;;  %3686 = vadd.xlane.f32.xlu1 %v3685_v37  ;;  %v3694_v27 = vsel %vm101_vm1, %v16445_v24, 0.0 }
 0xd41   :  { %15380 = vpow2.f32 %v3667_v1  ;;  %v3637_v32 = vsub.f32 %v16388_v51, %v3615_v8  ;;  %3695 = vadd.xlane.f32.xlu0 %v3694_v27  ;;  %v3621_v59 = vpop.xlane.xlu0 %3620  ;;  %v15132_v27 = vunpack.i.h.bf16 %v16408_v2 }
 0xd42   :  { %v16452_v38 = vpop.eup %15372  ;;  %15382 = vpow2.f32 %v3661_v33  ;;  %v3639_v62 = vsub.f32 %v16394_v31, %v3621_v59 }
 0xd43   :  { %v16455_v22 = vpop.eup %15374  ;;  %v3665_v20 = vmul.f32 1.442695, %v3637_v32  ;;  %v3700_v23 = vsel %vm101_vm1, %v16452_v38, 0.0  ;;  %v15131_v32 = vunpack.i.l.bf16 %v16408_v2 }
 0xd44   :  { %v3669_v56 = vmul.f32 1.442695, %v3639_v62  ;;  %3701 = vadd.xlane.f32.xlu1 %v3700_v23  ;;  %v3624_v41 = vpop.xlane.xlu1 %3623  ;;  %v3691_v57 = vsel %vm101_vm1, %v16455_v22, 0.0 }
 0xd45   :  { %15384 = vpow2.f32 %v3665_v20  ;;  %v3640_v51 = vsub.f32 %v16396_v15, %v3624_v41  ;;  %3692 = vadd.xlane.f32.xlu0 %v3691_v57  ;;  %v15140_v14 = vpop.permute.xlu0 %15139  ;;  %v14703_v59 = vpack.c.bf16 %v15132_v27, %v15131_v32 }
 0xd46   :  { %v16462_v25 = vpop.eup %15376  ;;  %15386 = vpow2.f32 %v3669_v56  ;;  %v15142_v23 = vunpack.i.h.bf16 %v15140_v14  ;;  %v15141_v56 = vunpack.i.l.bf16 %v15140_v14 }
 0xd47   :  { %v16464_v31 = vpop.eup %15378  ;;  %v3671_v34 = vmul.f32 1.442695, %v3640_v51  ;;  %v3697_v12 = vsel %vm101_vm1, %v16462_v25, 0.0 }
 0xd48   :  { %3698 = vadd.xlane.f32.xlu1 %v3697_v12  ;;  %v15135_v26 = vpop.permute.xlu1 %15134  ;;  %v3706_v63 = vsel %vm101_vm1, %v16464_v31, 0.0  ;;  %v14711_v2 = vpack.c.bf16 %v15142_v23, %v15141_v56 }
 0xd49   :  { %15388 = vpow2.f32 %v3671_v34  ;;  %v15137_v9 = vunpack.i.h.bf16 %v15135_v26  ;;  %v15136_v10 = vunpack.i.l.bf16 %v15135_v26  ;;  %3707 = vadd.xlane.f32.xlu0 %v3706_v63 }
 0xd4b   :  { %v16470_v15 = vpop.eup %15380  ;;  %v16472_v44 = vpack.c.bf16 %v15137_v9, %v15136_v10 }
 0xd4c   :  { %v16474_v55 = vpop.eup %15382  ;;  %v3712_v46 = vsel %vm101_vm1, %v16470_v15, 0.0 }
 0xd4d   :  { %3713 = vadd.xlane.f32.xlu1 %v3712_v46  ;;  %14708 = vmatprep.subr.bf16.mxu0 %v16472_v44  ;;  %v3703_v60 = vsel %vm101_vm1, %v16474_v55, 0.0 }
 0xd4e   :  { %3704 = vadd.xlane.f32.xlu0 %v3703_v60 }
 0xd4f   :  { %v16481_v13 = vpop.eup %15384 }
 0xd50   :  { %v16483_v21 = vpop.eup %15386  ;;  %v3709_v50 = vsel %vm101_vm1, %v16481_v13, 0.0 }
 0xd51   :  { %3710 = vadd.xlane.f32.xlu1 %v3709_v50  ;;  %v3715_v30 = vsel %vm101_vm1, %v16483_v21, 0.0 }
 0xd52   :  { %3716 = vadd.xlane.f32.xlu0 %v3715_v30 }
 0xd53   :  { %v16489_v45 = vpop.eup %15388 }
 0xd54   :  { %v3718_v52 = vsel %vm101_vm1, %v16489_v45, 0.0 }
 0xd55   :  { %3719 = vadd.xlane.f32.xlu1 %v3718_v52 }
 0xd66   :  { %15144 = vrot.lane.b32.xlu1 %v16273_v0, %s15618_s24 }
 0xd68   :  { %15149 = vrot.lane.b32.xlu0 %v16280_v18, %s15618_s24 }
 0xd76   :  { %v3675_v42 = vpop.xlane.xlu0 %3674 }
 0xd77   :  { %15390 = vrcp.f32 %v3675_v42 }
 0xd79   :  { %v3678_v39 = vpop.xlane.xlu1 %3677 }
 0xd7a   :  { %15392 = vrcp.f32 %v3678_v39  ;;  %v3684_v1 = vpop.xlane.xlu0 %3683 }
 0xd7b   :  { %15394 = vrcp.f32 %v3684_v1 }
 0xd7e   :  { %v3681_v33 = vpop.xlane.xlu0 %3680 }
 0xd7f   :  { %15396 = vrcp.f32 %v3681_v33 }
 0xd81   :  { %v15391_v37 = vpop.eup %15390 }
 0xd82   :  { %v3737_v8 = vmul.f32 %v15391_v37, %v16414_v40 }
 0xd84   :  { %v15393_v0 = vpop.eup %15392  ;;  %13790 = vmatprep.mubr.msk.f32.mxu1 %vm101_vm1, %v3737_v8 }
 0xd85   :  { %v3738_v18 = vmul.f32 %v15393_v0, %v16416_v47  ;;  %v15395_v62 = vpop.eup %15394 }
 0xd86   :  { %v3740_v41 = vmul.f32 %v15395_v62, %v16420_v58 }
 0xd87   :  { %13791 = vmatmul.mubr.msk.f32.vlgmr.msra.gmra.mrb[54].mxu1 %vm101_vm1, %v3738_v18 }
 0xd88   :  { %14698 = vmatpush3.bf16.msra.mxu1 %v16282_v11 }
 0xd89   :  { %v15397_v20 = vpop.eup %15396  ;;  %14704 = vmatprep.subr.bf16.mxu1 %v14703_v59 }
 0xd8a   :  { %v3739_v40 = vmul.f32 %v15397_v20, %v16426_v48 }
 0xd8c   :  { %13797 = vmatprep.mubr.msk.f32.mxu1 %vm101_vm1, %v3739_v40 }
 0xd8d   :  { %13798 = vmatmul.mubr.msk.f32.vlgmr.msra.gmra.mrb[56].mxu1 %vm101_vm1, %v3740_v41 }
 0xd8e   :  { %14706 = vmatpush3.bf16.msra.mxu1 %v14703_v59 }
 0xd8f   :  { %14712 = vmatprep.subr.bf16.mxu1 %v14711_v2 }
 0xdc9   :  { %v3690_v47 = vpop.xlane.xlu1 %3689 }
 0xdca   :  { %15398 = vrcp.f32 %v3690_v47 }
 0xdcd   :  { %v3687_v57 = vpop.xlane.xlu1 %3686 }
 0xdce   :  { %15400 = vrcp.f32 %v3687_v57  ;;  %v3696_v11 = vpop.xlane.xlu0 %3695 }
 0xdcf   :  { %15402 = vrcp.f32 %v3696_v11 }
 0xdd1   :  { %v3702_v51 = vpop.xlane.xlu1 %3701 }
 0xdd2   :  { %v3693_v34 = vpop.xlane.xlu0 %3692 }
 0xdd3   :  { %15404 = vrcp.f32 %v3693_v34 }
 0xdd4   :  { %15406 = vrcp.f32 %v3702_v51  ;;  %v15399_v12 = vpop.eup %15398 }
 0xdd5   :  { %v3699_v48 = vpop.xlane.xlu1 %3698  ;;  %v3742_v10 = vmul.f32 %v15399_v12, %v16437_v29 }
 0xdd6   :  { %15408 = vrcp.f32 %v3699_v48  ;;  %v3708_v58 = vpop.xlane.xlu0 %3707 }
 0xdd7   :  { %15410 = vrcp.f32 %v3708_v58 }
 0xdd8   :  { %v15401_v26 = vpop.eup %15400 }
 0xdd9   :  { %v3741_v63 = vmul.f32 %v15401_v26, %v16443_v19  ;;  %v15403_v60 = vpop.eup %15402 }
 0xdda   :  { %v3714_v9 = vpop.xlane.xlu1 %3713  ;;  %v3744_v29 = vmul.f32 %v15403_v60, %v16445_v24 }
 0xddb   :  { %v3705_v46 = vpop.xlane.xlu0 %3704  ;;  %13804 = vmatprep.mubr.msk.f32.mxu0 %vm101_vm1, %v3741_v63 }
 0xddc   :  { %15412 = vrcp.f32 %v3705_v46  ;;  %13805 = vmatmul.mubr.msk.f32.vlgmr.msra.gmra.mrb[30].mxu0 %vm101_vm1, %v3742_v10 }
 0xddd   :  { %v15405_v50 = vpop.eup %15404  ;;  %14710 = vmatpush3.bf16.msra.mxu0 %v16472_v44  ;;  %15414 = vrcp.f32 %v3714_v9 }
 0xdde   :  { %v3711_v30 = vpop.xlane.xlu1 %3710  ;;  %v3743_v52 = vmul.f32 %v15405_v50, %v16455_v22  ;;  %v15407_v14 = vpop.eup %15406 }
 0xddf   :  { %15416 = vrcp.f32 %v3711_v30  ;;  %v3717_v19 = vpop.xlane.xlu0 %3716  ;;  %v3746_v44 = vmul.f32 %v15407_v14, %v16452_v38 }
 0xde0   :  { %v15409_v42 = vpop.eup %15408  ;;  %13811 = vmatprep.mubr.msk.f32.mxu1 %vm101_vm1, %v3743_v52  ;;  %15418 = vrcp.f32 %v3717_v19 }
 0xde1   :  { %13812 = vmatmul.mubr.msk.f32.vlgmr.msra.gmra.mrb[58].mxu1 %vm101_vm1, %v3744_v29  ;;  %v3745_v39 = vmul.f32 %v15409_v42, %v16462_v25  ;;  %v15411_v24 = vpop.eup %15410 }
 0xde2   :  { %14714 = vmatpush3.bf16.msra.mxu1 %v14711_v2  ;;  %v3720_v1 = vpop.xlane.xlu1 %3719  ;;  %v3748_v38 = vmul.f32 %v15411_v24, %v16464_v31 }
 0xde3   :  { %15420 = vrcp.f32 %v3720_v1  ;;  %13818 = vmatprep.mubr.msk.f32.mxu0 %vm101_vm1, %v3745_v39  ;;  %v15150_v22 = vpop.permute.xlu0 %15149 }
 0xde4   :  { %v15152_v33 = vunpack.i.h.bf16 %v15150_v22  ;;  %v15151_v37 = vunpack.i.l.bf16 %v15150_v22  ;;  %13819 = vmatmul.mubr.msk.f32.vlgmr.msra.gmra.mrb[32].mxu0 %vm101_vm1, %v3746_v44 }
 0xde6   :  { %v15413_v8 = vpop.eup %15412  ;;  %v15145_v27 = vpop.permute.xlu1 %15144  ;;  %v14719_v32 = vpack.c.bf16 %v15152_v33, %v15151_v37 }
 0xde7   :  { %v15147_v0 = vunpack.i.h.bf16 %v15145_v27  ;;  %v15146_v18 = vunpack.i.l.bf16 %v15145_v27  ;;  %v3747_v25 = vmul.f32 %v15413_v8, %v16474_v55  ;;  %v15415_v59 = vpop.eup %15414 }
 0xde8   :  { %14720 = vmatprep.subr.bf16.mxu1 %v14719_v32  ;;  %v3750_v31 = vmul.f32 %v15415_v59, %v16470_v15  ;;  %v4461_v15 = vld [vmem:[%s17882_s2 + $0x188] sm:$0xff] }
 0xde9   :  { %v15417_v62 = vpop.eup %15416  ;;  %13825 = vmatprep.mubr.msk.f32.mxu1 %vm101_vm1, %v3747_v25  ;;  %v14715_v20 = vpack.c.bf16 %v15147_v0, %v15146_v18 }
 0xdea   :  { %v15419_v23 = vpop.eup %15418  ;;  %13826 = vmatmul.mubr.msk.f32.vlgmr.msra.gmra.mrb[60].mxu1 %vm101_vm1, %v3748_v38  ;;  %v3749_v56 = vmul.f32 %v15417_v62, %v16481_v13 }
 0xdeb   :  { %14722 = vmatpush3.bf16.msra.mxu1 %v14719_v32  ;;  %14716 = vmatprep.subr.bf16.mxu0 %v14715_v20  ;;  %v3751_v40 = vmul.f32 %v15419_v23, %v16483_v21  ;;  %v12785_v23 = vld [vmem:[%s17882_s2 + $0x198] ss:$0 sm:$0xff] }
 0xdec   :  { %14718 = vmatpush3.bf16.msra.mxu0 %v14715_v20  ;;  %13832 = vmatprep.mubr.msk.f32.mxu0 %vm101_vm1, %v3749_v56 }
 0xded   :  { %v15421_v55 = vpop.eup %15420  ;;  %13839 = vmatprep.mubr.msk.f32.mxu1 %vm101_vm1, %v3751_v40 }
 0xdee   :  { %v3752_v41 = vmul.f32 %v15421_v55, %v16489_v45  ;;  %v4462_v45 = vld [vmem:[%s17882_s2 + $0x190] sm:$0xff] }
 0xdef   :  { %13833 = vmatmul.mubr.msk.f32.vlgmr.msra.gmra.mrb[34].mxu0 %vm101_vm1, %v3750_v31  ;;  %v14723_v51 = vpack.c.bf16 %v4462_v45, %v4461_v15 }
 0xdf0   :  { %13840 = vmatmul.mubr.msk.f32.vlgmr.msra.gmra.mrb[62].mxu1 %vm101_vm1, %v3752_v41 }
 0xdf1   :  { %14724 = vmatprep.subr.bf16.mxu0 %v14723_v51 }
 0xdf2   :  { %14726 = vmatpush3.bf16.msra.mxu0 %v14723_v51 }
 0xe5a   :  { %v13792_v2 = vpop.f32.mrb[54].mxu1 }
 0xe5b   :  { %v3825_v13 = vpop.f32.mrb[55].mxu1 }
 0xe60   :  { %v13799_v47 = vpop.f32.mrb[56].mxu1 }
 0xe61   :  { %v3906_v57 = vpop.f32.mrb[57].mxu1 }
 0xeaf   :  { %v13806_v11 = vpop.f32.mrb[30].mxu0 }
 0xeb0   :  { %v3987_v21 = vpop.f32.mrb[31].mxu0  ;;  %4407 = vrot.lane.b32.xlu0 %v13806_v11, %s15619_s25 }
 0xeb1   :  { %4405 = vrot.lane.b32.xlu1 %v3987_v21, %s15619_s25 }
 0xeb4   :  { %v13813_v34 = vpop.f32.mrb[58].mxu1 }
 0xeb5   :  { %4411 = vrot.lane.b32.xlu0 %v13813_v34, %s15619_s25  ;;  %v4068_v48 = vpop.f32.mrb[59].mxu1 }
 0xeb6   :  { %4409 = vrot.lane.b32.xlu1 %v4068_v48, %s15619_s25 }
 0xeb7   :  { %v13820_v58 = vpop.f32.mrb[32].mxu0 }
 0xeb8   :  { %v4149_v12 = vpop.f32.mrb[33].mxu0 }
 0xeb9   :  { %4423 = vrot.lane.b32.xlu0 %v13820_v58, %s15620_s30 }
 0xeba   :  { %4421 = vrot.lane.b32.xlu1 %v4149_v12, %s15620_s30 }
 0xebd   :  { %v13827_v26 = vpop.f32.mrb[60].mxu1 }
 0xebe   :  { %4427 = vrot.lane.b32.xlu0 %v13827_v26, %s15620_s30  ;;  %v4230_v63 = vpop.f32.mrb[61].mxu1 }
 0xebf   :  { %4425 = vrot.lane.b32.xlu1 %v4230_v63, %s15620_s30 }
 0xec2   :  { %v13834_v9 = vpop.f32.mrb[34].mxu0 }
 0xec3   :  { %v4311_v10 = vpop.f32.mrb[35].mxu0  ;;  %4439 = vrot.lane.b32.xlu0 %v13834_v9, %s15621_s0  ;;  %v13841_v46 = vpop.f32.mrb[62].mxu1 }
 0xec4   :  { %4437 = vrot.lane.b32.xlu1 %v4311_v10, %s15621_s0  ;;  %v4392_v60 = vpop.f32.mrb[63].mxu1 }
 0xec7   :  { %4443 = vrot.lane.b32.xlu0 %v13841_v46, %s15621_s0 }
 0xec8   :  { %4441 = vrot.lane.b32.xlu1 %v4392_v60, %s15621_s0 }
 0xf22   :  { %v4408_v50 = vpop.permute.xlu0 %4407 }
 0xf23   :  { %v4406_v30 = vpop.permute.xlu1 %4405  ;;  %v4450_v22 = vsel %vm479_vm2, %v13792_v2, %v4408_v50 }
 0xf24   :  { %v4449_v1 = vsel %vm479_vm2, %v3825_v13, %v4406_v30 }
 0xf27   :  { %v4412_v52 = vpop.permute.xlu0 %4411 }
 0xf28   :  { %v4410_v14 = vpop.permute.xlu1 %4409  ;;  %v4452_v18 = vsel %vm479_vm2, %v13799_v47, %v4412_v52 }
 0xf29   :  { %v4451_v32 = vsel %vm479_vm2, %v3906_v57, %v4410_v14 }
 0xf2b   :  { %v4424_v19 = vpop.permute.xlu0 %4423 }
 0xf2c   :  { %v4422_v29 = vpop.permute.xlu1 %4421  ;;  %v4454_v24 = vsel %vm2036_vm4, %v4450_v22, %v4424_v19  ;;  %v4639_v22 = vld [vmem:[%s17883_s3 + $0x18] sm:$0xff] }
 0xf2d   :  { %v4453_v33 = vsel %vm2036_vm4, %v4449_v1, %v4422_v29  ;;  %v4931_v1 = vld [vmem:[%s17881_s1] sm:$0xff] }
 0xf30   :  { %v4428_v42 = vpop.permute.xlu0 %4427 }
 0xf31   :  { %v4426_v39 = vpop.permute.xlu1 %4425  ;;  %v4456_v38 = vsel %vm2036_vm4, %v4452_v18, %v4428_v42  ;;  %v4750_v18 = vld [vmem:[%s17882_s2 + $0x1b8] sm:$0xff] }
 0xf32   :  { %v4455_v25 = vsel %vm2036_vm4, %v4451_v32, %v4426_v39  ;;  %v4749_v32 = vld [vmem:[%s17882_s2 + $0x1b0] sm:$0xff] }
 0xf35   :  { %v4440_v44 = vpop.permute.xlu0 %4439 }
 0xf36   :  { %v4438_v37 = vpop.permute.xlu1 %4437  ;;  %v4458_v27 = vsel %vm2041_vm5, %v4454_v24, %v4440_v44  ;;  %v4932_v44 = vld [vmem:[%s17881_s1 + $0x8] sm:$0xff]  ;;  %s12632_s1 = sshll.u32 %s15625_s27, 4  ;;  %s12633_s1 = int_to_ptr.vmem [resolvable:$true] %s12632_s1 }
 0xf37   :  { %v4457_v8 = vsel %vm2041_vm5, %v4453_v33, %v4438_v37  ;;  %v4640_v33 = vld [vmem:[%s17883_s3 + $0x20] sm:$0xff]  ;;  %p15595_p1 = scmp.lt.s32.totalorder %s12633_s1, %s12633_s1 }
 0xf38   :  { %13846 = vmatprep.mubr.msk.f32.mxu0 %vm101_vm1, %v4457_v8  ;;  %v14727_v37 = vpack.c.bf16 %v4640_v33, %v4639_v22  ;;  %v4747_v8 = vld [vmem:[%s17882_s2 + $0x1a0] sm:$0xff] }
 0xf39   :  { %13847 = vmatmul.mubr.msk.f32.vlgmr.msra.gmra.mrb[36].mxu0 %vm101_vm1, %v4458_v27  ;;  %v4444_v0 = vpop.permute.xlu0 %4443  ;;  %v4748_v27 = vld [vmem:[%s17882_s2 + $0x1a8] sm:$0xff] }
 0xf3a   :  { %v4442_v59 = vpop.permute.xlu1 %4441  ;;  %v4460_v20 = vsel %vm2041_vm5, %v4456_v38, %v4444_v0  ;;  %14728 = vmatprep.subr.bf16.mxu1 %v14727_v37  ;;  %v14731_v0 = vpack.c.bf16 %v4748_v27, %v4747_v8  ;;  %v4752_v38 = vld [vmem:[%s17882_s2 + $0x1c8] sm:$0xff]  ;;  %v5064_v8 = vld [vmem:[%s17882_s2 + $0x260] sm:$0xff] }
 0xf3b   :  { %v4459_v62 = vsel %vm2041_vm5, %v4455_v25, %v4442_v59  ;;  %14730 = vmatpush3.bf16.msra.mxu1 %v14727_v37  ;;  %v14735_v25 = vpack.c.bf16 %v4750_v18, %v4749_v32  ;;  %v4751_v59 = vld [vmem:[%s17882_s2 + $0x1c0] sm:$0xff] }
 0xf3c   :  { %13849 = vmatprep.mubr.msk.f32.mxu0 %vm101_vm1, %v4459_v62  ;;  %14732 = vmatprep.subr.bf16.mxu0 %v14731_v0  ;;  %v14739_v62 = vpack.c.bf16 %v4752_v38, %v4751_v59 }
 0xf3d   :  { %13850 = vmatmul.mubr.msk.f32.gmra.mrb[38].mxu0 %vm101_vm1, %v4460_v20  ;;  %v4753_v20 = vld [vmem:[%s17882_s2 + $0x1d0] sm:$0xff] }
 0xf3e   :  { %14734 = vmatpush3.bf16.msra.mxu0 %v14731_v0 }
 0xf3f   :  { %14736 = vmatprep.subr.bf16.mxu0 %v14735_v25 }
 0xf42   :  { %14738 = vmatpush3.bf16.msra.mxu0 %v14735_v25 }
 0xf43   :  { %14740 = vmatprep.subr.bf16.mxu0 %v14739_v62 }
 0xf46   :  { %14742 = vmatpush3.bf16.msra.mxu0 %v14739_v62 }
0x100c   :  { %v13848_v56 = vpop.f32.mrb[36].mxu0 }
0x100d   :  { %v4552_v40 = vadd.f32 %v13848_v56, %v12785_v23  ;;  %v4546_v55 = vpop.f32.mrb[37].mxu0 }
0x100e   :  { %v4547_v31 = vadd.f32 %v12785_v23, %v4546_v55  ;;  %v4756_v55 = vld [vmem:[%s17882_s2 + $0x1e8] sm:$0xff] }
0x100f   :  { %v4566_v41 = vadd.f32 %v4552_v40, %v16220_v61  ;;  %v4755_v40 = vld [vmem:[%s17882_s2 + $0x1e0] sm:$0xff] }
0x1010   :  { %v4565_v2 = vadd.f32 %v4547_v31, %v16218_v43  ;;  %v13851_v13 = vpop.f32.mrb[38].mxu0  ;;  %v14747_v31 = vpack.c.bf16 %v4756_v55, %v4755_v40 }
0x1011   :  { %v4562_v47 = vadd.f32 %v13851_v13, %v12785_v23  ;;  %v4556_v57 = vpop.f32.mrb[39].mxu0  ;;  %v4572_v11 = vsel %vm101_vm1, %v4566_v41, 0.0 }
0x1012   :  { %v4557_v21 = vadd.f32 %v12785_v23, %v4556_v57  ;;  %4573 = vadd.xlane.f32.xlu0 %v4572_v11  ;;  %v4569_v15 = vsel %vm101_vm1, %v4565_v2, 0.0  ;;  %v4754_v23 = vld [vmem:[%s17882_s2 + $0x1d8] sm:$0xff]  ;;  %v4760_v57 = vld [vmem:[%s17882_s2 + $0x208] sm:$0xff] }
0x1013   :  { %v4568_v45 = vadd.f32 %v4562_v47, %v16228_v54  ;;  %4570 = vadd.xlane.f32.xlu1 %v4569_v15  ;;  %v14743_v56 = vpack.c.bf16 %v4754_v23, %v4753_v20  ;;  %v4759_v47 = vld [vmem:[%s17882_s2 + $0x200] sm:$0xff] }
0x1014   :  { %v4567_v51 = vadd.f32 %v4557_v21, %v16226_v28  ;;  %v14755_v11 = vpack.c.bf16 %v4760_v57, %v4759_v47  ;;  %v4761_v47 = vld [vmem:[%s17882_s2 + $0x210] sm:$0xff]  ;;  %v4762_v57 = vld [vmem:[%s17882_s2 + $0x218] sm:$0xff] }
0x1015   :  { %v4578_v34 = vsel %vm101_vm1, %v4568_v45, 0.0  ;;  %14744 = vmatprep.subr.bf16.mxu0 %v14743_v56 }
0x1016   :  { %v4575_v61 = vsel %vm101_vm1, %v4567_v51, 0.0  ;;  %14746 = vmatpush3.bf16.msra.mxu0 %v14743_v56  ;;  %v4973_v56 = vld [vmem:[%s17882_s2 + $0x30] sm:$0xff] }
0x1017   :  { %4579 = vadd.xlane.f32.xlu1 %v4578_v34  ;;  %4576 = vadd.xlane.f32.xlu0 %v4575_v61 }
0x1018   :  { %14748 = vmatprep.subr.bf16.mxu0 %v14747_v31 }
0x101a   :  { %14750 = vmatpush3.bf16.msra.mxu0 %v14747_v31 }
0x109f   :  { %v4574_v43 = vpop.xlane.xlu0 %4573 }
0x10a0   :  { %v4582_v48 = vmul.f32 0.0625, %v4574_v43  ;;  %v4571_v58 = vpop.xlane.xlu1 %4570 }
0x10a1   :  { %v4581_v12 = vmul.f32 0.0625, %v4571_v58 }
0x10a2   :  { %v16578_v26 = vsub.f32 %v4566_v41, %v4582_v48  ;;  %v4757_v41 = vld [vmem:[%s17882_s2 + $0x1f0] sm:$0xff] }
0x10a3   :  { %v16580_v63 = vsub.f32 %v4565_v2, %v4581_v12  ;;  %v4758_v2 = vld [vmem:[%s17882_s2 + $0x1f8] sm:$0xff] }
0x10a4   :  { %v4577_v9 = vpop.xlane.xlu0 %4576  ;;  %v4580_v10 = vpop.xlane.xlu1 %4579  ;;  %v4590_v54 = vmul.f32 %v16578_v26, %v16578_v26  ;;  %v14751_v13 = vpack.c.bf16 %v4758_v2, %v4757_v41  ;;  %v5146_v41 = vld [vmem:[%s17882_s2 + $0x278] sm:$0xff] }
0x10a5   :  { %v4583_v28 = vmul.f32 0.0625, %v4577_v9  ;;  %v4584_v46 = vmul.f32 0.0625, %v4580_v10  ;;  %v4589_v60 = vmul.f32 %v16580_v63, %v16580_v63 }
0x10a6   :  { %v4596_v50 = vsel %vm101_vm1, %v4590_v54, 0.0  ;;  %14752 = vmatprep.subr.bf16.mxu0 %v14751_v13  ;;  %v4933_v54 = vld [vmem:[%s17882_s2 + $0x10] sm:$0x3] }
0x10a7   :  { %v16587_v30 = vsub.f32 %v4567_v51, %v4583_v28  ;;  %v16589_v52 = vsub.f32 %v4568_v45, %v4584_v46  ;;  %4597 = vadd.xlane.f32.xlu1 %v4596_v50  ;;  %v4593_v14 = vsel %vm101_vm1, %v4589_v60, 0.0  ;;  %14754 = vmatpush3.bf16.msra.mxu0 %v14751_v13  ;;  %v4961_v46 = vrot.slane %v4933_v54, %v69_v17 }
0x10a8   :  { %4594 = vadd.xlane.f32.xlu0 %v4593_v14  ;;  %14756 = vmatprep.subr.bf16.mxu0 %v14755_v11  ;;  %v4947_v60 = vrot.slane %v4933_v54, %v45_v16  ;;  %v12801_v54 = vld [vmem:[%s17882_s2 + $0x258] ss:$0 sm:$0xff] }
0x10a9   :  { %v4591_v19 = vmul.f32 %v16587_v30, %v16587_v30  ;;  %v4592_v29 = vmul.f32 %v16589_v52, %v16589_v52 }
0x10ab   :  { %v4599_v42 = vsel %vm101_vm1, %v4591_v19, 0.0  ;;  %v4602_v39 = vsel %vm101_vm1, %v4592_v29, 0.0  ;;  %14758 = vmatpush3.bf16.msra.mxu0 %v14755_v11  ;;  %v14759_v11 = vpack.c.bf16 %v4762_v57, %v4761_v47 }
0x10ac   :  { %4600 = vadd.xlane.f32.xlu0 %v4599_v42  ;;  %4603 = vadd.xlane.f32.xlu1 %v4602_v39  ;;  %v12790_v39 = vld [vmem:[%s17882_s2 + $0x228] ss:$0 sm:$0xff] }
0x10ad   :  { %14760 = vmatprep.subr.bf16.mxu0 %v14759_v11 }
0x10af   :  { %14762 = vmatpush3.bf16.msra.mxu0 %v14759_v11 }
0x10bd   :  { %4951 = vperm.xlu1 %15154, %v4931_v1  }
0x10c1   :  { %15155 = vset.pattern.permute.xlu1 %v15614_v3  ;;  %v4976_v3 = vld [vmem:[%s17882_s2 + $0x248] sm:$0xff] }
0x10c2   :  { %4936 = vperm.xlu0 %15153, %v4931_v1   ;;  %4941 = vperm.xlu1 %15155, %v4932_v44  }
0x10c6   :  { %15156 = vset.pattern.permute.xlu1 %v15615_v7  ;;  %15277 = vset.pattern.permute.xlu0 %v15615_v7  ;;  %v4977_v7 = vld [vmem:[%s17882_s2 + $0x250] sm:$0xff] }
0x10c7   :  { %4955 = vperm.xlu1 %15156, %v4932_v44   ;;  %v16619_v24 = vpack.c.bf16 %v4977_v7, %v4976_v3 }
0x10c9   :  { %14764 = vmatprep.subr.bf16.mxu1 %v16619_v24 }
0x1134   :  { %v4598_v21 = vpop.xlane.xlu1 %4597 }
0x1135   :  { %v4606_v15 = vmul.f32 0.0625, %v4598_v21  ;;  %v4595_v45 = vpop.xlane.xlu0 %4594  ;;  %v15622_v21 = vmov 0.0  }
0x1136   :  { %v4605_v51 = vmul.f32 0.0625, %v4595_v45  ;;  %13946 = vmatprep.subr.mxu0 %v15622_v21 }
0x1137   :  { %v4610_v34 = vadd.f32 1e-05, %v4606_v15  ;;  %v12792_v15 = vld [vmem:[%s17883_s3 + $0x28] ss:$0 sm:$0xff] }
0x1138   :  { %v4609_v61 = vadd.f32 1e-05, %v4605_v51 }
0x1139   :  { %15422 = vrsqrt.f32 %v4610_v34  ;;  %v4601_v43 = vpop.xlane.xlu0 %4600  ;;  %v4604_v48 = vpop.xlane.xlu1 %4603 }
0x113a   :  { %15424 = vrsqrt.f32 %v4609_v61  ;;  %v4607_v58 = vmul.f32 0.0625, %v4601_v43  ;;  %v4608_v12 = vmul.f32 0.0625, %v4604_v48 }
0x113c   :  { %v4611_v9 = vadd.f32 1e-05, %v4607_v58  ;;  %v4612_v10 = vadd.f32 1e-05, %v4608_v12 }
0x113d   :  { %v4952_v28 = vpop.permute.xlu1 %4951 }
0x113e   :  { %15426 = vrsqrt.f32 %v4611_v9  ;;  %v4962_v29 = vmul.f32 %v4961_v46, %v4952_v28 }
0x113f   :  { %15428 = vrsqrt.f32 %v4612_v10 }
0x1141   :  { %v4937_v50 = vpop.permute.xlu0 %4936  ;;  %v4942_v14 = vpop.permute.xlu1 %4941 }
0x1142   :  { %v4948_v42 = vmul.f32 %v4947_v60, %v4937_v50  ;;  %v4949_v33 = vmul.f32 %v4947_v60, %v4942_v14 }
0x1143   :  { %v15423_v19 = vpop.eup %15422 }
0x1144   :  { %v15425_v1 = vpop.eup %15424  ;;  %v4618_v44 = vmul.f32 %v15423_v19, %v16578_v26  ;;  %v4964_v17 = vadd.f32 %v4962_v29, %v4948_v42  ;;  %v5065_v26 = vld [vmem:[%s17882_s2 + $0x268] sm:$0xff]  ;;  %v12804_v19 = vld [vmem:[%s17882_s2 + $0x270] ss:$0 sm:$0xff] }
0x1145   :  { %v4617_v22 = vmul.f32 %v15425_v1, %v16580_v63  ;;  %v12800_v63 = vld [vmem:[%s17882_s2 + $0x18] ss:$0 sm:$0xff]  ;;  %v14767_v62 = vpack.c.bf16 %v5065_v26, %v5064_v8  ;;  %v12807_v26 = vld [vmem:[%s17882_s2 + $0x288] ss:$0 sm:$0xff] }
0x1146   :  { %v4956_v37 = vpop.permute.xlu1 %4955  ;;  %v4627_v16 = vmul.f32 %v12790_v39, %v4618_v44  ;;  %v16694_v20 = vadd.f32 %v12800_v63, %v4964_v17 }
0x1147   :  { %v4963_v3 = vmul.f32 %v4961_v46, %v4956_v37  ;;  %v4626_v7 = vmul.f32 %v12790_v39, %v4617_v22 }
0x1148   :  { %v15427_v27 = vpop.eup %15426  ;;  %v16691_v59 = vadd.f32 %v12791_v4, %v4627_v16  ;;  %v16713_v31 = vadd.f32 %v4973_v56, %v16694_v20 }
0x1149   :  { %v15429_v32 = vpop.eup %15428  ;;  %v16688_v0 = vadd.f32 %v12791_v4, %v4626_v7  ;;  %v4619_v18 = vmul.f32 %v15427_v27, %v16587_v30  ;;  %v4965_v25 = vadd.f32 %v4963_v3, %v4949_v33 }
0x114a   :  { %v4620_v38 = vmul.f32 %v15429_v32, %v16589_v52 }
0x114b   :  { %13856 = vmatprep.mubr.msk.f32.mxu1 %vm101_vm1, %v16688_v0  ;;  %v4628_v23 = vmul.f32 %v12790_v39, %v4619_v18  ;;  %v16706_v52 = vadd.f32 %v12800_v63, %v4965_v25 }
0x114c   :  { %13857 = vmatmul.mubr.msk.f32.vlgmr.msra.gmra.mrb[64].mxu1 %vm101_vm1, %v16691_v59  ;;  %v4629_v30 = vmul.f32 %v12790_v39, %v4620_v38 }
0x114d   :  { %14766 = vmatpush3.bf16.msra.mxu1 %v16619_v24  ;;  %v16704_v40 = vadd.f32 %v12791_v4, %v4628_v23  ;;  %v5147_v24 = vld [vmem:[%s17882_s2 + $0x280] sm:$0xff]  ;;  %v16726_v2 = vadd.f32 %v4973_v56, %v16706_v52 }
0x114e   :  { %v16708_v55 = vadd.f32 %v12791_v4, %v4629_v30  ;;  %14768 = vmatprep.subr.bf16.mxu1 %v14767_v62  ;;  %v14771_v13 = vpack.c.bf16 %v5147_v24, %v5146_v41 }
0x114f   :  { %13859 = vmatprep.mubr.msk.f32.mxu1 %vm101_vm1, %v16704_v40 }
0x1150   :  { %13860 = vmatmul.mubr.msk.f32.gmra.mrb[66].mxu1 %vm101_vm1, %v16708_v55 }
0x1151   :  { %13904 = vmatprep.mubr.msk.f32.mxu1 %vm101_vm1, %v16713_v31 }
0x1154   :  { %13905 = vmatmul.mubr.msk.f32.vlgmr.msra.gmra.mrb[68].mxu1 %vm101_vm1, %v16726_v2 }
0x1155   :  { %14770 = vmatpush3.bf16.msra.mxu1 %v14767_v62  ;;  %13911 = vmatprep.mubr.msk.f32.mxu1 %vm101_vm1, %v16713_v31 }
0x1156   :  { %14772 = vmatprep.subr.bf16.mxu1 %v14771_v13 }
0x1158   :  { %13912 = vmatmul.mubr.msk.f32.vlgmr.msra.gmra.mrb[70].mxu1 %vm101_vm1, %v16726_v2 }
0x1159   :  { %14774 = vmatpush3.bf16.msra.mxu1 %v14771_v13  ;;  %13918 = vmatprep.mubr.msk.f32.mxu1 %vm101_vm1, %v16713_v31 }
0x115a   :  { %13921 = vmatprep.subr.mxu1 %v15622_v21 }
0x115c   :  { %13919 = vmatmul.mubr.msk.f32.vlgmr.msra.gmra.mrb[72].mxu1 %vm101_vm1, %v16726_v2 }
0x115d   :  { %13923 = vmatprep.mubr.msk.f32.mxu1 %vm15623_vm6, %v15622_v21 }
0x121f   :  { %v13858_v45 = vpop.f32.mrb[64].mxu1 }
0x1220   :  { %v4730_v51 = vadd.f32 %v13858_v45, %v12792_v15  ;;  %v4724_v34 = vpop.f32.mrb[65].mxu1 }
0x1221   :  { %v4725_v61 = vadd.f32 %v12792_v15, %v4724_v34 }
0x1222   :  { %v4744_v58 = vmax.f32 %v4730_v51, 0.0 }
0x1223   :  { %v4743_v43 = vmax.f32 %v4725_v61, 0.0  ;;  %v13861_v48 = vpop.f32.mrb[66].mxu1 }
0x1224   :  { %v4740_v12 = vadd.f32 %v13861_v48, %v12792_v15  ;;  %v4734_v9 = vpop.f32.mrb[67].mxu1 }
0x1225   :  { %v4735_v10 = vadd.f32 %v12792_v15, %v4734_v9  ;;  %13894 = vmatprep.mubr.f32.mxu0 %v4743_v43 }
0x1226   :  { %13895 = vmatmul.mubr.f32.vlgmr.msra.gmra.mrb[40].mxu0 %v4744_v58  ;;  %v4746_v60 = vmax.f32 %v4740_v12, 0.0 }
0x1227   :  { %v4745_v28 = vmax.f32 %v4735_v10, 0.0  ;;  %v13906_v46 = vpop.f32.mrb[68].mxu1 }
0x1228   :  { %v5061_v50 = vadd.f32 %v13906_v46, %v12801_v54  ;;  %v5055_v14 = vpop.f32.mrb[69].mxu1 }
0x1229   :  { %13897 = vmatprep.mubr.f32.mxu0 %v4745_v28  ;;  %v5056_v42 = vadd.f32 %v12801_v54, %v5055_v14 }
0x122a   :  { %13898 = vmatmul.mubr.f32.gmra.mrb[42].mxu0 %v4746_v60  ;;  %5232 = vrot.lane.b32.xlu1 %v5061_v50, %s15616_s18 }
0x122b   :  { %v13913_v29 = vpop.f32.mrb[70].mxu1  ;;  %13948 = vmatprep.mubr.msk.f32.mxu0 %vm15623_vm6, %v15622_v21 }
0x122c   :  { %v5143_v39 = vadd.f32 %v13913_v29, %v12804_v19  ;;  %v5137_v1 = vpop.f32.mrb[71].mxu1 }
0x122d   :  { %v5138_v44 = vadd.f32 %v12804_v19, %v5137_v1 }
0x122e   :  { %5250 = vrot.lane.b32.xlu0 %v5143_v39, %s15617_s23  ;;  %5230 = vrot.lane.b32.xlu1 %v5056_v42, %s15616_s18 }
0x122f   :  { %v13920_v22 = vpop.f32.mrb[72].mxu1  ;;  %13922 = vmatpush3.xpose.msk.msra.mxu1 %vm479_vm2, %v5138_v44 }
0x1230   :  { %v5219_v33 = vpop.f32.mrb[73].mxu1  ;;  %13926 = vmatprep.subr.mxu1 %v15622_v21  ;;  %v16793_v27 = vadd.f32 %v13920_v22, %v12807_v26 }
0x1231   :  { %v16815_v38 = vadd.f32 %v12807_v26, %v5219_v33 }
0x1232   :  { %5236 = vrot.lane.b32.xlu0 %v5061_v50, %s15617_s23  ;;  %5246 = vrot.lane.b32.xlu1 %v5143_v39, %s15616_s18 }
0x1233   :  { %13924 = vmatmul.mubr.msk.f32.vlgmr.msra.gmra.mrb[74].mxu1 %vm479_vm2, %v5056_v42 }
0x1234   :  { %13927 = vmatpush3.xpose.msk.msra.mxu1 %vm479_vm2, %v5143_v39  ;;  %13928 = vmatprep.mubr.msk.f32.mxu1 %vm15623_vm6, %v15622_v21 }
0x1235   :  { %13931 = vmatprep.subr.mxu1 %v15622_v21 }
0x1236   :  { %5254 = vrot.lane.b32.xlu0 %v5143_v39, %s15618_s24  ;;  %5244 = vrot.lane.b32.xlu1 %v5138_v44, %s15616_s18 }
0x1237   :  { %13929 = vmatmul.mubr.msk.f32.vlgmr.msra.gmra.mrb[76].mxu1 %vm479_vm2, %v5061_v50 }
0x1238   :  { %13933 = vmatprep.mubr.msk.f32.mxu1 %vm15623_vm6, %v15622_v21 }
0x123a   :  { %5240 = vrot.lane.b32.xlu0 %v5061_v50, %s15618_s24  ;;  %5234 = vrot.lane.b32.xlu1 %v5056_v42, %s15617_s23 }
0x123e   :  { %5248 = vrot.lane.b32.xlu1 %v5138_v44, %s15617_s23 }
0x1242   :  { %5252 = vrot.lane.b32.xlu1 %v5138_v44, %s15618_s24 }
0x1246   :  { %5238 = vrot.lane.b32.xlu1 %v5056_v42, %s15618_s24 }
0x129c   :  { %v5233_v37 = vpop.permute.xlu1 %5232 }
0x12a0   :  { %v5251_v4 = vpop.permute.xlu0 %5250  ;;  %v5231_v16 = vpop.permute.xlu1 %5230 }
0x12a1   :  { %13947 = vmatpush3.xpose.msk.msra.mxu0 %vm479_vm2, %v5251_v4 }
0x12a2   :  { %13956 = vmatprep.subr.mxu0 %v15622_v21 }
0x12a4   :  { %v5237_v17 = vpop.permute.xlu0 %5236  ;;  %v5247_v3 = vpop.permute.xlu1 %5246 }
0x12a5   :  { %13949 = vmatmul.mubr.msk.f32.vlgmr.msra.gmra.mrb[44].mxu0 %vm479_vm2, %v5237_v17 }
0x12a6   :  { %13958 = vmatprep.mubr.msk.f32.mxu0 %vm15623_vm6, %v15622_v21 }
0x12a8   :  { %v5255_v7 = vpop.permute.xlu0 %5254  ;;  %v5245_v8 = vpop.permute.xlu1 %5244 }
0x12a9   :  { %13932 = vmatpush3.xpose.msk.msra.mxu1 %vm479_vm2, %v5245_v8  ;;  %13957 = vmatpush3.xpose.msk.msra.mxu0 %vm479_vm2, %v5255_v7 }
0x12aa   :  { %13966 = vmatprep.subr.mxu0 %v15622_v21  ;;  %13936 = vmatprep.subr.mxu1 %v15622_v21 }
0x12ac   :  { %v5241_v63 = vpop.permute.xlu0 %5240  ;;  %v5235_v32 = vpop.permute.xlu1 %5234  ;;  %13934 = vmatmul.mubr.msk.f32.vlgmr.msra.gmra.mrb[78].mxu1 %vm479_vm2, %v5231_v16 }
0x12ad   :  { %13937 = vmatpush3.xpose.msk.msra.mxu1 %vm479_vm2, %v5247_v3  ;;  %13959 = vmatmul.mubr.msk.f32.vlgmr.msra.gmra.mrb[46].mxu0 %vm479_vm2, %v5241_v63 }
0x12ae   :  { %13967 = vmatpush3.msra.mxu0 %v16793_v27  ;;  %13938 = vmatprep.mubr.msk.f32.mxu1 %vm15623_vm6, %v15622_v21 }
0x12af   :  { %13941 = vmatprep.subr.mxu1 %v15622_v21  ;;  %13968 = vmatprep.mubr.msk.f32.mxu0 %vm15623_vm6, %v15622_v21 }
0x12b0   :  { %v5249_v18 = vpop.permute.xlu1 %5248  ;;  %13939 = vmatmul.mubr.msk.f32.vlgmr.msra.gmra.mrb[80].mxu1 %vm479_vm2, %v5233_v37  ;;  %13976 = vmatprep.subr.mxu0 %v15622_v21 }
0x12b1   :  { %13942 = vmatpush3.xpose.msk.msra.mxu1 %vm479_vm2, %v5249_v18  ;;  %13943 = vmatprep.mubr.msk.f32.mxu1 %vm15623_vm6, %v15622_v21 }
0x12b2   :  { %13951 = vmatprep.subr.mxu1 %v15622_v21 }
0x12b4   :  { %v5253_v25 = vpop.permute.xlu1 %5252  ;;  %13944 = vmatmul.mubr.msk.f32.vlgmr.msra.gmra.mrb[82].mxu1 %vm479_vm2, %v5235_v32 }
0x12b5   :  { %13952 = vmatpush3.xpose.msk.msra.mxu1 %vm479_vm2, %v5253_v25  ;;  %13953 = vmatprep.mubr.msk.f32.mxu1 %vm15623_vm6, %v15622_v21 }
0x12b6   :  { %13961 = vmatprep.subr.mxu1 %v15622_v21 }
0x12b8   :  { %v5239_v62 = vpop.permute.xlu1 %5238 }
0x12b9   :  { %13954 = vmatmul.mubr.msk.f32.vlgmr.msra.gmra.mrb[84].mxu1 %vm479_vm2, %v5239_v62 }
0x12ba   :  { %13962 = vmatpush3.msra.mxu1 %v16815_v38  ;;  %13963 = vmatprep.mubr.msk.f32.mxu1 %vm15623_vm6, %v15622_v21 }
0x12bb   :  { %13971 = vmatprep.subr.mxu1 %v15622_v21 }
0x12f9   :  { %v16822_v23 = vpop.f32.mrb[40].mxu0 }
0x12fa   :  { %v16824_v56 = vpop.f32.mrb[41].mxu0 }
0x12fd   :  { %v16826_v30 = vpop.f32.mrb[42].mxu0 }
0x12fe   :  { %v16828_v41 = vpop.f32.mrb[43].mxu0 }
0x1306   :  { %v5346_v24 = vpop.f32.mrb[74].mxu1 }
0x1307   :  { %v5868_v13 = vmul.f32 0.5, %v5346_v24  ;;  %v13925_v47 = vpop.f32.mrb[75].mxu1 }
0x1309   :  { %v5883_v57 = vsel %vm15663_vm0, %v5868_v13, -1e+09 }
0x130a   :  { %v5420_v11 = vpop.f32.mrb[76].mxu1  ;;  %v5891_v15 = vsel %vm2036_vm4, %v5883_v57, -inf }
0x130b   :  { %v5869_v45 = vmul.f32 0.5, %v5420_v11  ;;  %5892 = vmax.xlane.f32.xlu1 %v5891_v15  ;;  %v13930_v51 = vpop.f32.mrb[77].mxu1 }
0x130d   :  { %v5884_v34 = vsel %vm15663_vm0, %v5869_v45, -1e+09 }
0x130e   :  { %v5894_v61 = vsel %vm2036_vm4, %v5884_v34, -inf }
0x130f   :  { %5895 = vmax.xlane.f32.xlu0 %v5894_v61 }
0x1378   :  { %v5716_v43 = vpop.f32.mrb[44].mxu0 }
0x1379   :  { %v13950_v48 = vpop.f32.mrb[45].mxu0  ;;  %v5873_v50 = vmul.f32 0.5, %v5716_v43 }
0x137b   :  { %v5888_v1 = vsel %vm15663_vm0, %v5873_v50, -1e+09 }
0x137c   :  { %v5906_v4 = vsel %vm2036_vm4, %v5888_v1, -inf }
0x137f   :  { %v5494_v58 = vpop.f32.mrb[78].mxu1 }
0x1380   :  { %v5870_v12 = vmul.f32 0.5, %v5494_v58  ;;  %v13935_v9 = vpop.f32.mrb[79].mxu1  ;;  %v5864_v10 = vpop.f32.mrb[46].mxu0 }
0x1381   :  { %v13960_v54 = vpop.f32.mrb[47].mxu0  ;;  %v5875_v44 = vmul.f32 0.5, %v5864_v10 }
0x1382   :  { %v5885_v28 = vsel %vm15663_vm0, %v5870_v12, -1e+09 }
0x1383   :  { %v5568_v46 = vpop.f32.mrb[80].mxu1  ;;  %v5897_v60 = vsel %vm2036_vm4, %v5885_v28, -inf  ;;  %v5890_v17 = vsel %vm15663_vm0, %v5875_v44, -1e+09 }
0x1384   :  { %v5871_v14 = vmul.f32 0.5, %v5568_v46  ;;  %5898 = vmax.xlane.f32.xlu0 %v5897_v60  ;;  %v13940_v19 = vpop.f32.mrb[81].mxu1  ;;  %v5912_v63 = vsel %vm2036_vm4, %v5890_v17, -inf }
0x1386   :  { %v5886_v29 = vsel %vm15663_vm0, %v5871_v14, -1e+09 }
0x1387   :  { %v5642_v42 = vpop.f32.mrb[82].mxu1  ;;  %v5900_v39 = vsel %vm2036_vm4, %v5886_v29, -inf }
0x1388   :  { %v5872_v22 = vmul.f32 0.5, %v5642_v42  ;;  %5901 = vmax.xlane.f32.xlu1 %v5900_v39  ;;  %v13945_v33 = vpop.f32.mrb[83].mxu1 }
0x138a   :  { %v5887_v37 = vsel %vm15663_vm0, %v5872_v22, -1e+09 }
0x138b   :  { %v5903_v16 = vsel %vm2036_vm4, %v5887_v37, -inf }
0x138c   :  { %5907 = vmax.xlane.f32.xlu1 %v5906_v4  ;;  %5904 = vmax.xlane.f32.xlu0 %v5903_v16  ;;  %v5790_v3 = vpop.f32.mrb[84].mxu1 }
0x138d   :  { %v5874_v7 = vmul.f32 0.5, %v5790_v3  ;;  %v13955_v8 = vpop.f32.mrb[85].mxu1 }
0x138f   :  { %v5889_v26 = vsel %vm15663_vm0, %v5874_v7, -1e+09 }
0x1390   :  { %5913 = vmax.xlane.f32.xlu1 %v5912_v63  ;;  %v5909_v32 = vsel %vm2036_vm4, %v5889_v26, -inf }
0x1391   :  { %5910 = vmax.xlane.f32.xlu0 %v5909_v32 }
0x1398   :  { %v5893_v25 = vpop.xlane.xlu1 %5892 }
0x1399   :  { %v5915_v24 = vsub.f32 %v5883_v57, %v5893_v25 }
0x139b   :  { %v5923_v47 = vmul.f32 1.442695, %v5915_v24 }
0x139c   :  { %v5896_v18 = vpop.xlane.xlu0 %5895 }
0x139d   :  { %v5916_v62 = vsub.f32 %v5884_v34, %v5896_v18 }
0x139f   :  { %v5925_v13 = vmul.f32 1.442695, %v5916_v62 }
0x13a1   :  { %5260 = vrot.lane.b32.xlu1 %v16793_v27, %s15616_s18  ;;  %15430 = vpow2.f32 %v5925_v13 }
0x13a2   :  { %15432 = vpow2.f32 %v5923_v47 }
0x13a5   :  { %5264 = vrot.lane.b32.xlu1 %v16815_v38, %s15617_s23 }
0x13a7   :  { %5258 = vrot.lane.b32.xlu0 %v16815_v38, %s15616_s18 }
0x13ab   :  { %5266 = vrot.lane.b32.xlu0 %v16793_v27, %s15617_s23  ;;  %v15431_v11 = vpop.eup %15430 }
0x13ac   :  { %v15433_v15 = vpop.eup %15432  ;;  %v5942_v45 = vsel %vm2036_vm4, %v15431_v11, 0.0 }
0x13ad   :  { %v5939_v51 = vsel %vm2036_vm4, %v15433_v15, 0.0 }
0x13c9   :  { %5943 = vadd.xlane.f32.xlu1 %v5942_v45 }
0x13ca   :  { %5940 = vadd.xlane.f32.xlu0 %v5939_v51 }
0x1411   :  { %v5899_v61 = vpop.xlane.xlu0 %5898 }
0x1412   :  { %v5917_v43 = vsub.f32 %v5885_v28, %v5899_v61 }
0x1414   :  { %v5927_v48 = vmul.f32 1.442695, %v5917_v43 }
0x1415   :  { %v5902_v58 = vpop.xlane.xlu1 %5901 }
0x1416   :  { %15434 = vpow2.f32 %v5927_v48  ;;  %v5918_v10 = vsub.f32 %v5886_v29, %v5902_v58 }
0x1418   :  { %v5929_v39 = vmul.f32 1.442695, %v5918_v10 }
0x1419   :  { %v5908_v12 = vpop.xlane.xlu1 %5907  ;;  %v5905_v34 = vpop.xlane.xlu0 %5904 }
0x141a   :  { %v5920_v57 = vsub.f32 %v5888_v1, %v5908_v12  ;;  %v5919_v9 = vsub.f32 %v5887_v37, %v5905_v34 }
0x141c   :  { %v5933_v54 = vmul.f32 1.442695, %v5920_v57  ;;  %v5931_v46 = vmul.f32 1.442695, %v5919_v9 }
0x141d   :  { %v5914_v60 = vpop.xlane.xlu1 %5913 }
0x141e   :  { %15436 = vpow2.f32 %v5933_v54  ;;  %v5922_v50 = vsub.f32 %v5890_v17, %v5914_v60  ;;  %v5911_v14 = vpop.xlane.xlu0 %5910 }
0x141f   :  { %15438 = vpow2.f32 %v5931_v46  ;;  %v5921_v19 = vsub.f32 %v5889_v26, %v5911_v14 }
0x1420   :  { %v15435_v42 = vpop.eup %15434  ;;  %v5937_v44 = vmul.f32 1.442695, %v5922_v50 }
0x1421   :  { %v5935_v28 = vmul.f32 1.442695, %v5921_v19  ;;  %v5945_v22 = vsel %vm2036_vm4, %v15435_v42, 0.0  ;;  %v5261_v26 = vpop.permute.xlu1 %5260 }
0x1422   :  { %15440 = vpow2.f32 %v5937_v44  ;;  %5946 = vadd.xlane.f32.xlu0 %v5945_v22  ;;  %v5259_v63 = vpop.permute.xlu0 %5258 }
0x1423   :  { %15442 = vpow2.f32 %v5935_v28 }
0x1424   :  { %15444 = vpow2.f32 %v5929_v39 }
0x1425   :  { %v5265_v32 = vpop.permute.xlu1 %5264 }
0x1426   :  { %v5267_v18 = vpop.permute.xlu0 %5266 }
0x1428   :  { %v16865_v1 = vpop.eup %15436 }
0x1429   :  { %v15439_v29 = vpop.eup %15438  ;;  %v5954_v33 = vsel %vm2036_vm4, %v16865_v1, 0.0 }
0x142a   :  { %5955 = vadd.xlane.f32.xlu1 %v5954_v33  ;;  %v5951_v37 = vsel %vm2036_vm4, %v15439_v29, 0.0  ;;  %v6594_v33 = vld [vmem:[%s17882_s2 + $0x298] sm:$0xff] }
0x142b   :  { %5952 = vadd.xlane.f32.xlu0 %v5951_v37 }
0x142c   :  { %v16870_v4 = vpop.eup %15440 }
0x142d   :  { %v15443_v16 = vpop.eup %15442  ;;  %v5960_v17 = vsel %vm2036_vm4, %v16870_v4, 0.0 }
0x142e   :  { %v15445_v3 = vpop.eup %15444  ;;  %5961 = vadd.xlane.f32.xlu1 %v5960_v17  ;;  %v5957_v7 = vsel %vm2036_vm4, %v15443_v16, 0.0 }
0x142f   :  { %5958 = vadd.xlane.f32.xlu0 %v5957_v7  ;;  %v5948_v8 = vsel %vm2036_vm4, %v15445_v3, 0.0 }
0x1432   :  { %5949 = vadd.xlane.f32.xlu1 %v5948_v8 }
0x1443   :  { %5270 = vrot.lane.b32.xlu1 %v16815_v38, %s15618_s24 }
0x1445   :  { %5272 = vrot.lane.b32.xlu0 %v16793_v27, %s15618_s24 }
0x1456   :  { %v5944_v25 = vpop.xlane.xlu1 %5943 }
0x1457   :  { %15446 = vrcp.f32 %v5944_v25  ;;  %v5941_v62 = vpop.xlane.xlu0 %5940  ;;  %v12797_v25 = vld [vmem:[%s17882_s2 + $0x220] ss:$0 sm:$0xff] }
0x1458   :  { %15448 = vrcp.f32 %v5941_v62  ;;  %v4835_v62 = vadd.f32 %v12797_v25, %v16824_v56 }
0x1461   :  { %v15447_v24 = vpop.eup %15446 }
0x1462   :  { %v15449_v13 = vpop.eup %15448  ;;  %v5972_v47 = vmul.f32 %v15447_v24, %v15431_v11  ;;  %v4853_v24 = vadd.f32 %v4835_v62, %v16688_v0 }
0x1463   :  { %v5971_v45 = vmul.f32 %v15449_v13, %v15433_v15  ;;  %v4850_v13 = vadd.f32 %v16826_v30, %v12797_v25 }
0x1464   :  { %13969 = vmatmul.mubr.msk.f32.vlgmr.msra.gmra.mrb[48].mxu0 %vm2036_vm4, %v5972_v47  ;;  %v4840_v47 = vadd.f32 %v16822_v23, %v12797_v25 }
0x1465   :  { %13977 = vmatpush3.msra.mxu0 %v5261_v26  ;;  %13964 = vmatmul.mubr.msk.f32.vlgmr.msra.gmra.mrb[86].mxu1 %vm2036_vm4, %v5971_v45  ;;  %v4856_v45 = vadd.f32 %v4850_v13, %v16708_v55 }
0x1466   :  { %13972 = vmatpush3.msra.mxu1 %v5259_v63  ;;  %13973 = vmatprep.mubr.msk.f32.mxu1 %vm15623_vm6, %v15622_v21 }
0x1467   :  { %13981 = vmatprep.subr.mxu1 %v15622_v21  ;;  %13978 = vmatprep.mubr.msk.f32.mxu0 %vm15623_vm6, %v15622_v21 }
0x1468   :  { %13986 = vmatprep.subr.mxu0 %v15622_v21 }
0x14af   :  { %v5947_v27 = vpop.xlane.xlu0 %5946 }
0x14b0   :  { %15450 = vrcp.f32 %v5947_v27  ;;  %v4857_v27 = vsel %vm101_vm1, %v4853_v24, 0.0 }
0x14b7   :  { %v5956_v38 = vpop.xlane.xlu1 %5955 }
0x14b8   :  { %v5953_v11 = vpop.xlane.xlu0 %5952 }
0x14b9   :  { %15452 = vrcp.f32 %v5953_v11  ;;  %v4845_v11 = vadd.f32 %v12797_v25, %v16828_v41  ;;  %v6812_v25 = vld [vmem:[%s17882_s2 + $0x2c8] sm:$0xff] }
0x14ba   :  { %v15451_v15 = vpop.eup %15450 }
0x14bb   :  { %v5962_v51 = vpop.xlane.xlu1 %5961  ;;  %v5973_v61 = vmul.f32 %v15451_v15, %v15435_v42  ;;  %v4866_v15 = vsel %vm101_vm1, %v4856_v45, 0.0  ;;  %v4855_v56 = vadd.f32 %v4845_v11, %v16704_v40 }
0x14bc   :  { %v5959_v43 = vpop.xlane.xlu0 %5958 }
0x14bd   :  { %15454 = vrcp.f32 %v5959_v43  ;;  %13974 = vmatmul.mubr.msk.f32.vlgmr.msra.gmra.mrb[88].mxu1 %vm2036_vm4, %v5973_v61  ;;  %v4863_v30 = vsel %vm101_vm1, %v4855_v56, 0.0 }
0x14be   :  { %13982 = vmatpush3.msra.mxu1 %v5265_v32  ;;  %13983 = vmatprep.mubr.msk.f32.mxu1 %vm15623_vm6, %v15622_v21 }
0x14bf   :  { %v5950_v48 = vpop.xlane.xlu1 %5949  ;;  %13991 = vmatprep.subr.mxu1 %v15622_v21 }
0x14c0   :  { %15456 = vrcp.f32 %v5950_v48  ;;  %v5273_v14 = vpop.permute.xlu0 %5272 }
0x14c1   :  { %15458 = vrcp.f32 %v5956_v38  ;;  %v4854_v38 = vadd.f32 %v4840_v47, %v16691_v59 }
0x14c2   :  { %15460 = vrcp.f32 %v5962_v51 }
0x14c3   :  { %v15453_v58 = vpop.eup %15452  ;;  %v5271_v12 = vpop.permute.xlu1 %5270  ;;  %v4860_v0 = vsel %vm101_vm1, %v4854_v38, 0.0 }
0x14c4   :  { %v5975_v34 = vmul.f32 %v15453_v58, %v15439_v29  ;;  %v6593_v29 = vld [vmem:[%s17882_s2 + $0x290] sm:$0xff] }
0x14c6   :  { %13984 = vmatmul.mubr.msk.f32.vlgmr.msra.gmra.mrb[90].mxu1 %vm2036_vm4, %v5975_v34 }
0x14c7   :  { %v15455_v57 = vpop.eup %15454  ;;  %13992 = vmatpush3.msra.mxu1 %v5271_v12  ;;  %13993 = vmatprep.mubr.msk.f32.mxu1 %vm15623_vm6, %v15622_v21 }
0x14c8   :  { %v5977_v9 = vmul.f32 %v15455_v57, %v15443_v16 }
0x14ca   :  { %v15457_v10 = vpop.eup %15456  ;;  %13994 = vmatmul.mubr.msk.f32.vlgmr.msra.gmra.mrb[92].mxu1 %vm2036_vm4, %v5977_v9 }
0x14cb   :  { %v5974_v54 = vmul.f32 %v15457_v10, %v15445_v3  ;;  %v15459_v46 = vpop.eup %15458 }
0x14cc   :  { %v5976_v60 = vmul.f32 %v15459_v46, %v16865_v1  ;;  %v15461_v50 = vpop.eup %15460 }
0x14cd   :  { %13979 = vmatmul.mubr.msk.f32.vlgmr.msra.gmra.mrb[50].mxu0 %vm2036_vm4, %v5974_v54  ;;  %v5978_v19 = vmul.f32 %v15461_v50, %v16870_v4  ;;  %v14775_v4 = vpack.c.bf16 %v6594_v33, %v6593_v29 }
0x14ce   :  { %13987 = vmatpush3.msra.mxu0 %v5267_v18  ;;  %13988 = vmatprep.mubr.msk.f32.mxu0 %vm15623_vm6, %v15622_v21 }
0x14cf   :  { %13996 = vmatprep.subr.mxu0 %v15622_v21  ;;  %14776 = vmatprep.subr.bf16.mxu1 %v14775_v4 }
0x14d0   :  { %14778 = vmatpush3.bf16.msra.mxu1 %v14775_v4 }
0x14d1   :  { %13989 = vmatmul.mubr.msk.f32.vlgmr.msra.gmra.mrb[52].mxu0 %vm2036_vm4, %v5976_v60  ;;  %v12834_v60 = vld [vmem:[%s17882_s2 + $0x2a0] ss:$0 sm:$0xff] }
0x14d2   :  { %13997 = vmatpush3.msra.mxu0 %v5273_v14  ;;  %13998 = vmatprep.mubr.msk.f32.mxu0 %vm15623_vm6, %v15622_v21 }
0x14d5   :  { %13999 = vmatmul.mubr.msk.f32.vlgmr.msra.gmra.mrb[54].mxu0 %vm2036_vm4, %v5978_v19 }
0x1537   :  { %v6121_v42 = vpop.f32.mrb[48].mxu0 }
0x1538   :  { %v6048_v39 = vpop.f32.mrb[86].mxu1  ;;  %v13970_v44 = vpop.f32.mrb[49].mxu0 }
0x1539   :  { %v13965_v28 = vpop.f32.mrb[87].mxu1 }
0x1590   :  { %v6194_v22 = vpop.f32.mrb[88].mxu1 }
0x1591   :  { %6565 = vrot.lane.b32.xlu1 %v6194_v22, %s15619_s25  ;;  %v13975_v1 = vpop.f32.mrb[89].mxu1 }
0x1599   :  { %v6340_v37 = vpop.f32.mrb[90].mxu1 }
0x159a   :  { %6573 = vrot.lane.b32.xlu1 %v6340_v37, %s15620_s30  ;;  %v13985_v16 = vpop.f32.mrb[91].mxu1 }
0x159d   :  { %v6486_v17 = vpop.f32.mrb[92].mxu1 }
0x159e   :  { %6581 = vrot.lane.b32.xlu1 %v6486_v17, %s15621_s0  ;;  %v13995_v3 = vpop.f32.mrb[93].mxu1 }
0x15a0   :  { %v6267_v7 = vpop.f32.mrb[50].mxu0 }
0x15a1   :  { %v13980_v8 = vpop.f32.mrb[51].mxu0  ;;  %6567 = vrot.lane.b32.xlu0 %v6267_v7, %s15619_s25 }
0x15a4   :  { %v6413_v26 = vpop.f32.mrb[52].mxu0 }
0x15a5   :  { %6575 = vrot.lane.b32.xlu0 %v6413_v26, %s15620_s30  ;;  %v13990_v63 = vpop.f32.mrb[53].mxu0 }
0x15a8   :  { %v6559_v32 = vpop.f32.mrb[54].mxu0 }
0x15a9   :  { %6583 = vrot.lane.b32.xlu0 %v6559_v32, %s15621_s0  ;;  %v14000_v18 = vpop.f32.mrb[55].mxu0 }
0x15aa   :  { %v6811_v18 = vld [vmem:[%s17882_s2 + $0x2c0] sm:$0xff] }
0x15ab   :  { %v14783_v62 = vpack.c.bf16 %v6812_v25, %v6811_v18 }
0x15ad   :  { %14784 = vmatprep.subr.bf16.mxu1 %v14783_v62 }
0x15c2   :  { %4858 = vadd.xlane.f32.xlu1 %v4857_v27 }
0x15c6   :  { %4867 = vadd.xlane.f32.xlu1 %v4866_v15 }
0x15c8   :  { %4861 = vadd.xlane.f32.xlu0 %v4860_v0 }
0x15cc   :  { %4864 = vadd.xlane.f32.xlu0 %v4863_v30 }
0x1603   :  { %v6566_v23 = vpop.permute.xlu1 %6565 }
0x1604   :  { %v6587_v51 = vsel %vm479_vm2, %v6048_v39, %v6566_v23 }
0x160c   :  { %v6574_v55 = vpop.permute.xlu1 %6573 }
0x160d   :  { %v6589_v61 = vsel %vm2036_vm4, %v6587_v51, %v6574_v55 }
0x1610   :  { %v6582_v59 = vpop.permute.xlu1 %6581 }
0x1611   :  { %v6591_v41 = vsel %vm2041_vm5, %v6589_v61, %v6582_v59 }
0x1612   :  { %14005 = vmatprep.mubr.msk.f32.mxu1 %vm101_vm1, %v6591_v41 }
0x1613   :  { %v6568_v43 = vpop.permute.xlu0 %6567 }
0x1614   :  { %v6588_v40 = vsel %vm479_vm2, %v6121_v42, %v6568_v43 }
0x1617   :  { %v6576_v48 = vpop.permute.xlu0 %6575 }
0x1618   :  { %v6590_v58 = vsel %vm2036_vm4, %v6588_v40, %v6576_v48 }
0x161b   :  { %v6584_v12 = vpop.permute.xlu0 %6583 }
0x161c   :  { %v6592_v34 = vsel %vm2041_vm5, %v6590_v58, %v6584_v12 }
0x161d   :  { %14006 = vmatmul.mubr.msk.f32.vlgmr.msra.gmra.mrb[94].mxu1 %vm101_vm1, %v6592_v34 }
0x161e   :  { %14786 = vmatpush3.bf16.msra.mxu1 %v14783_v62  ;;  %v12837_v62 = vld [vmem:[%s17882_s2 + $0x390] ss:$0 sm:$0xff] }
0x164f   :  { %v4859_v57 = vpop.xlane.xlu1 %4858 }
0x1650   :  { %v4869_v54 = vmul.f32 0.0625, %v4859_v57  ;;  %v12798_v57 = vld [vmem:[%s17882_s2 + $0x238] ss:$0 sm:$0xff] }
0x1652   :  { %v4873_v28 = vsub.f32 %v4853_v24, %v4869_v54 }
0x1653   :  { %v4868_v46 = vpop.xlane.xlu1 %4867 }
0x1654   :  { %v4872_v19 = vmul.f32 0.0625, %v4868_v46  ;;  %v4877_v7 = vmul.f32 %v4873_v28, %v4873_v28  ;;  %v12799_v46 = vld [vmem:[%s17882_s2 + $0x240] ss:$0 sm:$0xff] }
0x1655   :  { %v4862_v9 = vpop.xlane.xlu0 %4861 }
0x1656   :  { %v4870_v10 = vmul.f32 0.0625, %v4862_v9  ;;  %v4876_v37 = vsub.f32 %v4856_v45, %v4872_v19  ;;  %v4881_v63 = vsel %vm101_vm1, %v4877_v7, 0.0 }
0x1658   :  { %v4874_v42 = vsub.f32 %v4854_v38, %v4870_v10  ;;  %v4880_v26 = vmul.f32 %v4876_v37, %v4876_v37 }
0x1659   :  { %v4865_v50 = vpop.xlane.xlu0 %4864 }
0x165a   :  { %v4871_v22 = vmul.f32 0.0625, %v4865_v50  ;;  %v4878_v16 = vmul.f32 %v4874_v42, %v4874_v42 }
0x165c   :  { %v4875_v17 = vsub.f32 %v4855_v56, %v4871_v22  ;;  %v4884_v8 = vsel %vm101_vm1, %v4878_v16, 0.0 }
0x165e   :  { %v4879_v32 = vmul.f32 %v4875_v17, %v4875_v17 }
0x16f0   :  { %v14007_v14 = vpop.f32.mrb[94].mxu1 }
0x16f1   :  { %v6678_v39 = vadd.f32 %v14007_v14, %v12834_v60  ;;  %v6672_v44 = vpop.f32.mrb[95].mxu1 }
0x16f2   :  { %v6673_v1 = vadd.f32 %v12834_v60, %v6672_v44 }
0x16f3   :  { %v6682_v29 = vadd.f32 %v6678_v39, %v16726_v2  ;;  %v4887_v2 = vsel %vm101_vm1, %v4879_v32, 0.0 }
0x16f4   :  { %v6681_v33 = vadd.f32 %v6673_v1, %v16713_v31  ;;  %v4890_v31 = vsel %vm101_vm1, %v4880_v26, 0.0 }
0x16f5   :  { %v6686_v4 = vsel %vm101_vm1, %v6682_v29, 0.0 }
0x16f6   :  { %6687 = vadd.xlane.f32.xlu1 %v6686_v4  ;;  %v6683_v3 = vsel %vm101_vm1, %v6681_v33, 0.0 }
0x16f7   :  { %6684 = vadd.xlane.f32.xlu0 %v6683_v3 }
0x16fa   :  { %4885 = vadd.xlane.f32.xlu1 %v4884_v8 }
0x16fb   :  { %4882 = vadd.xlane.f32.xlu0 %v4881_v63 }
0x16fe   :  { %4891 = vadd.xlane.f32.xlu1 %v4890_v31 }
0x16ff   :  { %4888 = vadd.xlane.f32.xlu0 %v4887_v2 }
0x1783   :  { %v6688_v24 = vpop.xlane.xlu1 %6687 }
0x1784   :  { %v6690_v13 = vmul.f32 0.0625, %v6688_v24  ;;  %v6685_v47 = vpop.xlane.xlu0 %6684 }
0x1785   :  { %v6689_v45 = vmul.f32 0.0625, %v6685_v47 }
0x1786   :  { %v16958_v27 = vsub.f32 %v6682_v29, %v6690_v13 }
0x1787   :  { %v16960_v38 = vsub.f32 %v6681_v33, %v6689_v45  ;;  %v4886_v11 = vpop.xlane.xlu1 %4885 }
0x1788   :  { %v4894_v15 = vmul.f32 0.0625, %v4886_v11  ;;  %v4883_v56 = vpop.xlane.xlu0 %4882  ;;  %v6694_v0 = vmul.f32 %v16958_v27, %v16958_v27  ;;  %v12838_v11 = vld [vmem:[%s17882_s2 + $0x398] ss:$0 sm:$0xff] }
0x1789   :  { %v4893_v30 = vmul.f32 0.0625, %v4883_v56  ;;  %v6693_v23 = vmul.f32 %v16960_v38, %v16960_v38 }
0x178a   :  { %v4898_v55 = vadd.f32 1e-05, %v4894_v15  ;;  %v6698_v51 = vsel %vm101_vm1, %v6694_v0, 0.0 }
0x178b   :  { %v4897_v61 = vadd.f32 1e-05, %v4893_v30  ;;  %6699 = vadd.xlane.f32.xlu1 %v6698_v51  ;;  %v4892_v59 = vpop.xlane.xlu1 %4891  ;;  %v6695_v41 = vsel %vm101_vm1, %v6693_v23, 0.0 }
0x178c   :  { %15462 = vrsqrt.f32 %v4898_v55  ;;  %v4896_v43 = vmul.f32 0.0625, %v4892_v59  ;;  %6696 = vadd.xlane.f32.xlu0 %v6695_v41  ;;  %v4889_v48 = vpop.xlane.xlu0 %4888 }
0x178d   :  { %15464 = vrsqrt.f32 %v4897_v61  ;;  %v4895_v40 = vmul.f32 0.0625, %v4889_v48 }
0x178e   :  { %v4900_v58 = vadd.f32 1e-05, %v4896_v43 }
0x178f   :  { %v4899_v12 = vadd.f32 1e-05, %v4895_v40 }
0x1790   :  { %15466 = vrsqrt.f32 %v4900_v58 }
0x1791   :  { %15468 = vrsqrt.f32 %v4899_v12 }
0x1796   :  { %v15463_v34 = vpop.eup %15462 }
0x1797   :  { %v15465_v9 = vpop.eup %15464  ;;  %v4906_v10 = vmul.f32 %v15463_v34, %v4874_v42  ;;  %v6723_v42 = vld [vmem:[%s17882_s2 + $0x2a8] sm:$0xff] }
0x1798   :  { %v4905_v54 = vmul.f32 %v15465_v9, %v4873_v28  ;;  %v6724_v28 = vld [vmem:[%s17882_s2 + $0x2b0] sm:$0xff] }
0x1799   :  { %v4915_v60 = vmul.f32 %v12798_v57, %v4906_v10  ;;  %v12839_v10 = vld [vmem:[%s17882_s2 + $0x2b8] ss:$0 sm:$0xff] }
0x179a   :  { %v15467_v50 = vpop.eup %15466  ;;  %v4914_v14 = vmul.f32 %v12798_v57, %v4905_v54 }
0x179b   :  { %v15469_v19 = vpop.eup %15468  ;;  %v4924_v39 = vadd.f32 %v12799_v46, %v4915_v60  ;;  %v4908_v44 = vmul.f32 %v15467_v50, %v4876_v37  ;;  %v14779_v37 = vpack.c.bf16 %v6724_v28, %v6723_v42 }
0x179c   :  { %v4923_v22 = vadd.f32 %v12799_v46, %v4914_v14  ;;  %v4907_v1 = vmul.f32 %v15469_v19, %v4875_v17 }
0x179d   :  { %v4917_v29 = vmul.f32 %v12798_v57, %v4908_v44  ;;  %v16984_v16 = vadd.f32 %v4924_v39, %v15708_v35  ;;  %14780 = vmatprep.subr.bf16.mxu0 %v14779_v37  ;;  %v6915_v35 = vld [vmem:[%s17882_s2 + $0x2d8] sm:$0xff]  ;;  %v12847_v44 = vld [vmem:[%s17882_s2 + $0x2e8] ss:$0 sm:$0xff] }
0x179e   :  { %v16975_v33 = vadd.f32 %v4923_v22, %v15710_v36  ;;  %v4916_v4 = vmul.f32 %v12798_v57, %v4907_v1  ;;  %14782 = vmatpush3.bf16.msra.mxu0 %v14779_v37 }
0x179f   :  { %v4926_v3 = vadd.f32 %v12799_v46, %v4917_v29 }
0x17a0   :  { %14019 = vmatprep.mubr.msk.f32.mxu1 %vm101_vm1, %v16975_v33  ;;  %v4925_v17 = vadd.f32 %v12799_v46, %v4916_v4 }
0x17a1   :  { %14020 = vmatmul.mubr.msk.f32.vlgmr.msra.gmra.mrb[96].mxu1 %vm101_vm1, %v16984_v16  ;;  %v16994_v7 = vadd.f32 %v4926_v3, %v15733_v53  ;;  %v15624_v53 = vmov 0.0|0.0  }
0x17a2   :  { %v16991_v36 = vadd.f32 %v4925_v17, %v15726_v49  ;;  %v6916_v49 = vld [vmem:[%s17882_s2 + $0x2e0] sm:$0xff]  ;;  %14791 = vmatprep.subr.bf16.mxu1 %v15624_v53 }
0x17a3   :  { %v14787_v8 = vpack.c.bf16 %v6916_v49, %v6915_v35 }
0x17a4   :  { %14022 = vmatprep.mubr.msk.f32.mxu1 %vm101_vm1, %v16991_v36 }
0x17a5   :  { %14023 = vmatmul.mubr.msk.f32.gmra.mrb[98].mxu1 %vm101_vm1, %v16994_v7  ;;  %14788 = vmatprep.subr.bf16.mxu0 %v14787_v8 }
0x17a6   :  { %14039 = vmatprep.mubr.msk.f32.mxu1 %vm15623_vm6, %v15622_v21 }
0x1818   :  { %v6700_v26 = vpop.xlane.xlu1 %6699 }
0x1819   :  { %v6702_v63 = vmul.f32 0.0625, %v6700_v26  ;;  %v6697_v32 = vpop.xlane.xlu0 %6696 }
0x181a   :  { %v6701_v31 = vmul.f32 0.0625, %v6697_v32 }
0x181b   :  { %v6704_v2 = vadd.f32 1e-05, %v6702_v63 }
0x181c   :  { %v6703_v18 = vadd.f32 1e-05, %v6701_v31 }
0x181d   :  { %15470 = vrsqrt.f32 %v6704_v2 }
0x181e   :  { %15472 = vrsqrt.f32 %v6703_v18 }
0x1827   :  { %v15471_v25 = vpop.eup %15470 }
0x1828   :  { %v15473_v24 = vpop.eup %15472  ;;  %v6708_v13 = vmul.f32 %v15471_v25, %v16958_v27  ;;  %v12842_v27 = vld [vmem:[%s17882_s2 + $0x2d0] ss:$0 sm:$0xff] }
0x1829   :  { %v6707_v47 = vmul.f32 %v15473_v24, %v16960_v38 }
0x182a   :  { %v6715_v45 = vmul.f32 %v12837_v62, %v6708_v13 }
0x182b   :  { %v6714_v15 = vmul.f32 %v12837_v62, %v6707_v47 }
0x182c   :  { %v17019_v0 = vadd.f32 %v12838_v11, %v6715_v45 }
0x182d   :  { %v17017_v56 = vadd.f32 %v12838_v11, %v6714_v15 }
0x182f   :  { %14012 = vmatprep.mubr.msk.f32.mxu0 %vm101_vm1, %v17017_v56 }
0x1830   :  { %14013 = vmatmul.mubr.msk.f32.vlgmr.msra.gmra.mrb[56].mxu0 %vm101_vm1, %v17019_v0 }
0x1831   :  { %14790 = vmatpush3.bf16.msra.mxu0 %v14787_v8  ;;  %14029 = vmatprep.mubr.msk.f32.mxu0 %vm101_vm1, %v16975_v33 }
0x1832   :  { %14795 = vmatprep.subr.bf16.mxu0 %v15624_v53 }
0x1834   :  { %14030 = vmatmul.mubr.msk.f32.vlgmr.msra.gmra.mrb[58].mxu0 %vm101_vm1, %v16984_v16 }
0x1835   :  { %14032 = vmatprep.mubr.msk.f32.mxu0 %vm101_vm1, %v16991_v36 }
0x1838   :  { %14033 = vmatmul.mubr.msk.f32.gmra.mrb[60].mxu0 %vm101_vm1, %v16994_v7 }
0x1839   :  { %14046 = vmatprep.mubr.msk.f32.mxu0 %vm15623_vm6, %v15622_v21 }
0x1874   :  { %v14021_v38 = vpop.f32.mrb[96].mxu1 }
0x1875   :  { %v6902_v30 = vadd.f32 %v14021_v38, %v12842_v27  ;;  %v6896_v23 = vpop.f32.mrb[97].mxu1 }
0x1876   :  { %v6897_v55 = vadd.f32 %v12842_v27, %v6896_v23 }
0x1878   :  { %v14792_v51 = vpack.c.bf16 %v6902_v30, %v6897_v55  ;;  %v14024_v61 = vpop.f32.mrb[98].mxu1  ;;  %v15157_v59 = vpack.i.bf16 %v6902_v30, %v6897_v55 }
0x1879   :  { %v6912_v41 = vadd.f32 %v14024_v61, %v12842_v27  ;;  %v6906_v43 = vpop.f32.mrb[99].mxu1 }
0x187a   :  { %v6907_v48 = vadd.f32 %v12842_v27, %v6906_v43  ;;  %15158 = vrot.lane.b32.xlu0 %v15157_v59, %s15616_s18  ;;  %14794 = vmatpush3.bf16.xpose.msk.msra.mxu1 %vm15769_vm3, %v14792_v51 }
0x187b   :  { %14799 = vmatprep.subr.bf16.mxu1 %v15624_v53 }
0x187c   :  { %v14796_v40 = vpack.c.bf16 %v6912_v41, %v6907_v48  ;;  %v15172_v58 = vpack.i.bf16 %v6912_v41, %v6907_v48 }
0x187e   :  { %15173 = vrot.lane.b32.xlu0 %v15172_v58, %s15617_s23  ;;  %15163 = vrot.lane.b32.xlu1 %v15172_v58, %s15616_s18 }
0x187f   :  { %14798 = vmatpush3.bf16.xpose.msk.msra.mxu0 %vm15769_vm3, %v14796_v40 }
0x1880   :  { %14803 = vmatprep.subr.bf16.mxu0 %v15624_v53 }
0x1882   :  { %15168 = vrot.lane.b32.xlu1 %v15157_v59, %s15617_s23 }
0x18ec   :  { %v15159_v34 = vpop.permute.xlu0 %15158 }
0x18ed   :  { %v15161_v54 = vunpack.i.h.bf16 %v15159_v34  ;;  %v15160_v46 = vunpack.i.l.bf16 %v15159_v34 }
0x18ef   :  { %v14800_v22 = vpack.c.bf16 %v15161_v54, %v15160_v46 }
0x18f0   :  { %v15164_v12 = vpop.permute.xlu1 %15163  ;;  %v15174_v63 = vpop.permute.xlu0 %15173 }
0x18f1   :  { %v15166_v57 = vunpack.i.h.bf16 %v15164_v12  ;;  %v15165_v9 = vunpack.i.l.bf16 %v15164_v12  ;;  %v15176_v31 = vunpack.i.h.bf16 %v15174_v63  ;;  %v15175_v2 = vunpack.i.l.bf16 %v15174_v63 }
0x18f3   :  { %v14804_v19 = vpack.c.bf16 %v15166_v57, %v15165_v9  ;;  %v14812_v62 = vpack.c.bf16 %v15176_v31, %v15175_v2 }
0x18f4   :  { %v15169_v32 = vpop.permute.xlu1 %15168 }
0x18f5   :  { %v15171_v18 = vunpack.i.h.bf16 %v15169_v32  ;;  %v15170_v25 = vunpack.i.l.bf16 %v15169_v32 }
0x18f7   :  { %v14808_v13 = vpack.c.bf16 %v15171_v18, %v15170_v25 }
0x1903   :  { %v14014_v60 = vpop.f32.mrb[56].mxu0 }
0x1904   :  { %v6808_v50 = vadd.f32 %v14014_v60, %v12839_v10  ;;  %v6802_v14 = vpop.f32.mrb[57].mxu0 }
0x1905   :  { %v6803_v39 = vadd.f32 %v12839_v10, %v6802_v14 }
0x1906   :  { %7011 = vrot.lane.b32.xlu0 %v6808_v50, %s15616_s18  ;;  %14047 = vmatmul.mubr.msk.f32.vlgmr.msra.gmra.mrb[62].mxu0 %vm479_vm2, %v6808_v50 }
0x1907   :  { %14806 = vmatpush3.bf16.xpose.msk.msra.mxu0 %vm15769_vm3, %v14804_v19  ;;  %v14031_v1 = vpop.f32.mrb[58].mxu0  ;;  %7009 = vrot.lane.b32.xlu1 %v6803_v39, %s15616_s18 }
0x1908   :  { %v17060_v29 = vadd.f32 %v14031_v1, %v12847_v44  ;;  %14040 = vmatmul.mubr.msk.f32.vlgmr.msra.gmra.mrb[100].mxu1 %vm479_vm2, %v6803_v39  ;;  %v6988_v4 = vpop.f32.mrb[59].mxu0  ;;  %14060 = vmatprep.mubr.msk.f32.mxu0 %vm15623_vm6, %v15622_v21 }
0x1909   :  { %14802 = vmatpush3.bf16.xpose.msk.msra.mxu1 %vm15769_vm3, %v14800_v22  ;;  %v6989_v42 = vadd.f32 %v12847_v44, %v6988_v4  ;;  %14811 = vmatprep.subr.bf16.mxu0 %v15624_v53 }
0x190a   :  { %15183 = vrot.lane.b32.xlu0 %v15172_v58, %s15618_s24  ;;  %14053 = vmatprep.mubr.msk.f32.mxu1 %vm15623_vm6, %v15622_v21 }
0x190b   :  { %v14034_v28 = vpop.f32.mrb[60].mxu0  ;;  %15178 = vrot.lane.b32.xlu1 %v15157_v59, %s15618_s24  ;;  %14807 = vmatprep.subr.bf16.mxu1 %v15624_v53  ;;  %v14824_v3 = vpack.c.bf16 %v17060_v29, %v6989_v42  ;;  %v17075_v37 = vpack.i.bf16 %v17060_v29, %v6989_v42 }
0x190c   :  { %v7004_v17 = vadd.f32 %v14034_v28, %v12847_v44  ;;  %v6998_v35 = vpop.f32.mrb[61].mxu0 }
0x190d   :  { %v6999_v49 = vadd.f32 %v12847_v44, %v6998_v35 }
0x190e   :  { %7015 = vrot.lane.b32.xlu0 %v6808_v50, %s15617_s23 }
0x190f   :  { %7013 = vrot.lane.b32.xlu1 %v6803_v39, %s15617_s23  ;;  %v14827_v8 = vpack.c.bf16 %v7004_v17, %v6999_v49  ;;  %v17079_v26 = vpack.i.bf16 %v7004_v17, %v6999_v49 }
0x1912   :  { %7019 = vrot.lane.b32.xlu0 %v6808_v50, %s15618_s24 }
0x1913   :  { %7017 = vrot.lane.b32.xlu1 %v6803_v39, %s15618_s24 }
0x1978   :  { %v7012_v24 = vpop.permute.xlu0 %7011 }
0x1979   :  { %v7010_v47 = vpop.permute.xlu1 %7009  ;;  %14061 = vmatmul.mubr.msk.f32.vlgmr.msra.gmra.mrb[64].mxu0 %vm479_vm2, %v7012_v24 }
0x197a   :  { %14814 = vmatpush3.bf16.xpose.msk.msra.mxu0 %vm15769_vm3, %v14812_v62  ;;  %14054 = vmatmul.mubr.msk.f32.vlgmr.msra.gmra.mrb[102].mxu1 %vm479_vm2, %v7010_v47 }
0x197b   :  { %14810 = vmatpush3.bf16.xpose.msk.msra.mxu1 %vm15769_vm3, %v14808_v13  ;;  %14074 = vmatprep.mubr.msk.f32.mxu0 %vm15623_vm6, %v15622_v21 }
0x197c   :  { %v15184_v45 = vpop.permute.xlu0 %15183  ;;  %14819 = vmatprep.subr.bf16.mxu0 %v15624_v53  ;;  %14067 = vmatprep.mubr.msk.f32.mxu1 %vm15623_vm6, %v15622_v21 }
0x197d   :  { %v15186_v11 = vunpack.i.h.bf16 %v15184_v45  ;;  %v15185_v15 = vunpack.i.l.bf16 %v15184_v45  ;;  %v15179_v27 = vpop.permute.xlu1 %15178  ;;  %14815 = vmatprep.subr.bf16.mxu1 %v15624_v53 }
0x197e   :  { %v15181_v38 = vunpack.i.h.bf16 %v15179_v27  ;;  %v15180_v30 = vunpack.i.l.bf16 %v15179_v27 }
0x197f   :  { %v14820_v23 = vpack.c.bf16 %v15186_v11, %v15185_v15 }
0x1980   :  { %v14816_v55 = vpack.c.bf16 %v15181_v38, %v15180_v30  ;;  %v7016_v51 = vpop.permute.xlu0 %7015 }
0x1981   :  { %v7014_v61 = vpop.permute.xlu1 %7013  ;;  %14075 = vmatmul.mubr.msk.f32.vlgmr.msra.gmra.mrb[66].mxu0 %vm479_vm2, %v7016_v51 }
0x1982   :  { %14822 = vmatpush3.bf16.xpose.msk.msra.mxu0 %vm15769_vm3, %v14820_v23  ;;  %14068 = vmatmul.mubr.msk.f32.vlgmr.msra.gmra.mrb[104].mxu1 %vm479_vm2, %v7014_v61 }
0x1983   :  { %14818 = vmatpush3.bf16.xpose.msk.msra.mxu1 %vm15769_vm3, %v14816_v55  ;;  %14088 = vmatprep.mubr.msk.f32.mxu0 %vm15623_vm6, %v15622_v21 }
0x1984   :  { %14081 = vmatprep.mubr.msk.f32.mxu1 %vm15623_vm6, %v15622_v21  ;;  %14826 = vmatprep.subr.bf16.mxu0 %v15624_v53  ;;  %v7020_v59 = vpop.permute.xlu0 %7019 }
0x1985   :  { %14823 = vmatprep.subr.bf16.mxu1 %v15624_v53  ;;  %v7018_v41 = vpop.permute.xlu1 %7017 }
0x1989   :  { %14089 = vmatmul.mubr.msk.f32.vlgmr.msra.gmra.mrb[68].mxu0 %vm479_vm2, %v7020_v59 }
0x198a   :  { %14082 = vmatmul.mubr.msk.f32.vlgmr.msra.gmra.mrb[106].mxu1 %vm479_vm2, %v7018_v41  ;;  %14828 = vmatpush3.bf16.msra.mxu0 %v14827_v8 }
0x198b   :  { %14825 = vmatpush3.bf16.msra.mxu1 %v14824_v3  ;;  %14102 = vmatprep.mubr.msk.f32.mxu0 %vm15623_vm6, %v15622_v21 }
0x198c   :  { %14832 = vmatprep.subr.bf16.mxu0 %v15624_v53  ;;  %14095 = vmatprep.mubr.msk.f32.mxu1 %vm15623_vm6, %v15622_v21 }
0x198d   :  { %14829 = vmatprep.subr.bf16.mxu1 %v15624_v53 }
0x19d9   :  { %v7237_v43 = vpop.f32.mrb[62].mxu0 }
0x19da   :  { %v7698_v48 = vmul.f32 0.5, %v7237_v43  ;;  %v14048_v40 = vpop.f32.mrb[63].mxu0 }
0x19db   :  { %v7161_v58 = vpop.f32.mrb[100].mxu1 }
0x19dc   :  { %v7697_v12 = vmul.f32 0.5, %v7161_v58  ;;  %v14041_v34 = vpop.f32.mrb[101].mxu1  ;;  %v7708_v57 = vsel %vm101_vm1, %v7698_v48, -inf }
0x19dd   :  { %7709 = vmax.xlane.f32.xlu0 %v7708_v57 }
0x19de   :  { %v7705_v9 = vsel %vm101_vm1, %v7697_v12, -inf }
0x19df   :  { %7706 = vmax.xlane.f32.xlu1 %v7705_v9 }
0x1a4c   :  { %v7389_v10 = vpop.f32.mrb[64].mxu0 }
0x1a4d   :  { %v7700_v54 = vmul.f32 0.5, %v7389_v10  ;;  %v7313_v46 = vpop.f32.mrb[102].mxu1  ;;  %v14062_v60 = vpop.f32.mrb[65].mxu0 }
0x1a4e   :  { %v7699_v50 = vmul.f32 0.5, %v7313_v46  ;;  %v14055_v14 = vpop.f32.mrb[103].mxu1 }
0x1a4f   :  { %v7714_v19 = vsel %vm101_vm1, %v7700_v54, -inf }
0x1a50   :  { %7715 = vmax.xlane.f32.xlu1 %v7714_v19  ;;  %v7711_v39 = vsel %vm101_vm1, %v7699_v50, -inf }
0x1a51   :  { %7712 = vmax.xlane.f32.xlu0 %v7711_v39 }
0x1a54   :  { %v7541_v44 = vpop.f32.mrb[66].mxu0 }
0x1a55   :  { %v7702_v22 = vmul.f32 0.5, %v7541_v44  ;;  %v7465_v1 = vpop.f32.mrb[104].mxu1  ;;  %v14076_v29 = vpop.f32.mrb[67].mxu0 }
0x1a56   :  { %v7701_v4 = vmul.f32 0.5, %v7465_v1  ;;  %v14069_v42 = vpop.f32.mrb[105].mxu1 }
0x1a57   :  { %v7720_v28 = vsel %vm101_vm1, %v7702_v22, -inf }
0x1a58   :  { %7721 = vmax.xlane.f32.xlu1 %v7720_v28  ;;  %v7717_v3 = vsel %vm101_vm1, %v7701_v4, -inf }
0x1a59   :  { %7718 = vmax.xlane.f32.xlu0 %v7717_v3 }
0x1a5c   :  { %v7693_v17 = vpop.f32.mrb[68].mxu0 }
0x1a5d   :  { %v7704_v35 = vmul.f32 0.5, %v7693_v17  ;;  %v7617_v49 = vpop.f32.mrb[106].mxu1  ;;  %v14090_v8 = vpop.f32.mrb[69].mxu0 }
0x1a5e   :  { %v7703_v63 = vmul.f32 0.5, %v7617_v49  ;;  %v14083_v32 = vpop.f32.mrb[107].mxu1 }
0x1a5f   :  { %v7726_v31 = vsel %vm101_vm1, %v7704_v35, -inf }
0x1a60   :  { %7727 = vmax.xlane.f32.xlu1 %v7726_v31  ;;  %v7723_v2 = vsel %vm101_vm1, %v7703_v63, -inf }
0x1a61   :  { %7724 = vmax.xlane.f32.xlu0 %v7723_v2 }
0x1a6a   :  { %v7710_v18 = vpop.xlane.xlu0 %7709 }
0x1a6b   :  { %v7730_v62 = vsub.f32 %v7698_v48, %v7710_v18 }
0x1a6c   :  { %v7707_v25 = vpop.xlane.xlu1 %7706 }
0x1a6d   :  { %v7729_v24 = vsub.f32 %v7697_v12, %v7707_v25  ;;  %v7739_v13 = vmul.f32 1.442695, %v7730_v62 }
0x1a6f   :  { %v7737_v47 = vmul.f32 1.442695, %v7729_v24  ;;  %15474 = vpow2.f32 %v7739_v13 }
0x1a71   :  { %15193 = vrot.lane.b32.xlu1 %v17079_v26, %s15616_s18  ;;  %15476 = vpow2.f32 %v7737_v47 }
0x1a75   :  { %15198 = vrot.lane.b32.xlu1 %v17075_v37, %s15617_s23 }
0x1a77   :  { %15188 = vrot.lane.b32.xlu0 %v17075_v37, %s15616_s18 }
0x1a79   :  { %v17131_v45 = vpop.eup %15474 }
0x1a7a   :  { %v7756_v15 = vsel %vm101_vm1, %v17131_v45, 0.0 }
0x1a7b   :  { %15203 = vrot.lane.b32.xlu0 %v17079_v26, %s15617_s23  ;;  %v17133_v11 = vpop.eup %15476 }
0x1a7c   :  { %v7753_v27 = vsel %vm101_vm1, %v17133_v11, 0.0 }
0x1a99   :  { %7757 = vadd.xlane.f32.xlu1 %v7756_v15 }
0x1a9a   :  { %7754 = vadd.xlane.f32.xlu0 %v7753_v27 }
0x1add   :  { %v7716_v38 = vpop.xlane.xlu1 %7715 }
0x1ade   :  { %v7732_v30 = vsub.f32 %v7700_v54, %v7716_v38  ;;  %v7713_v23 = vpop.xlane.xlu0 %7712 }
0x1adf   :  { %v7731_v55 = vsub.f32 %v7699_v50, %v7713_v23 }
0x1ae0   :  { %v7743_v51 = vmul.f32 1.442695, %v7732_v30 }
0x1ae1   :  { %v7741_v61 = vmul.f32 1.442695, %v7731_v55 }
0x1ae2   :  { %15478 = vpow2.f32 %v7743_v51 }
0x1ae3   :  { %15480 = vpow2.f32 %v7741_v61 }
0x1ae5   :  { %v7722_v59 = vpop.xlane.xlu1 %7721 }
0x1ae6   :  { %v7734_v41 = vsub.f32 %v7702_v22, %v7722_v59  ;;  %v7719_v43 = vpop.xlane.xlu0 %7718 }
0x1ae7   :  { %v7733_v48 = vsub.f32 %v7701_v4, %v7719_v43 }
0x1ae8   :  { %v7747_v40 = vmul.f32 1.442695, %v7734_v41 }
0x1ae9   :  { %v7745_v58 = vmul.f32 1.442695, %v7733_v48 }
0x1aea   :  { %15482 = vpow2.f32 %v7747_v40 }
0x1aeb   :  { %15484 = vpow2.f32 %v7745_v58 }
0x1aec   :  { %v17139_v12 = vpop.eup %15478 }
0x1aed   :  { %v17141_v34 = vpop.eup %15480  ;;  %v7728_v57 = vpop.xlane.xlu1 %7727  ;;  %v7762_v9 = vsel %vm101_vm1, %v17139_v12, 0.0 }
0x1aee   :  { %v7736_v10 = vsub.f32 %v7704_v35, %v7728_v57  ;;  %v7725_v54 = vpop.xlane.xlu0 %7724  ;;  %7763 = vadd.xlane.f32.xlu1 %v7762_v9  ;;  %v7759_v46 = vsel %vm101_vm1, %v17141_v34, 0.0 }
0x1aef   :  { %v7735_v60 = vsub.f32 %v7703_v63, %v7725_v54  ;;  %7760 = vadd.xlane.f32.xlu0 %v7759_v46 }
0x1af0   :  { %v7751_v50 = vmul.f32 1.442695, %v7736_v10 }
0x1af1   :  { %v7749_v14 = vmul.f32 1.442695, %v7735_v60  ;;  %v15194_v28 = vpop.permute.xlu1 %15193 }
0x1af2   :  { %15486 = vpow2.f32 %v7751_v50  ;;  %v15189_v3 = vpop.permute.xlu0 %15188  ;;  %v15196_v63 = vunpack.i.h.bf16 %v15194_v28  ;;  %v15195_v32 = vunpack.i.l.bf16 %v15194_v28 }
0x1af3   :  { %15488 = vpow2.f32 %v7749_v14  ;;  %v15191_v31 = vunpack.i.h.bf16 %v15189_v3  ;;  %v15190_v2 = vunpack.i.l.bf16 %v15189_v3 }
0x1af4   :  { %v17147_v19 = vpop.eup %15482 }
0x1af5   :  { %v17149_v39 = vpop.eup %15484  ;;  %v7768_v44 = vsel %vm101_vm1, %v17147_v19, 0.0  ;;  %v15199_v17 = vpop.permute.xlu1 %15198 }
0x1af6   :  { %7769 = vadd.xlane.f32.xlu1 %v7768_v44  ;;  %v7765_v22 = vsel %vm101_vm1, %v17149_v39, 0.0  ;;  %v15204_v35 = vpop.permute.xlu0 %15203  ;;  %v15201_v38 = vunpack.i.h.bf16 %v15199_v17  ;;  %v15200_v30 = vunpack.i.l.bf16 %v15199_v17 }
0x1af7   :  { %7766 = vadd.xlane.f32.xlu0 %v7765_v22  ;;  %v15205_v15 = vunpack.i.l.bf16 %v15204_v35 }
0x1af8   :  { %v14836_v41 = vpack.c.bf16 %v15201_v38, %v15200_v30 }
0x1afc   :  { %v17155_v1 = vpop.eup %15486 }
0x1afd   :  { %v17157_v29 = vpop.eup %15488  ;;  %v7774_v4 = vsel %vm101_vm1, %v17155_v1, 0.0 }
0x1afe   :  { %7775 = vadd.xlane.f32.xlu1 %v7774_v4  ;;  %v7771_v42 = vsel %vm101_vm1, %v17157_v29, 0.0 }
0x1aff   :  { %7772 = vadd.xlane.f32.xlu0 %v7771_v42 }
0x1b0f   :  { %15208 = vrot.lane.b32.xlu1 %v17075_v37, %s15618_s24  ;;  %v14833_v37 = vpack.c.bf16 %v15196_v63, %v15195_v32 }
0x1b15   :  { %15213 = vrot.lane.b32.xlu0 %v17079_v26, %s15618_s24  ;;  %v14830_v26 = vpack.c.bf16 %v15191_v31, %v15190_v2 }
0x1b26   :  { %v7758_v49 = vpop.xlane.xlu1 %7757 }
0x1b27   :  { %15490 = vrcp.f32 %v7758_v49  ;;  %v7755_v8 = vpop.xlane.xlu0 %7754 }
0x1b28   :  { %15492 = vrcp.f32 %v7755_v8  ;;  %v8407_v8 = vld [vmem:[%s17882_s2 + $0x2f0] sm:$0xff] }
0x1b31   :  { %v15491_v18 = vpop.eup %15490 }
0x1b32   :  { %v15493_v25 = vpop.eup %15492  ;;  %v7786_v62 = vmul.f32 %v15491_v18, %v17131_v45 }
0x1b33   :  { %v7785_v24 = vmul.f32 %v15493_v25, %v17133_v11  ;;  %v15206_v11 = vunpack.i.h.bf16 %v15204_v35 }
0x1b34   :  { %14103 = vmatmul.mubr.msk.f32.vlgmr.msra.gmra.mrb[70].mxu0 %vm101_vm1, %v7786_v62 }
0x1b35   :  { %14834 = vmatpush3.bf16.msra.mxu0 %v14833_v37  ;;  %14096 = vmatmul.mubr.msk.f32.vlgmr.msra.gmra.mrb[108].mxu1 %vm101_vm1, %v7785_v24  ;;  %v14839_v61 = vpack.c.bf16 %v15206_v11, %v15205_v15 }
0x1b36   :  { %14831 = vmatpush3.bf16.msra.mxu1 %v14830_v26  ;;  %14116 = vmatprep.mubr.msk.f32.mxu0 %vm15623_vm6, %v15622_v21 }
0x1b37   :  { %14838 = vmatprep.subr.bf16.mxu0 %v15624_v53  ;;  %14109 = vmatprep.mubr.msk.f32.mxu1 %vm15623_vm6, %v15622_v21 }
0x1b38   :  { %14835 = vmatprep.subr.bf16.mxu1 %v15624_v53 }
0x1b7b   :  { %v7764_v13 = vpop.xlane.xlu1 %7763 }
0x1b7c   :  { %15494 = vrcp.f32 %v7764_v13  ;;  %v7761_v47 = vpop.xlane.xlu0 %7760 }
0x1b7d   :  { %15496 = vrcp.f32 %v7761_v47 }
0x1b83   :  { %v7770_v45 = vpop.xlane.xlu1 %7769 }
0x1b84   :  { %15498 = vrcp.f32 %v7770_v45  ;;  %v7767_v27 = vpop.xlane.xlu0 %7766 }
0x1b85   :  { %15500 = vrcp.f32 %v7767_v27 }
0x1b86   :  { %v15495_v23 = vpop.eup %15494 }
0x1b87   :  { %v15497_v55 = vpop.eup %15496  ;;  %v7788_v51 = vmul.f32 %v15495_v23, %v17139_v12 }
0x1b88   :  { %v7787_v59 = vmul.f32 %v15497_v55, %v17141_v34 }
0x1b89   :  { %14117 = vmatmul.mubr.msk.f32.vlgmr.msra.gmra.mrb[72].mxu0 %vm101_vm1, %v7788_v51 }
0x1b8a   :  { %14840 = vmatpush3.bf16.msra.mxu0 %v14839_v61  ;;  %14110 = vmatmul.mubr.msk.f32.vlgmr.msra.gmra.mrb[110].mxu1 %vm101_vm1, %v7787_v59  ;;  %v12884_v61 = vld [vmem:[%s17882_s2 + $0x300] ss:$0 sm:$0xff] }
0x1b8b   :  { %v7776_v43 = vpop.xlane.xlu1 %7775  ;;  %14837 = vmatpush3.bf16.msra.mxu1 %v14836_v41  ;;  %14130 = vmatprep.mubr.msk.f32.mxu0 %vm15623_vm6, %v15622_v21 }
0x1b8c   :  { %15502 = vrcp.f32 %v7776_v43  ;;  %v7773_v48 = vpop.xlane.xlu0 %7772  ;;  %14123 = vmatprep.mubr.msk.f32.mxu1 %vm15623_vm6, %v15622_v21  ;;  %14841 = vmatprep.subr.bf16.mxu1 %v15624_v53 }
0x1b8d   :  { %15504 = vrcp.f32 %v7773_v48  ;;  %14844 = vmatprep.subr.bf16.mxu0 %v15624_v53 }
0x1b8e   :  { %v15499_v40 = vpop.eup %15498 }
0x1b8f   :  { %v15501_v58 = vpop.eup %15500  ;;  %v15209_v12 = vpop.permute.xlu1 %15208  ;;  %v7790_v34 = vmul.f32 %v15499_v40, %v17147_v19 }
0x1b90   :  { %v15211_v57 = vunpack.i.h.bf16 %v15209_v12  ;;  %v15210_v9 = vunpack.i.l.bf16 %v15209_v12  ;;  %v15214_v10 = vpop.permute.xlu0 %15213  ;;  %v7789_v54 = vmul.f32 %v15501_v58, %v17149_v39 }
0x1b91   :  { %v15216_v46 = vunpack.i.h.bf16 %v15214_v10  ;;  %v15215_v60 = vunpack.i.l.bf16 %v15214_v10  ;;  %14131 = vmatmul.mubr.msk.f32.vlgmr.msra.gmra.mrb[74].mxu0 %vm101_vm1, %v7790_v34 }
0x1b92   :  { %v14842_v50 = vpack.c.bf16 %v15211_v57, %v15210_v9  ;;  %14124 = vmatmul.mubr.msk.f32.vlgmr.msra.gmra.mrb[112].mxu1 %vm101_vm1, %v7789_v54  ;;  %14144 = vmatprep.mubr.msk.f32.mxu0 %vm15623_vm6, %v15622_v21 }
0x1b93   :  { %v14845_v14 = vpack.c.bf16 %v15216_v46, %v15215_v60  ;;  %14137 = vmatprep.mubr.msk.f32.mxu1 %vm15623_vm6, %v15622_v21 }
0x1b94   :  { %14843 = vmatpush3.bf16.msra.mxu1 %v14842_v50 }
0x1b95   :  { %14846 = vmatpush3.bf16.msra.mxu0 %v14845_v14 }
0x1b96   :  { %v15503_v19 = vpop.eup %15502 }
0x1b97   :  { %v15505_v44 = vpop.eup %15504  ;;  %v7792_v39 = vmul.f32 %v15503_v19, %v17155_v1  ;;  %v8408_v1 = vld [vmem:[%s17882_s2 + $0x2f8] sm:$0xff] }
0x1b98   :  { %v7791_v22 = vmul.f32 %v15505_v44, %v17157_v29  ;;  %v14847_v63 = vpack.c.bf16 %v8408_v1, %v8407_v8  ;;  %v8538_v44 = vld [vmem:[%s17883_s3 + $0x38] sm:$0xff] }
0x1b99   :  { %14145 = vmatmul.mubr.msk.f32.vlgmr.msra.gmra.mrb[76].mxu0 %vm101_vm1, %v7792_v39  ;;  %v8633_v1 = vld [vmem:[%s17882_s2 + $0x338] sm:$0xff] }
0x1b9a   :  { %14138 = vmatmul.mubr.msk.f32.vlgmr.msra.gmra.mrb[114].mxu1 %vm101_vm1, %v7791_v22  ;;  %14848 = vmatprep.subr.bf16.mxu1 %v14847_v63  ;;  %v8627_v22 = vld [vmem:[%s17882_s2 + $0x308] sm:$0xff] }
0x1b9b   :  { %14850 = vmatpush3.bf16.msra.mxu1 %v14847_v63 }
0x1c07   :  { %v7935_v4 = vpop.f32.mrb[70].mxu0 }
0x1c08   :  { %v7862_v42 = vpop.f32.mrb[108].mxu1  ;;  %v14104_v28 = vpop.f32.mrb[71].mxu0 }
0x1c09   :  { %v14097_v3 = vpop.f32.mrb[109].mxu1 }
0x1c0a   :  { %v8630_v3 = vld [vmem:[%s17882_s2 + $0x320] sm:$0xff] }
0x1c5c   :  { %v8081_v17 = vpop.f32.mrb[72].mxu0 }
0x1c5d   :  { %v14118_v35 = vpop.f32.mrb[73].mxu0  ;;  %8381 = vrot.lane.b32.xlu0 %v8081_v17, %s15619_s25  ;;  %v8008_v49 = vpop.f32.mrb[110].mxu1 }
0x1c5e   :  { %8379 = vrot.lane.b32.xlu1 %v8008_v49, %s15619_s25  ;;  %v14111_v29 = vpop.f32.mrb[111].mxu1  ;;  %v8631_v35 = vld [vmem:[%s17882_s2 + $0x328] sm:$0xff]  ;;  %v8632_v49 = vld [vmem:[%s17882_s2 + $0x330] sm:$0xff] }
0x1c5f   :  { %v14863_v8 = vpack.c.bf16 %v8632_v49, %v8631_v35  ;;  %v8634_v29 = vld [vmem:[%s17882_s2 + $0x340] sm:$0xff] }
0x1c60   :  { %v14867_v63 = vpack.c.bf16 %v8634_v29, %v8633_v1 }
0x1c64   :  { %v8227_v32 = vpop.f32.mrb[74].mxu0 }
0x1c65   :  { %8389 = vrot.lane.b32.xlu0 %v8227_v32, %s15620_s30  ;;  %v8154_v31 = vpop.f32.mrb[112].mxu1  ;;  %v14132_v2 = vpop.f32.mrb[75].mxu0  ;;  %v8635_v32 = vld [vmem:[%s17882_s2 + $0x348] sm:$0xff] }
0x1c66   :  { %8387 = vrot.lane.b32.xlu1 %v8154_v31, %s15620_s30  ;;  %v14125_v18 = vpop.f32.mrb[113].mxu1  ;;  %v8636_v31 = vld [vmem:[%s17882_s2 + $0x350] sm:$0xff] }
0x1c67   :  { %v14871_v2 = vpack.c.bf16 %v8636_v31, %v8635_v32  ;;  %v8637_v18 = vld [vmem:[%s17882_s2 + $0x358] sm:$0xff]  ;;  %v8765_v32 = vld [vmem:[%s17882_s2 + $0x3c0] sm:$0xff]  ;;  %v8766_v31 = vld [vmem:[%s17882_s2 + $0x3c8] sm:$0xff] }
0x1c6c   :  { %v8373_v25 = vpop.f32.mrb[76].mxu0 }
0x1c6d   :  { %8397 = vrot.lane.b32.xlu0 %v8373_v25, %s15621_s0  ;;  %v8300_v62 = vpop.f32.mrb[114].mxu1  ;;  %v14146_v37 = vpop.f32.mrb[77].mxu0  ;;  %v8638_v25 = vld [vmem:[%s17882_s2 + $0x360] sm:$0xff] }
0x1c6e   :  { %8395 = vrot.lane.b32.xlu1 %v8300_v62, %s15621_s0  ;;  %v14139_v24 = vpop.f32.mrb[115].mxu1  ;;  %v14875_v62 = vpack.c.bf16 %v8638_v25, %v8637_v18  ;;  %v8639_v37 = vld [vmem:[%s17882_s2 + $0x368] sm:$0xff]  ;;  %v8853_v18 = vld [vmem:[%s17882_s2 + $0x3d8] sm:$0xff]  ;;  %v8854_v25 = vld [vmem:[%s17882_s2 + $0x3e0] sm:$0xff] }
0x1c6f   :  { %v8640_v24 = vld [vmem:[%s17882_s2 + $0x370] sm:$0xff] }
0x1ccf   :  { %v8382_v26 = vpop.permute.xlu0 %8381 }
0x1cd0   :  { %v8380_v13 = vpop.permute.xlu1 %8379  ;;  %v8402_v27 = vsel %vm479_vm2, %v7935_v4, %v8382_v26  ;;  %v8628_v4 = vld [vmem:[%s17882_s2 + $0x310] sm:$0xff]  ;;  %v14879_v26 = vpack.c.bf16 %v8640_v24, %v8639_v37 }
0x1cd1   :  { %v8401_v11 = vsel %vm479_vm2, %v7862_v42, %v8380_v13  ;;  %v8629_v42 = vld [vmem:[%s17882_s2 + $0x318] sm:$0xff]  ;;  %v14855_v28 = vpack.c.bf16 %v8628_v4, %v8627_v22 }
0x1cd2   :  { %v14859_v17 = vpack.c.bf16 %v8630_v3, %v8629_v42 }
0x1cd3   :  { %14856 = vmatprep.subr.bf16.mxu1 %v14855_v28 }
0x1cd7   :  { %v8390_v47 = vpop.permute.xlu0 %8389 }
0x1cd8   :  { %v8388_v45 = vpop.permute.xlu1 %8387  ;;  %v8404_v23 = vsel %vm2036_vm4, %v8402_v27, %v8390_v47 }
0x1cd9   :  { %v8403_v38 = vsel %vm2036_vm4, %v8401_v11, %v8388_v45 }
0x1cdf   :  { %v8398_v15 = vpop.permute.xlu0 %8397 }
0x1ce0   :  { %v8396_v30 = vpop.permute.xlu1 %8395  ;;  %v8406_v51 = vsel %vm2041_vm5, %v8404_v23, %v8398_v15 }
0x1ce1   :  { %v8405_v55 = vsel %vm2041_vm5, %v8403_v38, %v8396_v30  ;;  %v12887_v30 = vld [vmem:[%s17882_s2 + $0x3a0] ss:$0 sm:$0xff] }
0x1ce2   :  { %14151 = vmatprep.mubr.msk.f32.mxu1 %vm101_vm1, %v8405_v55 }
0x1ce3   :  { %14152 = vmatmul.mubr.msk.f32.vlgmr.msra.gmra.mrb[116].mxu1 %vm101_vm1, %v8406_v51 }
0x1ce4   :  { %14858 = vmatpush3.bf16.msra.mxu1 %v14855_v28 }
0x1ce5   :  { %14860 = vmatprep.subr.bf16.mxu1 %v14859_v17 }
0x1ce8   :  { %14862 = vmatpush3.bf16.msra.mxu1 %v14859_v17 }
0x1ce9   :  { %14864 = vmatprep.subr.bf16.mxu1 %v14863_v8 }
0x1cec   :  { %14866 = vmatpush3.bf16.msra.mxu1 %v14863_v8 }
0x1ced   :  { %14868 = vmatprep.subr.bf16.mxu1 %v14867_v63 }
0x1cf0   :  { %14870 = vmatpush3.bf16.msra.mxu1 %v14867_v63 }
0x1cf1   :  { %14872 = vmatprep.subr.bf16.mxu1 %v14871_v2 }
0x1cf4   :  { %14874 = vmatpush3.bf16.msra.mxu1 %v14871_v2  ;;  %v14887_v2 = vpack.c.bf16 %v8766_v31, %v8765_v32 }
0x1cf5   :  { %14876 = vmatprep.subr.bf16.mxu1 %v14875_v62 }
0x1cf8   :  { %14878 = vmatpush3.bf16.msra.mxu1 %v14875_v62  ;;  %v14891_v62 = vpack.c.bf16 %v8854_v25, %v8853_v18 }
0x1cf9   :  { %14880 = vmatprep.subr.bf16.mxu1 %v14879_v26 }
0x1cfc   :  { %14882 = vmatpush3.bf16.msra.mxu1 %v14879_v26 }
0x1db6   :  { %v14153_v59 = vpop.f32.mrb[116].mxu1 }
0x1db7   :  { %v8492_v41 = vadd.f32 %v14153_v59, %v12884_v61  ;;  %v8486_v43 = vpop.f32.mrb[117].mxu1  ;;  %v12888_v59 = vld [vmem:[%s17882_s2 + $0x3a8] ss:$0 sm:$0xff] }
0x1db8   :  { %v8487_v48 = vadd.f32 %v12884_v61, %v8486_v43 }
0x1db9   :  { %v8496_v40 = vadd.f32 %v8492_v41, %v17019_v0 }
0x1dba   :  { %v8495_v58 = vadd.f32 %v8487_v48, %v17017_v56  ;;  %v8537_v56 = vld [vmem:[%s17883_s3 + $0x30] sm:$0xff] }
0x1dbb   :  { %v8500_v12 = vsel %vm101_vm1, %v8496_v40, 0.0  ;;  %v14851_v39 = vpack.c.bf16 %v8538_v44, %v8537_v56 }
0x1dbc   :  { %8501 = vadd.xlane.f32.xlu0 %v8500_v12  ;;  %v8497_v34 = vsel %vm101_vm1, %v8495_v58, 0.0 }
0x1dbd   :  { %8498 = vadd.xlane.f32.xlu1 %v8497_v34  ;;  %14852 = vmatprep.subr.bf16.mxu0 %v14851_v39  ;;  %v12889_v34 = vld [vmem:[%s17883_s3 + $0x40] ss:$0 sm:$0xff] }
0x1dbe   :  { %14854 = vmatpush3.bf16.msra.mxu0 %v14851_v39 }
0x1dbf   :  { %14888 = vmatprep.subr.bf16.mxu0 %v14887_v2 }
0x1e49   :  { %v8502_v57 = vpop.xlane.xlu0 %8501 }
0x1e4a   :  { %v8504_v9 = vmul.f32 0.0625, %v8502_v57  ;;  %v8499_v10 = vpop.xlane.xlu1 %8498 }
0x1e4b   :  { %v8503_v54 = vmul.f32 0.0625, %v8499_v10 }
0x1e4c   :  { %v8506_v46 = vsub.f32 %v8496_v40, %v8504_v9  ;;  %v8641_v40 = vld [vmem:[%s17882_s2 + $0x378] sm:$0xff] }
0x1e4d   :  { %v8505_v60 = vsub.f32 %v8495_v58, %v8503_v54  ;;  %v8642_v58 = vld [vmem:[%s17882_s2 + $0x380] sm:$0xff] }
0x1e4e   :  { %v8508_v50 = vmul.f32 %v8506_v46, %v8506_v46  ;;  %v14883_v12 = vpack.c.bf16 %v8642_v58, %v8641_v40  ;;  %v12895_v40 = vld [vmem:[%s17882_s2 + $0x3d0] ss:$0 sm:$0xff] }
0x1e4f   :  { %v8507_v14 = vmul.f32 %v8505_v60, %v8505_v60 }
0x1e50   :  { %v8512_v19 = vsel %vm101_vm1, %v8508_v50, 0.0  ;;  %14884 = vmatprep.subr.bf16.mxu1 %v14883_v12  ;;  %v12892_v50 = vld [vmem:[%s17882_s2 + $0x388] ss:$0 sm:$0xff] }
0x1e51   :  { %8513 = vadd.xlane.f32.xlu1 %v8512_v19  ;;  %v8509_v0 = vsel %vm101_vm1, %v8507_v14, 0.0  ;;  %14886 = vmatpush3.bf16.msra.mxu1 %v14883_v12 }
0x1e52   :  { %8510 = vadd.xlane.f32.xlu0 %v8509_v0  ;;  %14242 = vmatprep.subr.mxu1 %v15622_v21 }
0x1ede   :  { %v8514_v13 = vpop.xlane.xlu1 %8513 }
0x1edf   :  { %v8516_v47 = vmul.f32 0.0625, %v8514_v13  ;;  %v8511_v45 = vpop.xlane.xlu0 %8510 }
0x1ee0   :  { %v8515_v11 = vmul.f32 0.0625, %v8511_v45 }
0x1ee1   :  { %v8518_v15 = vadd.f32 1e-05, %v8516_v47 }
0x1ee2   :  { %v8517_v27 = vadd.f32 1e-05, %v8515_v11 }
0x1ee3   :  { %15506 = vrsqrt.f32 %v8518_v15  ;;  %v12893_v15 = vld [vmem:[%s17882_s2 + $0x3b0] ss:$0 sm:$0xff] }
0x1ee4   :  { %15508 = vrsqrt.f32 %v8517_v27 }
0x1eed   :  { %v15507_v38 = vpop.eup %15506 }
0x1eee   :  { %v15509_v23 = vpop.eup %15508  ;;  %v8522_v55 = vmul.f32 %v15507_v38, %v8506_v46 }
0x1eef   :  { %v8521_v51 = vmul.f32 %v15509_v23, %v8505_v60 }
0x1ef0   :  { %v8529_v61 = vmul.f32 %v12887_v30, %v8522_v55  ;;  %v12894_v55 = vld [vmem:[%s17882_s2 + $0x3b8] ss:$0 sm:$0xff] }
0x1ef1   :  { %v8528_v41 = vmul.f32 %v12887_v30, %v8521_v51 }
0x1ef2   :  { %v8536_v48 = vadd.f32 %v12888_v59, %v8529_v61  ;;  %v8935_v61 = vld [vmem:[%s17882_s2 + $0x3f0] sm:$0xff] }
0x1ef3   :  { %v8535_v43 = vadd.f32 %v12888_v59, %v8528_v41  ;;  %v8936_v59 = vld [vmem:[%s17882_s2 + $0x3f8] sm:$0xff] }
0x1ef5   :  { %14158 = vmatprep.mubr.msk.f32.mxu0 %vm101_vm1, %v8535_v43 }
0x1ef6   :  { %14159 = vmatmul.mubr.msk.f32.vlgmr.msra.gmra.mrb[78].mxu0 %vm101_vm1, %v8536_v48 }
0x1ef7   :  { %14890 = vmatpush3.bf16.msra.mxu0 %v14887_v2 }
0x1ef8   :  { %14892 = vmatprep.subr.bf16.mxu0 %v14891_v62 }
0x1fc9   :  { %v14160_v57 = vpop.f32.mrb[78].mxu0 }
0x1fca   :  { %v8622_v9 = vadd.f32 %v14160_v57, %v12889_v34  ;;  %v8616_v10 = vpop.f32.mrb[79].mxu0 }
0x1fcb   :  { %v8617_v54 = vadd.f32 %v12889_v34, %v8616_v10 }
0x1fcc   :  { %v8626_v60 = vmax.f32 %v8622_v9, 0.0  ;;  %v12898_v9 = vld [vmem:[%s17882_s2 + $0x3e8] ss:$0 sm:$0xff] }
0x1fcd   :  { %v8625_v46 = vmax.f32 %v8617_v54, 0.0 }
0x1fcf   :  { %14193 = vmatprep.mubr.f32.mxu1 %v8625_v46 }
0x1fd0   :  { %14194 = vmatmul.mubr.f32.vlgmr.msra.gmra.mrb[118].mxu1 %v8626_v60 }
0x1fd1   :  { %14244 = vmatprep.mubr.msk.f32.mxu1 %vm15623_vm6, %v15622_v21 }
0x20a3   :  { %v14195_v14 = vpop.f32.mrb[118].mxu1 }
0x20a4   :  { %v8720_v19 = vadd.f32 %v14195_v14, %v12892_v50  ;;  %v8714_v0 = vpop.f32.mrb[119].mxu1 }
0x20a5   :  { %v8715_v56 = vadd.f32 %v12892_v50, %v8714_v0 }
0x20a6   :  { %v8724_v44 = vadd.f32 %v8720_v19, %v8536_v48  ;;  %v14895_v48 = vpack.c.bf16 %v8936_v59, %v8935_v61 }
0x20a7   :  { %v8723_v39 = vadd.f32 %v8715_v56, %v8535_v43 }
0x20a8   :  { %v8728_v22 = vsel %vm101_vm1, %v8724_v44, 0.0 }
0x20a9   :  { %8729 = vadd.xlane.f32.xlu1 %v8728_v22  ;;  %v8725_v4 = vsel %vm101_vm1, %v8723_v39, 0.0 }
0x20aa   :  { %8726 = vadd.xlane.f32.xlu0 %v8725_v4 }
0x2136   :  { %v8730_v42 = vpop.xlane.xlu1 %8729 }
0x2137   :  { %v8732_v28 = vmul.f32 0.0625, %v8730_v42  ;;  %v8727_v3 = vpop.xlane.xlu0 %8726 }
0x2138   :  { %v8731_v17 = vmul.f32 0.0625, %v8727_v3  ;;  %v12901_v3 = vld [vmem:[%s17882_s2 + $0x400] ss:$0 sm:$0xff] }
0x2139   :  { %v8734_v35 = vsub.f32 %v8724_v44, %v8732_v28 }
0x213a   :  { %v8733_v49 = vsub.f32 %v8723_v39, %v8731_v17 }
0x213b   :  { %v8736_v8 = vmul.f32 %v8734_v35, %v8734_v35 }
0x213c   :  { %v8735_v1 = vmul.f32 %v8733_v49, %v8733_v49 }
0x213d   :  { %v8740_v29 = vsel %vm101_vm1, %v8736_v8, 0.0 }
0x213e   :  { %8741 = vadd.xlane.f32.xlu1 %v8740_v29  ;;  %v8737_v63 = vsel %vm101_vm1, %v8735_v1, 0.0 }
0x213f   :  { %8738 = vadd.xlane.f32.xlu0 %v8737_v63 }
0x21cb   :  { %v8742_v37 = vpop.xlane.xlu1 %8741 }
0x21cc   :  { %v8744_v24 = vmul.f32 0.0625, %v8742_v37  ;;  %v8739_v26 = vpop.xlane.xlu0 %8738 }
0x21cd   :  { %v8743_v13 = vmul.f32 0.0625, %v8739_v26 }
0x21ce   :  { %v8746_v47 = vadd.f32 1e-05, %v8744_v24 }
0x21cf   :  { %v8745_v45 = vadd.f32 1e-05, %v8743_v13 }
0x21d0   :  { %15510 = vrsqrt.f32 %v8746_v47 }
0x21d1   :  { %15512 = vrsqrt.f32 %v8745_v45 }
0x21da   :  { %v15511_v11 = vpop.eup %15510 }
0x21db   :  { %v15513_v27 = vpop.eup %15512  ;;  %v8750_v38 = vmul.f32 %v15511_v11, %v8734_v35 }
0x21dc   :  { %v8749_v30 = vmul.f32 %v15513_v27, %v8733_v49 }
0x21dd   :  { %v8757_v23 = vmul.f32 %v12893_v15, %v8750_v38 }
0x21de   :  { %v8756_v51 = vmul.f32 %v12893_v15, %v8749_v30 }
0x21df   :  { %v17329_v43 = vadd.f32 %v12894_v55, %v8757_v23 }
0x21e0   :  { %v17327_v41 = vadd.f32 %v12894_v55, %v8756_v51 }
0x21e2   :  { %14200 = vmatprep.mubr.msk.f32.mxu0 %vm101_vm1, %v17327_v41 }
0x21e3   :  { %14201 = vmatmul.mubr.msk.f32.vlgmr.msra.gmra.mrb[80].mxu0 %vm101_vm1, %v17329_v43 }
0x21e4   :  { %14894 = vmatpush3.bf16.msra.mxu0 %v14891_v62  ;;  %14207 = vmatprep.mubr.msk.f32.mxu0 %vm101_vm1, %v17327_v41 }
0x21e5   :  { %14896 = vmatprep.subr.bf16.mxu0 %v14895_v48 }
0x21e7   :  { %14208 = vmatmul.mubr.msk.f32.vlgmr.msra.gmra.mrb[82].mxu0 %vm101_vm1, %v17329_v43 }
0x21e8   :  { %14898 = vmatpush3.bf16.msra.mxu0 %v14895_v48  ;;  %14214 = vmatprep.mubr.msk.f32.mxu0 %vm101_vm1, %v17327_v41 }
0x21e9   :  { %14217 = vmatprep.subr.mxu0 %v15622_v21 }
0x21eb   :  { %14215 = vmatmul.mubr.msk.f32.vlgmr.msra.gmra.mrb[84].mxu0 %vm101_vm1, %v17329_v43 }
0x21ec   :  { %14219 = vmatprep.mubr.msk.f32.mxu0 %vm15623_vm6, %v15622_v21 }
0x22b6   :  { %v14202_v58 = vpop.f32.mrb[80].mxu0 }
0x22b7   :  { %v8850_v12 = vadd.f32 %v14202_v58, %v12895_v40  ;;  %v8844_v34 = vpop.f32.mrb[81].mxu0 }
0x22b8   :  { %v8845_v57 = vadd.f32 %v12895_v40, %v8844_v34 }
0x22b9   :  { %9021 = vrot.lane.b32.xlu0 %v8850_v12, %s15616_s18 }
0x22ba   :  { %v14209_v10 = vpop.f32.mrb[82].mxu0  ;;  %9019 = vrot.lane.b32.xlu1 %v8845_v57, %s15616_s18 }
0x22bb   :  { %v8932_v54 = vadd.f32 %v14209_v10, %v12898_v9  ;;  %v8926_v46 = vpop.f32.mrb[83].mxu0 }
0x22bc   :  { %v8927_v60 = vadd.f32 %v12898_v9, %v8926_v46 }
0x22be   :  { %v14216_v50 = vpop.f32.mrb[84].mxu0  ;;  %9033 = vrot.lane.b32.xlu0 %v8927_v60, %s15616_s18  ;;  %14218 = vmatpush3.xpose.msk.msra.mxu0 %vm479_vm2, %v8927_v60 }
0x22bf   :  { %9035 = vrot.lane.b32.xlu1 %v8932_v54, %s15616_s18  ;;  %v9008_v14 = vpop.f32.mrb[85].mxu0  ;;  %14222 = vmatprep.subr.mxu0 %v15622_v21  ;;  %v17401_v35 = vadd.f32 %v14216_v50, %v12901_v3 }
0x22c0   :  { %v17403_v8 = vadd.f32 %v12901_v3, %v9008_v14 }
0x22c1   :  { %14220 = vmatmul.mubr.msk.f32.vlgmr.msra.gmra.mrb[86].mxu0 %vm479_vm2, %v8845_v57 }
0x22c2   :  { %9039 = vrot.lane.b32.xlu0 %v8932_v54, %s15617_s23  ;;  %14223 = vmatpush3.xpose.msk.msra.mxu0 %vm479_vm2, %v8932_v54 }
0x22c3   :  { %9023 = vrot.lane.b32.xlu1 %v8845_v57, %s15617_s23  ;;  %14224 = vmatprep.mubr.msk.f32.mxu0 %vm15623_vm6, %v15622_v21 }
0x22c4   :  { %14227 = vmatprep.subr.mxu0 %v15622_v21 }
0x22c5   :  { %14225 = vmatmul.mubr.msk.f32.vlgmr.msra.gmra.mrb[88].mxu0 %vm479_vm2, %v8850_v12 }
0x22c6   :  { %9025 = vrot.lane.b32.xlu0 %v8850_v12, %s15617_s23  ;;  %14229 = vmatprep.mubr.msk.f32.mxu0 %vm15623_vm6, %v15622_v21 }
0x22c7   :  { %9037 = vrot.lane.b32.xlu1 %v8927_v60, %s15617_s23 }
0x22ca   :  { %9043 = vrot.lane.b32.xlu0 %v8932_v54, %s15618_s24 }
0x22cb   :  { %9041 = vrot.lane.b32.xlu1 %v8927_v60, %s15618_s24 }
0x22ce   :  { %9029 = vrot.lane.b32.xlu0 %v8850_v12, %s15618_s24 }
0x22cf   :  { %9027 = vrot.lane.b32.xlu1 %v8845_v57, %s15618_s24 }
0x232b   :  { %v9022_v19 = vpop.permute.xlu0 %9021 }
0x232c   :  { %v9020_v0 = vpop.permute.xlu1 %9019 }
0x2330   :  { %v9034_v56 = vpop.permute.xlu0 %9033 }
0x2331   :  { %v9036_v44 = vpop.permute.xlu1 %9035  ;;  %14228 = vmatpush3.xpose.msk.msra.mxu0 %vm479_vm2, %v9034_v56 }
0x2332   :  { %14232 = vmatprep.subr.mxu0 %v15622_v21 }
0x2334   :  { %v9040_v39 = vpop.permute.xlu0 %9039  ;;  %14230 = vmatmul.mubr.msk.f32.vlgmr.msra.gmra.mrb[90].mxu0 %vm479_vm2, %v9020_v0 }
0x2335   :  { %v9024_v22 = vpop.permute.xlu1 %9023  ;;  %14233 = vmatpush3.xpose.msk.msra.mxu0 %vm479_vm2, %v9036_v44  ;;  %14243 = vmatpush3.xpose.msk.msra.mxu1 %vm479_vm2, %v9040_v39 }
0x2336   :  { %14234 = vmatprep.mubr.msk.f32.mxu0 %vm15623_vm6, %v15622_v21  ;;  %14237 = vmatprep.subr.mxu0 %v15622_v21 }
0x2337   :  { %14252 = vmatprep.subr.mxu1 %v15622_v21 }
0x2338   :  { %v9026_v4 = vpop.permute.xlu0 %9025  ;;  %14235 = vmatmul.mubr.msk.f32.vlgmr.msra.gmra.mrb[92].mxu0 %vm479_vm2, %v9022_v19 }
0x2339   :  { %v9038_v42 = vpop.permute.xlu1 %9037  ;;  %14245 = vmatmul.mubr.msk.f32.vlgmr.msra.gmra.mrb[120].mxu1 %vm479_vm2, %v9026_v4  ;;  %14239 = vmatprep.mubr.msk.f32.mxu0 %vm15623_vm6, %v15622_v21 }
0x233a   :  { %14238 = vmatpush3.xpose.msk.msra.mxu0 %vm479_vm2, %v9038_v42  ;;  %14254 = vmatprep.mubr.msk.f32.mxu1 %vm15623_vm6, %v15622_v21 }
0x233b   :  { %14247 = vmatprep.subr.mxu0 %v15622_v21 }
0x233c   :  { %v9044_v28 = vpop.permute.xlu0 %9043 }
0x233d   :  { %v9042_v17 = vpop.permute.xlu1 %9041  ;;  %14240 = vmatmul.mubr.msk.f32.vlgmr.msra.gmra.mrb[94].mxu0 %vm479_vm2, %v9024_v22  ;;  %14253 = vmatpush3.xpose.msk.msra.mxu1 %vm479_vm2, %v9044_v28 }
0x233e   :  { %14248 = vmatpush3.xpose.msk.msra.mxu0 %vm479_vm2, %v9042_v17  ;;  %14262 = vmatprep.subr.mxu1 %v15622_v21 }
0x233f   :  { %14249 = vmatprep.mubr.msk.f32.mxu0 %vm15623_vm6, %v15622_v21  ;;  %14257 = vmatprep.subr.mxu0 %v15622_v21 }
0x2340   :  { %v9030_v49 = vpop.permute.xlu0 %9029 }
0x2341   :  { %v9028_v1 = vpop.permute.xlu1 %9027  ;;  %14255 = vmatmul.mubr.msk.f32.vlgmr.msra.gmra.mrb[122].mxu1 %vm479_vm2, %v9030_v49 }
0x2342   :  { %14250 = vmatmul.mubr.msk.f32.vlgmr.msra.gmra.mrb[96].mxu0 %vm479_vm2, %v9028_v1  ;;  %14263 = vmatpush3.msra.mxu1 %v17401_v35 }
0x2343   :  { %14258 = vmatpush3.msra.mxu0 %v17403_v8  ;;  %14259 = vmatprep.mubr.msk.f32.mxu0 %vm15623_vm6, %v15622_v21 }
0x2344   :  { %14264 = vmatprep.mubr.msk.f32.mxu1 %vm15623_vm6, %v15622_v21  ;;  %14267 = vmatprep.subr.mxu0 %v15622_v21 }
0x2345   :  { %14272 = vmatprep.subr.mxu1 %v15622_v21 }
0x2394   :  { %v9135_v29 = vpop.f32.mrb[86].mxu0 }
0x2395   :  { %v9657_v63 = vmul.f32 0.5, %v9135_v29  ;;  %v14221_v32 = vpop.f32.mrb[87].mxu0 }
0x2397   :  { %v9665_v31 = vsel %vm15663_vm0, %v9657_v63, -1e+09 }
0x2398   :  { %v9209_v2 = vpop.f32.mrb[88].mxu0  ;;  %v9673_v18 = vsel %vm2036_vm4, %v9665_v31, -inf }
0x2399   :  { %v9658_v25 = vmul.f32 0.5, %v9209_v2  ;;  %9674 = vmax.xlane.f32.xlu1 %v9673_v18  ;;  %v14226_v62 = vpop.f32.mrb[89].mxu0 }
0x239b   :  { %v9666_v37 = vsel %vm15663_vm0, %v9658_v25, -1e+09 }
0x239c   :  { %v9676_v24 = vsel %vm2036_vm4, %v9666_v37, -inf }
0x239d   :  { %9677 = vmax.xlane.f32.xlu0 %v9676_v24 }
0x2407   :  { %v9283_v26 = vpop.f32.mrb[90].mxu0 }
0x2408   :  { %v9659_v13 = vmul.f32 0.5, %v9283_v26  ;;  %v14231_v47 = vpop.f32.mrb[91].mxu0 }
0x240a   :  { %v9667_v45 = vsel %vm15663_vm0, %v9659_v13, -1e+09 }
0x240b   :  { %v9357_v11 = vpop.f32.mrb[92].mxu0  ;;  %v9679_v15 = vsel %vm2036_vm4, %v9667_v45, -inf }
0x240c   :  { %v9660_v27 = vmul.f32 0.5, %v9357_v11  ;;  %v9505_v38 = vpop.f32.mrb[120].mxu1  ;;  %9680 = vmax.xlane.f32.xlu0 %v9679_v15  ;;  %v14236_v30 = vpop.f32.mrb[93].mxu0 }
0x240d   :  { %v9662_v23 = vmul.f32 0.5, %v9505_v38  ;;  %v14246_v55 = vpop.f32.mrb[121].mxu1 }
0x240e   :  { %v9668_v51 = vsel %vm15663_vm0, %v9660_v27, -1e+09 }
0x240f   :  { %v9682_v61 = vsel %vm2036_vm4, %v9668_v51, -inf  ;;  %v9670_v59 = vsel %vm15663_vm0, %v9662_v23, -1e+09 }
0x2410   :  { %v9431_v48 = vpop.f32.mrb[94].mxu0  ;;  %9683 = vmax.xlane.f32.xlu1 %v9682_v61  ;;  %v9688_v34 = vsel %vm2036_vm4, %v9670_v59, -inf }
0x2411   :  { %v9661_v40 = vmul.f32 0.5, %v9431_v48  ;;  %v14241_v58 = vpop.f32.mrb[95].mxu0 }
0x2413   :  { %v9669_v12 = vsel %vm15663_vm0, %v9661_v40, -1e+09 }
0x2414   :  { %v9653_v57 = vpop.f32.mrb[122].mxu1  ;;  %9689 = vmax.xlane.f32.xlu1 %v9688_v34  ;;  %v9685_v9 = vsel %vm2036_vm4, %v9669_v12, -inf }
0x2415   :  { %v9664_v10 = vmul.f32 0.5, %v9653_v57  ;;  %9686 = vmax.xlane.f32.xlu0 %v9685_v9  ;;  %v9579_v54 = vpop.f32.mrb[96].mxu0  ;;  %v14256_v46 = vpop.f32.mrb[123].mxu1 }
0x2416   :  { %v9663_v60 = vmul.f32 0.5, %v9579_v54  ;;  %v14251_v50 = vpop.f32.mrb[97].mxu0 }
0x2417   :  { %v9672_v14 = vsel %vm15663_vm0, %v9664_v10, -1e+09 }
0x2418   :  { %v9671_v19 = vsel %vm15663_vm0, %v9663_v60, -1e+09  ;;  %v9694_v0 = vsel %vm2036_vm4, %v9672_v14, -inf }
0x2419   :  { %9695 = vmax.xlane.f32.xlu1 %v9694_v0  ;;  %v9691_v56 = vsel %vm2036_vm4, %v9671_v19, -inf }
0x241a   :  { %9692 = vmax.xlane.f32.xlu0 %v9691_v56 }
0x2426   :  { %v9675_v44 = vpop.xlane.xlu1 %9674 }
0x2427   :  { %v9697_v22 = vsub.f32 %v9665_v31, %v9675_v44 }
0x2429   :  { %v9705_v42 = vmul.f32 1.442695, %v9697_v22 }
0x242a   :  { %9049 = vrot.lane.b32.xlu1 %v17401_v35, %s15616_s18  ;;  %v9678_v6 = vpop.xlane.xlu0 %9677 }
0x242b   :  { %v9698_v39 = vsub.f32 %v9666_v37, %v9678_v6 }
0x242d   :  { %v9707_v4 = vmul.f32 1.442695, %v9698_v39 }
0x242e   :  { %9053 = vrot.lane.b32.xlu1 %v17403_v8, %s15617_s23 }
0x242f   :  { %15514 = vpow2.f32 %v9707_v4 }
0x2430   :  { %9047 = vrot.lane.b32.xlu0 %v17403_v8, %s15616_s18  ;;  %15516 = vpow2.f32 %v9705_v42 }
0x2434   :  { %9055 = vrot.lane.b32.xlu0 %v17401_v35, %s15617_s23 }
0x2439   :  { %v15515_v28 = vpop.eup %15514 }
0x243a   :  { %v15517_v3 = vpop.eup %15516  ;;  %v9724_v17 = vsel %vm2036_vm4, %v15515_v28, 0.0 }
0x243b   :  { %v9721_v49 = vsel %vm2036_vm4, %v15517_v3, 0.0 }
0x2452   :  { %9725 = vadd.xlane.f32.xlu1 %v9724_v17 }
0x2453   :  { %9722 = vadd.xlane.f32.xlu0 %v9721_v49 }
0x2499   :  { %v9681_v1 = vpop.xlane.xlu0 %9680 }
0x249a   :  { %v9699_v29 = vsub.f32 %v9667_v45, %v9681_v1 }
0x249c   :  { %v9709_v63 = vmul.f32 1.442695, %v9699_v29 }
0x249d   :  { %v9684_v32 = vpop.xlane.xlu1 %9683 }
0x249e   :  { %15518 = vpow2.f32 %v9709_v63  ;;  %v9700_v37 = vsub.f32 %v9668_v51, %v9684_v32 }
0x24a0   :  { %v9711_v27 = vmul.f32 1.442695, %v9700_v37 }
0x24a1   :  { %v9690_v2 = vpop.xlane.xlu1 %9689 }
0x24a2   :  { %v9702_v18 = vsub.f32 %v9670_v59, %v9690_v2  ;;  %v9687_v31 = vpop.xlane.xlu0 %9686 }
0x24a3   :  { %v9701_v25 = vsub.f32 %v9669_v12, %v9687_v31 }
0x24a4   :  { %v9715_v62 = vmul.f32 1.442695, %v9702_v18 }
0x24a5   :  { %v9713_v24 = vmul.f32 1.442695, %v9701_v25 }
0x24a6   :  { %15520 = vpow2.f32 %v9715_v62  ;;  %v9696_v26 = vpop.xlane.xlu1 %9695 }
0x24a7   :  { %15522 = vpow2.f32 %v9713_v24  ;;  %v9704_v13 = vsub.f32 %v9672_v14, %v9696_v26  ;;  %v9693_v47 = vpop.xlane.xlu0 %9692 }
0x24a8   :  { %v15519_v11 = vpop.eup %15518  ;;  %v9703_v15 = vsub.f32 %v9671_v19, %v9693_v47 }
0x24a9   :  { %v9719_v38 = vmul.f32 1.442695, %v9704_v13  ;;  %v9727_v45 = vsel %vm2036_vm4, %v15519_v11, 0.0 }
0x24aa   :  { %v9717_v30 = vmul.f32 1.442695, %v9703_v15  ;;  %9728 = vadd.xlane.f32.xlu0 %v9727_v45  ;;  %v9050_v57 = vpop.permute.xlu1 %9049  ;;  %v10376_v15 = vld [vmem:[%s17882_s2 + $0x410] sm:$0xff]  ;;  %v10593_v45 = vld [vmem:[%s17882_s2 + $0x438] sm:$0xff] }
0x24ab   :  { %15524 = vpow2.f32 %v9719_v38  ;;  %v9048_v9 = vpop.permute.xlu0 %9047 }
0x24ac   :  { %15526 = vpow2.f32 %v9717_v30  ;;  %v10594_v30 = vld [vmem:[%s17882_s2 + $0x440] sm:$0xff] }
0x24ad   :  { %15528 = vpow2.f32 %v9711_v27 }
0x24ae   :  { %v9054_v10 = vpop.permute.xlu1 %9053 }
0x24af   :  { %v9056_v54 = vpop.permute.xlu0 %9055 }
0x24b0   :  { %v17450_v23 = vpop.eup %15520 }
0x24b1   :  { %v15523_v55 = vpop.eup %15522  ;;  %v9736_v51 = vsel %vm2036_vm4, %v17450_v23, 0.0 }
0x24b2   :  { %9737 = vadd.xlane.f32.xlu1 %v9736_v51  ;;  %v9733_v61 = vsel %vm2036_vm4, %v15523_v55, 0.0 }
0x24b3   :  { %9734 = vadd.xlane.f32.xlu0 %v9733_v61 }
0x24b5   :  { %v17455_v59 = vpop.eup %15524 }
0x24b6   :  { %v15527_v48 = vpop.eup %15526  ;;  %v9742_v40 = vsel %vm2036_vm4, %v17455_v59, 0.0 }
0x24b7   :  { %v15529_v58 = vpop.eup %15528  ;;  %9743 = vadd.xlane.f32.xlu1 %v9742_v40  ;;  %v9739_v12 = vsel %vm2036_vm4, %v15527_v48, 0.0 }
0x24b8   :  { %9740 = vadd.xlane.f32.xlu0 %v9739_v12  ;;  %v9730_v34 = vsel %vm2036_vm4, %v15529_v58, 0.0 }
0x24bb   :  { %9731 = vadd.xlane.f32.xlu1 %v9730_v34 }
0x24cc   :  { %9059 = vrot.lane.b32.xlu1 %v17403_v8, %s15618_s24 }
0x24ce   :  { %9061 = vrot.lane.b32.xlu0 %v17401_v35, %s15618_s24 }
0x24df   :  { %v9726_v46 = vpop.xlane.xlu1 %9725 }
0x24e0   :  { %15530 = vrcp.f32 %v9726_v46  ;;  %v9723_v60 = vpop.xlane.xlu0 %9722 }
0x24e1   :  { %15532 = vrcp.f32 %v9723_v60 }
0x24ea   :  { %v15531_v50 = vpop.eup %15530 }
0x24eb   :  { %v15533_v14 = vpop.eup %15532  ;;  %v9754_v19 = vmul.f32 %v15531_v50, %v15515_v28 }
0x24ec   :  { %v9753_v0 = vmul.f32 %v15533_v14, %v15517_v3 }
0x24ed   :  { %14265 = vmatmul.mubr.msk.f32.vlgmr.msra.gmra.mrb[124].mxu1 %vm2036_vm4, %v9754_v19 }
0x24ee   :  { %14260 = vmatmul.mubr.msk.f32.vlgmr.msra.gmra.mrb[98].mxu0 %vm2036_vm4, %v9753_v0  ;;  %14273 = vmatpush3.msra.mxu1 %v9050_v57 }
0x24ef   :  { %14268 = vmatpush3.msra.mxu0 %v9048_v9  ;;  %14269 = vmatprep.mubr.msk.f32.mxu0 %vm15623_vm6, %v15622_v21 }
0x24f0   :  { %14277 = vmatprep.subr.mxu0 %v15622_v21  ;;  %14274 = vmatprep.mubr.msk.f32.mxu1 %vm15623_vm6, %v15622_v21 }
0x24f1   :  { %14282 = vmatprep.subr.mxu1 %v15622_v21 }
0x2537   :  { %v9729_v35 = vpop.xlane.xlu0 %9728 }
0x2538   :  { %15534 = vrcp.f32 %v9729_v35 }
0x253f   :  { %v9738_v8 = vpop.xlane.xlu1 %9737 }
0x2540   :  { %v9735_v56 = vpop.xlane.xlu0 %9734 }
0x2541   :  { %15536 = vrcp.f32 %v9735_v56 }
0x2542   :  { %v15535_v6 = vpop.eup %15534 }
0x2543   :  { %v9755_v44 = vmul.f32 %v15535_v6, %v15519_v11  ;;  %v10375_v11 = vld [vmem:[%s17882_s2 + $0x408] sm:$0xff] }
0x2544   :  { %v9744_v39 = vpop.xlane.xlu1 %9743  ;;  %v14899_v38 = vpack.c.bf16 %v10376_v15, %v10375_v11 }
0x2545   :  { %v9741_v22 = vpop.xlane.xlu0 %9740  ;;  %14270 = vmatmul.mubr.msk.f32.vlgmr.msra.gmra.mrb[100].mxu0 %vm2036_vm4, %v9755_v44 }
0x2546   :  { %15538 = vrcp.f32 %v9741_v22  ;;  %14278 = vmatpush3.msra.mxu0 %v9054_v10  ;;  %14279 = vmatprep.mubr.msk.f32.mxu0 %vm15623_vm6, %v15622_v21  ;;  %v12936_v22 = vld [vmem:[%s17882_s2 + $0x448] ss:$0 sm:$0xff] }
0x2547   :  { %14287 = vmatprep.subr.mxu0 %v15622_v21 }
0x2548   :  { %v9732_v4 = vpop.xlane.xlu1 %9731 }
0x2549   :  { %15540 = vrcp.f32 %v9732_v4  ;;  %v9062_v18 = vpop.permute.xlu0 %9061 }
0x254a   :  { %15542 = vrcp.f32 %v9738_v8  ;;  %v12928_v8 = vld [vmem:[%s17882_s2 + $0x418] ss:$0 sm:$0xff] }
0x254b   :  { %v15537_v42 = vpop.eup %15536  ;;  %15544 = vrcp.f32 %v9744_v39 }
0x254c   :  { %v9757_v28 = vmul.f32 %v15537_v42, %v15523_v55  ;;  %v9060_v3 = vpop.permute.xlu1 %9059  ;;  %v14907_v55 = vpack.c.bf16 %v10594_v30, %v10593_v45  ;;  %v10505_v45 = vld [vmem:[%s17882_s2 + $0x420] sm:$0xff]  ;;  %v10506_v30 = vld [vmem:[%s17882_s2 + $0x428] sm:$0xff] }
0x254e   :  { %14280 = vmatmul.mubr.msk.f32.vlgmr.msra.gmra.mrb[102].mxu0 %vm2036_vm4, %v9757_v28 }
0x254f   :  { %14288 = vmatpush3.msra.mxu0 %v9060_v3  ;;  %14289 = vmatprep.mubr.msk.f32.mxu0 %vm15623_vm6, %v15622_v21 }
0x2550   :  { %v15539_v17 = vpop.eup %15538  ;;  %14900 = vmatprep.subr.bf16.mxu0 %v14899_v38 }
0x2551   :  { %v9759_v49 = vmul.f32 %v15539_v17, %v15527_v48 }
0x2553   :  { %v15541_v1 = vpop.eup %15540  ;;  %14290 = vmatmul.mubr.msk.f32.vlgmr.msra.gmra.mrb[104].mxu0 %vm2036_vm4, %v9759_v49 }
0x2554   :  { %v9756_v29 = vmul.f32 %v15541_v1, %v15529_v58  ;;  %v15543_v63 = vpop.eup %15542  ;;  %14902 = vmatpush3.bf16.msra.mxu0 %v14899_v38 }
0x2555   :  { %v9758_v32 = vmul.f32 %v15543_v63, %v17450_v23  ;;  %v15545_v2 = vpop.eup %15544  ;;  %14908 = vmatprep.subr.bf16.mxu0 %v14907_v55 }
0x2556   :  { %14275 = vmatmul.mubr.msk.f32.vlgmr.msra.gmra.mrb[126].mxu1 %vm2036_vm4, %v9756_v29  ;;  %v9760_v31 = vmul.f32 %v15545_v2, %v17455_v59 }
0x2557   :  { %14283 = vmatpush3.msra.mxu1 %v9056_v54  ;;  %14284 = vmatprep.mubr.msk.f32.mxu1 %vm15623_vm6, %v15622_v21 }
0x2558   :  { %14292 = vmatprep.subr.mxu1 %v15622_v21 }
0x255a   :  { %14285 = vmatmul.mubr.msk.f32.vlgmr.msra.gmra.mrb[128].mxu1 %vm2036_vm4, %v9758_v32 }
0x255b   :  { %14293 = vmatpush3.msra.mxu1 %v9062_v18  ;;  %14294 = vmatprep.mubr.msk.f32.mxu1 %vm15623_vm6, %v15622_v21 }
0x255e   :  { %14295 = vmatmul.mubr.msk.f32.vlgmr.msra.gmra.mrb[130].mxu1 %vm2036_vm4, %v9760_v31 }
0x25c0   :  { %v9903_v25 = vpop.f32.mrb[124].mxu1 }
0x25c1   :  { %v9830_v62 = vpop.f32.mrb[98].mxu0  ;;  %v14266_v37 = vpop.f32.mrb[125].mxu1 }
0x25c2   :  { %v14261_v24 = vpop.f32.mrb[99].mxu0 }
0x2618   :  { %v9976_v26 = vpop.f32.mrb[100].mxu0 }
0x2619   :  { %10347 = vrot.lane.b32.xlu1 %v9976_v26, %s15619_s25  ;;  %v14271_v13 = vpop.f32.mrb[101].mxu0 }
0x2621   :  { %v10122_v47 = vpop.f32.mrb[102].mxu0 }
0x2622   :  { %10355 = vrot.lane.b32.xlu1 %v10122_v47, %s15620_s30  ;;  %v14281_v27 = vpop.f32.mrb[103].mxu0 }
0x2626   :  { %v10268_v23 = vpop.f32.mrb[104].mxu0 }
0x2627   :  { %10363 = vrot.lane.b32.xlu1 %v10268_v23, %s15621_s0  ;;  %v14291_v51 = vpop.f32.mrb[105].mxu0  ;;  %v14903_v23 = vpack.c.bf16 %v10506_v30, %v10505_v45 }
0x2628   :  { %v10686_v51 = vld [vmem:[%s17882_s2 + $0x458] sm:$0xff] }
0x2629   :  { %v10049_v61 = vpop.f32.mrb[126].mxu1  ;;  %14904 = vmatprep.subr.bf16.mxu1 %v14903_v23 }
0x262a   :  { %v14276_v59 = vpop.f32.mrb[127].mxu1  ;;  %10349 = vrot.lane.b32.xlu0 %v10049_v61, %s15619_s25  ;;  %14906 = vmatpush3.bf16.msra.mxu1 %v14903_v23 }
0x262d   :  { %v10195_v48 = vpop.f32.mrb[128].mxu1 }
0x262e   :  { %10357 = vrot.lane.b32.xlu0 %v10195_v48, %s15620_s30  ;;  %v14286_v40 = vpop.f32.mrb[129].mxu1 }
0x2631   :  { %v10341_v58 = vpop.f32.mrb[130].mxu1 }
0x2632   :  { %10365 = vrot.lane.b32.xlu0 %v10341_v58, %s15621_s0  ;;  %v14296_v12 = vpop.f32.mrb[131].mxu1 }
0x268b   :  { %v10348_v34 = vpop.permute.xlu1 %10347 }
0x268c   :  { %v10369_v9 = vsel %vm479_vm2, %v9830_v62, %v10348_v34 }
0x2694   :  { %v10356_v57 = vpop.permute.xlu1 %10355 }
0x2695   :  { %v10371_v10 = vsel %vm2036_vm4, %v10369_v9, %v10356_v57  ;;  %v12931_v9 = vld [vmem:[%s17882_s2 + $0x508] ss:$0 sm:$0xff] }
0x2699   :  { %v10364_v54 = vpop.permute.xlu1 %10363 }
0x269a   :  { %v10373_v46 = vsel %vm2041_vm5, %v10371_v10, %v10364_v54 }
0x269b   :  { %14301 = vmatprep.mubr.msk.f32.mxu0 %vm101_vm1, %v10373_v46 }
0x269c   :  { %v10350_v60 = vpop.permute.xlu0 %10349 }
0x269d   :  { %v10370_v14 = vsel %vm479_vm2, %v9903_v25, %v10350_v60 }
0x26a0   :  { %v10358_v50 = vpop.permute.xlu0 %10357 }
0x26a1   :  { %v10372_v19 = vsel %vm2036_vm4, %v10370_v14, %v10358_v50  ;;  %v12932_v50 = vld [vmem:[%s17882_s2 + $0x510] ss:$0 sm:$0xff] }
0x26a4   :  { %v10366_v0 = vpop.permute.xlu0 %10365 }
0x26a5   :  { %v10374_v35 = vsel %vm2041_vm5, %v10372_v19, %v10366_v0 }
0x26a6   :  { %14302 = vmatmul.mubr.msk.f32.vlgmr.msra.gmra.mrb[106].mxu0 %vm101_vm1, %v10374_v35 }
0x26a7   :  { %14910 = vmatpush3.bf16.msra.mxu0 %v14907_v55  ;;  %14315 = vmatprep.mubr.msk.f32.mxu0 %vm101_vm1, %v16975_v33  ;;  %v10685_v55 = vld [vmem:[%s17882_s2 + $0x450] sm:$0xff] }
0x26a8   :  { %14915 = vmatprep.subr.bf16.mxu0 %v15624_v53  ;;  %v14911_v61 = vpack.c.bf16 %v10686_v51, %v10685_v55 }
0x26aa   :  { %14316 = vmatmul.mubr.msk.f32.vlgmr.msra.gmra.mrb[108].mxu0 %vm101_vm1, %v16984_v16  ;;  %14912 = vmatprep.subr.bf16.mxu1 %v14911_v61 }
0x26ab   :  { %14318 = vmatprep.mubr.msk.f32.mxu0 %vm101_vm1, %v16991_v36 }
0x26ae   :  { %14319 = vmatmul.mubr.msk.f32.gmra.mrb[110].mxu0 %vm101_vm1, %v16994_v7 }
0x26af   :  { %14335 = vmatprep.mubr.msk.f32.mxu0 %vm15623_vm6, %v15622_v21 }
0x2779   :  { %v14303_v56 = vpop.f32.mrb[106].mxu0 }
0x277a   :  { %v10460_v6 = vadd.f32 %v14303_v56, %v12928_v8  ;;  %v10454_v44 = vpop.f32.mrb[107].mxu0 }
0x277b   :  { %v10455_v39 = vadd.f32 %v12928_v8, %v10454_v44 }
0x277c   :  { %v10464_v4 = vadd.f32 %v10460_v6, %v17329_v43 }
0x277d   :  { %v10463_v42 = vadd.f32 %v10455_v39, %v17327_v41  ;;  %v14317_v28 = vpop.f32.mrb[108].mxu0 }
0x277e   :  { %v10672_v3 = vadd.f32 %v14317_v28, %v12936_v22  ;;  %v10666_v17 = vpop.f32.mrb[109].mxu0  ;;  %v10468_v49 = vsel %vm101_vm1, %v10464_v4, 0.0 }
0x277f   :  { %v10667_v1 = vadd.f32 %v12936_v22, %v10666_v17  ;;  %10469 = vadd.xlane.f32.xlu0 %v10468_v49  ;;  %v10465_v29 = vsel %vm101_vm1, %v10463_v42, 0.0 }
0x2780   :  { %10466 = vadd.xlane.f32.xlu1 %v10465_v29 }
0x2781   :  { %v14916_v63 = vpack.c.bf16 %v10672_v3, %v10667_v1  ;;  %v14320_v32 = vpop.f32.mrb[110].mxu0  ;;  %v17538_v2 = vpack.i.bf16 %v10672_v3, %v10667_v1 }
0x2782   :  { %v10682_v18 = vadd.f32 %v14320_v32, %v12936_v22  ;;  %v10676_v31 = vpop.f32.mrb[111].mxu0 }
0x2783   :  { %v10677_v25 = vadd.f32 %v12936_v22, %v10676_v31  ;;  %14918 = vmatpush3.bf16.xpose.msk.msra.mxu0 %vm15769_vm3, %v14916_v63 }
0x2784   :  { %14923 = vmatprep.subr.bf16.mxu0 %v15624_v53 }
0x2785   :  { %v14920_v41 = vpack.c.bf16 %v10682_v18, %v10677_v25  ;;  %v17543_v43 = vpack.i.bf16 %v10682_v18, %v10677_v25 }
0x280c   :  { %v10470_v62 = vpop.xlane.xlu0 %10469 }
0x280d   :  { %v10472_v37 = vmul.f32 0.0625, %v10470_v62  ;;  %v10467_v24 = vpop.xlane.xlu1 %10466 }
0x280e   :  { %v10471_v26 = vmul.f32 0.0625, %v10467_v24 }
0x280f   :  { %v10474_v13 = vsub.f32 %v10464_v4, %v10472_v37 }
0x2810   :  { %v10473_v47 = vsub.f32 %v10463_v42, %v10471_v26  ;;  %v12941_v42 = vld [vmem:[%s17882_s2 + $0x460] ss:$0 sm:$0xff] }
0x2811   :  { %v10476_v11 = vmul.f32 %v10474_v13, %v10474_v13 }
0x2812   :  { %v10475_v15 = vmul.f32 %v10473_v47, %v10473_v47 }
0x2813   :  { %v10480_v27 = vsel %vm101_vm1, %v10476_v11, 0.0 }
0x2814   :  { %10481 = vadd.xlane.f32.xlu1 %v10480_v27  ;;  %v10477_v38 = vsel %vm101_vm1, %v10475_v15, 0.0 }
0x2815   :  { %10478 = vadd.xlane.f32.xlu0 %v10477_v38 }
0x2825   :  { %15223 = vrot.lane.b32.xlu1 %v17543_v43, %s15616_s18 }
0x2829   :  { %15228 = vrot.lane.b32.xlu1 %v17538_v2, %s15617_s23 }
0x282b   :  { %15218 = vrot.lane.b32.xlu0 %v17538_v2, %s15616_s18 }
0x282f   :  { %15233 = vrot.lane.b32.xlu0 %v17543_v43, %s15617_s23 }
0x28a1   :  { %v10482_v59 = vpop.xlane.xlu1 %10481 }
0x28a2   :  { %v10484_v48 = vmul.f32 0.0625, %v10482_v59  ;;  %v10479_v40 = vpop.xlane.xlu0 %10478 }
0x28a3   :  { %v10483_v58 = vmul.f32 0.0625, %v10479_v40 }
0x28a4   :  { %v10486_v12 = vadd.f32 1e-05, %v10484_v48 }
0x28a5   :  { %v10485_v34 = vadd.f32 1e-05, %v10483_v58 }
0x28a6   :  { %15546 = vrsqrt.f32 %v10486_v12  ;;  %v15219_v35 = vpop.permute.xlu0 %15218 }
0x28a7   :  { %15548 = vrsqrt.f32 %v10485_v34  ;;  %v15220_v6 = vunpack.i.l.bf16 %v15219_v35 }
0x28b0   :  { %v15547_v57 = vpop.eup %15546 }
0x28b1   :  { %v15549_v10 = vpop.eup %15548  ;;  %v10490_v54 = vmul.f32 %v15547_v57, %v10474_v13 }
0x28b2   :  { %v10489_v46 = vmul.f32 %v15549_v10, %v10473_v47 }
0x28b3   :  { %v10497_v60 = vmul.f32 %v12931_v9, %v10490_v54 }
0x28b4   :  { %v10496_v14 = vmul.f32 %v12931_v9, %v10489_v46 }
0x28b5   :  { %v17575_v0 = vadd.f32 %v12932_v50, %v10497_v60 }
0x28b6   :  { %v17573_v19 = vadd.f32 %v12932_v50, %v10496_v14 }
0x28b8   :  { %14308 = vmatprep.mubr.msk.f32.mxu1 %vm101_vm1, %v17573_v19 }
0x28b9   :  { %14309 = vmatmul.mubr.msk.f32.vlgmr.msra.gmra.mrb[132].mxu1 %vm101_vm1, %v17575_v0 }
0x28ba   :  { %14914 = vmatpush3.bf16.msra.mxu1 %v14911_v61  ;;  %14325 = vmatprep.mubr.msk.f32.mxu1 %vm101_vm1, %v16975_v33  ;;  %v15224_v33 = vpop.permute.xlu1 %15223 }
0x28bb   :  { %14919 = vmatprep.subr.bf16.mxu1 %v15624_v53  ;;  %v15226_v8 = vunpack.i.h.bf16 %v15224_v33  ;;  %v15225_v56 = vunpack.i.l.bf16 %v15224_v33 }
0x28bd   :  { %14326 = vmatmul.mubr.msk.f32.vlgmr.msra.gmra.mrb[134].mxu1 %vm101_vm1, %v16984_v16  ;;  %v12933_v16 = vld [vmem:[%s17882_s2 + $0x430] ss:$0 sm:$0xff]  ;;  %v14928_v22 = vpack.c.bf16 %v15226_v8, %v15225_v56 }
0x28be   :  { %14328 = vmatprep.mubr.msk.f32.mxu1 %vm101_vm1, %v16991_v36  ;;  %v15221_v36 = vunpack.i.h.bf16 %v15219_v35  ;;  %v15229_v62 = vpop.permute.xlu1 %15228 }
0x28bf   :  { %v15231_v26 = vunpack.i.h.bf16 %v15229_v62  ;;  %v15230_v13 = vunpack.i.l.bf16 %v15229_v62 }
0x28c0   :  { %v14924_v28 = vpack.c.bf16 %v15221_v36, %v15220_v6 }
0x28c1   :  { %14329 = vmatmul.mubr.msk.f32.gmra.mrb[136].mxu1 %vm101_vm1, %v16994_v7  ;;  %v14932_v15 = vpack.c.bf16 %v15231_v26, %v15230_v13 }
0x28c2   :  { %14342 = vmatprep.mubr.msk.f32.mxu1 %vm15623_vm6, %v15622_v21 }
0x28c3   :  { %14922 = vmatpush3.bf16.xpose.msk.msra.mxu1 %vm15769_vm3, %v14920_v41 }
0x28c4   :  { %14927 = vmatprep.subr.bf16.mxu1 %v15624_v53 }
0x298c   :  { %v14310_v44 = vpop.f32.mrb[132].mxu1 }
0x298d   :  { %v10590_v7 = vadd.f32 %v14310_v44, %v12933_v16  ;;  %v10584_v39 = vpop.f32.mrb[133].mxu1 }
0x298e   :  { %v10585_v4 = vadd.f32 %v12933_v16, %v10584_v39 }
0x298f   :  { %10781 = vrot.lane.b32.xlu0 %v10590_v7, %s15616_s18  ;;  %14343 = vmatmul.mubr.msk.f32.vlgmr.msra.gmra.mrb[138].mxu1 %vm479_vm2, %v10590_v7 }
0x2990   :  { %14930 = vmatpush3.bf16.xpose.msk.msra.mxu1 %vm15769_vm3, %v14928_v22  ;;  %v14327_v3 = vpop.f32.mrb[134].mxu1  ;;  %10779 = vrot.lane.b32.xlu1 %v10585_v4, %s15616_s18 }
0x2991   :  { %v17606_v17 = vadd.f32 %v14327_v3, %v12941_v42  ;;  %14336 = vmatmul.mubr.msk.f32.vlgmr.msra.gmra.mrb[112].mxu0 %vm479_vm2, %v10585_v4  ;;  %v10758_v49 = vpop.f32.mrb[135].mxu1  ;;  %14356 = vmatprep.mubr.msk.f32.mxu1 %vm15623_vm6, %v15622_v21 }
0x2992   :  { %14926 = vmatpush3.bf16.xpose.msk.msra.mxu0 %vm15769_vm3, %v14924_v28  ;;  %v10759_v1 = vadd.f32 %v12941_v42, %v10758_v49  ;;  %14935 = vmatprep.subr.bf16.mxu1 %v15624_v53 }
0x2993   :  { %15243 = vrot.lane.b32.xlu0 %v17543_v43, %s15618_s24  ;;  %14349 = vmatprep.mubr.msk.f32.mxu0 %vm15623_vm6, %v15622_v21 }
0x2994   :  { %v14330_v29 = vpop.f32.mrb[136].mxu1  ;;  %15238 = vrot.lane.b32.xlu1 %v17538_v2, %s15618_s24  ;;  %14931 = vmatprep.subr.bf16.mxu0 %v15624_v53  ;;  %v14948_v63 = vpack.c.bf16 %v17606_v17, %v10759_v1  ;;  %v17623_v32 = vpack.i.bf16 %v17606_v17, %v10759_v1  ;;  %v15234_v2 = vpop.permute.xlu0 %15233 }
0x2995   :  { %v10774_v18 = vadd.f32 %v14330_v29, %v12941_v42  ;;  %v10768_v31 = vpop.f32.mrb[137].mxu1  ;;  %v15236_v37 = vunpack.i.h.bf16 %v15234_v2  ;;  %v15235_v24 = vunpack.i.l.bf16 %v15234_v2 }
0x2996   :  { %v10769_v25 = vadd.f32 %v12941_v42, %v10768_v31 }
0x2997   :  { %10785 = vrot.lane.b32.xlu0 %v10590_v7, %s15617_s23  ;;  %v14936_v47 = vpack.c.bf16 %v15236_v37, %v15235_v24 }
0x2998   :  { %10783 = vrot.lane.b32.xlu1 %v10585_v4, %s15617_s23  ;;  %v14951_v41 = vpack.c.bf16 %v10774_v18, %v10769_v25  ;;  %v17627_v43 = vpack.i.bf16 %v10774_v18, %v10769_v25 }
0x299b   :  { %10789 = vrot.lane.b32.xlu0 %v10590_v7, %s15618_s24 }
0x299c   :  { %10787 = vrot.lane.b32.xlu1 %v10585_v4, %s15618_s24 }
0x2a01   :  { %v10782_v11 = vpop.permute.xlu0 %10781 }
0x2a02   :  { %v10780_v27 = vpop.permute.xlu1 %10779  ;;  %14357 = vmatmul.mubr.msk.f32.vlgmr.msra.gmra.mrb[140].mxu1 %vm479_vm2, %v10782_v11 }
0x2a03   :  { %14938 = vmatpush3.bf16.xpose.msk.msra.mxu1 %vm15769_vm3, %v14936_v47  ;;  %14350 = vmatmul.mubr.msk.f32.vlgmr.msra.gmra.mrb[114].mxu0 %vm479_vm2, %v10780_v27 }
0x2a04   :  { %14934 = vmatpush3.bf16.xpose.msk.msra.mxu0 %vm15769_vm3, %v14932_v15  ;;  %14370 = vmatprep.mubr.msk.f32.mxu1 %vm15623_vm6, %v15622_v21 }
0x2a05   :  { %v15244_v38 = vpop.permute.xlu0 %15243  ;;  %14943 = vmatprep.subr.bf16.mxu1 %v15624_v53  ;;  %14363 = vmatprep.mubr.msk.f32.mxu0 %vm15623_vm6, %v15622_v21 }
0x2a06   :  { %v15246_v45 = vunpack.i.h.bf16 %v15244_v38  ;;  %v15245_v30 = vunpack.i.l.bf16 %v15244_v38  ;;  %v15239_v23 = vpop.permute.xlu1 %15238  ;;  %14939 = vmatprep.subr.bf16.mxu0 %v15624_v53 }
0x2a07   :  { %v15241_v55 = vunpack.i.h.bf16 %v15239_v23  ;;  %v15240_v51 = vunpack.i.l.bf16 %v15239_v23 }
0x2a08   :  { %v14944_v61 = vpack.c.bf16 %v15246_v45, %v15245_v30 }
0x2a09   :  { %v14940_v59 = vpack.c.bf16 %v15241_v55, %v15240_v51  ;;  %v10786_v48 = vpop.permute.xlu0 %10785 }
0x2a0a   :  { %v10784_v40 = vpop.permute.xlu1 %10783  ;;  %14371 = vmatmul.mubr.msk.f32.vlgmr.msra.gmra.mrb[142].mxu1 %vm479_vm2, %v10786_v48 }
0x2a0b   :  { %14946 = vmatpush3.bf16.xpose.msk.msra.mxu1 %vm15769_vm3, %v14944_v61  ;;  %14364 = vmatmul.mubr.msk.f32.vlgmr.msra.gmra.mrb[116].mxu0 %vm479_vm2, %v10784_v40 }
0x2a0c   :  { %14942 = vmatpush3.bf16.xpose.msk.msra.mxu0 %vm15769_vm3, %v14940_v59  ;;  %14384 = vmatprep.mubr.msk.f32.mxu1 %vm15623_vm6, %v15622_v21 }
0x2a0d   :  { %14377 = vmatprep.mubr.msk.f32.mxu0 %vm15623_vm6, %v15622_v21  ;;  %14950 = vmatprep.subr.bf16.mxu1 %v15624_v53  ;;  %v10790_v58 = vpop.permute.xlu0 %10789 }
0x2a0e   :  { %14947 = vmatprep.subr.bf16.mxu0 %v15624_v53  ;;  %v10788_v12 = vpop.permute.xlu1 %10787 }
0x2a12   :  { %14385 = vmatmul.mubr.msk.f32.vlgmr.msra.gmra.mrb[144].mxu1 %vm479_vm2, %v10790_v58 }
0x2a13   :  { %14378 = vmatmul.mubr.msk.f32.vlgmr.msra.gmra.mrb[118].mxu0 %vm479_vm2, %v10788_v12  ;;  %14952 = vmatpush3.bf16.msra.mxu1 %v14951_v41 }
0x2a14   :  { %14949 = vmatpush3.bf16.msra.mxu0 %v14948_v63  ;;  %14398 = vmatprep.mubr.msk.f32.mxu1 %vm15623_vm6, %v15622_v21 }
0x2a15   :  { %14956 = vmatprep.subr.bf16.mxu1 %v15624_v53  ;;  %14391 = vmatprep.mubr.msk.f32.mxu0 %vm15623_vm6, %v15622_v21 }
0x2a16   :  { %14953 = vmatprep.subr.bf16.mxu0 %v15624_v53 }
0x2a62   :  { %v11007_v5 = vpop.f32.mrb[138].mxu1 }
0x2a63   :  { %v11468_v34 = vmul.f32 0.5, %v11007_v5  ;;  %v14344_v57 = vpop.f32.mrb[139].mxu1 }
0x2a64   :  { %v10931_v9 = vpop.f32.mrb[112].mxu0 }
0x2a65   :  { %v11467_v10 = vmul.f32 0.5, %v10931_v9  ;;  %v14337_v54 = vpop.f32.mrb[113].mxu0  ;;  %v11478_v46 = vsel %vm101_vm1, %v11468_v34, -inf }
0x2a66   :  { %11479 = vmax.xlane.f32.xlu0 %v11478_v46 }
0x2a67   :  { %v11475_v60 = vsel %vm101_vm1, %v11467_v10, -inf }
0x2a68   :  { %11476 = vmax.xlane.f32.xlu1 %v11475_v60 }
0x2ad5   :  { %v11159_v50 = vpop.f32.mrb[140].mxu1 }
0x2ad6   :  { %v11470_v14 = vmul.f32 0.5, %v11159_v50  ;;  %v11083_v33 = vpop.f32.mrb[114].mxu0  ;;  %v14358_v35 = vpop.f32.mrb[141].mxu1 }
0x2ad7   :  { %v11469_v8 = vmul.f32 0.5, %v11083_v33  ;;  %v14351_v56 = vpop.f32.mrb[115].mxu0 }
0x2ad8   :  { %v11484_v16 = vsel %vm101_vm1, %v11470_v14, -inf }
0x2ad9   :  { %11485 = vmax.xlane.f32.xlu1 %v11484_v16  ;;  %v11481_v36 = vsel %vm101_vm1, %v11469_v8, -inf }
0x2ada   :  { %11482 = vmax.xlane.f32.xlu0 %v11481_v36 }
0x2add   :  { %v11311_v6 = vpop.f32.mrb[142].mxu1 }
0x2ade   :  { %v11472_v44 = vmul.f32 0.5, %v11311_v6  ;;  %v11235_v7 = vpop.f32.mrb[116].mxu0  ;;  %v14372_v39 = vpop.f32.mrb[143].mxu1 }
0x2adf   :  { %v11471_v22 = vmul.f32 0.5, %v11235_v7  ;;  %v14365_v4 = vpop.f32.mrb[117].mxu0 }
0x2ae0   :  { %v11490_v42 = vsel %vm101_vm1, %v11472_v44, -inf }
0x2ae1   :  { %11491 = vmax.xlane.f32.xlu1 %v11490_v42  ;;  %v11487_v28 = vsel %vm101_vm1, %v11471_v22, -inf }
0x2ae2   :  { %11488 = vmax.xlane.f32.xlu0 %v11487_v28 }
0x2ae5   :  { %v11463_v3 = vpop.f32.mrb[144].mxu1 }
0x2ae6   :  { %v11474_v17 = vmul.f32 0.5, %v11463_v3  ;;  %v11387_v49 = vpop.f32.mrb[118].mxu0  ;;  %v14386_v1 = vpop.f32.mrb[145].mxu1 }
0x2ae7   :  { %v11473_v29 = vmul.f32 0.5, %v11387_v49  ;;  %v14379_v63 = vpop.f32.mrb[119].mxu0 }
0x2ae8   :  { %v11496_v18 = vsel %vm101_vm1, %v11474_v17, -inf }
0x2ae9   :  { %11497 = vmax.xlane.f32.xlu1 %v11496_v18  ;;  %v11493_v31 = vsel %vm101_vm1, %v11473_v29, -inf }
0x2aea   :  { %11494 = vmax.xlane.f32.xlu0 %v11493_v31 }
0x2af3   :  { %v11480_v25 = vpop.xlane.xlu0 %11479 }
0x2af4   :  { %v11500_v2 = vsub.f32 %v11468_v34, %v11480_v25 }
0x2af5   :  { %v11477_v41 = vpop.xlane.xlu1 %11476 }
0x2af6   :  { %v11499_v62 = vsub.f32 %v11467_v10, %v11477_v41  ;;  %v11509_v37 = vmul.f32 1.442695, %v11500_v2 }
0x2af8   :  { %v11507_v24 = vmul.f32 1.442695, %v11499_v62  ;;  %15550 = vpow2.f32 %v11509_v37 }
0x2afa   :  { %15253 = vrot.lane.b32.xlu1 %v17627_v43, %s15616_s18  ;;  %15552 = vpow2.f32 %v11507_v24 }
0x2afe   :  { %15258 = vrot.lane.b32.xlu1 %v17623_v32, %s15617_s23 }
0x2b00   :  { %15248 = vrot.lane.b32.xlu0 %v17623_v32, %s15616_s18 }
0x2b02   :  { %v17679_v26 = vpop.eup %15550 }
0x2b03   :  { %v11526_v47 = vsel %vm101_vm1, %v17679_v26, 0.0 }
0x2b04   :  { %15263 = vrot.lane.b32.xlu0 %v17627_v43, %s15617_s23  ;;  %v17681_v13 = vpop.eup %15552 }
0x2b05   :  { %v11523_v11 = vsel %vm101_vm1, %v17681_v13, 0.0 }
0x2b22   :  { %11527 = vadd.xlane.f32.xlu1 %v11526_v47 }
0x2b23   :  { %11524 = vadd.xlane.f32.xlu0 %v11523_v11 }
0x2b66   :  { %v11486_v15 = vpop.xlane.xlu1 %11485 }
0x2b67   :  { %v11502_v27 = vsub.f32 %v11470_v14, %v11486_v15  ;;  %v11483_v38 = vpop.xlane.xlu0 %11482 }
0x2b68   :  { %v11501_v45 = vsub.f32 %v11469_v8, %v11483_v38 }
0x2b69   :  { %v11513_v30 = vmul.f32 1.442695, %v11502_v27 }
0x2b6a   :  { %v11511_v23 = vmul.f32 1.442695, %v11501_v45 }
0x2b6b   :  { %15554 = vpow2.f32 %v11513_v30 }
0x2b6c   :  { %15556 = vpow2.f32 %v11511_v23 }
0x2b6e   :  { %v11492_v55 = vpop.xlane.xlu1 %11491 }
0x2b6f   :  { %v11504_v51 = vsub.f32 %v11472_v44, %v11492_v55  ;;  %v11489_v61 = vpop.xlane.xlu0 %11488 }
0x2b70   :  { %v11503_v59 = vsub.f32 %v11471_v22, %v11489_v61 }
0x2b71   :  { %v11517_v48 = vmul.f32 1.442695, %v11504_v51 }
0x2b72   :  { %v11515_v40 = vmul.f32 1.442695, %v11503_v59 }
0x2b73   :  { %15558 = vpow2.f32 %v11517_v48 }
0x2b74   :  { %15560 = vpow2.f32 %v11515_v40 }
0x2b75   :  { %v17687_v58 = vpop.eup %15554 }
0x2b76   :  { %v17689_v12 = vpop.eup %15556  ;;  %v11498_v5 = vpop.xlane.xlu1 %11497  ;;  %v11532_v34 = vsel %vm101_vm1, %v17687_v58, 0.0 }
0x2b77   :  { %v11506_v57 = vsub.f32 %v11474_v17, %v11498_v5  ;;  %v11495_v9 = vpop.xlane.xlu0 %11494  ;;  %11533 = vadd.xlane.f32.xlu1 %v11532_v34  ;;  %v11529_v10 = vsel %vm101_vm1, %v17689_v12, 0.0 }
0x2b78   :  { %v11505_v54 = vsub.f32 %v11473_v29, %v11495_v9  ;;  %11530 = vadd.xlane.f32.xlu0 %v11529_v10 }
0x2b79   :  { %v11521_v46 = vmul.f32 1.442695, %v11506_v57 }
0x2b7a   :  { %v11519_v60 = vmul.f32 1.442695, %v11505_v54  ;;  %v15254_v6 = vpop.permute.xlu1 %15253 }
0x2b7b   :  { %15562 = vpow2.f32 %v11521_v46  ;;  %v15249_v44 = vpop.permute.xlu0 %15248  ;;  %v15256_v42 = vunpack.i.h.bf16 %v15254_v6  ;;  %v15255_v28 = vunpack.i.l.bf16 %v15254_v6 }
0x2b7c   :  { %15564 = vpow2.f32 %v11519_v60  ;;  %v15251_v3 = vunpack.i.h.bf16 %v15249_v44  ;;  %v15250_v17 = vunpack.i.l.bf16 %v15249_v44 }
0x2b7d   :  { %v17695_v50 = vpop.eup %15558 }
0x2b7e   :  { %v17697_v14 = vpop.eup %15560  ;;  %v11538_v33 = vsel %vm101_vm1, %v17695_v50, 0.0  ;;  %v15259_v7 = vpop.permute.xlu1 %15258 }
0x2b7f   :  { %11539 = vadd.xlane.f32.xlu1 %v11538_v33  ;;  %v11535_v35 = vsel %vm101_vm1, %v17697_v14, 0.0  ;;  %v15264_v39 = vpop.permute.xlu0 %15263  ;;  %v15261_v37 = vunpack.i.h.bf16 %v15259_v7  ;;  %v15260_v24 = vunpack.i.l.bf16 %v15259_v7 }
0x2b80   :  { %11536 = vadd.xlane.f32.xlu0 %v11535_v35  ;;  %v15266_v41 = vunpack.i.h.bf16 %v15264_v39  ;;  %v15265_v2 = vunpack.i.l.bf16 %v15264_v39 }
0x2b81   :  { %v14960_v27 = vpack.c.bf16 %v15261_v37, %v15260_v24 }
0x2b82   :  { %v14963_v11 = vpack.c.bf16 %v15266_v41, %v15265_v2  ;;  %v12978_v41 = vld [vmem:[%s17882_s2 + $0x478] ss:$0 sm:$0xff] }
0x2b85   :  { %v17703_v8 = vpop.eup %15562 }
0x2b86   :  { %v17705_v56 = vpop.eup %15564  ;;  %v11544_v16 = vsel %vm101_vm1, %v17703_v8, 0.0 }
0x2b87   :  { %11545 = vadd.xlane.f32.xlu1 %v11544_v16  ;;  %v11541_v36 = vsel %vm101_vm1, %v17705_v56, 0.0 }
0x2b88   :  { %11542 = vadd.xlane.f32.xlu0 %v11541_v36 }
0x2b98   :  { %15268 = vrot.lane.b32.xlu1 %v17623_v32, %s15618_s24  ;;  %v14957_v32 = vpack.c.bf16 %v15256_v42, %v15255_v28 }
0x2b9e   :  { %15273 = vrot.lane.b32.xlu0 %v17627_v43, %s15618_s24  ;;  %v14954_v43 = vpack.c.bf16 %v15251_v3, %v15250_v17 }
0x2baf   :  { %v11528_v22 = vpop.xlane.xlu1 %11527 }
0x2bb0   :  { %15566 = vrcp.f32 %v11528_v22  ;;  %v11525_v4 = vpop.xlane.xlu0 %11524 }
0x2bb1   :  { %15568 = vrcp.f32 %v11525_v4 }
0x2bba   :  { %v15567_v49 = vpop.eup %15566 }
0x2bbb   :  { %v15569_v1 = vpop.eup %15568  ;;  %v11556_v29 = vmul.f32 %v15567_v49, %v17679_v26 }
0x2bbc   :  { %v11555_v63 = vmul.f32 %v15569_v1, %v17681_v13 }
0x2bbd   :  { %14399 = vmatmul.mubr.msk.f32.vlgmr.msra.gmra.mrb[146].mxu1 %vm101_vm1, %v11556_v29 }
0x2bbe   :  { %14958 = vmatpush3.bf16.msra.mxu1 %v14957_v32  ;;  %14392 = vmatmul.mubr.msk.f32.vlgmr.msra.gmra.mrb[120].mxu0 %vm101_vm1, %v11555_v63 }
0x2bbf   :  { %14955 = vmatpush3.bf16.msra.mxu0 %v14954_v43  ;;  %14412 = vmatprep.mubr.msk.f32.mxu1 %vm15623_vm6, %v15622_v21 }
0x2bc0   :  { %14962 = vmatprep.subr.bf16.mxu1 %v15624_v53  ;;  %14405 = vmatprep.mubr.msk.f32.mxu0 %vm15623_vm6, %v15622_v21 }
0x2bc1   :  { %14959 = vmatprep.subr.bf16.mxu0 %v15624_v53 }
0x2c04   :  { %v11534_v18 = vpop.xlane.xlu1 %11533 }
0x2c05   :  { %15570 = vrcp.f32 %v11534_v18  ;;  %v11531_v31 = vpop.xlane.xlu0 %11530 }
0x2c06   :  { %15572 = vrcp.f32 %v11531_v31 }
0x2c0c   :  { %v11540_v25 = vpop.xlane.xlu1 %11539 }
0x2c0d   :  { %15574 = vrcp.f32 %v11540_v25  ;;  %v11537_v62 = vpop.xlane.xlu0 %11536 }
0x2c0e   :  { %15576 = vrcp.f32 %v11537_v62 }
0x2c0f   :  { %v15571_v26 = vpop.eup %15570 }
0x2c10   :  { %v15573_v13 = vpop.eup %15572  ;;  %v11558_v47 = vmul.f32 %v15571_v26, %v17687_v58 }
0x2c11   :  { %v11557_v15 = vmul.f32 %v15573_v13, %v17689_v12 }
0x2c12   :  { %14413 = vmatmul.mubr.msk.f32.vlgmr.msra.gmra.mrb[148].mxu1 %vm101_vm1, %v11558_v47 }
0x2c13   :  { %14964 = vmatpush3.bf16.msra.mxu1 %v14963_v11  ;;  %14406 = vmatmul.mubr.msk.f32.vlgmr.msra.gmra.mrb[122].mxu0 %vm101_vm1, %v11557_v15 }
0x2c14   :  { %v11546_v38 = vpop.xlane.xlu1 %11545  ;;  %14961 = vmatpush3.bf16.msra.mxu0 %v14960_v27  ;;  %14426 = vmatprep.mubr.msk.f32.mxu1 %vm15623_vm6, %v15622_v21 }
0x2c15   :  { %15578 = vrcp.f32 %v11546_v38  ;;  %v11543_v45 = vpop.xlane.xlu0 %11542  ;;  %14419 = vmatprep.mubr.msk.f32.mxu0 %vm15623_vm6, %v15622_v21  ;;  %14965 = vmatprep.subr.bf16.mxu0 %v15624_v53 }
0x2c16   :  { %15580 = vrcp.f32 %v11543_v45  ;;  %14968 = vmatprep.subr.bf16.mxu1 %v15624_v53 }
0x2c17   :  { %v15575_v30 = vpop.eup %15574 }
0x2c18   :  { %v15577_v23 = vpop.eup %15576  ;;  %v11560_v55 = vmul.f32 %v15575_v30, %v17695_v50  ;;  %v15269_v51 = vpop.permute.xlu1 %15268 }
0x2c19   :  { %v11559_v61 = vmul.f32 %v15577_v23, %v17697_v14  ;;  %v15271_v59 = vunpack.i.h.bf16 %v15269_v51  ;;  %v15270_v48 = vunpack.i.l.bf16 %v15269_v51  ;;  %v15274_v40 = vpop.permute.xlu0 %15273  ;;  %v12178_v14 = vld [vmem:[%s17882_s2 + $0x470] sm:$0xff] }
0x2c1a   :  { %v15276_v58 = vunpack.i.h.bf16 %v15274_v40  ;;  %v15275_v12 = vunpack.i.l.bf16 %v15274_v40  ;;  %14427 = vmatmul.mubr.msk.f32.vlgmr.msra.gmra.mrb[150].mxu1 %vm101_vm1, %v11560_v55  ;;  %v12397_v40 = vld [vmem:[%s17882_s2 + $0x480] sm:$0xff] }
0x2c1b   :  { %v14966_v5 = vpack.c.bf16 %v15271_v59, %v15270_v48  ;;  %14420 = vmatmul.mubr.msk.f32.vlgmr.msra.gmra.mrb[124].mxu0 %vm101_vm1, %v11559_v61  ;;  %14440 = vmatprep.mubr.msk.f32.mxu1 %vm15623_vm6, %v15622_v21  ;;  %v12308_v59 = vld [vmem:[%s17883_s3 + $0x50] sm:$0xff] }
0x2c1c   :  { %v14969_v53 = vpack.c.bf16 %v15276_v58, %v15275_v12  ;;  %14433 = vmatprep.mubr.msk.f32.mxu0 %vm15623_vm6, %v15622_v21  ;;  %v12177_v21 = vld [vmem:[%s17882_s2 + $0x468] sm:$0xff]  ;;  %v12399_v12 = vld [vmem:[%s17882_s2 + $0x490] sm:$0xff] }
0x2c1d   :  { %14967 = vmatpush3.bf16.msra.mxu0 %v14966_v5  ;;  %v14971_v33 = vpack.c.bf16 %v12178_v14, %v12177_v21  ;;  %v12398_v58 = vld [vmem:[%s17882_s2 + $0x488] sm:$0xff] }
0x2c1e   :  { %14970 = vmatpush3.bf16.msra.mxu1 %v14969_v53  ;;  %v14979_v5 = vpack.c.bf16 %v12398_v58, %v12397_v40  ;;  %v12400_v53 = vld [vmem:[%s17882_s2 + $0x498] sm:$0xff]  ;;  %v12406_v21 = vld [vmem:[%s17882_s2 + $0x4c8] sm:$0xff] }
0x2c1f   :  { %v15579_v34 = vpop.eup %15578  ;;  %14972 = vmatprep.subr.bf16.mxu0 %v14971_v33 }
0x2c20   :  { %v15581_v57 = vpop.eup %15580  ;;  %v11562_v9 = vmul.f32 %v15579_v34, %v17703_v8  ;;  %v14983_v34 = vpack.c.bf16 %v12400_v53, %v12399_v12  ;;  %v12537_v53 = vld [vmem:[%s17883_s3 + $0x60] sm:$0xff] }
0x2c21   :  { %v11561_v10 = vmul.f32 %v15581_v57, %v17705_v56  ;;  %v12401_v57 = vld [vmem:[%s17882_s2 + $0x4a0] sm:$0xff] }
0x2c22   :  { %14441 = vmatmul.mubr.msk.f32.vlgmr.msra.gmra.mrb[152].mxu1 %vm101_vm1, %v11562_v9  ;;  %v12402_v9 = vld [vmem:[%s17882_s2 + $0x4a8] sm:$0xff] }
0x2c23   :  { %14434 = vmatmul.mubr.msk.f32.vlgmr.msra.gmra.mrb[126].mxu0 %vm101_vm1, %v11561_v10  ;;  %v14987_v10 = vpack.c.bf16 %v12402_v9, %v12401_v57 }
0x2c24   :  { %14974 = vmatpush3.bf16.msra.mxu0 %v14971_v33  ;;  %v12407_v33 = vld [vmem:[%s17882_s2 + $0x4d0] sm:$0xff] }
0x2c25   :  { %14980 = vmatprep.subr.bf16.mxu0 %v14979_v5 }
0x2c90   :  { %v11705_v54 = vpop.f32.mrb[146].mxu1 }
0x2c91   :  { %v11632_v46 = vpop.f32.mrb[120].mxu0  ;;  %v14400_v60 = vpop.f32.mrb[147].mxu1 }
0x2c92   :  { %v14393_v50 = vpop.f32.mrb[121].mxu0 }
0x2c93   :  { %v12405_v50 = vld [vmem:[%s17882_s2 + $0x4c0] sm:$0xff] }
0x2c94   :  { %v14995_v14 = vpack.c.bf16 %v12406_v21, %v12405_v50 }
0x2ce5   :  { %v11851_v35 = vpop.f32.mrb[148].mxu1 }
0x2ce6   :  { %v11778_v8 = vpop.f32.mrb[122].mxu0  ;;  %12151 = vrot.lane.b32.xlu0 %v11851_v35, %s15619_s25  ;;  %v14414_v56 = vpop.f32.mrb[149].mxu1  ;;  %v12408_v35 = vld [vmem:[%s17882_s2 + $0x4d8] sm:$0xff] }
0x2ce7   :  { %v14407_v16 = vpop.f32.mrb[123].mxu0  ;;  %12149 = vrot.lane.b32.xlu1 %v11778_v8, %s15619_s25  ;;  %v14999_v8 = vpack.c.bf16 %v12408_v35, %v12407_v33  ;;  %v12409_v56 = vld [vmem:[%s17882_s2 + $0x4e0] sm:$0xff] }
0x2ce8   :  { %v12410_v16 = vld [vmem:[%s17882_s2 + $0x4e8] sm:$0xff] }
0x2ced   :  { %v11997_v36 = vpop.f32.mrb[150].mxu1 }
0x2cee   :  { %v11924_v6 = vpop.f32.mrb[124].mxu0  ;;  %12159 = vrot.lane.b32.xlu0 %v11997_v36, %s15620_s30  ;;  %v14428_v44 = vpop.f32.mrb[151].mxu1  ;;  %v15003_v36 = vpack.c.bf16 %v12410_v16, %v12409_v56  ;;  %v12988_v56 = vld [vmem:[%s17882_s2 + $0x530] ss:$0 sm:$0xff] }
0x2cef   :  { %12157 = vrot.lane.b32.xlu1 %v11924_v6, %s15620_s30  ;;  %v14421_v7 = vpop.f32.mrb[125].mxu0 }
0x2cf5   :  { %v12143_v39 = vpop.f32.mrb[152].mxu1 }
0x2cf6   :  { %v12070_v22 = vpop.f32.mrb[126].mxu0  ;;  %12167 = vrot.lane.b32.xlu0 %v12143_v39, %s15621_s0  ;;  %v14442_v4 = vpop.f32.mrb[153].mxu1 }
0x2cf7   :  { %12165 = vrot.lane.b32.xlu1 %v12070_v22, %s15621_s0  ;;  %v14435_v42 = vpop.f32.mrb[127].mxu0 }
0x2d58   :  { %v12152_v28 = vpop.permute.xlu0 %12151 }
0x2d59   :  { %v12150_v3 = vpop.permute.xlu1 %12149  ;;  %v12172_v32 = vsel %vm479_vm2, %v11705_v54, %v12152_v28  ;;  %v12403_v54 = vld [vmem:[%s17882_s2 + $0x4b0] sm:$0xff]  ;;  %v12981_v28 = vld [vmem:[%s17882_s2 + $0x518] ss:$0 sm:$0xff] }
0x2d5a   :  { %v12171_v1 = vsel %vm479_vm2, %v11632_v46, %v12150_v3  ;;  %v12404_v46 = vld [vmem:[%s17882_s2 + $0x4b8] sm:$0xff] }
0x2d5b   :  { %v14991_v60 = vpack.c.bf16 %v12404_v46, %v12403_v54 }
0x2d60   :  { %v12160_v17 = vpop.permute.xlu0 %12159 }
0x2d61   :  { %v12158_v49 = vpop.permute.xlu1 %12157  ;;  %v12174_v18 = vsel %vm2036_vm4, %v12172_v32, %v12160_v17 }
0x2d62   :  { %v12173_v63 = vsel %vm2036_vm4, %v12171_v1, %v12158_v49 }
0x2d68   :  { %v12168_v29 = vpop.permute.xlu0 %12167 }
0x2d69   :  { %v12166_v43 = vpop.permute.xlu1 %12165  ;;  %v12176_v25 = vsel %vm2041_vm5, %v12174_v18, %v12168_v29  ;;  %v12982_v29 = vld [vmem:[%s17882_s2 + $0x520] ss:$0 sm:$0xff]  ;;  %v12411_v18 = vld [vmem:[%s17882_s2 + $0x4f0] sm:$0xff] }
0x2d6a   :  { %v12175_v31 = vsel %vm2041_vm5, %v12173_v63, %v12166_v43 }
0x2d6b   :  { %14447 = vmatprep.mubr.msk.f32.mxu0 %vm101_vm1, %v12175_v31  ;;  %v12412_v31 = vld [vmem:[%s17882_s2 + $0x4f8] sm:$0xff] }
0x2d6c   :  { %14448 = vmatmul.mubr.msk.f32.vlgmr.msra.gmra.mrb[128].mxu0 %vm101_vm1, %v12176_v25  ;;  %v15007_v25 = vpack.c.bf16 %v12412_v31, %v12411_v18 }
0x2d6d   :  { %14982 = vmatpush3.bf16.msra.mxu0 %v14979_v5 }
0x2d6e   :  { %14984 = vmatprep.subr.bf16.mxu0 %v14983_v34 }
0x2d71   :  { %14986 = vmatpush3.bf16.msra.mxu0 %v14983_v34  ;;  %v12538_v34 = vld [vmem:[%s17883_s3 + $0x68] sm:$0xff] }
0x2d72   :  { %14988 = vmatprep.subr.bf16.mxu0 %v14987_v10  ;;  %v15011_v57 = vpack.c.bf16 %v12538_v34, %v12537_v53 }
0x2d75   :  { %14990 = vmatpush3.bf16.msra.mxu0 %v14987_v10 }
0x2d76   :  { %14992 = vmatprep.subr.bf16.mxu0 %v14991_v60 }
0x2d79   :  { %14994 = vmatpush3.bf16.msra.mxu0 %v14991_v60 }
0x2d7a   :  { %14996 = vmatprep.subr.bf16.mxu0 %v14995_v14 }
0x2d7d   :  { %14998 = vmatpush3.bf16.msra.mxu0 %v14995_v14  ;;  %v12987_v14 = vld [vmem:[%s17882_s2 + $0x528] ss:$0 sm:$0xff] }
0x2d7e   :  { %15000 = vmatprep.subr.bf16.mxu0 %v14999_v8 }
0x2d81   :  { %15002 = vmatpush3.bf16.msra.mxu0 %v14999_v8 }
0x2d82   :  { %15004 = vmatprep.subr.bf16.mxu0 %v15003_v36 }
0x2d85   :  { %15006 = vmatpush3.bf16.msra.mxu0 %v15003_v36 }
0x2d86   :  { %15008 = vmatprep.subr.bf16.mxu0 %v15007_v25 }
0x2d89   :  { %15010 = vmatpush3.bf16.msra.mxu0 %v15007_v25 }
0x2e3f   :  { %v14449_v2 = vpop.f32.mrb[128].mxu0 }
0x2e40   :  { %v12262_v62 = vadd.f32 %v14449_v2, %v12978_v41  ;;  %v12256_v37 = vpop.f32.mrb[129].mxu0 }
0x2e41   :  { %v12257_v24 = vadd.f32 %v12978_v41, %v12256_v37  ;;  %v12983_v41 = vld [vmem:[%s17883_s3 + $0x58] ss:$0 sm:$0xff] }
0x2e42   :  { %v12266_v26 = vadd.f32 %v12262_v62, %v17575_v0 }
0x2e43   :  { %v12265_v13 = vadd.f32 %v12257_v24, %v17573_v19  ;;  %v12307_v19 = vld [vmem:[%s17883_s3 + $0x48] sm:$0xff] }
0x2e44   :  { %v12270_v47 = vsel %vm101_vm1, %v12266_v26, 0.0  ;;  %v14975_v48 = vpack.c.bf16 %v12308_v59, %v12307_v19 }
0x2e45   :  { %12271 = vadd.xlane.f32.xlu0 %v12270_v47  ;;  %v12267_v11 = vsel %vm101_vm1, %v12265_v13, 0.0  ;;  %v12986_v47 = vld [vmem:[%s17882_s2 + $0x500] ss:$0 sm:$0xff]  ;;  %s15590_s2 = scalar_lea.vmem %s12633_s1, 256 }
0x2e46   :  { %12268 = vadd.xlane.f32.xlu1 %v12267_v11  ;;  %14976 = vmatprep.subr.bf16.mxu1 %v14975_v48  ;;  %p15591_p0 = scmp.ne.s32.totalorder %s12633_s1, %s15590_s2  ;;  %p15596_p2 = scmp.lt.s32.totalorder %s15590_s2, %s15590_s2 }
0x2e47   :  { %14978 = vmatpush3.bf16.msra.mxu1 %v14975_v48 }
0x2e48   :  { %15012 = vmatprep.subr.bf16.mxu1 %v15011_v57  ;;  %p15597_p3 = por %p15596_p2, %p15595_p1 }
0x2e4a   :  { %p15598_p4 = pnand %p15597_p3, %p15591_p0 }
0x2ed2   :  { %v12272_v15 = vpop.xlane.xlu0 %12271 }
0x2ed3   :  { %v12274_v27 = vmul.f32 0.0625, %v12272_v15  ;;  %v12269_v38 = vpop.xlane.xlu1 %12268 }
0x2ed4   :  { %v12273_v45 = vmul.f32 0.0625, %v12269_v38 }
0x2ed5   :  { %v12276_v30 = vsub.f32 %v12266_v26, %v12274_v27 }
0x2ed6   :  { %v12275_v23 = vsub.f32 %v12265_v13, %v12273_v45 }
0x2ed7   :  { %v12278_v55 = vmul.f32 %v12276_v30, %v12276_v30 }
0x2ed8   :  { %v12277_v51 = vmul.f32 %v12275_v23, %v12275_v23 }
0x2ed9   :  { %v12282_v61 = vsel %vm101_vm1, %v12278_v55, 0.0 }
0x2eda   :  { %12283 = vadd.xlane.f32.xlu1 %v12282_v61  ;;  %v12279_v0 = vsel %vm101_vm1, %v12277_v51, 0.0 }
0x2edb   :  { %12280 = vadd.xlane.f32.xlu0 %v12279_v0 }
0x2f67   :  { %v12284_v6 = vpop.xlane.xlu1 %12283 }
0x2f68   :  { %v12286_v44 = vmul.f32 0.0625, %v12284_v6  ;;  %v12281_v7 = vpop.xlane.xlu0 %12280 }
0x2f69   :  { %v12285_v39 = vmul.f32 0.0625, %v12281_v7 }
0x2f6a   :  { %v12288_v22 = vadd.f32 1e-05, %v12286_v44 }
0x2f6b   :  { %v12287_v4 = vadd.f32 1e-05, %v12285_v39 }
0x2f6c   :  { %15582 = vrsqrt.f32 %v12288_v22  ;;  %v12989_v22 = vld [vmem:[%s17883_s3 + $0x70] ss:$0 sm:$0xff] }
0x2f6d   :  { %15584 = vrsqrt.f32 %v12287_v4 }
0x2f76   :  { %v15583_v42 = vpop.eup %15582 }
0x2f77   :  { %v15585_v3 = vpop.eup %15584  ;;  %v12292_v17 = vmul.f32 %v15583_v42, %v12276_v30 }
0x2f78   :  { %v12291_v49 = vmul.f32 %v15585_v3, %v12275_v23 }
0x2f79   :  { %v12299_v1 = vmul.f32 %v12981_v28, %v12292_v17 }
0x2f7a   :  { %v12298_v32 = vmul.f32 %v12981_v28, %v12291_v49 }
0x2f7b   :  { %v12306_v43 = vadd.f32 %v12982_v29, %v12299_v1 }
0x2f7c   :  { %v12305_v63 = vadd.f32 %v12982_v29, %v12298_v32 }
0x2f7e   :  { %14454 = vmatprep.mubr.msk.f32.mxu1 %vm101_vm1, %v12305_v63 }
0x2f7f   :  { %14455 = vmatmul.mubr.msk.f32.vlgmr.msra.gmra.mrb[154].mxu1 %vm101_vm1, %v12306_v43 }
0x2f80   :  { %15014 = vmatpush3.bf16.msra.mxu1 %v15011_v57 }
0x3052   :  { %v14456_v2 = vpop.f32.mrb[154].mxu1 }
0x3053   :  { %v12392_v62 = vadd.f32 %v14456_v2, %v12983_v41  ;;  %v12386_v37 = vpop.f32.mrb[155].mxu1 }
0x3054   :  { %v12387_v24 = vadd.f32 %v12983_v41, %v12386_v37 }
0x3055   :  { %v12396_v13 = vmax.f32 %v12392_v62, 0.0 }
0x3056   :  { %v12395_v26 = vmax.f32 %v12387_v24, 0.0 }
0x3058   :  { %14489 = vmatprep.mubr.f32.mxu0 %v12395_v26 }
0x3059   :  { %14490 = vmatmul.mubr.f32.vlgmr.msra.gmra.mrb[130].mxu0 %v12396_v13 }
0x312c   :  { %v14491_v11 = vpop.f32.mrb[130].mxu0 }
0x312d   :  { %v12490_v15 = vadd.f32 %v14491_v11, %v12986_v47  ;;  %v12484_v27 = vpop.f32.mrb[131].mxu0 }
0x312e   :  { %v12485_v38 = vadd.f32 %v12986_v47, %v12484_v27 }
0x312f   :  { %v12494_v45 = vadd.f32 %v12490_v15, %v12306_v43 }
0x3130   :  { %v12493_v30 = vadd.f32 %v12485_v38, %v12305_v63 }
0x3131   :  { %v12498_v23 = vsel %vm101_vm1, %v12494_v45, 0.0 }
0x3132   :  { %12499 = vadd.xlane.f32.xlu1 %v12498_v23  ;;  %v12495_v55 = vsel %vm101_vm1, %v12493_v30, 0.0 }
0x3133   :  { %12496 = vadd.xlane.f32.xlu0 %v12495_v55 }
0x31bf   :  { %v12500_v51 = vpop.xlane.xlu1 %12499 }
0x31c0   :  { %v12502_v61 = vmul.f32 0.0625, %v12500_v51  ;;  %v12497_v0 = vpop.xlane.xlu0 %12496 }
0x31c1   :  { %v12501_v19 = vmul.f32 0.0625, %v12497_v0 }
0x31c2   :  { %v12504_v59 = vsub.f32 %v12494_v45, %v12502_v61 }
0x31c3   :  { %v12503_v48 = vsub.f32 %v12493_v30, %v12501_v19 }
0x31c4   :  { %v12506_v40 = vmul.f32 %v12504_v59, %v12504_v59 }
0x31c5   :  { %v12505_v58 = vmul.f32 %v12503_v48, %v12503_v48 }
0x31c6   :  { %v12510_v12 = vsel %vm101_vm1, %v12506_v40, 0.0 }
0x31c7   :  { %12511 = vadd.xlane.f32.xlu1 %v12510_v12  ;;  %v12507_v5 = vsel %vm101_vm1, %v12505_v58, 0.0 }
0x31c8   :  { %12508 = vadd.xlane.f32.xlu0 %v12507_v5 }
0x3254   :  { %v12512_v9 = vpop.xlane.xlu1 %12511 }
0x3255   :  { %v12514_v10 = vmul.f32 0.0625, %v12512_v9  ;;  %v12509_v54 = vpop.xlane.xlu0 %12508 }
0x3256   :  { %v12513_v46 = vmul.f32 0.0625, %v12509_v54 }
0x3257   :  { %v12516_v60 = vadd.f32 1e-05, %v12514_v10 }
0x3258   :  { %v12515_v50 = vadd.f32 1e-05, %v12513_v46 }
0x3259   :  { %15586 = vrsqrt.f32 %v12516_v60 }
0x325a   :  { %15588 = vrsqrt.f32 %v12515_v50 }
0x3263   :  { %v15587_v21 = vpop.eup %15586 }
0x3264   :  { %v15589_v33 = vpop.eup %15588  ;;  %v12520_v35 = vmul.f32 %v15587_v21, %v12504_v59 }
0x3265   :  { %v12519_v8 = vmul.f32 %v15589_v33, %v12503_v48 }
0x3266   :  { %v12527_v16 = vmul.f32 %v12987_v14, %v12520_v35 }
0x3267   :  { %v12526_v36 = vmul.f32 %v12987_v14, %v12519_v8 }
0x3268   :  { %v12534_v6 = vadd.f32 %v12988_v56, %v12527_v16 }
0x3269   :  { %v12533_v44 = vadd.f32 %v12988_v56, %v12526_v36 }
0x326a   :  { %v12536_v39 = vadd.f32 %v12534_v6, %v16706_v52 }
0x326b   :  { %v12535_v7 = vadd.f32 %v12533_v44, %v16694_v20 }
0x326d   :  { %14496 = vmatprep.mubr.msk.f32.mxu1 %vm101_vm1, %v12535_v7 }
0x326e   :  { %14497 = vmatmul.mubr.msk.f32.vlgmr.msra.gmra.mrb[156].mxu1 %vm101_vm1, %v12536_v39 }
0x3341   :  { %v14498_v4 = vpop.f32.mrb[156].mxu1 }
0x3342   :  { %v12622_v42 = vadd.f32 %v14498_v4, %v12989_v22  ;;  %v12616_v28 = vpop.f32.mrb[157].mxu1 }
0x3343   :  { %v12617_v3 = vadd.f32 %v12989_v22, %v12616_v28 }
0x3344   :  { %12626 = vst [vmem:[#allocation2 + $0x8] sm:$0xff] %v12622_v42 }
0x3345   :  { %12625 = vst [vmem:[#allocation2] sm:$0xff] %v12617_v3 }
0x3346   :  { %15601 = shalt.err (!%p15598_p4)
}
0x3347   :  { %s15602_s3 = scalar_lea.hbm %s17884_s4, 256 }
0x3348   :  { %p15603_p5 = scmp.ne.s32.totalorder %s17884_s4, %s15602_s3  ;;  %p15606_p6 = scmp.lt.u32.totalorder %s15602_s3, %s17884_s4 }
0x334a   :  { %p15608_p7 = pnand %p15606_p6, %p15603_p5 }
0x334c   :  { %15611 = shalt.err (!%p15608_p7)
}
0x334d   :  { %s15626_s9 = smov 128  }
0x334e   :  { %12638 = dma.vmem_to_hbm [thread:$0]  %s12633_s1, 256, %s17884_s4, [#allocation3], %s15626_s9, %s15626_s9, %s15620_s30  }
0x334f   :  { %15612 = dma.done.wait [#allocation3], 256  }
0x3350   :  { %15613 = vsyncadd [#allocation3], 4294967040 }
0x3351   :  { %12642 = vsyncpa [#allocation3], 1 }

</bundles_post_ra>
